<compile_context>
chip_gen: v7x
topology: tpu7x:2x2x1
jax: 0.10.0
libtpu: 0.0.40
codegen_flags: <defaults>
</compile_context>

<pallas_src>
import functools
import numpy as np

import jax
import jax.numpy as jnp
from jax.experimental import pallas as pl
from jax.experimental.pallas import tpu as pltpu


# ----------------------------------------------------------------------------
# helpers
# ----------------------------------------------------------------------------
def _round_up(x, m):
    return (x + m - 1) // m * m


_VMEM_LIMIT = 48 * 1024 * 1024   # safe on v5e/v6e (128 MiB phys) and v7x (64 MiB phys)


# ----------------------------------------------------------------------------
# fused linear kernel: y = act(x @ w + b) [-> LayerNorm] [-> + residual]
# ----------------------------------------------------------------------------
def _linear_kernel(*refs, act, eps, has_ln, has_res, k_steps):
    x_ref, w_ref, b_ref = refs[0], refs[1], refs[2]
    idx = 3
    if has_ln:
        g_ref, be_ref = refs[idx], refs[idx + 1]
        idx += 2
    if has_res:
        r_ref = refs[idx]
        idx += 1
    o_ref, acc_ref = refs[idx], refs[idx + 1]

    @pl.when(pl.program_id(2) == 0)
    def _init():
        acc_ref[...] = jnp.zeros_like(acc_ref)

    # bf16 MXU matmul, f32 accumulation (w is already bf16; x cast is a no-op
    # for bf16 activations)
    acc_ref[...] += jnp.dot(
        x_ref[...].astype(jnp.bfloat16), w_ref[...],
        preferred_element_type=jnp.float32)

    @pl.when(pl.program_id(2) == k_steps - 1)
    def _finish():
        y = acc_ref[...] + b_ref[...].astype(jnp.float32)
        if act == "relu":
            y = jnp.maximum(y, 0.0)
        elif act == "gelu":
            # TODO(synk): tanh-approx GELU used in-kernel (exact erf-GELU
            # lowering in Mosaic not guaranteed); max abs diff ~1e-3.
            y = 0.5 * y * (1.0 + jnp.tanh(
                0.7978845608028654 * (y + 0.044715 * y * y * y)))
        if has_ln:
            mu = jnp.mean(y, axis=-1, keepdims=True)
            var = jnp.mean(jnp.square(y - mu), axis=-1, keepdims=True)
            y = (y - mu) * jax.lax.rsqrt(var + eps)
            y = y * g_ref[...].astype(jnp.float32) + be_ref[...].astype(jnp.float32)
        if has_res:
            y = y + r_ref[...].astype(jnp.float32)
        o_ref[...] = y.astype(o_ref.dtype)


def pallas_linear(x, w, b=None, act=None, ln=None, residual=None,
                  out_dtype=jnp.bfloat16,
                  bm=256, bn=512, bk=1024, ln_eps=1e-5):
    """y = epilogue(x @ w + b);  x: (M, K), w: (K, N) bf16, b: (N,) or None.

    act      : None | "relu" | "gelu"  (fused epilogue)
    ln       : None | (gamma, beta)    (fused LayerNorm over last dim)
    residual : None | (M, N) array     (fused post-norm residual add)
    """
    M, K = x.shape
    Kw, N = w.shape
    assert K == Kw
    has_ln = ln is not None
    has_res = residual is not None

    if b is None:
        b = jnp.zeros((N,), jnp.float32)
    if w.dtype != jnp.bfloat16:          # fallback only; build_model stores bf16
        w = w.astype(jnp.bfloat16)

    BM = min(bm, _round_up(M, 8))
    # LayerNorm epilogue needs the full row -> keep N as one block in that case
    BN = N if (has_ln or N <= bn) else bn
    BK = K if K <= bk else bk

    Mp = _round_up(M, BM)
    Np = _round_up(N, BN)
    Kp = _round_up(K, BK)
    k_steps = Kp // BK

    xp = jnp.pad(x, ((0, Mp - M), (0, Kp - K))) if (Mp != M or Kp != K) else x
    wp = jnp.pad(w, ((0, Kp - K), (0, Np - N))) if (Kp != K or Np != N) else w
    b2d = b.reshape(1, N).astype(jnp.float32)
    if Np != N:
        b2d = jnp.pad(b2d, ((0, 0), (0, Np - N)))

    inputs = [xp, wp, b2d]
    in_specs = [
        pl.BlockSpec((BM, BK), lambda i, j, k: (i, k)),
        pl.BlockSpec((BK, BN), lambda i, j, k: (k, j)),
        pl.BlockSpec((1, BN), lambda i, j, k: (0, j)),
    ]
    if has_ln:
        g, be = ln
        inputs += [g.reshape(1, N), be.reshape(1, N)]
        in_specs += [pl.BlockSpec((1, BN), lambda i, j, k: (0, j)),
                     pl.BlockSpec((1, BN), lambda i, j, k: (0, j))]
    if has_res:
        r = residual
        if Mp != M or Np != N:
            r = jnp.pad(r, ((0, Mp - M), (0, Np - N)))
        inputs.append(r)
        in_specs.append(pl.BlockSpec((BM, BN), lambda i, j, k: (i, j)))

    out_bytes = np.dtype(out_dtype).itemsize
    cost = pl.CostEstimate(
        flops=int(2 * Mp * Kp * Np),
        transcendentals=int(Mp * Np) if act == "gelu" else 0,
        bytes_accessed=int(Mp * Kp * xp.dtype.itemsize + Kp * Np * 2
                           + Mp * Np * out_bytes
                           + (Mp * Np * 2 if has_res else 0)))

    out = pl.pallas_call(
        functools.partial(_linear_kernel, act=act, eps=ln_eps,
                          has_ln=has_ln, has_res=has_res, k_steps=k_steps),
        out_shape=jax.ShapeDtypeStruct((Mp, Np), out_dtype),
        grid=(Mp // BM, Np // BN, k_steps),
        in_specs=in_specs,
        out_specs=pl.BlockSpec((BM, BN), lambda i, j, k: (i, j)),
        scratch_shapes=[pltpu.VMEM((BM, BN), jnp.float32)],
        compiler_params=pltpu.CompilerParams(
            dimension_semantics=("parallel", "parallel", "arbitrary"),
            vmem_limit_bytes=_VMEM_LIMIT),
        cost_estimate=cost,
    )(*inputs)
    if Mp != M or Np != N:
        out = out[:M, :N]
    return out


# ----------------------------------------------------------------------------
# window cosine attention kernel (WB windows per grid step)
# ----------------------------------------------------------------------------
def _window_attn_kernel(qkv_ref, bias_ref, mask_ref, tau_ref, o_ref, *, heads):
    # qkv_ref : (WB, T, 3C) bf16  packed q|k|v
    # bias_ref: (H, T, T)   f32   relative-position bias (resident)
    # mask_ref: (WB, T, T)  f32   per-window shift mask (resident, tiled)
    # tau_ref : (H,) in SMEM      learned temperature
    # o_ref   : (WB, T, C)  bf16  heads recombined
    WB, T, C3 = qkv_ref.shape
    C = C3 // 3
    D = C // heads
    qkv = qkv_ref[...]                      # single bf16 load, no f32 upcast
    mask = mask_ref[...]

    outs = []
    # TODO(synk): per-head D-wide lane slices of the packed 3C tile; a head-major
    # qkv layout + one batched dot_general would remove the hidden relayouts.
    for h in range(heads):
        q = qkv[:, :, h * D:(h + 1) * D].astype(jnp.float32)
        k = qkv[:, :, C + h * D:C + (h + 1) * D].astype(jnp.float32)
        v = qkv[:, :, 2 * C + h * D:2 * C + (h + 1) * D]        # stays bf16

        # cosine attention: pre-normalize q/k rows, fold 1/clamp(tau, .01) into q
        qn = q * jax.lax.rsqrt(jnp.maximum(jnp.sum(q * q, -1, keepdims=True), 1e-12))
        kn = k * jax.lax.rsqrt(jnp.maximum(jnp.sum(k * k, -1, keepdims=True), 1e-12))
        inv_tau = 1.0 / jnp.maximum(tau_ref[h], 0.01)
        qn = qn * inv_tau

        s = jnp.einsum("wtd,wsd->wts",
                       qn.astype(jnp.bfloat16), kn.astype(jnp.bfloat16),
                       preferred_element_type=jnp.float32)
        s = s + bias_ref[h] + mask
        s = s - jnp.max(s, axis=-1, keepdims=True)
        p = jnp.exp(s)
        p = p * pl.reciprocal(jnp.sum(p, axis=-1, keepdims=True), approx=True)
        outs.append(jnp.einsum("wts,wsd->wtd",
                               p.astype(jnp.bfloat16), v,
                               preferred_element_type=jnp.float32))
    # single lane-dense store of the full (WB, T, C) block
    o_ref[...] = jnp.concatenate(outs, axis=-1).astype(o_ref.dtype)


def pallas_window_attention(qkv, pos_bias, mask, tau, *, heads, target_wb=16):
    """qkv: (BW, T, 3C) bf16; pos_bias: (H, T, T); mask: (nW, T, T); tau: (H,)."""
    BW, T, C3 = qkv.shape
    C = C3 // 3
    nWm = mask.shape[0]                     # mask cycle length (1 if no shift)
    blocks_total = BW // nWm

    # cap WB so double-buffered qkv/out tiles + resident mask stay well within
    # VMEM on all generations (re-derived for bf16 activations)
    per_win = (T * C3 * qkv.dtype.itemsize * 2        # qkv, double-buffered
               + T * C * qkv.dtype.itemsize * 2       # out, double-buffered
               + T * T * 4)                           # mask (resident)
    budget = 8 << 20
    wb_cap = max(nWm, budget // max(per_win, 1))
    tgt = min(target_wb, wb_cap)

    # WB = reps * nWm: multiple of the mask cycle, divides BW exactly
    reps = max(1, min(max(1, tgt // nWm), blocks_total))
    while blocks_total % reps:
        reps -= 1
    WB = reps * nWm
    mask_t = jnp.tile(mask, (reps, 1, 1)) if reps > 1 else mask

    D = C // heads
    cost = pl.CostEstimate(
        flops=int(4 * BW * heads * T * T * D),
        transcendentals=int(BW * heads * T * T),
        bytes_accessed=int(BW * T * C3 * qkv.dtype.itemsize
                           + heads * T * T * 4 + WB * T * T * 4
                           + BW * T * C * qkv.dtype.itemsize))

    return pl.pallas_call(
        functools.partial(_window_attn_kernel, heads=heads),
        out_shape=jax.ShapeDtypeStruct((BW, T, C), qkv.dtype),
        grid=(BW // WB,),
        in_specs=[
            pl.BlockSpec((WB, T, C3), lambda i: (i, 0, 0)),
            pl.BlockSpec((heads, T, T), lambda i: (0, 0, 0)),   # resident bias
            pl.BlockSpec((WB, T, T), lambda i: (0, 0, 0)),      # resident mask
            pl.BlockSpec(memory_space=pltpu.MemorySpace.SMEM),  # tau scalars
        ],
        out_specs=pl.BlockSpec((WB, T, C), lambda i: (i, 0, 0)),
        compiler_params=pltpu.CompilerParams(
            dimension_semantics=("parallel",),
            vmem_limit_bytes=_VMEM_LIMIT),
        cost_estimate=cost,
    )(qkv, pos_bias, mask_t, tau)


# ----------------------------------------------------------------------------
# static buffers (relative coords / shift mask), same math as the PyTorch code
# ----------------------------------------------------------------------------
def make_relative_coords_log(ws):
    idx = np.arange(ws)
    ci, cj = np.meshgrid(idx, idx, indexing="ij")
    coords = np.stack([ci, cj], 0).reshape(2, -1)             # (2, T)
    rel = coords[:, :, None] - coords[:, None, :]             # (2, T, T)
    rel = rel.transpose(1, 2, 0).reshape(-1, 2).astype(np.float32)
    return np.sign(rel) * np.log1p(np.abs(rel))               # (T*T, 2)


def make_attention_mask(res, ws, shift):
    T = ws * ws
    if shift == 0:
        return np.zeros((1, T, T), np.float32)
    H, W = res
    img = np.zeros((H, W), np.float32)
    cnt = 0
    for hs in (slice(0, -ws), slice(-ws, -shift), slice(-shift, None)):
        for wsl in (slice(0, -ws), slice(-ws, -shift), slice(-shift, None)):
            img[hs, wsl] = cnt
            cnt += 1
    mw = img.reshape(H // ws, ws, W // ws, ws).transpose(0, 2, 1, 3).reshape(-1, T)
    am = mw[:, None, :] - mw[:, :, None]
    return np.where(am != 0, -100.0, 0.0).astype(np.float32)  # (nW, T, T)


# ----------------------------------------------------------------------------
# model pieces (glue in JAX, compute in Pallas)
# ----------------------------------------------------------------------------
def window_partition(x, ws):
    B, H, W, C = x.shape
    x = x.reshape(B, H // ws, ws, W // ws, ws, C).transpose(0, 1, 3, 2, 4, 5)
    return x.reshape(B * (H // ws) * (W // ws), ws * ws, C)


def window_reverse(xw, ws, B, H, W):
    C = xw.shape[-1]
    x = xw.reshape(B, H // ws, W // ws, ws, ws, C).transpose(0, 1, 3, 2, 4, 5)
    return x.reshape(B, H, W, C)


def patch_embed_forward(x_nchw, p, patch_size):
    B, Cin, H, W = x_nchw.shape
    ps = patch_size
    Hp, Wp = H // ps, W // ps
    # 4x4 stride-4 conv == non-overlapping patch extraction + matmul (Cin,kh,kw order)
    xp = x_nchw.reshape(B, Cin, Hp, ps, Wp, ps).transpose(0, 2, 4, 1, 3, 5)
    xp = xp.reshape(B * Hp * Wp, Cin * ps * ps)
    # conv-as-matmul with fused LayerNorm epilogue, bf16 output
    y = pallas_linear(xp, p["conv_w"], p["conv_b"], ln=(p["ln_g"], p["ln_b"]))
    return y.reshape(B, Hp, Wp, -1)                            # NHWC, bf16


def patch_merging_forward(x, merge_w):
    B, H, W, C = x.shape
    x = x.reshape(B, H // 2, 2, W // 2, 2, C).transpose(0, 1, 3, 5, 2, 4)
    x = x.reshape(B * (H // 2) * (W // 2), 4 * C)              # flatten order (C, hh, ww)
    y = pallas_linear(x, merge_w, None)                        # bias-free Linear(4C -> 2C)
    return y.reshape(B, H // 2, W // 2, 2 * C)


def swin_block_forward(x, bp, *, heads, ws, shift, attn_mask):
    # x: (B, H, W, C), NHWC, bf16
    B, H, W, C = x.shape
    T = ws * ws

    # TODO(synk): cyclic shift + window partition/reverse are still XLA-level
    # permutes; folding them into the qkv linear's index_map (scalar-prefetch
    # offsets) would remove ~4 full HBM passes per block.
    xs = jnp.roll(x, shift=(-shift, -shift), axis=(2, 1)) if shift > 0 else x
    xw = window_partition(xs, ws)                              # (BW, T, C)
    BW = xw.shape[0]
    xw_flat = xw.reshape(BW * T, C)

    # packed qkv, kept in (BW, T, 3C) bf16 layout for the attention kernel
    qkv = pallas_linear(xw_flat, bp["qkv_w"], bp["qkv_b"]).reshape(BW, T, 3 * C)

    # precomputed continuous relative position bias (build-time CPB meta-net)
    attn = pallas_window_attention(qkv, bp["pos_bias"], attn_mask,
                                   bp["tau"].reshape(-1), heads=heads)  # (BW, T, C)

    # proj + LayerNorm1 + residual, fused.  Residual in window order is exactly
    # xw (LN / residual are per-token, so they commute with the shift/partition
    # permutation); we undo the permutation once, at the end of the block.
    skip_w = pallas_linear(attn.reshape(BW * T, C), bp["proj_w"], bp["proj_b"],
                           ln=(bp["ln1_g"], bp["ln1_b"]), residual=xw_flat)

    # FFN: Linear + fused GELU, then Linear + fused LayerNorm2 + residual
    h = pallas_linear(skip_w, bp["ffn_w1"], bp["ffn_b1"], act="gelu")
    out_w = pallas_linear(h, bp["ffn_w2"], bp["ffn_b2"],
                          ln=(bp["ln2_g"], bp["ln2_b"]), residual=skip_w)

    xm = window_reverse(out_w.reshape(BW, T, C), ws, B, H, W)
    if shift > 0:
        xm = jnp.roll(xm, shift=(shift, shift), axis=(2, 1))
    return xm


def swin_v2_encoder_forward(params, cfg, x_nchw):
    feats = patch_embed_forward(x_nchw, params["patch_embed"], cfg["patch_size"])
    outs = []
    for sp in params["stages"]:
        if sp["downsample"] is not None:
            feats = patch_merging_forward(feats, sp["downsample"])
        for bp, meta in zip(sp["blocks"], sp["block_meta"]):
            feats = swin_block_forward(
                feats, bp, heads=sp["heads"], ws=meta["ws"], shift=meta["shift"],
                attn_mask=meta["mask"])
        outs.append(jnp.transpose(feats, (0, 3, 1, 2)).astype(jnp.float32))  # NCHW
    return outs


# ----------------------------------------------------------------------------
# deterministic parameter construction (synthetic, mirrors module __init__ shapes)
# ----------------------------------------------------------------------------
def build_model(key, cfg):
    keys = iter(jax.random.split(key, 4096))

    def dense(fan_in, fan_out, dtype=jnp.bfloat16):
        w = jax.random.normal(next(keys), (fan_in, fan_out), jnp.float32) * 0.02
        return w.astype(dtype)          # matmul weights stored in bf16 at build time

    ps, Cin, emb = cfg["patch_size"], cfg["in_channels"], cfg["embedding_channels"]
    params = {
        "patch_embed": {
            "conv_w": dense(Cin * ps * ps, emb),               # Conv2d(Cin, emb, 4, stride=4)
            "conv_b": jnp.zeros((emb,), jnp.float32),
            "ln_g": jnp.ones((emb,), jnp.float32),
            "ln_b": jnp.zeros((emb,), jnp.float32),
        },
        "stages": [],
    }
    Hp, Wp = cfg["input_resolution"][0] // ps, cfg["input_resolution"][1] // ps

    for idx, (depth, heads) in enumerate(zip(cfg["depths"], cfg["number_of_heads"])):
        c_in = emb * (2 ** max(idx - 1, 0))
        res = (Hp // (2 ** max(idx - 1, 0)), Wp // (2 ** max(idx - 1, 0)))
        downscale = idx != 0
        if downscale:
            downsample = dense(4 * c_in, 2 * c_in)             # PatchMerging Linear (no bias)
            C = 2 * c_in
            res = (res[0] // 2, res[1] // 2)
        else:
            downsample = None
            C = c_in
        # window / shift adaptation (as in the reference implementation)
        ws_eff = min(res) if min(res) <= cfg["window_size"] else cfg["window_size"]
        T = ws_eff * ws_eff
        rel_log = jnp.asarray(make_relative_coords_log(ws_eff))   # (T*T, 2) f32
        hidden = int(C * cfg["ff_ratio"])
        blocks, metas = [], []
        for bi in range(depth):
            shift = 0 if (bi % 2 == 0) else cfg["window_size"] // 2
            shift_eff = 0 if min(res) <= cfg["window_size"] else shift

            # CPB meta-net params (Linear(2,256) -> ReLU -> Linear(256,heads))
            meta_w1 = dense(2, cfg["meta_hidden"], jnp.float32)
            meta_b1 = jnp.zeros((cfg["meta_hidden"],), jnp.float32)
            meta_w2 = dense(cfg["meta_hidden"], heads, jnp.float32)
            meta_b2 = jnp.zeros((heads,), jnp.float32)
            # precompute the (H, T, T) relative-position bias once (constant
            # w.r.t. the forward pass) instead of running the meta-net per call
            h1 = jnp.maximum(rel_log @ meta_w1 + meta_b1, 0.0)
            pos_bias = (h1 @ meta_w2 + meta_b2).T.reshape(heads, T, T)

            blocks.append({
                "ln1_g": jnp.ones((C,), jnp.float32), "ln1_b": jnp.zeros((C,), jnp.float32),
                "ln2_g": jnp.ones((C,), jnp.float32), "ln2_b": jnp.zeros((C,), jnp.float32),
                "qkv_w": dense(C, 3 * C), "qkv_b": jnp.zeros((3 * C,), jnp.float32),
                "proj_w": dense(C, C), "proj_b": jnp.zeros((C,), jnp.float32),
                "ffn_w1": dense(C, hidden), "ffn_b1": jnp.zeros((hidden,), jnp.float32),
                "ffn_w2": dense(hidden, C), "ffn_b2": jnp.zeros((C,), jnp.float32),
                "meta_w1": meta_w1, "meta_b1": meta_b1,
                "meta_w2": meta_w2, "meta_b2": meta_b2,
                "pos_bias": pos_bias,
                "tau": jnp.ones((heads, 1, 1), jnp.float32),
            })
            metas.append({
                "ws": ws_eff,
                "shift": shift_eff,
                "mask": jnp.asarray(make_attention_mask(res, ws_eff, shift_eff)),
            })
        params["stages"].append({
            "downsample": downsample,
            "blocks": blocks,
            "block_meta": metas,
            "heads": heads,
        })
    return params


# ----------------------------------------------------------------------------
if __name__ == "__main__":
    cfg = dict(
        input_resolution=(32, 32),
        window_size=4,
        in_channels=3,
        embedding_channels=16,
        depths=(2, 2),
        number_of_heads=(2, 4),
        patch_size=4,
        ff_ratio=4,
        meta_hidden=256,
    )
    key = jax.random.PRNGKey(0)
    pkey, xkey = jax.random.split(key)
    params = build_model(pkey, cfg)

    x = jax.random.normal(xkey, (2, cfg["in_channels"], *cfg["input_resolution"]), jnp.float32)

    fwd = jax.jit(lambda inp: swin_v2_encoder_forward(params, cfg, inp))
    outs = fwd(x)
    outs = jax.block_until_ready(outs)

    # sanity: encoder out_channels = [emb * 2**i], spatial halves per stage after the first
    expected = [(2, 16, 8, 8), (2, 32, 4, 4)]
    assert [tuple(o.shape) for o in outs] == expected, [o.shape for o in outs]
    assert all(bool(jnp.all(jnp.isfinite(o))) for o in outs)
    print("KERNEL_OK")
</pallas_src>

<mosaic_0001>
module attributes {stable_mosaic.version = 11 : i64} {
  func.func @_linear_kernel(%arg0: i32, %arg1: i32, %arg2: i32, %arg3: memref<128x16xbf16, #tpu.memory_space<vmem>>, %arg4: memref<16x48xbf16, #tpu.memory_space<vmem>>, %arg5: memref<1x48xf32, #tpu.memory_space<vmem>>, %arg6: memref<128x48xbf16, #tpu.memory_space<vmem>>, %arg7: memref<128x48xf32, #tpu.memory_space<vmem>>) attributes {dimension_semantics = [#tpu.dimension_semantics<parallel>, #tpu.dimension_semantics<parallel>, #tpu.dimension_semantics<arbitrary>], iteration_bounds = array<i64: 1, 1, 1>, scalar_prefetch = 0 : i64, scratch_operands = 1 : i64, tpu.core_type = #tpu.core_type<tc>, window_params = [{transform_indices = @transform_0, window_bounds = array<i64: 128, 16>}, {transform_indices = @transform_1, window_bounds = array<i64: 16, 48>}, {transform_indices = @transform_2, window_bounds = array<i64: 1, 48>}, {transform_indices = @transform_3, window_bounds = array<i64: 128, 48>}]} {
    %c0_i32 = arith.constant 0 : i32
    %0 = arith.cmpi eq, %arg2, %c0_i32 : i32
    %1 = arith.extui %0 : i1 to i32
    %c0_i32_0 = arith.constant 0 : i32
    %2 = arith.cmpi ne, %1, %c0_i32_0 : i32
    scf.if %2 {
      %cst_10 = arith.constant 0.000000e+00 : f32
      %12 = vector.broadcast %cst_10 : f32 to vector<128x48xf32>
      %c0_11 = arith.constant 0 : index
      %c0_12 = arith.constant 0 : index
      %13 = vector.load %arg7[%c0_11, %c0_12] : memref<128x48xf32, #tpu.memory_space<vmem>>, vector<128x48xf32>
      tpu.vector_store %arg7[%c0_11, %c0_12], %12 {strides = array<i32>} : memref<128x48xf32, #tpu.memory_space<vmem>>, vector<128x48xf32>,
    } else {
    }
    %c0 = arith.constant 0 : index
    %c0_1 = arith.constant 0 : index
    %3 = vector.load %arg7[%c0, %c0_1] : memref<128x48xf32, #tpu.memory_space<vmem>>, vector<128x48xf32>
    %c0_2 = arith.constant 0 : index
    %c0_3 = arith.constant 0 : index
    %4 = vector.load %arg3[%c0_2, %c0_3] : memref<128x16xbf16, #tpu.memory_space<vmem>>, vector<128x16xbf16>
    %c0_4 = arith.constant 0 : index
    %c0_5 = arith.constant 0 : index
    %5 = vector.load %arg4[%c0_4, %c0_5] : memref<16x48xbf16, #tpu.memory_space<vmem>>, vector<16x48xbf16>
    %cst = arith.constant dense<0.000000e+00> : vector<128x48xf32>
    %6 = tpu.matmul %4, %5, %cst {dimension_numbers = #tpu.dot_dimension_numbers<[1], [0], [0], [1], [0, 0, 1, 1], [], []>} : vector<128x16xbf16>, vector<16x48xbf16>, vector<128x48xf32> -> vector<128x48xf32>
    %7 = arith.addf %3, %6 : vector<128x48xf32>
    %c0_6 = arith.constant 0 : index
    %c0_7 = arith.constant 0 : index
    %8 = vector.load %arg7[%c0_6, %c0_7] : memref<128x48xf32, #tpu.memory_space<vmem>>, vector<128x48xf32>
    tpu.vector_store %arg7[%c0_6, %c0_7], %7 {strides = array<i32>} : memref<128x48xf32, #tpu.memory_space<vmem>>, vector<128x48xf32>,
    %c0_i32_8 = arith.constant 0 : i32
    %9 = arith.cmpi eq, %arg2, %c0_i32_8 : i32
    %10 = arith.extui %9 : i1 to i32
    %c0_i32_9 = arith.constant 0 : i32
    %11 = arith.cmpi ne, %10, %c0_i32_9 : i32
    scf.if %11 {
      %c0_10 = arith.constant 0 : index
      %c0_11 = arith.constant 0 : index
      %12 = vector.load %arg7[%c0_10, %c0_11] : memref<128x48xf32, #tpu.memory_space<vmem>>, vector<128x48xf32>
      %c0_12 = arith.constant 0 : index
      %c0_13 = arith.constant 0 : index
      %13 = vector.load %arg5[%c0_12, %c0_13] : memref<1x48xf32, #tpu.memory_space<vmem>>, vector<1x48xf32>
      %14 = vector.broadcast %13 : vector<1x48xf32> to vector<128x48xf32>
      %15 = arith.addf %12, %14 : vector<128x48xf32>
      %16 = arith.truncf %15 : vector<128x48xf32> to vector<128x48xbf16>
      %c0_14 = arith.constant 0 : index
      %c0_15 = arith.constant 0 : index
      %17 = vector.load %arg6[%c0_14, %c0_15] : memref<128x48xbf16, #tpu.memory_space<vmem>>, vector<128x48xbf16>
      tpu.vector_store %arg6[%c0_14, %c0_15], %16 {strides = array<i32>} : memref<128x48xbf16, #tpu.memory_space<vmem>>, vector<128x48xbf16>,
    } else {
    }
    return
  }
  func.func @transform_0(%arg0: i32, %arg1: i32, %arg2: i32) -> (i32, i32) {
    %c0_i32 = arith.constant 0 : i32
    return %arg0, %arg2 : i32, i32
  }
  func.func @transform_1(%arg0: i32, %arg1: i32, %arg2: i32) -> (i32, i32) {
    %c0_i32 = arith.constant 0 : i32
    return %arg2, %arg1 : i32, i32
  }
  func.func @transform_2(%arg0: i32, %arg1: i32, %arg2: i32) -> (i32, i32) {
    %c0_i32 = arith.constant 0 : i32
    %c0_i32_0 = arith.constant 0 : i32
    return %c0_i32, %arg1 : i32, i32
  }
  func.func @transform_3(%arg0: i32, %arg1: i32, %arg2: i32) -> (i32, i32) {
    %c0_i32 = arith.constant 0 : i32
    return %arg0, %arg1 : i32, i32
  }
}

module attributes {stable_mosaic.version = 11 : i64} {
  func.func @_linear_kernel(%arg0: i32, %arg1: i32, %arg2: i32, %arg3: memref<128x48xf32, #tpu.memory_space<vmem>>, %arg4: memref<48x16xbf16, #tpu.memory_space<vmem>>, %arg5: memref<1x16xf32, #tpu.memory_space<vmem>>, %arg6: memref<1x16xf32, #tpu.memory_space<vmem>>, %arg7: memref<1x16xf32, #tpu.memory_space<vmem>>, %arg8: memref<128x16xbf16, #tpu.memory_space<vmem>>, %arg9: memref<128x16xf32, #tpu.memory_space<vmem>>) attributes {dimension_semantics = [#tpu.dimension_semantics<parallel>, #tpu.dimension_semantics<parallel>, #tpu.dimension_semantics<arbitrary>], iteration_bounds = array<i64: 1, 1, 1>, scalar_prefetch = 0 : i64, scratch_operands = 1 : i64, tpu.core_type = #tpu.core_type<tc>, window_params = [{transform_indices = @transform_0, window_bounds = array<i64: 128, 48>}, {transform_indices = @transform_1, window_bounds = array<i64: 48, 16>}, {transform_indices = @transform_2, window_bounds = array<i64: 1, 16>}, {transform_indices = @transform_3, window_bounds = array<i64: 1, 16>}, {transform_indices = @transform_4, window_bounds = array<i64: 1, 16>}, {transform_indices = @transform_5, window_bounds = array<i64: 128, 16>}]} {
    %c0_i32 = arith.constant 0 : i32
    %0 = arith.cmpi eq, %arg2, %c0_i32 : i32
    %1 = arith.extui %0 : i1 to i32
    %c0_i32_0 = arith.constant 0 : i32
    %2 = arith.cmpi ne, %1, %c0_i32_0 : i32
    scf.if %2 {
      %cst_10 = arith.constant 0.000000e+00 : f32
      %13 = vector.broadcast %cst_10 : f32 to vector<128x16xf32>
      %c0_11 = arith.constant 0 : index
      %c0_12 = arith.constant 0 : index
      %14 = vector.load %arg9[%c0_11, %c0_12] : memref<128x16xf32, #tpu.memory_space<vmem>>, vector<128x16xf32>
      tpu.vector_store %arg9[%c0_11, %c0_12], %13 {strides = array<i32>} : memref<128x16xf32, #tpu.memory_space<vmem>>, vector<128x16xf32>,
    } else {
    }
    %c0 = arith.constant 0 : index
    %c0_1 = arith.constant 0 : index
    %3 = vector.load %arg9[%c0, %c0_1] : memref<128x16xf32, #tpu.memory_space<vmem>>, vector<128x16xf32>
    %c0_2 = arith.constant 0 : index
    %c0_3 = arith.constant 0 : index
    %4 = vector.load %arg3[%c0_2, %c0_3] : memref<128x48xf32, #tpu.memory_space<vmem>>, vector<128x48xf32>
    %5 = arith.truncf %4 : vector<128x48xf32> to vector<128x48xbf16>
    %c0_4 = arith.constant 0 : index
    %c0_5 = arith.constant 0 : index
    %6 = vector.load %arg4[%c0_4, %c0_5] : memref<48x16xbf16, #tpu.memory_space<vmem>>, vector<48x16xbf16>
    %cst = arith.constant dense<0.000000e+00> : vector<128x16xf32>
    %7 = tpu.matmul %5, %6, %cst {dimension_numbers = #tpu.dot_dimension_numbers<[1], [0], [0], [1], [0, 0, 1, 1], [], []>} : vector<128x48xbf16>, vector<48x16xbf16>, vector<128x16xf32> -> vector<128x16xf32>
    %8 = arith.addf %3, %7 : vector<128x16xf32>
    %c0_6 = arith.constant 0 : index
    %c0_7 = arith.constant 0 : index
    %9 = vector.load %arg9[%c0_6, %c0_7] : memref<128x16xf32, #tpu.memory_space<vmem>>, vector<128x16xf32>
    tpu.vector_store %arg9[%c0_6, %c0_7], %8 {strides = array<i32>} : memref<128x16xf32, #tpu.memory_space<vmem>>, vector<128x16xf32>,
    %c0_i32_8 = arith.constant 0 : i32
    %10 = arith.cmpi eq, %arg2, %c0_i32_8 : i32
    %11 = arith.extui %10 : i1 to i32
    %c0_i32_9 = arith.constant 0 : i32
    %12 = arith.cmpi ne, %11, %c0_i32_9 : i32
    scf.if %12 {
      %c0_10 = arith.constant 0 : index
      %c0_11 = arith.constant 0 : index
      %13 = vector.load %arg9[%c0_10, %c0_11] : memref<128x16xf32, #tpu.memory_space<vmem>>, vector<128x16xf32>
      %c0_12 = arith.constant 0 : index
      %c0_13 = arith.constant 0 : index
      %14 = vector.load %arg5[%c0_12, %c0_13] : memref<1x16xf32, #tpu.memory_space<vmem>>, vector<1x16xf32>
      %15 = vector.broadcast %14 : vector<1x16xf32> to vector<128x16xf32>
      %16 = arith.addf %13, %15 : vector<128x16xf32>
      %cst_14 = arith.constant dense<0.000000e+00> : vector<128xf32>
      %17 = vector.multi_reduction <add>, %16, %cst_14 [1] : vector<128x16xf32> to vector<128xf32>
      %18 = vector.shape_cast %17 : vector<128xf32> to vector<128x1xf32>
      %cst_15 = arith.constant 1.600000e+01 : f32
      %19 = vector.broadcast %cst_15 : f32 to vector<128x1xf32>
      %20 = arith.divf %18, %19 : vector<128x1xf32>
      %21 = vector.broadcast %20 : vector<128x1xf32> to vector<128x16xf32>
      %22 = arith.subf %16, %21 : vector<128x16xf32>
      %23 = arith.mulf %22, %22 : vector<128x16xf32>
      %cst_16 = arith.constant dense<0.000000e+00> : vector<128xf32>
      %24 = vector.multi_reduction <add>, %23, %cst_16 [1] : vector<128x16xf32> to vector<128xf32>
      %25 = vector.shape_cast %24 : vector<128xf32> to vector<128x1xf32>
      %cst_17 = arith.constant 1.600000e+01 : f32
      %26 = vector.broadcast %cst_17 : f32 to vector<128x1xf32>
      %27 = arith.divf %25, %26 : vector<128x1xf32>
      %28 = vector.broadcast %20 : vector<128x1xf32> to vector<128x16xf32>
      %29 = arith.subf %16, %28 : vector<128x16xf32>
      %cst_18 = arith.constant 9.99999974E-6 : f32
      %30 = vector.broadcast %cst_18 : f32 to vector<128x1xf32>
      %31 = arith.addf %27, %30 : vector<128x1xf32>
      %32 = math.rsqrt %31 : vector<128x1xf32>
      %33 = vector.broadcast %32 : vector<128x1xf32> to vector<128x16xf32>
      %34 = arith.mulf %29, %33 : vector<128x16xf32>
      %c0_19 = arith.constant 0 : index
      %c0_20 = arith.constant 0 : index
      %35 = vector.load %arg6[%c0_19, %c0_20] : memref<1x16xf32, #tpu.memory_space<vmem>>, vector<1x16xf32>
      %36 = vector.broadcast %35 : vector<1x16xf32> to vector<128x16xf32>
      %37 = arith.mulf %34, %36 : vector<128x16xf32>
      %c0_21 = arith.constant 0 : index
      %c0_22 = arith.constant 0 : index
      %38 = vector.load %arg7[%c0_21, %c0_22] : memref<1x16xf32, #tpu.memory_space<vmem>>, vector<1x16xf32>
      %39 = vector.broadcast %38 : vector<1x16xf32> to vector<128x16xf32>
      %40 = arith.addf %37, %39 : vector<128x16xf32>
      %41 = arith.truncf %40 : vector<128x16xf32> to vector<128x16xbf16>
      %c0_23 = arith.constant 0 : index
      %c0_24 = arith.constant 0 : index
      %42 = vector.load %arg8[%c0_23, %c0_24] : memref<128x16xbf16, #tpu.memory_space<vmem>>, vector<128x16xbf16>
      tpu.vector_store %arg8[%c0_23, %c0_24], %41 {strides = array<i32>} : memref<128x16xbf16, #tpu.memory_space<vmem>>, vector<128x16xbf16>,
    } else {
    }
    return
  }
  func.func @transform_0(%arg0: i32, %arg1: i32, %arg2: i32) -> (i32, i32) {
    %c0_i32 = arith.constant 0 : i32
    return %arg0, %arg2 : i32, i32
  }
  func.func @transform_1(%arg0: i32, %arg1: i32, %arg2: i32) -> (i32, i32) {
    %c0_i32 = arith.constant 0 : i32
    return %arg2, %arg1 : i32, i32
  }
  func.func @transform_2(%arg0: i32, %arg1: i32, %arg2: i32) -> (i32, i32) {
    %c0_i32 = arith.constant 0 : i32
    %c0_i32_0 = arith.constant 0 : i32
    return %c0_i32, %arg1 : i32, i32
  }
  func.func @transform_3(%arg0: i32, %arg1: i32, %arg2: i32) -> (i32, i32) {
    %c0_i32 = arith.constant 0 : i32
    %c0_i32_0 = arith.constant 0 : i32
    return %c0_i32, %arg1 : i32, i32
  }
  func.func @transform_4(%arg0: i32, %arg1: i32, %arg2: i32) -> (i32, i32) {
    %c0_i32 = arith.constant 0 : i32
    %c0_i32_0 = arith.constant 0 : i32
    return %c0_i32, %arg1 : i32, i32
  }
  func.func @transform_5(%arg0: i32, %arg1: i32, %arg2: i32) -> (i32, i32) {
    %c0_i32 = arith.constant 0 : i32
    return %arg0, %arg1 : i32, i32
  }
}

module attributes {stable_mosaic.version = 11 : i64} {
  func.func @_window_attn_kernel(%arg0: i32, %arg1: memref<8x16x48xbf16, #tpu.memory_space<vmem>>, %arg2: memref<2x16x16xf32, #tpu.memory_space<vmem>>, %arg3: memref<8x16x16xf32, #tpu.memory_space<vmem>>, %arg4: memref<2xf32, #tpu.memory_space<smem>>, %arg5: memref<8x16x16xbf16, #tpu.memory_space<vmem>>) attributes {dimension_semantics = [#tpu.dimension_semantics<parallel>], iteration_bounds = array<i64: 1>, scalar_prefetch = 0 : i64, scratch_operands = 0 : i64, tpu.core_type = #tpu.core_type<tc>, window_params = [{transform_indices = @transform_0, window_bounds = array<i64: 8, 16, 48>}, {pipeline_mode = #tpu.pipeline_mode<synchronous>, transform_indices = @transform_1, window_bounds = array<i64: 2, 16, 16>}, {pipeline_mode = #tpu.pipeline_mode<synchronous>, transform_indices = @transform_2, window_bounds = array<i64: 8, 16, 16>}, {transform_indices = @transform_3, window_bounds = array<i64: 2>}, {transform_indices = @transform_4, window_bounds = array<i64: 8, 16, 16>}]} {
    %c0 = arith.constant 0 : index
    %c0_0 = arith.constant 0 : index
    %c0_1 = arith.constant 0 : index
    %0 = vector.load %arg1[%c0, %c0_0, %c0_1] : memref<8x16x48xbf16, #tpu.memory_space<vmem>>, vector<8x16x48xbf16>
    %c0_2 = arith.constant 0 : index
    %c0_3 = arith.constant 0 : index
    %c0_4 = arith.constant 0 : index
    %1 = vector.load %arg3[%c0_2, %c0_3, %c0_4] : memref<8x16x16xf32, #tpu.memory_space<vmem>>, vector<8x16x16xf32>
    %2 = vector.extract_strided_slice %0 {offsets = [0, 0, 0], sizes = [8, 16, 8], strides = [1, 1, 1]} : vector<8x16x48xbf16> to vector<8x16x8xbf16>
    %3 = arith.extf %2 : vector<8x16x8xbf16> to vector<8x16x8xf32>
    %4 = vector.extract_strided_slice %0 {offsets = [0, 0, 16], sizes = [8, 16, 8], strides = [1, 1, 1]} : vector<8x16x48xbf16> to vector<8x16x8xbf16>
    %5 = arith.extf %4 : vector<8x16x8xbf16> to vector<8x16x8xf32>
    %6 = vector.extract_strided_slice %0 {offsets = [0, 0, 32], sizes = [8, 16, 8], strides = [1, 1, 1]} : vector<8x16x48xbf16> to vector<8x16x8xbf16>
    %7 = arith.mulf %3, %3 : vector<8x16x8xf32>
    %cst = arith.constant dense<0.000000e+00> : vector<8x16xf32>
    %8 = vector.multi_reduction <add>, %7, %cst [2] : vector<8x16x8xf32> to vector<8x16xf32>
    %9 = vector.shape_cast %8 : vector<8x16xf32> to vector<8x16x1xf32>
    %cst_5 = arith.constant 9.99999996E-13 : f32
    %10 = vector.broadcast %cst_5 : f32 to vector<8x16x1xf32>
    %11 = arith.maximumf %9, %10 : vector<8x16x1xf32>
    %12 = math.rsqrt %11 : vector<8x16x1xf32>
    %13 = vector.broadcast %12 : vector<8x16x1xf32> to vector<8x16x8xf32>
    %14 = arith.mulf %3, %13 : vector<8x16x8xf32>
    %15 = arith.mulf %5, %5 : vector<8x16x8xf32>
    %cst_6 = arith.constant dense<0.000000e+00> : vector<8x16xf32>
    %16 = vector.multi_reduction <add>, %15, %cst_6 [2] : vector<8x16x8xf32> to vector<8x16xf32>
    %17 = vector.shape_cast %16 : vector<8x16xf32> to vector<8x16x1xf32>
    %cst_7 = arith.constant 9.99999996E-13 : f32
    %18 = vector.broadcast %cst_7 : f32 to vector<8x16x1xf32>
    %19 = arith.maximumf %17, %18 : vector<8x16x1xf32>
    %20 = math.rsqrt %19 : vector<8x16x1xf32>
    %21 = vector.broadcast %20 : vector<8x16x1xf32> to vector<8x16x8xf32>
    %22 = arith.mulf %5, %21 : vector<8x16x8xf32>
    %c0_8 = arith.constant 0 : index
    %23 = memref.load %arg4[%c0_8] : memref<2xf32, #tpu.memory_space<smem>>
    %cst_9 = arith.constant 0.00999999977 : f32
    %24 = arith.maximumf %23, %cst_9 : f32
    %cst_10 = arith.constant 1.000000e+00 : f32
    %25 = arith.divf %cst_10, %24 : f32
    %26 = vector.broadcast %25 : f32 to vector<8x16x8xf32>
    %27 = arith.mulf %14, %26 : vector<8x16x8xf32>
    %28 = arith.truncf %27 : vector<8x16x8xf32> to vector<8x16x8xbf16>
    %29 = arith.truncf %22 : vector<8x16x8xf32> to vector<8x16x8xbf16>
    "tpu.trace_start"() <{level = 10 : i32, message = "wtd,wsd->wts"}> : () -> ()
    %cst_11 = arith.constant dense<0.000000e+00> : vector<8x16x16xf32>
    %30 = tpu.matmul %28, %29, %cst_11 {dimension_numbers = #tpu.dot_dimension_numbers<[2], [2], [1], [1], [0, 0, 0, 1, 1, 1], [0], [0]>} : vector<8x16x8xbf16>, vector<8x16x8xbf16>, vector<8x16x16xf32> -> vector<8x16x16xf32>
    "tpu.trace_stop"() : () -> ()
    %c0_12 = arith.constant 0 : index
    %c0_13 = arith.constant 0 : index
    %c0_14 = arith.constant 0 : index
    %31 = vector.load %arg2[%c0_12, %c0_13, %c0_14] : memref<2x16x16xf32, #tpu.memory_space<vmem>>, vector<1x16x16xf32>
    %32 = vector.shape_cast %31 : vector<1x16x16xf32> to vector<16x16xf32>
    %33 = vector.shape_cast %32 : vector<16x16xf32> to vector<1x16x16xf32>
    %34 = vector.broadcast %33 : vector<1x16x16xf32> to vector<8x16x16xf32>
    %35 = arith.addf %30, %34 : vector<8x16x16xf32>
    %36 = arith.addf %35, %1 : vector<8x16x16xf32>
    %cst_15 = arith.constant dense<0xFF800000> : vector<8x16xf32>
    %37 = vector.multi_reduction <maximumf>, %36, %cst_15 [2] : vector<8x16x16xf32> to vector<8x16xf32>
    %38 = vector.shape_cast %37 : vector<8x16xf32> to vector<8x16x1xf32>
    %39 = vector.broadcast %38 : vector<8x16x1xf32> to vector<8x16x16xf32>
    %40 = arith.subf %36, %39 : vector<8x16x16xf32>
    %41 = math.exp %40 : vector<8x16x16xf32>
    %cst_16 = arith.constant dense<0.000000e+00> : vector<8x16xf32>
    %42 = vector.multi_reduction <add>, %41, %cst_16 [2] : vector<8x16x16xf32> to vector<8x16xf32>
    %43 = vector.shape_cast %42 : vector<8x16xf32> to vector<8x16x1xf32>
    %44 = tpu.reciprocal %43 {approx = true} : vector<8x16x1xf32> -> vector<8x16x1xf32>
    %45 = vector.broadcast %44 : vector<8x16x1xf32> to vector<8x16x16xf32>
    %46 = arith.mulf %41, %45 : vector<8x16x16xf32>
    %47 = arith.truncf %46 : vector<8x16x16xf32> to vector<8x16x16xbf16>
    "tpu.trace_start"() <{level = 10 : i32, message = "wts,wsd->wtd"}> : () -> ()
    %cst_17 = arith.constant dense<0.000000e+00> : vector<8x16x8xf32>
    %48 = tpu.matmul %47, %6, %cst_17 {dimension_numbers = #tpu.dot_dimension_numbers<[2], [1], [1], [2], [0, 0, 0, 1, 1, 2], [0], [0]>} : vector<8x16x16xbf16>, vector<8x16x8xbf16>, vector<8x16x8xf32> -> vector<8x16x8xf32>
    "tpu.trace_stop"() : () -> ()
    %49 = vector.extract_strided_slice %0 {offsets = [0, 0, 8], sizes = [8, 16, 8], strides = [1, 1, 1]} : vector<8x16x48xbf16> to vector<8x16x8xbf16>
    %50 = arith.extf %49 : vector<8x16x8xbf16> to vector<8x16x8xf32>
    %51 = vector.extract_strided_slice %0 {offsets = [0, 0, 24], sizes = [8, 16, 8], strides = [1, 1, 1]} : vector<8x16x48xbf16> to vector<8x16x8xbf16>
    %52 = arith.extf %51 : vector<8x16x8xbf16> to vector<8x16x8xf32>
    %53 = vector.extract_strided_slice %0 {offsets = [0, 0, 40], sizes = [8, 16, 8], strides = [1, 1, 1]} : vector<8x16x48xbf16> to vector<8x16x8xbf16>
    %54 = arith.mulf %50, %50 : vector<8x16x8xf32>
    %cst_18 = arith.constant dense<0.000000e+00> : vector<8x16xf32>
    %55 = vector.multi_reduction <add>, %54, %cst_18 [2] : vector<8x16x8xf32> to vector<8x16xf32>
    %56 = vector.shape_cast %55 : vector<8x16xf32> to vector<8x16x1xf32>
    %cst_19 = arith.constant 9.99999996E-13 : f32
    %57 = vector.broadcast %cst_19 : f32 to vector<8x16x1xf32>
    %58 = arith.maximumf %56, %57 : vector<8x16x1xf32>
    %59 = math.rsqrt %58 : vector<8x16x1xf32>
    %60 = vector.broadcast %59 : vector<8x16x1xf32> to vector<8x16x8xf32>
    %61 = arith.mulf %50, %60 : vector<8x16x8xf32>
    %62 = arith.mulf %52, %52 : vector<8x16x8xf32>
    %cst_20 = arith.constant dense<0.000000e+00> : vector<8x16xf32>
    %63 = vector.multi_reduction <add>, %62, %cst_20 [2] : vector<8x16x8xf32> to vector<8x16xf32>
    %64 = vector.shape_cast %63 : vector<8x16xf32> to vector<8x16x1xf32>
    %cst_21 = arith.constant 9.99999996E-13 : f32
    %65 = vector.broadcast %cst_21 : f32 to vector<8x16x1xf32>
    %66 = arith.maximumf %64, %65 : vector<8x16x1xf32>
    %67 = math.rsqrt %66 : vector<8x16x1xf32>
    %68 = vector.broadcast %67 : vector<8x16x1xf32> to vector<8x16x8xf32>
    %69 = arith.mulf %52, %68 : vector<8x16x8xf32>
    %c1 = arith.constant 1 : index
    %70 = memref.load %arg4[%c1] : memref<2xf32, #tpu.memory_space<smem>>
    %cst_22 = arith.constant 0.00999999977 : f32
    %71 = arith.maximumf %70, %cst_22 : f32
    %cst_23 = arith.constant 1.000000e+00 : f32
    %72 = arith.divf %cst_23, %71 : f32
    %73 = vector.broadcast %72 : f32 to vector<8x16x8xf32>
    %74 = arith.mulf %61, %73 : vector<8x16x8xf32>
    %75 = arith.truncf %74 : vector<8x16x8xf32> to vector<8x16x8xbf16>
    %76 = arith.truncf %69 : vector<8x16x8xf32> to vector<8x16x8xbf16>
    "tpu.trace_start"() <{level = 10 : i32, message = "wtd,wsd->wts"}> : () -> ()
    %cst_24 = arith.constant dense<0.000000e+00> : vector<8x16x16xf32>
    %77 = tpu.matmul %75, %76, %cst_24 {dimension_numbers = #tpu.dot_dimension_numbers<[2], [2], [1], [1], [0, 0, 0, 1, 1, 1], [0], [0]>} : vector<8x16x8xbf16>, vector<8x16x8xbf16>, vector<8x16x16xf32> -> vector<8x16x16xf32>
    "tpu.trace_stop"() : () -> ()
    %c1_25 = arith.constant 1 : index
    %c0_26 = arith.constant 0 : index
    %c0_27 = arith.constant 0 : index
    %78 = vector.load %arg2[%c1_25, %c0_26, %c0_27] : memref<2x16x16xf32, #tpu.memory_space<vmem>>, vector<1x16x16xf32>
    %79 = vector.shape_cast %78 : vector<1x16x16xf32> to vector<16x16xf32>
    %80 = vector.shape_cast %79 : vector<16x16xf32> to vector<1x16x16xf32>
    %81 = vector.broadcast %80 : vector<1x16x16xf32> to vector<8x16x16xf32>
    %82 = arith.addf %77, %81 : vector<8x16x16xf32>
    %83 = arith.addf %82, %1 : vector<8x16x16xf32>
    %cst_28 = arith.constant dense<0xFF800000> : vector<8x16xf32>
    %84 = vector.multi_reduction <maximumf>, %83, %cst_28 [2] : vector<8x16x16xf32> to vector<8x16xf32>
    %85 = vector.shape_cast %84 : vector<8x16xf32> to vector<8x16x1xf32>
    %86 = vector.broadcast %85 : vector<8x16x1xf32> to vector<8x16x16xf32>
    %87 = arith.subf %83, %86 : vector<8x16x16xf32>
    %88 = math.exp %87 : vector<8x16x16xf32>
    %cst_29 = arith.constant dense<0.000000e+00> : vector<8x16xf32>
    %89 = vector.multi_reduction <add>, %88, %cst_29 [2] : vector<8x16x16xf32> to vector<8x16xf32>
    %90 = vector.shape_cast %89 : vector<8x16xf32> to vector<8x16x1xf32>
    %91 = tpu.reciprocal %90 {approx = true} : vector<8x16x1xf32> -> vector<8x16x1xf32>
    %92 = vector.broadcast %91 : vector<8x16x1xf32> to vector<8x16x16xf32>
    %93 = arith.mulf %88, %92 : vector<8x16x16xf32>
    %94 = arith.truncf %93 : vector<8x16x16xf32> to vector<8x16x16xbf16>
    "tpu.trace_start"() <{level = 10 : i32, message = "wts,wsd->wtd"}> : () -> ()
    %cst_30 = arith.constant dense<0.000000e+00> : vector<8x16x8xf32>
    %95 = tpu.matmul %94, %53, %cst_30 {dimension_numbers = #tpu.dot_dimension_numbers<[2], [1], [1], [2], [0, 0, 0, 1, 1, 2], [0], [0]>} : vector<8x16x16xbf16>, vector<8x16x8xbf16>, vector<8x16x8xf32> -> vector<8x16x8xf32>
    "tpu.trace_stop"() : () -> ()
    %96 = tpu.concatenate %48, %95 in 2 : vector<8x16x8xf32>, vector<8x16x8xf32> -> vector<8x16x16xf32>
    %97 = arith.truncf %96 : vector<8x16x16xf32> to vector<8x16x16xbf16>
    %c0_31 = arith.constant 0 : index
    %c0_32 = arith.constant 0 : index
    %c0_33 = arith.constant 0 : index
    %98 = vector.load %arg5[%c0_31, %c0_32, %c0_33] : memref<8x16x16xbf16, #tpu.memory_space<vmem>>, vector<8x16x16xbf16>
    tpu.vector_store %arg5[%c0_31, %c0_32, %c0_33], %97 {strides = array<i32>} : memref<8x16x16xbf16, #tpu.memory_space<vmem>>, vector<8x16x16xbf16>,
    return
  }
  func.func @transform_0(%arg0: i32) -> (i32, i32, i32) {
    %c0_i32 = arith.constant 0 : i32
    %c0_i32_0 = arith.constant 0 : i32
    %c0_i32_1 = arith.constant 0 : i32
    return %arg0, %c0_i32, %c0_i32_0 : i32, i32, i32
  }
  func.func @transform_1(%arg0: i32) -> (i32, i32, i32) {
    %c0_i32 = arith.constant 0 : i32
    %c0_i32_0 = arith.constant 0 : i32
    %c0_i32_1 = arith.constant 0 : i32
    %c0_i32_2 = arith.constant 0 : i32
    return %c0_i32, %c0_i32_0, %c0_i32_1 : i32, i32, i32
  }
  func.func @transform_2(%arg0: i32) -> (i32, i32, i32) {
    %c0_i32 = arith.constant 0 : i32
    %c0_i32_0 = arith.constant 0 : i32
    %c0_i32_1 = arith.constant 0 : i32
    %c0_i32_2 = arith.constant 0 : i32
    return %c0_i32, %c0_i32_0, %c0_i32_1 : i32, i32, i32
  }
  func.func @transform_3(%arg0: i32) -> i32 {
    %c0_i32 = arith.constant 0 : i32
    %c0_i32_0 = arith.constant 0 : i32
    return %c0_i32 : i32
  }
  func.func @transform_4(%arg0: i32) -> (i32, i32, i32) {
    %c0_i32 = arith.constant 0 : i32
    %c0_i32_0 = arith.constant 0 : i32
    %c0_i32_1 = arith.constant 0 : i32
    return %arg0, %c0_i32, %c0_i32_0 : i32, i32, i32
  }
}

module attributes {stable_mosaic.version = 11 : i64} {
  func.func @_linear_kernel(%arg0: i32, %arg1: i32, %arg2: i32, %arg3: memref<128x16xbf16, #tpu.memory_space<vmem>>, %arg4: memref<16x16xbf16, #tpu.memory_space<vmem>>, %arg5: memref<1x16xf32, #tpu.memory_space<vmem>>, %arg6: memref<1x16xf32, #tpu.memory_space<vmem>>, %arg7: memref<1x16xf32, #tpu.memory_space<vmem>>, %arg8: memref<128x16xbf16, #tpu.memory_space<vmem>>, %arg9: memref<128x16xbf16, #tpu.memory_space<vmem>>, %arg10: memref<128x16xf32, #tpu.memory_space<vmem>>) attributes {dimension_semantics = [#tpu.dimension_semantics<parallel>, #tpu.dimension_semantics<parallel>, #tpu.dimension_semantics<arbitrary>], iteration_bounds = array<i64: 1, 1, 1>, scalar_prefetch = 0 : i64, scratch_operands = 1 : i64, tpu.core_type = #tpu.core_type<tc>, window_params = [{transform_indices = @transform_0, window_bounds = array<i64: 128, 16>}, {transform_indices = @transform_1, window_bounds = array<i64: 16, 16>}, {transform_indices = @transform_2, window_bounds = array<i64: 1, 16>}, {transform_indices = @transform_3, window_bounds = array<i64: 1, 16>}, {transform_indices = @transform_4, window_bounds = array<i64: 1, 16>}, {transform_indices = @transform_5, window_bounds = array<i64: 128, 16>}, {transform_indices = @transform_6, window_bounds = array<i64: 128, 16>}]} {
    %c0_i32 = arith.constant 0 : i32
    %0 = arith.cmpi eq, %arg2, %c0_i32 : i32
    %1 = arith.extui %0 : i1 to i32
    %c0_i32_0 = arith.constant 0 : i32
    %2 = arith.cmpi ne, %1, %c0_i32_0 : i32
    scf.if %2 {
      %cst_10 = arith.constant 0.000000e+00 : f32
      %12 = vector.broadcast %cst_10 : f32 to vector<128x16xf32>
      %c0_11 = arith.constant 0 : index
      %c0_12 = arith.constant 0 : index
      %13 = vector.load %arg10[%c0_11, %c0_12] : memref<128x16xf32, #tpu.memory_space<vmem>>, vector<128x16xf32>
      tpu.vector_store %arg10[%c0_11, %c0_12], %12 {strides = array<i32>} : memref<128x16xf32, #tpu.memory_space<vmem>>, vector<128x16xf32>,
    } else {
    }
    %c0 = arith.constant 0 : index
    %c0_1 = arith.constant 0 : index
    %3 = vector.load %arg10[%c0, %c0_1] : memref<128x16xf32, #tpu.memory_space<vmem>>, vector<128x16xf32>
    %c0_2 = arith.constant 0 : index
    %c0_3 = arith.constant 0 : index
    %4 = vector.load %arg3[%c0_2, %c0_3] : memref<128x16xbf16, #tpu.memory_space<vmem>>, vector<128x16xbf16>
    %c0_4 = arith.constant 0 : index
    %c0_5 = arith.constant 0 : index
    %5 = vector.load %arg4[%c0_4, %c0_5] : memref<16x16xbf16, #tpu.memory_space<vmem>>, vector<16x16xbf16>
    %cst = arith.constant dense<0.000000e+00> : vector<128x16xf32>
    %6 = tpu.matmul %4, %5, %cst {dimension_numbers = #tpu.dot_dimension_numbers<[1], [0], [0], [1], [0, 0, 1, 1], [], []>} : vector<128x16xbf16>, vector<16x16xbf16>, vector<128x16xf32> -> vector<128x16xf32>
    %7 = arith.addf %3, %6 : vector<128x16xf32>
    %c0_6 = arith.constant 0 : index
    %c0_7 = arith.constant 0 : index
    %8 = vector.load %arg10[%c0_6, %c0_7] : memref<128x16xf32, #tpu.memory_space<vmem>>, vector<128x16xf32>
    tpu.vector_store %arg10[%c0_6, %c0_7], %7 {strides = array<i32>} : memref<128x16xf32, #tpu.memory_space<vmem>>, vector<128x16xf32>,
    %c0_i32_8 = arith.constant 0 : i32
    %9 = arith.cmpi eq, %arg2, %c0_i32_8 : i32
    %10 = arith.extui %9 : i1 to i32
    %c0_i32_9 = arith.constant 0 : i32
    %11 = arith.cmpi ne, %10, %c0_i32_9 : i32
    scf.if %11 {
      %c0_10 = arith.constant 0 : index
      %c0_11 = arith.constant 0 : index
      %12 = vector.load %arg10[%c0_10, %c0_11] : memref<128x16xf32, #tpu.memory_space<vmem>>, vector<128x16xf32>
      %c0_12 = arith.constant 0 : index
      %c0_13 = arith.constant 0 : index
      %13 = vector.load %arg5[%c0_12, %c0_13] : memref<1x16xf32, #tpu.memory_space<vmem>>, vector<1x16xf32>
      %14 = vector.broadcast %13 : vector<1x16xf32> to vector<128x16xf32>
      %15 = arith.addf %12, %14 : vector<128x16xf32>
      %cst_14 = arith.constant dense<0.000000e+00> : vector<128xf32>
      %16 = vector.multi_reduction <add>, %15, %cst_14 [1] : vector<128x16xf32> to vector<128xf32>
      %17 = vector.shape_cast %16 : vector<128xf32> to vector<128x1xf32>
      %cst_15 = arith.constant 1.600000e+01 : f32
      %18 = vector.broadcast %cst_15 : f32 to vector<128x1xf32>
      %19 = arith.divf %17, %18 : vector<128x1xf32>
      %20 = vector.broadcast %19 : vector<128x1xf32> to vector<128x16xf32>
      %21 = arith.subf %15, %20 : vector<128x16xf32>
      %22 = arith.mulf %21, %21 : vector<128x16xf32>
      %cst_16 = arith.constant dense<0.000000e+00> : vector<128xf32>
      %23 = vector.multi_reduction <add>, %22, %cst_16 [1] : vector<128x16xf32> to vector<128xf32>
      %24 = vector.shape_cast %23 : vector<128xf32> to vector<128x1xf32>
      %cst_17 = arith.constant 1.600000e+01 : f32
      %25 = vector.broadcast %cst_17 : f32 to vector<128x1xf32>
      %26 = arith.divf %24, %25 : vector<128x1xf32>
      %27 = vector.broadcast %19 : vector<128x1xf32> to vector<128x16xf32>
      %28 = arith.subf %15, %27 : vector<128x16xf32>
      %cst_18 = arith.constant 9.99999974E-6 : f32
      %29 = vector.broadcast %cst_18 : f32 to vector<128x1xf32>
      %30 = arith.addf %26, %29 : vector<128x1xf32>
      %31 = math.rsqrt %30 : vector<128x1xf32>
      %32 = vector.broadcast %31 : vector<128x1xf32> to vector<128x16xf32>
      %33 = arith.mulf %28, %32 : vector<128x16xf32>
      %c0_19 = arith.constant 0 : index
      %c0_20 = arith.constant 0 : index
      %34 = vector.load %arg6[%c0_19, %c0_20] : memref<1x16xf32, #tpu.memory_space<vmem>>, vector<1x16xf32>
      %35 = vector.broadcast %34 : vector<1x16xf32> to vector<128x16xf32>
      %36 = arith.mulf %33, %35 : vector<128x16xf32>
      %c0_21 = arith.constant 0 : index
      %c0_22 = arith.constant 0 : index
      %37 = vector.load %arg7[%c0_21, %c0_22] : memref<1x16xf32, #tpu.memory_space<vmem>>, vector<1x16xf32>
      %38 = vector.broadcast %37 : vector<1x16xf32> to vector<128x16xf32>
      %39 = arith.addf %36, %38 : vector<128x16xf32>
      %c0_23 = arith.constant 0 : index
      %c0_24 = arith.constant 0 : index
      %40 = vector.load %arg8[%c0_23, %c0_24] : memref<128x16xbf16, #tpu.memory_space<vmem>>, vector<128x16xbf16>
      %41 = arith.extf %40 : vector<128x16xbf16> to vector<128x16xf32>
      %42 = arith.addf %39, %41 : vector<128x16xf32>
      %43 = arith.truncf %42 : vector<128x16xf32> to vector<128x16xbf16>
      %c0_25 = arith.constant 0 : index
      %c0_26 = arith.constant 0 : index
      %44 = vector.load %arg9[%c0_25, %c0_26] : memref<128x16xbf16, #tpu.memory_space<vmem>>, vector<128x16xbf16>
      tpu.vector_store %arg9[%c0_25, %c0_26], %43 {strides = array<i32>} : memref<128x16xbf16, #tpu.memory_space<vmem>>, vector<128x16xbf16>,
    } else {
    }
    return
  }
  func.func @transform_0(%arg0: i32, %arg1: i32, %arg2: i32) -> (i32, i32) {
    %c0_i32 = arith.constant 0 : i32
    return %arg0, %arg2 : i32, i32
  }
  func.func @transform_1(%arg0: i32, %arg1: i32, %arg2: i32) -> (i32, i32) {
    %c0_i32 = arith.constant 0 : i32
    return %arg2, %arg1 : i32, i32
  }
  func.func @transform_2(%arg0: i32, %arg1: i32, %arg2: i32) -> (i32, i32) {
    %c0_i32 = arith.constant 0 : i32
    %c0_i32_0 = arith.constant 0 : i32
    return %c0_i32, %arg1 : i32, i32
  }
  func.func @transform_3(%arg0: i32, %arg1: i32, %arg2: i32) -> (i32, i32) {
    %c0_i32 = arith.constant 0 : i32
    %c0_i32_0 = arith.constant 0 : i32
    return %c0_i32, %arg1 : i32, i32
  }
  func.func @transform_4(%arg0: i32, %arg1: i32, %arg2: i32) -> (i32, i32) {
    %c0_i32 = arith.constant 0 : i32
    %c0_i32_0 = arith.constant 0 : i32
    return %c0_i32, %arg1 : i32, i32
  }
  func.func @transform_5(%arg0: i32, %arg1: i32, %arg2: i32) -> (i32, i32) {
    %c0_i32 = arith.constant 0 : i32
    return %arg0, %arg1 : i32, i32
  }
  func.func @transform_6(%arg0: i32, %arg1: i32, %arg2: i32) -> (i32, i32) {
    %c0_i32 = arith.constant 0 : i32
    return %arg0, %arg1 : i32, i32
  }
}

module attributes {stable_mosaic.version = 11 : i64} {
  func.func @_linear_kernel(%arg0: i32, %arg1: i32, %arg2: i32, %arg3: memref<128x16xbf16, #tpu.memory_space<vmem>>, %arg4: memref<16x64xbf16, #tpu.memory_space<vmem>>, %arg5: memref<1x64xf32, #tpu.memory_space<vmem>>, %arg6: memref<128x64xbf16, #tpu.memory_space<vmem>>, %arg7: memref<128x64xf32, #tpu.memory_space<vmem>>) attributes {dimension_semantics = [#tpu.dimension_semantics<parallel>, #tpu.dimension_semantics<parallel>, #tpu.dimension_semantics<arbitrary>], iteration_bounds = array<i64: 1, 1, 1>, scalar_prefetch = 0 : i64, scratch_operands = 1 : i64, tpu.core_type = #tpu.core_type<tc>, window_params = [{transform_indices = @transform_0, window_bounds = array<i64: 128, 16>}, {transform_indices = @transform_1, window_bounds = array<i64: 16, 64>}, {transform_indices = @transform_2, window_bounds = array<i64: 1, 64>}, {transform_indices = @transform_3, window_bounds = array<i64: 128, 64>}]} {
    %c0_i32 = arith.constant 0 : i32
    %0 = arith.cmpi eq, %arg2, %c0_i32 : i32
    %1 = arith.extui %0 : i1 to i32
    %c0_i32_0 = arith.constant 0 : i32
    %2 = arith.cmpi ne, %1, %c0_i32_0 : i32
    scf.if %2 {
      %cst_10 = arith.constant 0.000000e+00 : f32
      %12 = vector.broadcast %cst_10 : f32 to vector<128x64xf32>
      %c0_11 = arith.constant 0 : index
      %c0_12 = arith.constant 0 : index
      %13 = vector.load %arg7[%c0_11, %c0_12] : memref<128x64xf32, #tpu.memory_space<vmem>>, vector<128x64xf32>
      tpu.vector_store %arg7[%c0_11, %c0_12], %12 {strides = array<i32>} : memref<128x64xf32, #tpu.memory_space<vmem>>, vector<128x64xf32>,
    } else {
    }
    %c0 = arith.constant 0 : index
    %c0_1 = arith.constant 0 : index
    %3 = vector.load %arg7[%c0, %c0_1] : memref<128x64xf32, #tpu.memory_space<vmem>>, vector<128x64xf32>
    %c0_2 = arith.constant 0 : index
    %c0_3 = arith.constant 0 : index
    %4 = vector.load %arg3[%c0_2, %c0_3] : memref<128x16xbf16, #tpu.memory_space<vmem>>, vector<128x16xbf16>
    %c0_4 = arith.constant 0 : index
    %c0_5 = arith.constant 0 : index
    %5 = vector.load %arg4[%c0_4, %c0_5] : memref<16x64xbf16, #tpu.memory_space<vmem>>, vector<16x64xbf16>
    %cst = arith.constant dense<0.000000e+00> : vector<128x64xf32>
    %6 = tpu.matmul %4, %5, %cst {dimension_numbers = #tpu.dot_dimension_numbers<[1], [0], [0], [1], [0, 0, 1, 1], [], []>} : vector<128x16xbf16>, vector<16x64xbf16>, vector<128x64xf32> -> vector<128x64xf32>
    %7 = arith.addf %3, %6 : vector<128x64xf32>
    %c0_6 = arith.constant 0 : index
    %c0_7 = arith.constant 0 : index
    %8 = vector.load %arg7[%c0_6, %c0_7] : memref<128x64xf32, #tpu.memory_space<vmem>>, vector<128x64xf32>
    tpu.vector_store %arg7[%c0_6, %c0_7], %7 {strides = array<i32>} : memref<128x64xf32, #tpu.memory_space<vmem>>, vector<128x64xf32>,
    %c0_i32_8 = arith.constant 0 : i32
    %9 = arith.cmpi eq, %arg2, %c0_i32_8 : i32
    %10 = arith.extui %9 : i1 to i32
    %c0_i32_9 = arith.constant 0 : i32
    %11 = arith.cmpi ne, %10, %c0_i32_9 : i32
    scf.if %11 {
      %c0_10 = arith.constant 0 : index
      %c0_11 = arith.constant 0 : index
      %12 = vector.load %arg7[%c0_10, %c0_11] : memref<128x64xf32, #tpu.memory_space<vmem>>, vector<128x64xf32>
      %c0_12 = arith.constant 0 : index
      %c0_13 = arith.constant 0 : index
      %13 = vector.load %arg5[%c0_12, %c0_13] : memref<1x64xf32, #tpu.memory_space<vmem>>, vector<1x64xf32>
      %14 = vector.broadcast %13 : vector<1x64xf32> to vector<128x64xf32>
      %15 = arith.addf %12, %14 : vector<128x64xf32>
      %cst_14 = arith.constant 5.000000e-01 : f32
      %16 = vector.broadcast %cst_14 : f32 to vector<128x64xf32>
      %17 = arith.mulf %16, %15 : vector<128x64xf32>
      %cst_15 = arith.constant 4.471500e-02 : f32
      %18 = vector.broadcast %cst_15 : f32 to vector<128x64xf32>
      %19 = arith.mulf %18, %15 : vector<128x64xf32>
      %20 = arith.mulf %19, %15 : vector<128x64xf32>
      %21 = arith.mulf %20, %15 : vector<128x64xf32>
      %22 = arith.addf %15, %21 : vector<128x64xf32>
      %cst_16 = arith.constant 0.797884583 : f32
      %23 = vector.broadcast %cst_16 : f32 to vector<128x64xf32>
      %24 = arith.mulf %23, %22 : vector<128x64xf32>
      %25 = math.tanh %24 : vector<128x64xf32>
      %cst_17 = arith.constant 1.000000e+00 : f32
      %26 = vector.broadcast %cst_17 : f32 to vector<128x64xf32>
      %27 = arith.addf %26, %25 : vector<128x64xf32>
      %28 = arith.mulf %17, %27 : vector<128x64xf32>
      %29 = arith.truncf %28 : vector<128x64xf32> to vector<128x64xbf16>
      %c0_18 = arith.constant 0 : index
      %c0_19 = arith.constant 0 : index
      %30 = vector.load %arg6[%c0_18, %c0_19] : memref<128x64xbf16, #tpu.memory_space<vmem>>, vector<128x64xbf16>
      tpu.vector_store %arg6[%c0_18, %c0_19], %29 {strides = array<i32>} : memref<128x64xbf16, #tpu.memory_space<vmem>>, vector<128x64xbf16>,
    } else {
    }
    return
  }
  func.func @transform_0(%arg0: i32, %arg1: i32, %arg2: i32) -> (i32, i32) {
    %c0_i32 = arith.constant 0 : i32
    return %arg0, %arg2 : i32, i32
  }
  func.func @transform_1(%arg0: i32, %arg1: i32, %arg2: i32) -> (i32, i32) {
    %c0_i32 = arith.constant 0 : i32
    return %arg2, %arg1 : i32, i32
  }
  func.func @transform_2(%arg0: i32, %arg1: i32, %arg2: i32) -> (i32, i32) {
    %c0_i32 = arith.constant 0 : i32
    %c0_i32_0 = arith.constant 0 : i32
    return %c0_i32, %arg1 : i32, i32
  }
  func.func @transform_3(%arg0: i32, %arg1: i32, %arg2: i32) -> (i32, i32) {
    %c0_i32 = arith.constant 0 : i32
    return %arg0, %arg1 : i32, i32
  }
}

module attributes {stable_mosaic.version = 11 : i64} {
  func.func @_linear_kernel(%arg0: i32, %arg1: i32, %arg2: i32, %arg3: memref<128x64xbf16, #tpu.memory_space<vmem>>, %arg4: memref<64x16xbf16, #tpu.memory_space<vmem>>, %arg5: memref<1x16xf32, #tpu.memory_space<vmem>>, %arg6: memref<1x16xf32, #tpu.memory_space<vmem>>, %arg7: memref<1x16xf32, #tpu.memory_space<vmem>>, %arg8: memref<128x16xbf16, #tpu.memory_space<vmem>>, %arg9: memref<128x16xbf16, #tpu.memory_space<vmem>>, %arg10: memref<128x16xf32, #tpu.memory_space<vmem>>) attributes {dimension_semantics = [#tpu.dimension_semantics<parallel>, #tpu.dimension_semantics<parallel>, #tpu.dimension_semantics<arbitrary>], iteration_bounds = array<i64: 1, 1, 1>, scalar_prefetch = 0 : i64, scratch_operands = 1 : i64, tpu.core_type = #tpu.core_type<tc>, window_params = [{transform_indices = @transform_0, window_bounds = array<i64: 128, 64>}, {transform_indices = @transform_1, window_bounds = array<i64: 64, 16>}, {transform_indices = @transform_2, window_bounds = array<i64: 1, 16>}, {transform_indices = @transform_3, window_bounds = array<i64: 1, 16>}, {transform_indices = @transform_4, window_bounds = array<i64: 1, 16>}, {transform_indices = @transform_5, window_bounds = array<i64: 128, 16>}, {transform_indices = @transform_6, window_bounds = array<i64: 128, 16>}]} {
    %c0_i32 = arith.constant 0 : i32
    %0 = arith.cmpi eq, %arg2, %c0_i32 : i32
    %1 = arith.extui %0 : i1 to i32
    %c0_i32_0 = arith.constant 0 : i32
    %2 = arith.cmpi ne, %1, %c0_i32_0 : i32
    scf.if %2 {
      %cst_10 = arith.constant 0.000000e+00 : f32
      %12 = vector.broadcast %cst_10 : f32 to vector<128x16xf32>
      %c0_11 = arith.constant 0 : index
      %c0_12 = arith.constant 0 : index
      %13 = vector.load %arg10[%c0_11, %c0_12] : memref<128x16xf32, #tpu.memory_space<vmem>>, vector<128x16xf32>
      tpu.vector_store %arg10[%c0_11, %c0_12], %12 {strides = array<i32>} : memref<128x16xf32, #tpu.memory_space<vmem>>, vector<128x16xf32>,
    } else {
    }
    %c0 = arith.constant 0 : index
    %c0_1 = arith.constant 0 : index
    %3 = vector.load %arg10[%c0, %c0_1] : memref<128x16xf32, #tpu.memory_space<vmem>>, vector<128x16xf32>
    %c0_2 = arith.constant 0 : index
    %c0_3 = arith.constant 0 : index
    %4 = vector.load %arg3[%c0_2, %c0_3] : memref<128x64xbf16, #tpu.memory_space<vmem>>, vector<128x64xbf16>
    %c0_4 = arith.constant 0 : index
    %c0_5 = arith.constant 0 : index
    %5 = vector.load %arg4[%c0_4, %c0_5] : memref<64x16xbf16, #tpu.memory_space<vmem>>, vector<64x16xbf16>
    %cst = arith.constant dense<0.000000e+00> : vector<128x16xf32>
    %6 = tpu.matmul %4, %5, %cst {dimension_numbers = #tpu.dot_dimension_numbers<[1], [0], [0], [1], [0, 0, 1, 1], [], []>} : vector<128x64xbf16>, vector<64x16xbf16>, vector<128x16xf32> -> vector<128x16xf32>
    %7 = arith.addf %3, %6 : vector<128x16xf32>
    %c0_6 = arith.constant 0 : index
    %c0_7 = arith.constant 0 : index
    %8 = vector.load %arg10[%c0_6, %c0_7] : memref<128x16xf32, #tpu.memory_space<vmem>>, vector<128x16xf32>
    tpu.vector_store %arg10[%c0_6, %c0_7], %7 {strides = array<i32>} : memref<128x16xf32, #tpu.memory_space<vmem>>, vector<128x16xf32>,
    %c0_i32_8 = arith.constant 0 : i32
    %9 = arith.cmpi eq, %arg2, %c0_i32_8 : i32
    %10 = arith.extui %9 : i1 to i32
    %c0_i32_9 = arith.constant 0 : i32
    %11 = arith.cmpi ne, %10, %c0_i32_9 : i32
    scf.if %11 {
      %c0_10 = arith.constant 0 : index
      %c0_11 = arith.constant 0 : index
      %12 = vector.load %arg10[%c0_10, %c0_11] : memref<128x16xf32, #tpu.memory_space<vmem>>, vector<128x16xf32>
      %c0_12 = arith.constant 0 : index
      %c0_13 = arith.constant 0 : index
      %13 = vector.load %arg5[%c0_12, %c0_13] : memref<1x16xf32, #tpu.memory_space<vmem>>, vector<1x16xf32>
      %14 = vector.broadcast %13 : vector<1x16xf32> to vector<128x16xf32>
      %15 = arith.addf %12, %14 : vector<128x16xf32>
      %cst_14 = arith.constant dense<0.000000e+00> : vector<128xf32>
      %16 = vector.multi_reduction <add>, %15, %cst_14 [1] : vector<128x16xf32> to vector<128xf32>
      %17 = vector.shape_cast %16 : vector<128xf32> to vector<128x1xf32>
      %cst_15 = arith.constant 1.600000e+01 : f32
      %18 = vector.broadcast %cst_15 : f32 to vector<128x1xf32>
      %19 = arith.divf %17, %18 : vector<128x1xf32>
      %20 = vector.broadcast %19 : vector<128x1xf32> to vector<128x16xf32>
      %21 = arith.subf %15, %20 : vector<128x16xf32>
      %22 = arith.mulf %21, %21 : vector<128x16xf32>
      %cst_16 = arith.constant dense<0.000000e+00> : vector<128xf32>
      %23 = vector.multi_reduction <add>, %22, %cst_16 [1] : vector<128x16xf32> to vector<128xf32>
      %24 = vector.shape_cast %23 : vector<128xf32> to vector<128x1xf32>
      %cst_17 = arith.constant 1.600000e+01 : f32
      %25 = vector.broadcast %cst_17 : f32 to vector<128x1xf32>
      %26 = arith.divf %24, %25 : vector<128x1xf32>
      %27 = vector.broadcast %19 : vector<128x1xf32> to vector<128x16xf32>
      %28 = arith.subf %15, %27 : vector<128x16xf32>
      %cst_18 = arith.constant 9.99999974E-6 : f32
      %29 = vector.broadcast %cst_18 : f32 to vector<128x1xf32>
      %30 = arith.addf %26, %29 : vector<128x1xf32>
      %31 = math.rsqrt %30 : vector<128x1xf32>
      %32 = vector.broadcast %31 : vector<128x1xf32> to vector<128x16xf32>
      %33 = arith.mulf %28, %32 : vector<128x16xf32>
      %c0_19 = arith.constant 0 : index
      %c0_20 = arith.constant 0 : index
      %34 = vector.load %arg6[%c0_19, %c0_20] : memref<1x16xf32, #tpu.memory_space<vmem>>, vector<1x16xf32>
      %35 = vector.broadcast %34 : vector<1x16xf32> to vector<128x16xf32>
      %36 = arith.mulf %33, %35 : vector<128x16xf32>
      %c0_21 = arith.constant 0 : index
      %c0_22 = arith.constant 0 : index
      %37 = vector.load %arg7[%c0_21, %c0_22] : memref<1x16xf32, #tpu.memory_space<vmem>>, vector<1x16xf32>
      %38 = vector.broadcast %37 : vector<1x16xf32> to vector<128x16xf32>
      %39 = arith.addf %36, %38 : vector<128x16xf32>
      %c0_23 = arith.constant 0 : index
      %c0_24 = arith.constant 0 : index
      %40 = vector.load %arg8[%c0_23, %c0_24] : memref<128x16xbf16, #tpu.memory_space<vmem>>, vector<128x16xbf16>
      %41 = arith.extf %40 : vector<128x16xbf16> to vector<128x16xf32>
      %42 = arith.addf %39, %41 : vector<128x16xf32>
      %43 = arith.truncf %42 : vector<128x16xf32> to vector<128x16xbf16>
      %c0_25 = arith.constant 0 : index
      %c0_26 = arith.constant 0 : index
      %44 = vector.load %arg9[%c0_25, %c0_26] : memref<128x16xbf16, #tpu.memory_space<vmem>>, vector<128x16xbf16>
      tpu.vector_store %arg9[%c0_25, %c0_26], %43 {strides = array<i32>} : memref<128x16xbf16, #tpu.memory_space<vmem>>, vector<128x16xbf16>,
    } else {
    }
    return
  }
  func.func @transform_0(%arg0: i32, %arg1: i32, %arg2: i32) -> (i32, i32) {
    %c0_i32 = arith.constant 0 : i32
    return %arg0, %arg2 : i32, i32
  }
  func.func @transform_1(%arg0: i32, %arg1: i32, %arg2: i32) -> (i32, i32) {
    %c0_i32 = arith.constant 0 : i32
    return %arg2, %arg1 : i32, i32
  }
  func.func @transform_2(%arg0: i32, %arg1: i32, %arg2: i32) -> (i32, i32) {
    %c0_i32 = arith.constant 0 : i32
    %c0_i32_0 = arith.constant 0 : i32
    return %c0_i32, %arg1 : i32, i32
  }
  func.func @transform_3(%arg0: i32, %arg1: i32, %arg2: i32) -> (i32, i32) {
    %c0_i32 = arith.constant 0 : i32
    %c0_i32_0 = arith.constant 0 : i32
    return %c0_i32, %arg1 : i32, i32
  }
  func.func @transform_4(%arg0: i32, %arg1: i32, %arg2: i32) -> (i32, i32) {
    %c0_i32 = arith.constant 0 : i32
    %c0_i32_0 = arith.constant 0 : i32
    return %c0_i32, %arg1 : i32, i32
  }
  func.func @transform_5(%arg0: i32, %arg1: i32, %arg2: i32) -> (i32, i32) {
    %c0_i32 = arith.constant 0 : i32
    return %arg0, %arg1 : i32, i32
  }
  func.func @transform_6(%arg0: i32, %arg1: i32, %arg2: i32) -> (i32, i32) {
    %c0_i32 = arith.constant 0 : i32
    return %arg0, %arg1 : i32, i32
  }
}

module attributes {stable_mosaic.version = 11 : i64} {
  func.func @_linear_kernel(%arg0: i32, %arg1: i32, %arg2: i32, %arg3: memref<32x64xbf16, #tpu.memory_space<vmem>>, %arg4: memref<64x32xbf16, #tpu.memory_space<vmem>>, %arg5: memref<1x32xf32, #tpu.memory_space<vmem>>, %arg6: memref<32x32xbf16, #tpu.memory_space<vmem>>, %arg7: memref<32x32xf32, #tpu.memory_space<vmem>>) attributes {dimension_semantics = [#tpu.dimension_semantics<parallel>, #tpu.dimension_semantics<parallel>, #tpu.dimension_semantics<arbitrary>], iteration_bounds = array<i64: 1, 1, 1>, scalar_prefetch = 0 : i64, scratch_operands = 1 : i64, tpu.core_type = #tpu.core_type<tc>, window_params = [{transform_indices = @transform_0, window_bounds = array<i64: 32, 64>}, {transform_indices = @transform_1, window_bounds = array<i64: 64, 32>}, {transform_indices = @transform_2, window_bounds = array<i64: 1, 32>}, {transform_indices = @transform_3, window_bounds = array<i64: 32, 32>}]} {
    %c0_i32 = arith.constant 0 : i32
    %0 = arith.cmpi eq, %arg2, %c0_i32 : i32
    %1 = arith.extui %0 : i1 to i32
    %c0_i32_0 = arith.constant 0 : i32
    %2 = arith.cmpi ne, %1, %c0_i32_0 : i32
    scf.if %2 {
      %cst_10 = arith.constant 0.000000e+00 : f32
      %12 = vector.broadcast %cst_10 : f32 to vector<32x32xf32>
      %c0_11 = arith.constant 0 : index
      %c0_12 = arith.constant 0 : index
      %13 = vector.load %arg7[%c0_11, %c0_12] : memref<32x32xf32, #tpu.memory_space<vmem>>, vector<32x32xf32>
      tpu.vector_store %arg7[%c0_11, %c0_12], %12 {strides = array<i32>} : memref<32x32xf32, #tpu.memory_space<vmem>>, vector<32x32xf32>,
    } else {
    }
    %c0 = arith.constant 0 : index
    %c0_1 = arith.constant 0 : index
    %3 = vector.load %arg7[%c0, %c0_1] : memref<32x32xf32, #tpu.memory_space<vmem>>, vector<32x32xf32>
    %c0_2 = arith.constant 0 : index
    %c0_3 = arith.constant 0 : index
    %4 = vector.load %arg3[%c0_2, %c0_3] : memref<32x64xbf16, #tpu.memory_space<vmem>>, vector<32x64xbf16>
    %c0_4 = arith.constant 0 : index
    %c0_5 = arith.constant 0 : index
    %5 = vector.load %arg4[%c0_4, %c0_5] : memref<64x32xbf16, #tpu.memory_space<vmem>>, vector<64x32xbf16>
    %cst = arith.constant dense<0.000000e+00> : vector<32x32xf32>
    %6 = tpu.matmul %4, %5, %cst {dimension_numbers = #tpu.dot_dimension_numbers<[1], [0], [0], [1], [0, 0, 1, 1], [], []>} : vector<32x64xbf16>, vector<64x32xbf16>, vector<32x32xf32> -> vector<32x32xf32>
    %7 = arith.addf %3, %6 : vector<32x32xf32>
    %c0_6 = arith.constant 0 : index
    %c0_7 = arith.constant 0 : index
    %8 = vector.load %arg7[%c0_6, %c0_7] : memref<32x32xf32, #tpu.memory_space<vmem>>, vector<32x32xf32>
    tpu.vector_store %arg7[%c0_6, %c0_7], %7 {strides = array<i32>} : memref<32x32xf32, #tpu.memory_space<vmem>>, vector<32x32xf32>,
    %c0_i32_8 = arith.constant 0 : i32
    %9 = arith.cmpi eq, %arg2, %c0_i32_8 : i32
    %10 = arith.extui %9 : i1 to i32
    %c0_i32_9 = arith.constant 0 : i32
    %11 = arith.cmpi ne, %10, %c0_i32_9 : i32
    scf.if %11 {
      %c0_10 = arith.constant 0 : index
      %c0_11 = arith.constant 0 : index
      %12 = vector.load %arg7[%c0_10, %c0_11] : memref<32x32xf32, #tpu.memory_space<vmem>>, vector<32x32xf32>
      %c0_12 = arith.constant 0 : index
      %c0_13 = arith.constant 0 : index
      %13 = vector.load %arg5[%c0_12, %c0_13] : memref<1x32xf32, #tpu.memory_space<vmem>>, vector<1x32xf32>
      %14 = vector.broadcast %13 : vector<1x32xf32> to vector<32x32xf32>
      %15 = arith.addf %12, %14 : vector<32x32xf32>
      %16 = arith.truncf %15 : vector<32x32xf32> to vector<32x32xbf16>
      %c0_14 = arith.constant 0 : index
      %c0_15 = arith.constant 0 : index
      %17 = vector.load %arg6[%c0_14, %c0_15] : memref<32x32xbf16, #tpu.memory_space<vmem>>, vector<32x32xbf16>
      tpu.vector_store %arg6[%c0_14, %c0_15], %16 {strides = array<i32>} : memref<32x32xbf16, #tpu.memory_space<vmem>>, vector<32x32xbf16>,
    } else {
    }
    return
  }
  func.func @transform_0(%arg0: i32, %arg1: i32, %arg2: i32) -> (i32, i32) {
    %c0_i32 = arith.constant 0 : i32
    return %arg0, %arg2 : i32, i32
  }
  func.func @transform_1(%arg0: i32, %arg1: i32, %arg2: i32) -> (i32, i32) {
    %c0_i32 = arith.constant 0 : i32
    return %arg2, %arg1 : i32, i32
  }
  func.func @transform_2(%arg0: i32, %arg1: i32, %arg2: i32) -> (i32, i32) {
    %c0_i32 = arith.constant 0 : i32
    %c0_i32_0 = arith.constant 0 : i32
    return %c0_i32, %arg1 : i32, i32
  }
  func.func @transform_3(%arg0: i32, %arg1: i32, %arg2: i32) -> (i32, i32) {
    %c0_i32 = arith.constant 0 : i32
    return %arg0, %arg1 : i32, i32
  }
}

module attributes {stable_mosaic.version = 11 : i64} {
  func.func @_linear_kernel(%arg0: i32, %arg1: i32, %arg2: i32, %arg3: memref<32x32xbf16, #tpu.memory_space<vmem>>, %arg4: memref<32x96xbf16, #tpu.memory_space<vmem>>, %arg5: memref<1x96xf32, #tpu.memory_space<vmem>>, %arg6: memref<32x96xbf16, #tpu.memory_space<vmem>>, %arg7: memref<32x96xf32, #tpu.memory_space<vmem>>) attributes {dimension_semantics = [#tpu.dimension_semantics<parallel>, #tpu.dimension_semantics<parallel>, #tpu.dimension_semantics<arbitrary>], iteration_bounds = array<i64: 1, 1, 1>, scalar_prefetch = 0 : i64, scratch_operands = 1 : i64, tpu.core_type = #tpu.core_type<tc>, window_params = [{transform_indices = @transform_0, window_bounds = array<i64: 32, 32>}, {transform_indices = @transform_1, window_bounds = array<i64: 32, 96>}, {transform_indices = @transform_2, window_bounds = array<i64: 1, 96>}, {transform_indices = @transform_3, window_bounds = array<i64: 32, 96>}]} {
    %c0_i32 = arith.constant 0 : i32
    %0 = arith.cmpi eq, %arg2, %c0_i32 : i32
    %1 = arith.extui %0 : i1 to i32
    %c0_i32_0 = arith.constant 0 : i32
    %2 = arith.cmpi ne, %1, %c0_i32_0 : i32
    scf.if %2 {
      %cst_10 = arith.constant 0.000000e+00 : f32
      %12 = vector.broadcast %cst_10 : f32 to vector<32x96xf32>
      %c0_11 = arith.constant 0 : index
      %c0_12 = arith.constant 0 : index
      %13 = vector.load %arg7[%c0_11, %c0_12] : memref<32x96xf32, #tpu.memory_space<vmem>>, vector<32x96xf32>
      tpu.vector_store %arg7[%c0_11, %c0_12], %12 {strides = array<i32>} : memref<32x96xf32, #tpu.memory_space<vmem>>, vector<32x96xf32>,
    } else {
    }
    %c0 = arith.constant 0 : index
    %c0_1 = arith.constant 0 : index
    %3 = vector.load %arg7[%c0, %c0_1] : memref<32x96xf32, #tpu.memory_space<vmem>>, vector<32x96xf32>
    %c0_2 = arith.constant 0 : index
    %c0_3 = arith.constant 0 : index
    %4 = vector.load %arg3[%c0_2, %c0_3] : memref<32x32xbf16, #tpu.memory_space<vmem>>, vector<32x32xbf16>
    %c0_4 = arith.constant 0 : index
    %c0_5 = arith.constant 0 : index
    %5 = vector.load %arg4[%c0_4, %c0_5] : memref<32x96xbf16, #tpu.memory_space<vmem>>, vector<32x96xbf16>
    %cst = arith.constant dense<0.000000e+00> : vector<32x96xf32>
    %6 = tpu.matmul %4, %5, %cst {dimension_numbers = #tpu.dot_dimension_numbers<[1], [0], [0], [1], [0, 0, 1, 1], [], []>} : vector<32x32xbf16>, vector<32x96xbf16>, vector<32x96xf32> -> vector<32x96xf32>
    %7 = arith.addf %3, %6 : vector<32x96xf32>
    %c0_6 = arith.constant 0 : index
    %c0_7 = arith.constant 0 : index
    %8 = vector.load %arg7[%c0_6, %c0_7] : memref<32x96xf32, #tpu.memory_space<vmem>>, vector<32x96xf32>
    tpu.vector_store %arg7[%c0_6, %c0_7], %7 {strides = array<i32>} : memref<32x96xf32, #tpu.memory_space<vmem>>, vector<32x96xf32>,
    %c0_i32_8 = arith.constant 0 : i32
    %9 = arith.cmpi eq, %arg2, %c0_i32_8 : i32
    %10 = arith.extui %9 : i1 to i32
    %c0_i32_9 = arith.constant 0 : i32
    %11 = arith.cmpi ne, %10, %c0_i32_9 : i32
    scf.if %11 {
      %c0_10 = arith.constant 0 : index
      %c0_11 = arith.constant 0 : index
      %12 = vector.load %arg7[%c0_10, %c0_11] : memref<32x96xf32, #tpu.memory_space<vmem>>, vector<32x96xf32>
      %c0_12 = arith.constant 0 : index
      %c0_13 = arith.constant 0 : index
      %13 = vector.load %arg5[%c0_12, %c0_13] : memref<1x96xf32, #tpu.memory_space<vmem>>, vector<1x96xf32>
      %14 = vector.broadcast %13 : vector<1x96xf32> to vector<32x96xf32>
      %15 = arith.addf %12, %14 : vector<32x96xf32>
      %16 = arith.truncf %15 : vector<32x96xf32> to vector<32x96xbf16>
      %c0_14 = arith.constant 0 : index
      %c0_15 = arith.constant 0 : index
      %17 = vector.load %arg6[%c0_14, %c0_15] : memref<32x96xbf16, #tpu.memory_space<vmem>>, vector<32x96xbf16>
      tpu.vector_store %arg6[%c0_14, %c0_15], %16 {strides = array<i32>} : memref<32x96xbf16, #tpu.memory_space<vmem>>, vector<32x96xbf16>,
    } else {
    }
    return
  }
  func.func @transform_0(%arg0: i32, %arg1: i32, %arg2: i32) -> (i32, i32) {
    %c0_i32 = arith.constant 0 : i32
    return %arg0, %arg2 : i32, i32
  }
  func.func @transform_1(%arg0: i32, %arg1: i32, %arg2: i32) -> (i32, i32) {
    %c0_i32 = arith.constant 0 : i32
    return %arg2, %arg1 : i32, i32
  }
  func.func @transform_2(%arg0: i32, %arg1: i32, %arg2: i32) -> (i32, i32) {
    %c0_i32 = arith.constant 0 : i32
    %c0_i32_0 = arith.constant 0 : i32
    return %c0_i32, %arg1 : i32, i32
  }
  func.func @transform_3(%arg0: i32, %arg1: i32, %arg2: i32) -> (i32, i32) {
    %c0_i32 = arith.constant 0 : i32
    return %arg0, %arg1 : i32, i32
  }
}

module attributes {stable_mosaic.version = 11 : i64} {
  func.func @_linear_kernel(%arg0: i32, %arg1: i32, %arg2: i32, %arg3: memref<32x32xbf16, #tpu.memory_space<vmem>>, %arg4: memref<32x32xbf16, #tpu.memory_space<vmem>>, %arg5: memref<1x32xf32, #tpu.memory_space<vmem>>, %arg6: memref<1x32xf32, #tpu.memory_space<vmem>>, %arg7: memref<1x32xf32, #tpu.memory_space<vmem>>, %arg8: memref<32x32xbf16, #tpu.memory_space<vmem>>, %arg9: memref<32x32xbf16, #tpu.memory_space<vmem>>, %arg10: memref<32x32xf32, #tpu.memory_space<vmem>>) attributes {dimension_semantics = [#tpu.dimension_semantics<parallel>, #tpu.dimension_semantics<parallel>, #tpu.dimension_semantics<arbitrary>], iteration_bounds = array<i64: 1, 1, 1>, scalar_prefetch = 0 : i64, scratch_operands = 1 : i64, tpu.core_type = #tpu.core_type<tc>, window_params = [{transform_indices = @transform_0, window_bounds = array<i64: 32, 32>}, {transform_indices = @transform_1, window_bounds = array<i64: 32, 32>}, {transform_indices = @transform_2, window_bounds = array<i64: 1, 32>}, {transform_indices = @transform_3, window_bounds = array<i64: 1, 32>}, {transform_indices = @transform_4, window_bounds = array<i64: 1, 32>}, {transform_indices = @transform_5, window_bounds = array<i64: 32, 32>}, {transform_indices = @transform_6, window_bounds = array<i64: 32, 32>}]} {
    %c0_i32 = arith.constant 0 : i32
    %0 = arith.cmpi eq, %arg2, %c0_i32 : i32
    %1 = arith.extui %0 : i1 to i32
    %c0_i32_0 = arith.constant 0 : i32
    %2 = arith.cmpi ne, %1, %c0_i32_0 : i32
    scf.if %2 {
      %cst_10 = arith.constant 0.000000e+00 : f32
      %12 = vector.broadcast %cst_10 : f32 to vector<32x32xf32>
      %c0_11 = arith.constant 0 : index
      %c0_12 = arith.constant 0 : index
      %13 = vector.load %arg10[%c0_11, %c0_12] : memref<32x32xf32, #tpu.memory_space<vmem>>, vector<32x32xf32>
      tpu.vector_store %arg10[%c0_11, %c0_12], %12 {strides = array<i32>} : memref<32x32xf32, #tpu.memory_space<vmem>>, vector<32x32xf32>,
    } else {
    }
    %c0 = arith.constant 0 : index
    %c0_1 = arith.constant 0 : index
    %3 = vector.load %arg10[%c0, %c0_1] : memref<32x32xf32, #tpu.memory_space<vmem>>, vector<32x32xf32>
    %c0_2 = arith.constant 0 : index
    %c0_3 = arith.constant 0 : index
    %4 = vector.load %arg3[%c0_2, %c0_3] : memref<32x32xbf16, #tpu.memory_space<vmem>>, vector<32x32xbf16>
    %c0_4 = arith.constant 0 : index
    %c0_5 = arith.constant 0 : index
    %5 = vector.load %arg4[%c0_4, %c0_5] : memref<32x32xbf16, #tpu.memory_space<vmem>>, vector<32x32xbf16>
    %cst = arith.constant dense<0.000000e+00> : vector<32x32xf32>
    %6 = tpu.matmul %4, %5, %cst {dimension_numbers = #tpu.dot_dimension_numbers<[1], [0], [0], [1], [0, 0, 1, 1], [], []>} : vector<32x32xbf16>, vector<32x32xbf16>, vector<32x32xf32> -> vector<32x32xf32>
    %7 = arith.addf %3, %6 : vector<32x32xf32>
    %c0_6 = arith.constant 0 : index
    %c0_7 = arith.constant 0 : index
    %8 = vector.load %arg10[%c0_6, %c0_7] : memref<32x32xf32, #tpu.memory_space<vmem>>, vector<32x32xf32>
    tpu.vector_store %arg10[%c0_6, %c0_7], %7 {strides = array<i32>} : memref<32x32xf32, #tpu.memory_space<vmem>>, vector<32x32xf32>,
    %c0_i32_8 = arith.constant 0 : i32
    %9 = arith.cmpi eq, %arg2, %c0_i32_8 : i32
    %10 = arith.extui %9 : i1 to i32
    %c0_i32_9 = arith.constant 0 : i32
    %11 = arith.cmpi ne, %10, %c0_i32_9 : i32
    scf.if %11 {
      %c0_10 = arith.constant 0 : index
      %c0_11 = arith.constant 0 : index
      %12 = vector.load %arg10[%c0_10, %c0_11] : memref<32x32xf32, #tpu.memory_space<vmem>>, vector<32x32xf32>
      %c0_12 = arith.constant 0 : index
      %c0_13 = arith.constant 0 : index
      %13 = vector.load %arg5[%c0_12, %c0_13] : memref<1x32xf32, #tpu.memory_space<vmem>>, vector<1x32xf32>
      %14 = vector.broadcast %13 : vector<1x32xf32> to vector<32x32xf32>
      %15 = arith.addf %12, %14 : vector<32x32xf32>
      %cst_14 = arith.constant dense<0.000000e+00> : vector<32xf32>
      %16 = vector.multi_reduction <add>, %15, %cst_14 [1] : vector<32x32xf32> to vector<32xf32>
      %17 = vector.shape_cast %16 : vector<32xf32> to vector<32x1xf32>
      %cst_15 = arith.constant 3.200000e+01 : f32
      %18 = vector.broadcast %cst_15 : f32 to vector<32x1xf32>
      %19 = arith.divf %17, %18 : vector<32x1xf32>
      %20 = vector.broadcast %19 : vector<32x1xf32> to vector<32x32xf32>
      %21 = arith.subf %15, %20 : vector<32x32xf32>
      %22 = arith.mulf %21, %21 : vector<32x32xf32>
      %cst_16 = arith.constant dense<0.000000e+00> : vector<32xf32>
      %23 = vector.multi_reduction <add>, %22, %cst_16 [1] : vector<32x32xf32> to vector<32xf32>
      %24 = vector.shape_cast %23 : vector<32xf32> to vector<32x1xf32>
      %cst_17 = arith.constant 3.200000e+01 : f32
      %25 = vector.broadcast %cst_17 : f32 to vector<32x1xf32>
      %26 = arith.divf %24, %25 : vector<32x1xf32>
      %27 = vector.broadcast %19 : vector<32x1xf32> to vector<32x32xf32>
      %28 = arith.subf %15, %27 : vector<32x32xf32>
      %cst_18 = arith.constant 9.99999974E-6 : f32
      %29 = vector.broadcast %cst_18 : f32 to vector<32x1xf32>
      %30 = arith.addf %26, %29 : vector<32x1xf32>
      %31 = math.rsqrt %30 : vector<32x1xf32>
      %32 = vector.broadcast %31 : vector<32x1xf32> to vector<32x32xf32>
      %33 = arith.mulf %28, %32 : vector<32x32xf32>
      %c0_19 = arith.constant 0 : index
      %c0_20 = arith.constant 0 : index
      %34 = vector.load %arg6[%c0_19, %c0_20] : memref<1x32xf32, #tpu.memory_space<vmem>>, vector<1x32xf32>
      %35 = vector.broadcast %34 : vector<1x32xf32> to vector<32x32xf32>
      %36 = arith.mulf %33, %35 : vector<32x32xf32>
      %c0_21 = arith.constant 0 : index
      %c0_22 = arith.constant 0 : index
      %37 = vector.load %arg7[%c0_21, %c0_22] : memref<1x32xf32, #tpu.memory_space<vmem>>, vector<1x32xf32>
      %38 = vector.broadcast %37 : vector<1x32xf32> to vector<32x32xf32>
      %39 = arith.addf %36, %38 : vector<32x32xf32>
      %c0_23 = arith.constant 0 : index
      %c0_24 = arith.constant 0 : index
      %40 = vector.load %arg8[%c0_23, %c0_24] : memref<32x32xbf16, #tpu.memory_space<vmem>>, vector<32x32xbf16>
      %41 = arith.extf %40 : vector<32x32xbf16> to vector<32x32xf32>
      %42 = arith.addf %39, %41 : vector<32x32xf32>
      %43 = arith.truncf %42 : vector<32x32xf32> to vector<32x32xbf16>
      %c0_25 = arith.constant 0 : index
      %c0_26 = arith.constant 0 : index
      %44 = vector.load %arg9[%c0_25, %c0_26] : memref<32x32xbf16, #tpu.memory_space<vmem>>, vector<32x32xbf16>
      tpu.vector_store %arg9[%c0_25, %c0_26], %43 {strides = array<i32>} : memref<32x32xbf16, #tpu.memory_space<vmem>>, vector<32x32xbf16>,
    } else {
    }
    return
  }
  func.func @transform_0(%arg0: i32, %arg1: i32, %arg2: i32) -> (i32, i32) {
    %c0_i32 = arith.constant 0 : i32
    return %arg0, %arg2 : i32, i32
  }
  func.func @transform_1(%arg0: i32, %arg1: i32, %arg2: i32) -> (i32, i32) {
    %c0_i32 = arith.constant 0 : i32
    return %arg2, %arg1 : i32, i32
  }
  func.func @transform_2(%arg0: i32, %arg1: i32, %arg2: i32) -> (i32, i32) {
    %c0_i32 = arith.constant 0 : i32
    %c0_i32_0 = arith.constant 0 : i32
    return %c0_i32, %arg1 : i32, i32
  }
  func.func @transform_3(%arg0: i32, %arg1: i32, %arg2: i32) -> (i32, i32) {
    %c0_i32 = arith.constant 0 : i32
    %c0_i32_0 = arith.constant 0 : i32
    return %c0_i32, %arg1 : i32, i32
  }
  func.func @transform_4(%arg0: i32, %arg1: i32, %arg2: i32) -> (i32, i32) {
    %c0_i32 = arith.constant 0 : i32
    %c0_i32_0 = arith.constant 0 : i32
    return %c0_i32, %arg1 : i32, i32
  }
  func.func @transform_5(%arg0: i32, %arg1: i32, %arg2: i32) -> (i32, i32) {
    %c0_i32 = arith.constant 0 : i32
    return %arg0, %arg1 : i32, i32
  }
  func.func @transform_6(%arg0: i32, %arg1: i32, %arg2: i32) -> (i32, i32) {
    %c0_i32 = arith.constant 0 : i32
    return %arg0, %arg1 : i32, i32
  }
}

module attributes {stable_mosaic.version = 11 : i64} {
  func.func @_window_attn_kernel(%arg0: i32, %arg1: memref<2x16x96xbf16, #tpu.memory_space<vmem>>, %arg2: memref<4x16x16xf32, #tpu.memory_space<vmem>>, %arg3: memref<2x16x16xf32, #tpu.memory_space<vmem>>, %arg4: memref<4xf32, #tpu.memory_space<smem>>, %arg5: memref<2x16x32xbf16, #tpu.memory_space<vmem>>) attributes {dimension_semantics = [#tpu.dimension_semantics<parallel>], iteration_bounds = array<i64: 1>, scalar_prefetch = 0 : i64, scratch_operands = 0 : i64, tpu.core_type = #tpu.core_type<tc>, window_params = [{transform_indices = @transform_0, window_bounds = array<i64: 2, 16, 96>}, {pipeline_mode = #tpu.pipeline_mode<synchronous>, transform_indices = @transform_1, window_bounds = array<i64: 4, 16, 16>}, {pipeline_mode = #tpu.pipeline_mode<synchronous>, transform_indices = @transform_2, window_bounds = array<i64: 2, 16, 16>}, {transform_indices = @transform_3, window_bounds = array<i64: 4>}, {transform_indices = @transform_4, window_bounds = array<i64: 2, 16, 32>}]} {
    %c0 = arith.constant 0 : index
    %c0_0 = arith.constant 0 : index
    %c0_1 = arith.constant 0 : index
    %0 = vector.load %arg1[%c0, %c0_0, %c0_1] : memref<2x16x96xbf16, #tpu.memory_space<vmem>>, vector<2x16x96xbf16>
    %c0_2 = arith.constant 0 : index
    %c0_3 = arith.constant 0 : index
    %c0_4 = arith.constant 0 : index
    %1 = vector.load %arg3[%c0_2, %c0_3, %c0_4] : memref<2x16x16xf32, #tpu.memory_space<vmem>>, vector<2x16x16xf32>
    %2 = vector.extract_strided_slice %0 {offsets = [0, 0, 0], sizes = [2, 16, 8], strides = [1, 1, 1]} : vector<2x16x96xbf16> to vector<2x16x8xbf16>
    %3 = arith.extf %2 : vector<2x16x8xbf16> to vector<2x16x8xf32>
    %4 = vector.extract_strided_slice %0 {offsets = [0, 0, 32], sizes = [2, 16, 8], strides = [1, 1, 1]} : vector<2x16x96xbf16> to vector<2x16x8xbf16>
    %5 = arith.extf %4 : vector<2x16x8xbf16> to vector<2x16x8xf32>
    %6 = vector.extract_strided_slice %0 {offsets = [0, 0, 64], sizes = [2, 16, 8], strides = [1, 1, 1]} : vector<2x16x96xbf16> to vector<2x16x8xbf16>
    %7 = arith.mulf %3, %3 : vector<2x16x8xf32>
    %cst = arith.constant dense<0.000000e+00> : vector<2x16xf32>
    %8 = vector.multi_reduction <add>, %7, %cst [2] : vector<2x16x8xf32> to vector<2x16xf32>
    %9 = vector.shape_cast %8 : vector<2x16xf32> to vector<2x16x1xf32>
    %cst_5 = arith.constant 9.99999996E-13 : f32
    %10 = vector.broadcast %cst_5 : f32 to vector<2x16x1xf32>
    %11 = arith.maximumf %9, %10 : vector<2x16x1xf32>
    %12 = math.rsqrt %11 : vector<2x16x1xf32>
    %13 = vector.broadcast %12 : vector<2x16x1xf32> to vector<2x16x8xf32>
    %14 = arith.mulf %3, %13 : vector<2x16x8xf32>
    %15 = arith.mulf %5, %5 : vector<2x16x8xf32>
    %cst_6 = arith.constant dense<0.000000e+00> : vector<2x16xf32>
    %16 = vector.multi_reduction <add>, %15, %cst_6 [2] : vector<2x16x8xf32> to vector<2x16xf32>
    %17 = vector.shape_cast %16 : vector<2x16xf32> to vector<2x16x1xf32>
    %cst_7 = arith.constant 9.99999996E-13 : f32
    %18 = vector.broadcast %cst_7 : f32 to vector<2x16x1xf32>
    %19 = arith.maximumf %17, %18 : vector<2x16x1xf32>
    %20 = math.rsqrt %19 : vector<2x16x1xf32>
    %21 = vector.broadcast %20 : vector<2x16x1xf32> to vector<2x16x8xf32>
    %22 = arith.mulf %5, %21 : vector<2x16x8xf32>
    %c0_8 = arith.constant 0 : index
    %23 = memref.load %arg4[%c0_8] : memref<4xf32, #tpu.memory_space<smem>>
    %cst_9 = arith.constant 0.00999999977 : f32
    %24 = arith.maximumf %23, %cst_9 : f32
    %cst_10 = arith.constant 1.000000e+00 : f32
    %25 = arith.divf %cst_10, %24 : f32
    %26 = vector.broadcast %25 : f32 to vector<2x16x8xf32>
    %27 = arith.mulf %14, %26 : vector<2x16x8xf32>
    %28 = arith.truncf %27 : vector<2x16x8xf32> to vector<2x16x8xbf16>
    %29 = arith.truncf %22 : vector<2x16x8xf32> to vector<2x16x8xbf16>
    "tpu.trace_start"() <{level = 10 : i32, message = "wtd,wsd->wts"}> : () -> ()
    %cst_11 = arith.constant dense<0.000000e+00> : vector<2x16x16xf32>
    %30 = tpu.matmul %28, %29, %cst_11 {dimension_numbers = #tpu.dot_dimension_numbers<[2], [2], [1], [1], [0, 0, 0, 1, 1, 1], [0], [0]>} : vector<2x16x8xbf16>, vector<2x16x8xbf16>, vector<2x16x16xf32> -> vector<2x16x16xf32>
    "tpu.trace_stop"() : () -> ()
    %c0_12 = arith.constant 0 : index
    %c0_13 = arith.constant 0 : index
    %c0_14 = arith.constant 0 : index
    %31 = vector.load %arg2[%c0_12, %c0_13, %c0_14] : memref<4x16x16xf32, #tpu.memory_space<vmem>>, vector<1x16x16xf32>
    %32 = vector.shape_cast %31 : vector<1x16x16xf32> to vector<16x16xf32>
    %33 = vector.shape_cast %32 : vector<16x16xf32> to vector<1x16x16xf32>
    %34 = vector.broadcast %33 : vector<1x16x16xf32> to vector<2x16x16xf32>
    %35 = arith.addf %30, %34 : vector<2x16x16xf32>
    %36 = arith.addf %35, %1 : vector<2x16x16xf32>
    %cst_15 = arith.constant dense<0xFF800000> : vector<2x16xf32>
    %37 = vector.multi_reduction <maximumf>, %36, %cst_15 [2] : vector<2x16x16xf32> to vector<2x16xf32>
    %38 = vector.shape_cast %37 : vector<2x16xf32> to vector<2x16x1xf32>
    %39 = vector.broadcast %38 : vector<2x16x1xf32> to vector<2x16x16xf32>
    %40 = arith.subf %36, %39 : vector<2x16x16xf32>
    %41 = math.exp %40 : vector<2x16x16xf32>
    %cst_16 = arith.constant dense<0.000000e+00> : vector<2x16xf32>
    %42 = vector.multi_reduction <add>, %41, %cst_16 [2] : vector<2x16x16xf32> to vector<2x16xf32>
    %43 = vector.shape_cast %42 : vector<2x16xf32> to vector<2x16x1xf32>
    %44 = tpu.reciprocal %43 {approx = true} : vector<2x16x1xf32> -> vector<2x16x1xf32>
    %45 = vector.broadcast %44 : vector<2x16x1xf32> to vector<2x16x16xf32>
    %46 = arith.mulf %41, %45 : vector<2x16x16xf32>
    %47 = arith.truncf %46 : vector<2x16x16xf32> to vector<2x16x16xbf16>
    "tpu.trace_start"() <{level = 10 : i32, message = "wts,wsd->wtd"}> : () -> ()
    %cst_17 = arith.constant dense<0.000000e+00> : vector<2x16x8xf32>
    %48 = tpu.matmul %47, %6, %cst_17 {dimension_numbers = #tpu.dot_dimension_numbers<[2], [1], [1], [2], [0, 0, 0, 1, 1, 2], [0], [0]>} : vector<2x16x16xbf16>, vector<2x16x8xbf16>, vector<2x16x8xf32> -> vector<2x16x8xf32>
    "tpu.trace_stop"() : () -> ()
    %49 = vector.extract_strided_slice %0 {offsets = [0, 0, 8], sizes = [2, 16, 8], strides = [1, 1, 1]} : vector<2x16x96xbf16> to vector<2x16x8xbf16>
    %50 = arith.extf %49 : vector<2x16x8xbf16> to vector<2x16x8xf32>
    %51 = vector.extract_strided_slice %0 {offsets = [0, 0, 40], sizes = [2, 16, 8], strides = [1, 1, 1]} : vector<2x16x96xbf16> to vector<2x16x8xbf16>
    %52 = arith.extf %51 : vector<2x16x8xbf16> to vector<2x16x8xf32>
    %53 = vector.extract_strided_slice %0 {offsets = [0, 0, 72], sizes = [2, 16, 8], strides = [1, 1, 1]} : vector<2x16x96xbf16> to vector<2x16x8xbf16>
    %54 = arith.mulf %50, %50 : vector<2x16x8xf32>
    %cst_18 = arith.constant dense<0.000000e+00> : vector<2x16xf32>
    %55 = vector.multi_reduction <add>, %54, %cst_18 [2] : vector<2x16x8xf32> to vector<2x16xf32>
    %56 = vector.shape_cast %55 : vector<2x16xf32> to vector<2x16x1xf32>
    %cst_19 = arith.constant 9.99999996E-13 : f32
    %57 = vector.broadcast %cst_19 : f32 to vector<2x16x1xf32>
    %58 = arith.maximumf %56, %57 : vector<2x16x1xf32>
    %59 = math.rsqrt %58 : vector<2x16x1xf32>
    %60 = vector.broadcast %59 : vector<2x16x1xf32> to vector<2x16x8xf32>
    %61 = arith.mulf %50, %60 : vector<2x16x8xf32>
    %62 = arith.mulf %52, %52 : vector<2x16x8xf32>
    %cst_20 = arith.constant dense<0.000000e+00> : vector<2x16xf32>
    %63 = vector.multi_reduction <add>, %62, %cst_20 [2] : vector<2x16x8xf32> to vector<2x16xf32>
    %64 = vector.shape_cast %63 : vector<2x16xf32> to vector<2x16x1xf32>
    %cst_21 = arith.constant 9.99999996E-13 : f32
    %65 = vector.broadcast %cst_21 : f32 to vector<2x16x1xf32>
    %66 = arith.maximumf %64, %65 : vector<2x16x1xf32>
    %67 = math.rsqrt %66 : vector<2x16x1xf32>
    %68 = vector.broadcast %67 : vector<2x16x1xf32> to vector<2x16x8xf32>
    %69 = arith.mulf %52, %68 : vector<2x16x8xf32>
    %c1 = arith.constant 1 : index
    %70 = memref.load %arg4[%c1] : memref<4xf32, #tpu.memory_space<smem>>
    %cst_22 = arith.constant 0.00999999977 : f32
    %71 = arith.maximumf %70, %cst_22 : f32
    %cst_23 = arith.constant 1.000000e+00 : f32
    %72 = arith.divf %cst_23, %71 : f32
    %73 = vector.broadcast %72 : f32 to vector<2x16x8xf32>
    %74 = arith.mulf %61, %73 : vector<2x16x8xf32>
    %75 = arith.truncf %74 : vector<2x16x8xf32> to vector<2x16x8xbf16>
    %76 = arith.truncf %69 : vector<2x16x8xf32> to vector<2x16x8xbf16>
    "tpu.trace_start"() <{level = 10 : i32, message = "wtd,wsd->wts"}> : () -> ()
    %cst_24 = arith.constant dense<0.000000e+00> : vector<2x16x16xf32>
    %77 = tpu.matmul %75, %76, %cst_24 {dimension_numbers = #tpu.dot_dimension_numbers<[2], [2], [1], [1], [0, 0, 0, 1, 1, 1], [0], [0]>} : vector<2x16x8xbf16>, vector<2x16x8xbf16>, vector<2x16x16xf32> -> vector<2x16x16xf32>
    "tpu.trace_stop"() : () -> ()
    %c1_25 = arith.constant 1 : index
    %c0_26 = arith.constant 0 : index
    %c0_27 = arith.constant 0 : index
    %78 = vector.load %arg2[%c1_25, %c0_26, %c0_27] : memref<4x16x16xf32, #tpu.memory_space<vmem>>, vector<1x16x16xf32>
    %79 = vector.shape_cast %78 : vector<1x16x16xf32> to vector<16x16xf32>
    %80 = vector.shape_cast %79 : vector<16x16xf32> to vector<1x16x16xf32>
    %81 = vector.broadcast %80 : vector<1x16x16xf32> to vector<2x16x16xf32>
    %82 = arith.addf %77, %81 : vector<2x16x16xf32>
    %83 = arith.addf %82, %1 : vector<2x16x16xf32>
    %cst_28 = arith.constant dense<0xFF800000> : vector<2x16xf32>
    %84 = vector.multi_reduction <maximumf>, %83, %cst_28 [2] : vector<2x16x16xf32> to vector<2x16xf32>
    %85 = vector.shape_cast %84 : vector<2x16xf32> to vector<2x16x1xf32>
    %86 = vector.broadcast %85 : vector<2x16x1xf32> to vector<2x16x16xf32>
    %87 = arith.subf %83, %86 : vector<2x16x16xf32>
    %88 = math.exp %87 : vector<2x16x16xf32>
    %cst_29 = arith.constant dense<0.000000e+00> : vector<2x16xf32>
    %89 = vector.multi_reduction <add>, %88, %cst_29 [2] : vector<2x16x16xf32> to vector<2x16xf32>
    %90 = vector.shape_cast %89 : vector<2x16xf32> to vector<2x16x1xf32>
    %91 = tpu.reciprocal %90 {approx = true} : vector<2x16x1xf32> -> vector<2x16x1xf32>
    %92 = vector.broadcast %91 : vector<2x16x1xf32> to vector<2x16x16xf32>
    %93 = arith.mulf %88, %92 : vector<2x16x16xf32>
    %94 = arith.truncf %93 : vector<2x16x16xf32> to vector<2x16x16xbf16>
    "tpu.trace_start"() <{level = 10 : i32, message = "wts,wsd->wtd"}> : () -> ()
    %cst_30 = arith.constant dense<0.000000e+00> : vector<2x16x8xf32>
    %95 = tpu.matmul %94, %53, %cst_30 {dimension_numbers = #tpu.dot_dimension_numbers<[2], [1], [1], [2], [0, 0, 0, 1, 1, 2], [0], [0]>} : vector<2x16x16xbf16>, vector<2x16x8xbf16>, vector<2x16x8xf32> -> vector<2x16x8xf32>
    "tpu.trace_stop"() : () -> ()
    %96 = vector.extract_strided_slice %0 {offsets = [0, 0, 16], sizes = [2, 16, 8], strides = [1, 1, 1]} : vector<2x16x96xbf16> to vector<2x16x8xbf16>
    %97 = arith.extf %96 : vector<2x16x8xbf16> to vector<2x16x8xf32>
    %98 = vector.extract_strided_slice %0 {offsets = [0, 0, 48], sizes = [2, 16, 8], strides = [1, 1, 1]} : vector<2x16x96xbf16> to vector<2x16x8xbf16>
    %99 = arith.extf %98 : vector<2x16x8xbf16> to vector<2x16x8xf32>
    %100 = vector.extract_strided_slice %0 {offsets = [0, 0, 80], sizes = [2, 16, 8], strides = [1, 1, 1]} : vector<2x16x96xbf16> to vector<2x16x8xbf16>
    %101 = arith.mulf %97, %97 : vector<2x16x8xf32>
    %cst_31 = arith.constant dense<0.000000e+00> : vector<2x16xf32>
    %102 = vector.multi_reduction <add>, %101, %cst_31 [2] : vector<2x16x8xf32> to vector<2x16xf32>
    %103 = vector.shape_cast %102 : vector<2x16xf32> to vector<2x16x1xf32>
    %cst_32 = arith.constant 9.99999996E-13 : f32
    %104 = vector.broadcast %cst_32 : f32 to vector<2x16x1xf32>
    %105 = arith.maximumf %103, %104 : vector<2x16x1xf32>
    %106 = math.rsqrt %105 : vector<2x16x1xf32>
    %107 = vector.broadcast %106 : vector<2x16x1xf32> to vector<2x16x8xf32>
    %108 = arith.mulf %97, %107 : vector<2x16x8xf32>
    %109 = arith.mulf %99, %99 : vector<2x16x8xf32>
    %cst_33 = arith.constant dense<0.000000e+00> : vector<2x16xf32>
    %110 = vector.multi_reduction <add>, %109, %cst_33 [2] : vector<2x16x8xf32> to vector<2x16xf32>
    %111 = vector.shape_cast %110 : vector<2x16xf32> to vector<2x16x1xf32>
    %cst_34 = arith.constant 9.99999996E-13 : f32
    %112 = vector.broadcast %cst_34 : f32 to vector<2x16x1xf32>
    %113 = arith.maximumf %111, %112 : vector<2x16x1xf32>
    %114 = math.rsqrt %113 : vector<2x16x1xf32>
    %115 = vector.broadcast %114 : vector<2x16x1xf32> to vector<2x16x8xf32>
    %116 = arith.mulf %99, %115 : vector<2x16x8xf32>
    %c2 = arith.constant 2 : index
    %117 = memref.load %arg4[%c2] : memref<4xf32, #tpu.memory_space<smem>>
    %cst_35 = arith.constant 0.00999999977 : f32
    %118 = arith.maximumf %117, %cst_35 : f32
    %cst_36 = arith.constant 1.000000e+00 : f32
    %119 = arith.divf %cst_36, %118 : f32
    %120 = vector.broadcast %119 : f32 to vector<2x16x8xf32>
    %121 = arith.mulf %108, %120 : vector<2x16x8xf32>
    %122 = arith.truncf %121 : vector<2x16x8xf32> to vector<2x16x8xbf16>
    %123 = arith.truncf %116 : vector<2x16x8xf32> to vector<2x16x8xbf16>
    "tpu.trace_start"() <{level = 10 : i32, message = "wtd,wsd->wts"}> : () -> ()
    %cst_37 = arith.constant dense<0.000000e+00> : vector<2x16x16xf32>
    %124 = tpu.matmul %122, %123, %cst_37 {dimension_numbers = #tpu.dot_dimension_numbers<[2], [2], [1], [1], [0, 0, 0, 1, 1, 1], [0], [0]>} : vector<2x16x8xbf16>, vector<2x16x8xbf16>, vector<2x16x16xf32> -> vector<2x16x16xf32>
    "tpu.trace_stop"() : () -> ()
    %c2_38 = arith.constant 2 : index
    %c0_39 = arith.constant 0 : index
    %c0_40 = arith.constant 0 : index
    %125 = vector.load %arg2[%c2_38, %c0_39, %c0_40] : memref<4x16x16xf32, #tpu.memory_space<vmem>>, vector<1x16x16xf32>
    %126 = vector.shape_cast %125 : vector<1x16x16xf32> to vector<16x16xf32>
    %127 = vector.shape_cast %126 : vector<16x16xf32> to vector<1x16x16xf32>
    %128 = vector.broadcast %127 : vector<1x16x16xf32> to vector<2x16x16xf32>
    %129 = arith.addf %124, %128 : vector<2x16x16xf32>
    %130 = arith.addf %129, %1 : vector<2x16x16xf32>
    %cst_41 = arith.constant dense<0xFF800000> : vector<2x16xf32>
    %131 = vector.multi_reduction <maximumf>, %130, %cst_41 [2] : vector<2x16x16xf32> to vector<2x16xf32>
    %132 = vector.shape_cast %131 : vector<2x16xf32> to vector<2x16x1xf32>
    %133 = vector.broadcast %132 : vector<2x16x1xf32> to vector<2x16x16xf32>
    %134 = arith.subf %130, %133 : vector<2x16x16xf32>
    %135 = math.exp %134 : vector<2x16x16xf32>
    %cst_42 = arith.constant dense<0.000000e+00> : vector<2x16xf32>
    %136 = vector.multi_reduction <add>, %135, %cst_42 [2] : vector<2x16x16xf32> to vector<2x16xf32>
    %137 = vector.shape_cast %136 : vector<2x16xf32> to vector<2x16x1xf32>
    %138 = tpu.reciprocal %137 {approx = true} : vector<2x16x1xf32> -> vector<2x16x1xf32>
    %139 = vector.broadcast %138 : vector<2x16x1xf32> to vector<2x16x16xf32>
    %140 = arith.mulf %135, %139 : vector<2x16x16xf32>
    %141 = arith.truncf %140 : vector<2x16x16xf32> to vector<2x16x16xbf16>
    "tpu.trace_start"() <{level = 10 : i32, message = "wts,wsd->wtd"}> : () -> ()
    %cst_43 = arith.constant dense<0.000000e+00> : vector<2x16x8xf32>
    %142 = tpu.matmul %141, %100, %cst_43 {dimension_numbers = #tpu.dot_dimension_numbers<[2], [1], [1], [2], [0, 0, 0, 1, 1, 2], [0], [0]>} : vector<2x16x16xbf16>, vector<2x16x8xbf16>, vector<2x16x8xf32> -> vector<2x16x8xf32>
    "tpu.trace_stop"() : () -> ()
    %143 = vector.extract_strided_slice %0 {offsets = [0, 0, 24], sizes = [2, 16, 8], strides = [1, 1, 1]} : vector<2x16x96xbf16> to vector<2x16x8xbf16>
    %144 = arith.extf %143 : vector<2x16x8xbf16> to vector<2x16x8xf32>
    %145 = vector.extract_strided_slice %0 {offsets = [0, 0, 56], sizes = [2, 16, 8], strides = [1, 1, 1]} : vector<2x16x96xbf16> to vector<2x16x8xbf16>
    %146 = arith.extf %145 : vector<2x16x8xbf16> to vector<2x16x8xf32>
    %147 = vector.extract_strided_slice %0 {offsets = [0, 0, 88], sizes = [2, 16, 8], strides = [1, 1, 1]} : vector<2x16x96xbf16> to vector<2x16x8xbf16>
    %148 = arith.mulf %144, %144 : vector<2x16x8xf32>
    %cst_44 = arith.constant dense<0.000000e+00> : vector<2x16xf32>
    %149 = vector.multi_reduction <add>, %148, %cst_44 [2] : vector<2x16x8xf32> to vector<2x16xf32>
    %150 = vector.shape_cast %149 : vector<2x16xf32> to vector<2x16x1xf32>
    %cst_45 = arith.constant 9.99999996E-13 : f32
    %151 = vector.broadcast %cst_45 : f32 to vector<2x16x1xf32>
    %152 = arith.maximumf %150, %151 : vector<2x16x1xf32>
    %153 = math.rsqrt %152 : vector<2x16x1xf32>
    %154 = vector.broadcast %153 : vector<2x16x1xf32> to vector<2x16x8xf32>
    %155 = arith.mulf %144, %154 : vector<2x16x8xf32>
    %156 = arith.mulf %146, %146 : vector<2x16x8xf32>
    %cst_46 = arith.constant dense<0.000000e+00> : vector<2x16xf32>
    %157 = vector.multi_reduction <add>, %156, %cst_46 [2] : vector<2x16x8xf32> to vector<2x16xf32>
    %158 = vector.shape_cast %157 : vector<2x16xf32> to vector<2x16x1xf32>
    %cst_47 = arith.constant 9.99999996E-13 : f32
    %159 = vector.broadcast %cst_47 : f32 to vector<2x16x1xf32>
    %160 = arith.maximumf %158, %159 : vector<2x16x1xf32>
    %161 = math.rsqrt %160 : vector<2x16x1xf32>
    %162 = vector.broadcast %161 : vector<2x16x1xf32> to vector<2x16x8xf32>
    %163 = arith.mulf %146, %162 : vector<2x16x8xf32>
    %c3 = arith.constant 3 : index
    %164 = memref.load %arg4[%c3] : memref<4xf32, #tpu.memory_space<smem>>
    %cst_48 = arith.constant 0.00999999977 : f32
    %165 = arith.maximumf %164, %cst_48 : f32
    %cst_49 = arith.constant 1.000000e+00 : f32
    %166 = arith.divf %cst_49, %165 : f32
    %167 = vector.broadcast %166 : f32 to vector<2x16x8xf32>
    %168 = arith.mulf %155, %167 : vector<2x16x8xf32>
    %169 = arith.truncf %168 : vector<2x16x8xf32> to vector<2x16x8xbf16>
    %170 = arith.truncf %163 : vector<2x16x8xf32> to vector<2x16x8xbf16>
    "tpu.trace_start"() <{level = 10 : i32, message = "wtd,wsd->wts"}> : () -> ()
    %cst_50 = arith.constant dense<0.000000e+00> : vector<2x16x16xf32>
    %171 = tpu.matmul %169, %170, %cst_50 {dimension_numbers = #tpu.dot_dimension_numbers<[2], [2], [1], [1], [0, 0, 0, 1, 1, 1], [0], [0]>} : vector<2x16x8xbf16>, vector<2x16x8xbf16>, vector<2x16x16xf32> -> vector<2x16x16xf32>
    "tpu.trace_stop"() : () -> ()
    %c3_51 = arith.constant 3 : index
    %c0_52 = arith.constant 0 : index
    %c0_53 = arith.constant 0 : index
    %172 = vector.load %arg2[%c3_51, %c0_52, %c0_53] : memref<4x16x16xf32, #tpu.memory_space<vmem>>, vector<1x16x16xf32>
    %173 = vector.shape_cast %172 : vector<1x16x16xf32> to vector<16x16xf32>
    %174 = vector.shape_cast %173 : vector<16x16xf32> to vector<1x16x16xf32>
    %175 = vector.broadcast %174 : vector<1x16x16xf32> to vector<2x16x16xf32>
    %176 = arith.addf %171, %175 : vector<2x16x16xf32>
    %177 = arith.addf %176, %1 : vector<2x16x16xf32>
    %cst_54 = arith.constant dense<0xFF800000> : vector<2x16xf32>
    %178 = vector.multi_reduction <maximumf>, %177, %cst_54 [2] : vector<2x16x16xf32> to vector<2x16xf32>
    %179 = vector.shape_cast %178 : vector<2x16xf32> to vector<2x16x1xf32>
    %180 = vector.broadcast %179 : vector<2x16x1xf32> to vector<2x16x16xf32>
    %181 = arith.subf %177, %180 : vector<2x16x16xf32>
    %182 = math.exp %181 : vector<2x16x16xf32>
    %cst_55 = arith.constant dense<0.000000e+00> : vector<2x16xf32>
    %183 = vector.multi_reduction <add>, %182, %cst_55 [2] : vector<2x16x16xf32> to vector<2x16xf32>
    %184 = vector.shape_cast %183 : vector<2x16xf32> to vector<2x16x1xf32>
    %185 = tpu.reciprocal %184 {approx = true} : vector<2x16x1xf32> -> vector<2x16x1xf32>
    %186 = vector.broadcast %185 : vector<2x16x1xf32> to vector<2x16x16xf32>
    %187 = arith.mulf %182, %186 : vector<2x16x16xf32>
    %188 = arith.truncf %187 : vector<2x16x16xf32> to vector<2x16x16xbf16>
    "tpu.trace_start"() <{level = 10 : i32, message = "wts,wsd->wtd"}> : () -> ()
    %cst_56 = arith.constant dense<0.000000e+00> : vector<2x16x8xf32>
    %189 = tpu.matmul %188, %147, %cst_56 {dimension_numbers = #tpu.dot_dimension_numbers<[2], [1], [1], [2], [0, 0, 0, 1, 1, 2], [0], [0]>} : vector<2x16x16xbf16>, vector<2x16x8xbf16>, vector<2x16x8xf32> -> vector<2x16x8xf32>
    "tpu.trace_stop"() : () -> ()
    %190 = tpu.concatenate %48, %95, %142, %189 in 2 : vector<2x16x8xf32>, vector<2x16x8xf32>, vector<2x16x8xf32>, vector<2x16x8xf32> -> vector<2x16x32xf32>
    %191 = arith.truncf %190 : vector<2x16x32xf32> to vector<2x16x32xbf16>
    %c0_57 = arith.constant 0 : index
    %c0_58 = arith.constant 0 : index
    %c0_59 = arith.constant 0 : index
    %192 = vector.load %arg5[%c0_57, %c0_58, %c0_59] : memref<2x16x32xbf16, #tpu.memory_space<vmem>>, vector<2x16x32xbf16>
    tpu.vector_store %arg5[%c0_57, %c0_58, %c0_59], %191 {strides = array<i32>} : memref<2x16x32xbf16, #tpu.memory_space<vmem>>, vector<2x16x32xbf16>,
    return
  }
  func.func @transform_0(%arg0: i32) -> (i32, i32, i32) {
    %c0_i32 = arith.constant 0 : i32
    %c0_i32_0 = arith.constant 0 : i32
    %c0_i32_1 = arith.constant 0 : i32
    return %arg0, %c0_i32, %c0_i32_0 : i32, i32, i32
  }
  func.func @transform_1(%arg0: i32) -> (i32, i32, i32) {
    %c0_i32 = arith.constant 0 : i32
    %c0_i32_0 = arith.constant 0 : i32
    %c0_i32_1 = arith.constant 0 : i32
    %c0_i32_2 = arith.constant 0 : i32
    return %c0_i32, %c0_i32_0, %c0_i32_1 : i32, i32, i32
  }
  func.func @transform_2(%arg0: i32) -> (i32, i32, i32) {
    %c0_i32 = arith.constant 0 : i32
    %c0_i32_0 = arith.constant 0 : i32
    %c0_i32_1 = arith.constant 0 : i32
    %c0_i32_2 = arith.constant 0 : i32
    return %c0_i32, %c0_i32_0, %c0_i32_1 : i32, i32, i32
  }
  func.func @transform_3(%arg0: i32) -> i32 {
    %c0_i32 = arith.constant 0 : i32
    %c0_i32_0 = arith.constant 0 : i32
    return %c0_i32 : i32
  }
  func.func @transform_4(%arg0: i32) -> (i32, i32, i32) {
    %c0_i32 = arith.constant 0 : i32
    %c0_i32_0 = arith.constant 0 : i32
    %c0_i32_1 = arith.constant 0 : i32
    return %arg0, %c0_i32, %c0_i32_0 : i32, i32, i32
  }
}

module attributes {stable_mosaic.version = 11 : i64} {
  func.func @_linear_kernel(%arg0: i32, %arg1: i32, %arg2: i32, %arg3: memref<32x32xbf16, #tpu.memory_space<vmem>>, %arg4: memref<32x128xbf16, #tpu.memory_space<vmem>>, %arg5: memref<1x128xf32, #tpu.memory_space<vmem>>, %arg6: memref<32x128xbf16, #tpu.memory_space<vmem>>, %arg7: memref<32x128xf32, #tpu.memory_space<vmem>>) attributes {dimension_semantics = [#tpu.dimension_semantics<parallel>, #tpu.dimension_semantics<parallel>, #tpu.dimension_semantics<arbitrary>], iteration_bounds = array<i64: 1, 1, 1>, scalar_prefetch = 0 : i64, scratch_operands = 1 : i64, tpu.core_type = #tpu.core_type<tc>, window_params = [{transform_indices = @transform_0, window_bounds = array<i64: 32, 32>}, {transform_indices = @transform_1, window_bounds = array<i64: 32, 128>}, {transform_indices = @transform_2, window_bounds = array<i64: 1, 128>}, {transform_indices = @transform_3, window_bounds = array<i64: 32, 128>}]} {
    %c0_i32 = arith.constant 0 : i32
    %0 = arith.cmpi eq, %arg2, %c0_i32 : i32
    %1 = arith.extui %0 : i1 to i32
    %c0_i32_0 = arith.constant 0 : i32
    %2 = arith.cmpi ne, %1, %c0_i32_0 : i32
    scf.if %2 {
      %cst_10 = arith.constant 0.000000e+00 : f32
      %12 = vector.broadcast %cst_10 : f32 to vector<32x128xf32>
      %c0_11 = arith.constant 0 : index
      %c0_12 = arith.constant 0 : index
      %13 = vector.load %arg7[%c0_11, %c0_12] : memref<32x128xf32, #tpu.memory_space<vmem>>, vector<32x128xf32>
      tpu.vector_store %arg7[%c0_11, %c0_12], %12 {strides = array<i32>} : memref<32x128xf32, #tpu.memory_space<vmem>>, vector<32x128xf32>,
    } else {
    }
    %c0 = arith.constant 0 : index
    %c0_1 = arith.constant 0 : index
    %3 = vector.load %arg7[%c0, %c0_1] : memref<32x128xf32, #tpu.memory_space<vmem>>, vector<32x128xf32>
    %c0_2 = arith.constant 0 : index
    %c0_3 = arith.constant 0 : index
    %4 = vector.load %arg3[%c0_2, %c0_3] : memref<32x32xbf16, #tpu.memory_space<vmem>>, vector<32x32xbf16>
    %c0_4 = arith.constant 0 : index
    %c0_5 = arith.constant 0 : index
    %5 = vector.load %arg4[%c0_4, %c0_5] : memref<32x128xbf16, #tpu.memory_space<vmem>>, vector<32x128xbf16>
    %cst = arith.constant dense<0.000000e+00> : vector<32x128xf32>
    %6 = tpu.matmul %4, %5, %cst {dimension_numbers = #tpu.dot_dimension_numbers<[1], [0], [0], [1], [0, 0, 1, 1], [], []>} : vector<32x32xbf16>, vector<32x128xbf16>, vector<32x128xf32> -> vector<32x128xf32>
    %7 = arith.addf %3, %6 : vector<32x128xf32>
    %c0_6 = arith.constant 0 : index
    %c0_7 = arith.constant 0 : index
    %8 = vector.load %arg7[%c0_6, %c0_7] : memref<32x128xf32, #tpu.memory_space<vmem>>, vector<32x128xf32>
    tpu.vector_store %arg7[%c0_6, %c0_7], %7 {strides = array<i32>} : memref<32x128xf32, #tpu.memory_space<vmem>>, vector<32x128xf32>,
    %c0_i32_8 = arith.constant 0 : i32
    %9 = arith.cmpi eq, %arg2, %c0_i32_8 : i32
    %10 = arith.extui %9 : i1 to i32
    %c0_i32_9 = arith.constant 0 : i32
    %11 = arith.cmpi ne, %10, %c0_i32_9 : i32
    scf.if %11 {
      %c0_10 = arith.constant 0 : index
      %c0_11 = arith.constant 0 : index
      %12 = vector.load %arg7[%c0_10, %c0_11] : memref<32x128xf32, #tpu.memory_space<vmem>>, vector<32x128xf32>
      %c0_12 = arith.constant 0 : index
      %c0_13 = arith.constant 0 : index
      %13 = vector.load %arg5[%c0_12, %c0_13] : memref<1x128xf32, #tpu.memory_space<vmem>>, vector<1x128xf32>
      %14 = vector.broadcast %13 : vector<1x128xf32> to vector<32x128xf32>
      %15 = arith.addf %12, %14 : vector<32x128xf32>
      %cst_14 = arith.constant 5.000000e-01 : f32
      %16 = vector.broadcast %cst_14 : f32 to vector<32x128xf32>
      %17 = arith.mulf %16, %15 : vector<32x128xf32>
      %cst_15 = arith.constant 4.471500e-02 : f32
      %18 = vector.broadcast %cst_15 : f32 to vector<32x128xf32>
      %19 = arith.mulf %18, %15 : vector<32x128xf32>
      %20 = arith.mulf %19, %15 : vector<32x128xf32>
      %21 = arith.mulf %20, %15 : vector<32x128xf32>
      %22 = arith.addf %15, %21 : vector<32x128xf32>
      %cst_16 = arith.constant 0.797884583 : f32
      %23 = vector.broadcast %cst_16 : f32 to vector<32x128xf32>
      %24 = arith.mulf %23, %22 : vector<32x128xf32>
      %25 = math.tanh %24 : vector<32x128xf32>
      %cst_17 = arith.constant 1.000000e+00 : f32
      %26 = vector.broadcast %cst_17 : f32 to vector<32x128xf32>
      %27 = arith.addf %26, %25 : vector<32x128xf32>
      %28 = arith.mulf %17, %27 : vector<32x128xf32>
      %29 = arith.truncf %28 : vector<32x128xf32> to vector<32x128xbf16>
      %c0_18 = arith.constant 0 : index
      %c0_19 = arith.constant 0 : index
      %30 = vector.load %arg6[%c0_18, %c0_19] : memref<32x128xbf16, #tpu.memory_space<vmem>>, vector<32x128xbf16>
      tpu.vector_store %arg6[%c0_18, %c0_19], %29 {strides = array<i32>} : memref<32x128xbf16, #tpu.memory_space<vmem>>, vector<32x128xbf16>,
    } else {
    }
    return
  }
  func.func @transform_0(%arg0: i32, %arg1: i32, %arg2: i32) -> (i32, i32) {
    %c0_i32 = arith.constant 0 : i32
    return %arg0, %arg2 : i32, i32
  }
  func.func @transform_1(%arg0: i32, %arg1: i32, %arg2: i32) -> (i32, i32) {
    %c0_i32 = arith.constant 0 : i32
    return %arg2, %arg1 : i32, i32
  }
  func.func @transform_2(%arg0: i32, %arg1: i32, %arg2: i32) -> (i32, i32) {
    %c0_i32 = arith.constant 0 : i32
    %c0_i32_0 = arith.constant 0 : i32
    return %c0_i32, %arg1 : i32, i32
  }
  func.func @transform_3(%arg0: i32, %arg1: i32, %arg2: i32) -> (i32, i32) {
    %c0_i32 = arith.constant 0 : i32
    return %arg0, %arg1 : i32, i32
  }
}

module attributes {stable_mosaic.version = 11 : i64} {
  func.func @_linear_kernel(%arg0: i32, %arg1: i32, %arg2: i32, %arg3: memref<32x128xbf16, #tpu.memory_space<vmem>>, %arg4: memref<128x32xbf16, #tpu.memory_space<vmem>>, %arg5: memref<1x32xf32, #tpu.memory_space<vmem>>, %arg6: memref<1x32xf32, #tpu.memory_space<vmem>>, %arg7: memref<1x32xf32, #tpu.memory_space<vmem>>, %arg8: memref<32x32xbf16, #tpu.memory_space<vmem>>, %arg9: memref<32x32xbf16, #tpu.memory_space<vmem>>, %arg10: memref<32x32xf32, #tpu.memory_space<vmem>>) attributes {dimension_semantics = [#tpu.dimension_semantics<parallel>, #tpu.dimension_semantics<parallel>, #tpu.dimension_semantics<arbitrary>], iteration_bounds = array<i64: 1, 1, 1>, scalar_prefetch = 0 : i64, scratch_operands = 1 : i64, tpu.core_type = #tpu.core_type<tc>, window_params = [{transform_indices = @transform_0, window_bounds = array<i64: 32, 128>}, {transform_indices = @transform_1, window_bounds = array<i64: 128, 32>}, {transform_indices = @transform_2, window_bounds = array<i64: 1, 32>}, {transform_indices = @transform_3, window_bounds = array<i64: 1, 32>}, {transform_indices = @transform_4, window_bounds = array<i64: 1, 32>}, {transform_indices = @transform_5, window_bounds = array<i64: 32, 32>}, {transform_indices = @transform_6, window_bounds = array<i64: 32, 32>}]} {
    %c0_i32 = arith.constant 0 : i32
    %0 = arith.cmpi eq, %arg2, %c0_i32 : i32
    %1 = arith.extui %0 : i1 to i32
    %c0_i32_0 = arith.constant 0 : i32
    %2 = arith.cmpi ne, %1, %c0_i32_0 : i32
    scf.if %2 {
      %cst_10 = arith.constant 0.000000e+00 : f32
      %12 = vector.broadcast %cst_10 : f32 to vector<32x32xf32>
      %c0_11 = arith.constant 0 : index
      %c0_12 = arith.constant 0 : index
      %13 = vector.load %arg10[%c0_11, %c0_12] : memref<32x32xf32, #tpu.memory_space<vmem>>, vector<32x32xf32>
      tpu.vector_store %arg10[%c0_11, %c0_12], %12 {strides = array<i32>} : memref<32x32xf32, #tpu.memory_space<vmem>>, vector<32x32xf32>,
    } else {
    }
    %c0 = arith.constant 0 : index
    %c0_1 = arith.constant 0 : index
    %3 = vector.load %arg10[%c0, %c0_1] : memref<32x32xf32, #tpu.memory_space<vmem>>, vector<32x32xf32>
    %c0_2 = arith.constant 0 : index
    %c0_3 = arith.constant 0 : index
    %4 = vector.load %arg3[%c0_2, %c0_3] : memref<32x128xbf16, #tpu.memory_space<vmem>>, vector<32x128xbf16>
    %c0_4 = arith.constant 0 : index
    %c0_5 = arith.constant 0 : index
    %5 = vector.load %arg4[%c0_4, %c0_5] : memref<128x32xbf16, #tpu.memory_space<vmem>>, vector<128x32xbf16>
    %cst = arith.constant dense<0.000000e+00> : vector<32x32xf32>
    %6 = tpu.matmul %4, %5, %cst {dimension_numbers = #tpu.dot_dimension_numbers<[1], [0], [0], [1], [0, 0, 1, 1], [], []>} : vector<32x128xbf16>, vector<128x32xbf16>, vector<32x32xf32> -> vector<32x32xf32>
    %7 = arith.addf %3, %6 : vector<32x32xf32>
    %c0_6 = arith.constant 0 : index
    %c0_7 = arith.constant 0 : index
    %8 = vector.load %arg10[%c0_6, %c0_7] : memref<32x32xf32, #tpu.memory_space<vmem>>, vector<32x32xf32>
    tpu.vector_store %arg10[%c0_6, %c0_7], %7 {strides = array<i32>} : memref<32x32xf32, #tpu.memory_space<vmem>>, vector<32x32xf32>,
    %c0_i32_8 = arith.constant 0 : i32
    %9 = arith.cmpi eq, %arg2, %c0_i32_8 : i32
    %10 = arith.extui %9 : i1 to i32
    %c0_i32_9 = arith.constant 0 : i32
    %11 = arith.cmpi ne, %10, %c0_i32_9 : i32
    scf.if %11 {
      %c0_10 = arith.constant 0 : index
      %c0_11 = arith.constant 0 : index
      %12 = vector.load %arg10[%c0_10, %c0_11] : memref<32x32xf32, #tpu.memory_space<vmem>>, vector<32x32xf32>
      %c0_12 = arith.constant 0 : index
      %c0_13 = arith.constant 0 : index
      %13 = vector.load %arg5[%c0_12, %c0_13] : memref<1x32xf32, #tpu.memory_space<vmem>>, vector<1x32xf32>
      %14 = vector.broadcast %13 : vector<1x32xf32> to vector<32x32xf32>
      %15 = arith.addf %12, %14 : vector<32x32xf32>
      %cst_14 = arith.constant dense<0.000000e+00> : vector<32xf32>
      %16 = vector.multi_reduction <add>, %15, %cst_14 [1] : vector<32x32xf32> to vector<32xf32>
      %17 = vector.shape_cast %16 : vector<32xf32> to vector<32x1xf32>
      %cst_15 = arith.constant 3.200000e+01 : f32
      %18 = vector.broadcast %cst_15 : f32 to vector<32x1xf32>
      %19 = arith.divf %17, %18 : vector<32x1xf32>
      %20 = vector.broadcast %19 : vector<32x1xf32> to vector<32x32xf32>
      %21 = arith.subf %15, %20 : vector<32x32xf32>
      %22 = arith.mulf %21, %21 : vector<32x32xf32>
      %cst_16 = arith.constant dense<0.000000e+00> : vector<32xf32>
      %23 = vector.multi_reduction <add>, %22, %cst_16 [1] : vector<32x32xf32> to vector<32xf32>
      %24 = vector.shape_cast %23 : vector<32xf32> to vector<32x1xf32>
      %cst_17 = arith.constant 3.200000e+01 : f32
      %25 = vector.broadcast %cst_17 : f32 to vector<32x1xf32>
      %26 = arith.divf %24, %25 : vector<32x1xf32>
      %27 = vector.broadcast %19 : vector<32x1xf32> to vector<32x32xf32>
      %28 = arith.subf %15, %27 : vector<32x32xf32>
      %cst_18 = arith.constant 9.99999974E-6 : f32
      %29 = vector.broadcast %cst_18 : f32 to vector<32x1xf32>
      %30 = arith.addf %26, %29 : vector<32x1xf32>
      %31 = math.rsqrt %30 : vector<32x1xf32>
      %32 = vector.broadcast %31 : vector<32x1xf32> to vector<32x32xf32>
      %33 = arith.mulf %28, %32 : vector<32x32xf32>
      %c0_19 = arith.constant 0 : index
      %c0_20 = arith.constant 0 : index
      %34 = vector.load %arg6[%c0_19, %c0_20] : memref<1x32xf32, #tpu.memory_space<vmem>>, vector<1x32xf32>
      %35 = vector.broadcast %34 : vector<1x32xf32> to vector<32x32xf32>
      %36 = arith.mulf %33, %35 : vector<32x32xf32>
      %c0_21 = arith.constant 0 : index
      %c0_22 = arith.constant 0 : index
      %37 = vector.load %arg7[%c0_21, %c0_22] : memref<1x32xf32, #tpu.memory_space<vmem>>, vector<1x32xf32>
      %38 = vector.broadcast %37 : vector<1x32xf32> to vector<32x32xf32>
      %39 = arith.addf %36, %38 : vector<32x32xf32>
      %c0_23 = arith.constant 0 : index
      %c0_24 = arith.constant 0 : index
      %40 = vector.load %arg8[%c0_23, %c0_24] : memref<32x32xbf16, #tpu.memory_space<vmem>>, vector<32x32xbf16>
      %41 = arith.extf %40 : vector<32x32xbf16> to vector<32x32xf32>
      %42 = arith.addf %39, %41 : vector<32x32xf32>
      %43 = arith.truncf %42 : vector<32x32xf32> to vector<32x32xbf16>
      %c0_25 = arith.constant 0 : index
      %c0_26 = arith.constant 0 : index
      %44 = vector.load %arg9[%c0_25, %c0_26] : memref<32x32xbf16, #tpu.memory_space<vmem>>, vector<32x32xbf16>
      tpu.vector_store %arg9[%c0_25, %c0_26], %43 {strides = array<i32>} : memref<32x32xbf16, #tpu.memory_space<vmem>>, vector<32x32xbf16>,
    } else {
    }
    return
  }
  func.func @transform_0(%arg0: i32, %arg1: i32, %arg2: i32) -> (i32, i32) {
    %c0_i32 = arith.constant 0 : i32
    return %arg0, %arg2 : i32, i32
  }
  func.func @transform_1(%arg0: i32, %arg1: i32, %arg2: i32) -> (i32, i32) {
    %c0_i32 = arith.constant 0 : i32
    return %arg2, %arg1 : i32, i32
  }
  func.func @transform_2(%arg0: i32, %arg1: i32, %arg2: i32) -> (i32, i32) {
    %c0_i32 = arith.constant 0 : i32
    %c0_i32_0 = arith.constant 0 : i32
    return %c0_i32, %arg1 : i32, i32
  }
  func.func @transform_3(%arg0: i32, %arg1: i32, %arg2: i32) -> (i32, i32) {
    %c0_i32 = arith.constant 0 : i32
    %c0_i32_0 = arith.constant 0 : i32
    return %c0_i32, %arg1 : i32, i32
  }
  func.func @transform_4(%arg0: i32, %arg1: i32, %arg2: i32) -> (i32, i32) {
    %c0_i32 = arith.constant 0 : i32
    %c0_i32_0 = arith.constant 0 : i32
    return %c0_i32, %arg1 : i32, i32
  }
  func.func @transform_5(%arg0: i32, %arg1: i32, %arg2: i32) -> (i32, i32) {
    %c0_i32 = arith.constant 0 : i32
    return %arg0, %arg1 : i32, i32
  }
  func.func @transform_6(%arg0: i32, %arg1: i32, %arg2: i32) -> (i32, i32) {
    %c0_i32 = arith.constant 0 : i32
    return %arg0, %arg1 : i32, i32
  }
}

</mosaic_0001>

<bundles_post_ra>
// kernel: tile.5
= control target key start
LH: loop header
LB: loop body
LE: loop exit
PB: predicated region body
PF: predicated region fallthrough
CT: control target
= control target key end

     0   :  { %s110_s0 = inlined_call_operand.<no memory space> [shape: f32[], index: 0, kind: input, shape index: {}]   ;;  %s111_s1 = inlined_call_operand.vmem [shape: f32[8,16,16], index: 1, kind: output, shape index: {}]  }
   0x1   :  { %v2_v0 = vstv %s110_s0 }
   0x2   :  { %3 = vst [vmem:[%s111_s1] sm:$0xff] %v2_v0  ;;  %34 = vst [vmem:[%s111_s1 + $0x10] sm:$0xff] %v2_v0 }
   0x3   :  { %35 = vst [vmem:[%s111_s1 + $0x20] sm:$0xff] %v2_v0  ;;  %36 = vst [vmem:[%s111_s1 + $0x30] sm:$0xff] %v2_v0 }
   0x4   :  { %37 = vst [vmem:[%s111_s1 + $0x40] sm:$0xff] %v2_v0  ;;  %38 = vst [vmem:[%s111_s1 + $0x50] sm:$0xff] %v2_v0 }
   0x5   :  { %39 = vst [vmem:[%s111_s1 + $0x60] sm:$0xff] %v2_v0  ;;  %40 = vst [vmem:[%s111_s1 + $0x70] sm:$0xff] %v2_v0 }
   0x6   :  { %41 = vst [vmem:[%s111_s1 + $0x8] sm:$0xff] %v2_v0  ;;  %42 = vst [vmem:[%s111_s1 + $0x18] sm:$0xff] %v2_v0 }
   0x7   :  { %43 = vst [vmem:[%s111_s1 + $0x28] sm:$0xff] %v2_v0  ;;  %44 = vst [vmem:[%s111_s1 + $0x38] sm:$0xff] %v2_v0 }
   0x8   :  { %45 = vst [vmem:[%s111_s1 + $0x48] sm:$0xff] %v2_v0  ;;  %46 = vst [vmem:[%s111_s1 + $0x58] sm:$0xff] %v2_v0 }
   0x9   :  { %47 = vst [vmem:[%s111_s1 + $0x68] sm:$0xff] %v2_v0  ;;  %48 = vst [vmem:[%s111_s1 + $0x78] sm:$0xff] %v2_v0 }

// kernel: _lambda_.22
= control target key start
LH: loop header
LB: loop body
LE: loop exit
PB: predicated region body
PF: predicated region fallthrough
CT: control target
= control target key end

     0   :  { %vm25_vm0 = vcmask 130048   ;;  %v764_v1 = vmov 0.0   ;;  %vm106_vm1 = vcmask 392192   ;;  %vm622_vm2 = vcmask 125952   ;;  %s1195_s1 = inlined_call_operand.vmem [shape: bf16[48,16], index: 1, kind: input, shape index: {}]   ;;  %s1196_s0 = inlined_call_operand.vmem [shape: f32[128,48], index: 0, kind: input, shape index: {}]   ;;  %s1197_s2 = inlined_call_operand.vmem [shape: f32[1,16], index: 2, kind: input, shape index: {}, may-alias: {2,4}]   ;;  %s1198_s3 = inlined_call_operand.vmem [shape: f32[1,16], index: 3, kind: input, shape index: {}]   ;;  %s1199_s4 = inlined_call_operand.vmem [shape: f32[1,16], index: 4, kind: input, shape index: {}, may-alias: {2,4}]   ;;  %s1200_s5 = inlined_call_operand.vmem [shape: bf16[128,16], index: 5, kind: output, shape index: {}]  }
   0x1   :  { %v729_v0 = vld [vmem:[%s1195_s1] sm:$0xff]   ;;  %28 = vst.msk [vmem:[#allocation2 + $0x10] sm:$0xff] %vm25_vm0, %v764_v1  ;;  %26 = vst.msk [vmem:[#allocation2] sm:$0xff] %vm25_vm0, %v764_v1  ;;  %v730_v2 = vld [vmem:[%s1195_s1 + $0x8] sm:$0xff]  }
   0x2   :  { %27 = vst.msk [vmem:[#allocation2 + $0x8] sm:$0xff] %vm25_vm0, %v764_v1  ;;  %29 = vst.msk [vmem:[#allocation2 + $0x18] sm:$0xff] %vm25_vm0, %v764_v1  ;;  %700 = vmatprep.subr.bf16.mxu0 %v729_v0  ;;  %722 = vmatprep.subr.bf16.mxu1 %v729_v0  ;;  %v58_v3 = vld [vmem:[%s1196_s0] sm:$0xff]  ;;  %v59_v4 = vld [vmem:[%s1196_s0 + $0x8] sm:$0xff] }
   0x3   :  { %30 = vst.msk [vmem:[#allocation2 + $0x20] sm:$0xff] %vm25_vm0, %v764_v1  ;;  %31 = vst.msk [vmem:[#allocation2 + $0x28] sm:$0xff] %vm25_vm0, %v764_v1  ;;  %701 = vmatpush3.bf16.msra.mxu0 %v729_v0  ;;  %725 = vmatpush3.bf16.msra.mxu1 %v729_v0  ;;  %v66_v5 = vld [vmem:[%s1196_s0 + $0x40] sm:$0xff]  ;;  %v731_v6 = vld [vmem:[%s1195_s1 + $0x10] sm:$0xff]   ;;  %v74_v7 = vpack.c.bf16 %v59_v4, %v58_v3 }
   0x4   :  { %32 = vst.msk [vmem:[#allocation2 + $0x30] sm:$0xff] %vm25_vm0, %v764_v1  ;;  %33 = vst.msk [vmem:[#allocation2 + $0x38] sm:$0xff] %vm25_vm0, %v764_v1  ;;  %702 = vmatprep.subr.bf16.mxu0 %v730_v2  ;;  %723 = vmatprep.subr.bf16.mxu1 %v730_v2  ;;  %v67_v8 = vld [vmem:[%s1196_s0 + $0x48] sm:$0xff]  ;;  %v60_v10 = vld [vmem:[%s1196_s0 + $0x10] sm:$0xff] }
   0x5   :  { %34 = vst.msk [vmem:[#allocation2 + $0x40] sm:$0xff] %vm25_vm0, %v764_v1  ;;  %35 = vst.msk [vmem:[#allocation2 + $0x48] sm:$0xff] %vm25_vm0, %v764_v1  ;;  %v78_v9 = vpack.c.bf16 %v67_v8, %v66_v5  ;;  %706 = vmatprep.mubr.msk.bf16.mxu0 %vm106_vm1, %v74_v7  ;;  %v61_v11 = vld [vmem:[%s1196_s0 + $0x18] sm:$0xff]  ;;  %v68_v12 = vld [vmem:[%s1196_s0 + $0x50] sm:$0xff] }
   0x6   :  { %36 = vst.msk [vmem:[#allocation2 + $0x50] sm:$0xff] %vm25_vm0, %v764_v1  ;;  %37 = vst.msk [vmem:[#allocation2 + $0x58] sm:$0xff] %vm25_vm0, %v764_v1  ;;  %v69_v13 = vld [vmem:[%s1196_s0 + $0x58] sm:$0xff]  ;;  %v62_v14 = vld [vmem:[%s1196_s0 + $0x20] sm:$0xff]  ;;  %v75_v18 = vpack.c.bf16 %v61_v11, %v60_v10 }
   0x7   :  { %38 = vst.msk [vmem:[#allocation2 + $0x60] sm:$0xff] %vm25_vm0, %v764_v1  ;;  %39 = vst.msk [vmem:[#allocation2 + $0x68] sm:$0xff] %vm25_vm0, %v764_v1  ;;  %703 = vmatpush3.bf16.msra.mxu0 %v730_v2  ;;  %726 = vmatpush3.bf16.msra.mxu1 %v730_v2  ;;  %v63_v15 = vld [vmem:[%s1196_s0 + $0x28] sm:$0xff]  ;;  %v70_v16 = vld [vmem:[%s1196_s0 + $0x60] sm:$0xff]  ;;  %v79_v19 = vpack.c.bf16 %v69_v13, %v68_v12 }
   0x8   :  { %40 = vst.msk [vmem:[#allocation2 + $0x70] sm:$0xff] %vm25_vm0, %v764_v1  ;;  %41 = vst.msk [vmem:[#allocation2 + $0x78] sm:$0xff] %vm25_vm0, %v764_v1  ;;  %704 = vmatprep.subr.bf16.mxu0 %v731_v6  ;;  %724 = vmatprep.subr.bf16.mxu1 %v731_v6  ;;  %v71_v17 = vld [vmem:[%s1196_s0 + $0x68] sm:$0xff]  ;;  %v76_v20 = vpack.c.bf16 %v63_v15, %v62_v14  ;;  %v64_v22 = vld [vmem:[%s1196_s0 + $0x30] sm:$0xff] }
   0x9   :  { %714 = vmatprep.mubr.msk.bf16.mxu1 %vm106_vm1, %v78_v9  ;;  %v80_v21 = vpack.c.bf16 %v71_v17, %v70_v16  ;;  %v65_v23 = vld [vmem:[%s1196_s0 + $0x38] sm:$0xff]  ;;  %v72_v24 = vld [vmem:[%s1196_s0 + $0x70] sm:$0xff]  ;;  %v42_v30 = vld [vmem:[#allocation2] sm:$0xff] }
   0xa   :  { %v73_v25 = vld [vmem:[%s1196_s0 + $0x78] sm:$0xff]  ;;  %v77_v26 = vpack.c.bf16 %v65_v23, %v64_v22  ;;  %v44_v28 = vld [vmem:[#allocation2 + $0x10] sm:$0xff]  ;;  %v43_v40 = vld [vmem:[#allocation2 + $0x8] sm:$0xff] }
   0xb   :  { %705 = vmatpush3.bf16.msra.mxu0 %v731_v6  ;;  %727 = vmatpush3.bf16.msra.mxu1 %v731_v6  ;;  %v81_v27 = vpack.c.bf16 %v73_v25, %v72_v24  ;;  %v45_v34 = vld [vmem:[#allocation2 + $0x18] sm:$0xff]  ;;  %v48_v52 = vld [vmem:[#allocation2 + $0x30] sm:$0xff]  ;;  %v46_v54 = vld [vmem:[#allocation2 + $0x20] sm:$0xff] }
   0xc   :  { %v50_v31 = vld [vmem:[#allocation2 + $0x40] sm:$0xff]  ;;  %v51_v41 = vld [vmem:[#allocation2 + $0x48] sm:$0xff]  ;;  %v49_v58 = vld [vmem:[#allocation2 + $0x38] sm:$0xff] }
   0xd   :  { %v52_v29 = vld [vmem:[#allocation2 + $0x50] sm:$0xff]  ;;  %v53_v35 = vld [vmem:[#allocation2 + $0x58] sm:$0xff]  ;;  %v887_v56 = vld [vmem:[%s1197_s2] ss:$0 sm:$0xff] }
   0xe   :  { %707 = vmatmul.mubr.msk.bf16.vlgmr.msra.gmra.mrb[0].mxu0 %vm106_vm1, %v75_v18  ;;  %715 = vmatmul.mubr.msk.bf16.vlgmr.msra.gmra.mrb[0].mxu1 %vm106_vm1, %v79_v19  ;;  %v54_v55 = vld [vmem:[#allocation2 + $0x60] sm:$0xff]  ;;  %v47_v63 = vld [vmem:[#allocation2 + $0x28] sm:$0xff] }
   0xf   :  { %710 = vmatprep.mubr.msk.bf16.mxu0 %vm106_vm1, %v76_v20  ;;  %718 = vmatprep.mubr.msk.bf16.mxu1 %vm106_vm1, %v80_v21  ;;  %v56_v53 = vld [vmem:[#allocation2 + $0x70] sm:$0xff]  ;;  %v57_v60 = vld [vmem:[#allocation2 + $0x78] sm:$0xff]  ;;  %v55_v2 = vld [vmem:[#allocation2 + $0x68] sm:$0xff] }
  0x16   :  { %711 = vmatmul.mubr.msk.bf16.gmra.mrb[4].mxu0 %vm106_vm1, %v77_v26  ;;  %719 = vmatmul.mubr.msk.bf16.gmra.mrb[4].mxu1 %vm106_vm1, %v81_v27 }
  0xe1   :  { %v708_v32 = vpop.f32.mrb[0].mxu0  ;;  %v716_v33 = vpop.f32.mrb[0].mxu1 }
  0xe2   :  { %v230_v36 = vadd.f32 %v708_v32, %v44_v28  ;;  %v238_v37 = vadd.f32 %v716_v33, %v52_v29  ;;  %v165_v38 = vpop.f32.mrb[1].mxu0  ;;  %v197_v39 = vpop.f32.mrb[1].mxu1 }
  0xe3   :  { %v228_v42 = vadd.f32 %v165_v38, %v42_v30  ;;  %v236_v43 = vadd.f32 %v197_v39, %v50_v31  ;;  %v709_v44 = vpop.f32.mrb[2].mxu0  ;;  %v717_v45 = vpop.f32.mrb[2].mxu1 }
  0xe4   :  { %247 = vst.msk [vmem:[#allocation2 + $0x10] sm:$0xff] %vm25_vm0, %v230_v36  ;;  %255 = vst.msk [vmem:[#allocation2 + $0x50] sm:$0xff] %vm25_vm0, %v238_v37  ;;  %v231_v46 = vadd.f32 %v709_v44, %v45_v34  ;;  %v239_v47 = vadd.f32 %v717_v45, %v53_v35  ;;  %v168_v48 = vpop.f32.mrb[3].mxu0  ;;  %v200_v49 = vpop.f32.mrb[3].mxu1 }
  0xe5   :  { %245 = vst.msk [vmem:[#allocation2] sm:$0xff] %vm25_vm0, %v228_v42  ;;  %253 = vst.msk [vmem:[#allocation2 + $0x40] sm:$0xff] %vm25_vm0, %v236_v43  ;;  %v229_v50 = vadd.f32 %v168_v48, %v43_v40  ;;  %v237_v51 = vadd.f32 %v200_v49, %v51_v41 }
  0xe6   :  { %248 = vst.msk [vmem:[#allocation2 + $0x18] sm:$0xff] %vm25_vm0, %v231_v46  ;;  %256 = vst.msk [vmem:[#allocation2 + $0x58] sm:$0xff] %vm25_vm0, %v239_v47 }
  0xe7   :  { %246 = vst.msk [vmem:[#allocation2 + $0x8] sm:$0xff] %vm25_vm0, %v229_v50  ;;  %254 = vst.msk [vmem:[#allocation2 + $0x48] sm:$0xff] %vm25_vm0, %v237_v51 }
  0xe9   :  { %v712_v57 = vpop.f32.mrb[4].mxu0  ;;  %v720_v59 = vpop.f32.mrb[4].mxu1 }
  0xea   :  { %v234_v61 = vadd.f32 %v712_v57, %v48_v52  ;;  %v181_v62 = vpop.f32.mrb[5].mxu0  ;;  %v242_v0 = vadd.f32 %v720_v59, %v56_v53  ;;  %v213_v1 = vpop.f32.mrb[5].mxu1 }
  0xeb   :  { %v274_v3 = vld [vmem:[#allocation2 + $0x50] sm:$0xff]  ;;  %v232_v5 = vadd.f32 %v181_v62, %v46_v54  ;;  %v713_v6 = vpop.f32.mrb[6].mxu0  ;;  %v240_v7 = vadd.f32 %v213_v1, %v54_v55  ;;  %v721_v8 = vpop.f32.mrb[6].mxu1 }
  0xec   :  { %v266_v4 = vld [vmem:[#allocation2 + $0x10] sm:$0xff]  ;;  %v890_v9 = vadd.f32 %v887_v56, %v274_v3  ;;  %251 = vst.msk [vmem:[#allocation2 + $0x30] sm:$0xff] %vm25_vm0, %v234_v61  ;;  %v235_v11 = vadd.f32 %v713_v6, %v49_v58  ;;  %v264_v12 = vld [vmem:[#allocation2] sm:$0xff]  ;;  %v184_v13 = vpop.f32.mrb[7].mxu0  ;;  %259 = vst.msk [vmem:[#allocation2 + $0x70] sm:$0xff] %vm25_vm0, %v242_v0  ;;  %v243_v14 = vadd.f32 %v721_v8, %v57_v60  ;;  %v216_v15 = vpop.f32.mrb[7].mxu1 }
  0xed   :  { %v893_v10 = vadd.f32 %v887_v56, %v266_v4  ;;  %249 = vst.msk [vmem:[#allocation2 + $0x20] sm:$0xff] %vm25_vm0, %v232_v5  ;;  %v267_v16 = vld [vmem:[#allocation2 + $0x18] sm:$0xff]  ;;  %v233_v17 = vadd.f32 %v184_v13, %v47_v63  ;;  %257 = vst.msk [vmem:[#allocation2 + $0x60] sm:$0xff] %vm25_vm0, %v240_v7  ;;  %v241_v18 = vadd.f32 %v216_v15, %v55_v2  ;;  %v272_v23 = vld [vmem:[#allocation2 + $0x40] sm:$0xff] }
  0xee   :  { %v333_v19 = vsel %vm25_vm0, %v890_v9, 0.0  ;;  %252 = vst.msk [vmem:[#allocation2 + $0x38] sm:$0xff] %vm25_vm0, %v235_v11  ;;  %v905_v21 = vadd.f32 %v887_v56, %v264_v12  ;;  %v908_v22 = vadd.f32 %v887_v56, %v267_v16  ;;  %260 = vst.msk [vmem:[#allocation2 + $0x78] sm:$0xff] %vm25_vm0, %v243_v14  ;;  %v275_v24 = vld [vmem:[#allocation2 + $0x58] sm:$0xff]  ;;  %v918_v27 = vadd.f32 %v887_v56, %v272_v23  ;;  %v273_v29 = vld [vmem:[#allocation2 + $0x48] sm:$0xff] }
  0xef   :  { %v309_v20 = vsel %vm25_vm0, %v893_v10, 0.0  ;;  %334 = vadd.xlane.f32.xlu0 %v333_v19  ;;  %250 = vst.msk [vmem:[#allocation2 + $0x28] sm:$0xff] %vm25_vm0, %v233_v17  ;;  %258 = vst.msk [vmem:[#allocation2 + $0x68] sm:$0xff] %vm25_vm0, %v241_v18  ;;  %v921_v28 = vadd.f32 %v887_v56, %v275_v24  ;;  %v265_v30 = vld [vmem:[#allocation2 + $0x8] sm:$0xff]  ;;  %v928_v35 = vadd.f32 %v887_v56, %v273_v29 }
  0xf0   :  { %310 = vadd.xlane.f32.xlu1 %v309_v20  ;;  %v303_v25 = vsel %vm25_vm0, %v905_v21, 0.0  ;;  %v312_v26 = vsel %vm25_vm0, %v908_v22, 0.0  ;;  %v327_v33 = vsel %vm25_vm0, %v918_v27, 0.0  ;;  %v931_v36 = vadd.f32 %v887_v56, %v265_v30 }
  0xf1   :  { %v336_v34 = vsel %vm25_vm0, %v921_v28, 0.0  ;;  %v330_v39 = vsel %vm25_vm0, %v928_v35, 0.0 }
  0xf2   :  { %v306_v40 = vsel %vm25_vm0, %v931_v36, 0.0 }
  0xf3   :  { %304 = vadd.xlane.f32.xlu0 %v303_v25  ;;  %v270_v31 = vld [vmem:[#allocation2 + $0x30] sm:$0xff] }
  0xf4   :  { %313 = vadd.xlane.f32.xlu1 %v312_v26  ;;  %v934_v37 = vadd.f32 %v887_v56, %v270_v31  ;;  %v268_v41 = vld [vmem:[#allocation2 + $0x20] sm:$0xff]  ;;  %v278_v53 = vld [vmem:[#allocation2 + $0x70] sm:$0xff] }
  0xf5   :  { %v271_v32 = vld [vmem:[#allocation2 + $0x38] sm:$0xff]  ;;  %v276_v45 = vld [vmem:[#allocation2 + $0x60] sm:$0xff]  ;;  %v948_v47 = vadd.f32 %v887_v56, %v268_v41  ;;  %v968_v58 = vadd.f32 %v887_v56, %v278_v53 }
  0xf6   :  { %v937_v38 = vadd.f32 %v887_v56, %v271_v32  ;;  %v269_v42 = vld [vmem:[#allocation2 + $0x28] sm:$0xff]  ;;  %v321_v43 = vsel %vm25_vm0, %v934_v37, 0.0  ;;  %v954_v49 = vadd.f32 %v887_v56, %v276_v45  ;;  %v279_v54 = vld [vmem:[#allocation2 + $0x78] sm:$0xff] }
  0xf7   :  { %328 = vadd.xlane.f32.xlu0 %v327_v33  ;;  %v277_v46 = vld [vmem:[#allocation2 + $0x68] sm:$0xff]  ;;  %v951_v48 = vadd.f32 %v887_v56, %v269_v42  ;;  %v315_v51 = vsel %vm25_vm0, %v948_v47, 0.0  ;;  %v971_v59 = vadd.f32 %v887_v56, %v279_v54  ;;  %v345_v60 = vsel %vm25_vm0, %v968_v58, 0.0 }
  0xf8   :  { %337 = vadd.xlane.f32.xlu1 %v336_v34  ;;  %v324_v44 = vsel %vm25_vm0, %v937_v38, 0.0  ;;  %v957_v50 = vadd.f32 %v887_v56, %v277_v46  ;;  %v339_v55 = vsel %vm25_vm0, %v954_v49, 0.0 }
  0xf9   :  { %v318_v52 = vsel %vm25_vm0, %v951_v48, 0.0  ;;  %v348_v61 = vsel %vm25_vm0, %v971_v59, 0.0 }
  0xfa   :  { %v342_v57 = vsel %vm25_vm0, %v957_v50, 0.0 }
  0xfb   :  { %307 = vadd.xlane.f32.xlu0 %v306_v40 }
  0xfc   :  { %331 = vadd.xlane.f32.xlu1 %v330_v39 }
  0xff   :  { %322 = vadd.xlane.f32.xlu0 %v321_v43 }
 0x100   :  { %325 = vadd.xlane.f32.xlu1 %v324_v44 }
 0x103   :  { %316 = vadd.xlane.f32.xlu0 %v315_v51 }
 0x104   :  { %319 = vadd.xlane.f32.xlu1 %v318_v52 }
 0x107   :  { %340 = vadd.xlane.f32.xlu0 %v339_v55 }
 0x108   :  { %343 = vadd.xlane.f32.xlu1 %v342_v57 }
 0x10b   :  { %346 = vadd.xlane.f32.xlu0 %v345_v60 }
 0x10c   :  { %349 = vadd.xlane.f32.xlu1 %v348_v61 }
 0x17c   :  { %v335_v62 = vpop.xlane.xlu0 %334 }
 0x17d   :  { %v311_v63 = vpop.xlane.xlu1 %310  ;;  %v362_v0 = vmul.f32 0.0625, %v335_v62 }
 0x17e   :  { %v354_v1 = vmul.f32 0.0625, %v311_v63 }
 0x17f   :  { %v978_v2 = vsub.f32 %v890_v9, %v362_v0 }
 0x180   :  { %v981_v56 = vsub.f32 %v893_v10, %v354_v1  ;;  %v305_v3 = vpop.xlane.xlu0 %304 }
 0x181   :  { %v314_v4 = vpop.xlane.xlu1 %313  ;;  %v352_v5 = vmul.f32 0.0625, %v305_v3  ;;  %v394_v9 = vmul.f32 %v978_v2, %v978_v2 }
 0x182   :  { %v355_v6 = vmul.f32 0.0625, %v314_v4  ;;  %v386_v7 = vmul.f32 %v981_v56, %v981_v56 }
 0x183   :  { %v986_v8 = vsub.f32 %v905_v21, %v352_v5  ;;  %v430_v20 = vsel %vm25_vm0, %v394_v9, 0.0 }
 0x184   :  { %v989_v11 = vsub.f32 %v908_v22, %v355_v6  ;;  %v406_v12 = vsel %vm25_vm0, %v386_v7, 0.0  ;;  %v329_v10 = vpop.xlane.xlu0 %328 }
 0x185   :  { %v338_v13 = vpop.xlane.xlu1 %337  ;;  %407 = vadd.xlane.f32.xlu0 %v406_v12  ;;  %v360_v14 = vmul.f32 0.0625, %v329_v10  ;;  %v384_v17 = vmul.f32 %v986_v8, %v986_v8 }
 0x186   :  { %v363_v15 = vmul.f32 0.0625, %v338_v13  ;;  %v387_v16 = vmul.f32 %v989_v11, %v989_v11 }
 0x187   :  { %v999_v18 = vsub.f32 %v918_v27, %v360_v14  ;;  %v400_v29 = vsel %vm25_vm0, %v384_v17, 0.0 }
 0x188   :  { %v1002_v19 = vsub.f32 %v921_v28, %v363_v15  ;;  %v409_v21 = vsel %vm25_vm0, %v387_v16, 0.0  ;;  %v308_v23 = vpop.xlane.xlu0 %307 }
 0x189   :  { %v332_v22 = vpop.xlane.xlu1 %331  ;;  %431 = vadd.xlane.f32.xlu0 %v430_v20  ;;  %410 = vadd.xlane.f32.xlu1 %v409_v21  ;;  %v353_v25 = vmul.f32 0.0625, %v308_v23  ;;  %v392_v31 = vmul.f32 %v999_v18, %v999_v18 }
 0x18a   :  { %v361_v24 = vmul.f32 0.0625, %v332_v22  ;;  %v395_v26 = vmul.f32 %v1002_v19, %v1002_v19 }
 0x18b   :  { %v1013_v28 = vsub.f32 %v931_v36, %v353_v25  ;;  %v424_v42 = vsel %vm25_vm0, %v392_v31, 0.0 }
 0x18c   :  { %v1010_v27 = vsub.f32 %v928_v35, %v361_v24  ;;  %v433_v30 = vsel %vm25_vm0, %v395_v26, 0.0  ;;  %v323_v32 = vpop.xlane.xlu0 %322 }
 0x18d   :  { %401 = vadd.xlane.f32.xlu0 %v400_v29  ;;  %v326_v33 = vpop.xlane.xlu1 %325  ;;  %434 = vadd.xlane.f32.xlu1 %v433_v30  ;;  %v358_v34 = vmul.f32 0.0625, %v323_v32  ;;  %v385_v40 = vmul.f32 %v1013_v28, %v1013_v28 }
 0x18e   :  { %v359_v39 = vmul.f32 0.0625, %v326_v33  ;;  %v393_v35 = vmul.f32 %v1010_v27, %v1010_v27 }
 0x18f   :  { %v1023_v36 = vsub.f32 %v934_v37, %v358_v34  ;;  %v403_v43 = vsel %vm25_vm0, %v385_v40, 0.0 }
 0x190   :  { %v1026_v41 = vsub.f32 %v937_v38, %v359_v39  ;;  %v317_v44 = vpop.xlane.xlu0 %316  ;;  %v427_v53 = vsel %vm25_vm0, %v393_v35, 0.0 }
 0x191   :  { %425 = vadd.xlane.f32.xlu0 %v424_v42  ;;  %404 = vadd.xlane.f32.xlu1 %v403_v43  ;;  %v320_v45 = vpop.xlane.xlu1 %319  ;;  %v356_v46 = vmul.f32 0.0625, %v317_v44  ;;  %v390_v52 = vmul.f32 %v1023_v36, %v1023_v36 }
 0x192   :  { %v357_v51 = vmul.f32 0.0625, %v320_v45  ;;  %v391_v55 = vmul.f32 %v1026_v41, %v1026_v41  ;;  %v1076_v45 = vld [vmem:[%s1198_s3] ss:$0 sm:$0xff] }
 0x193   :  { %v1034_v37 = vsub.f32 %v948_v47, %v356_v46  ;;  %v418_v54 = vsel %vm25_vm0, %v390_v52, 0.0 }
 0x194   :  { %v1037_v38 = vsub.f32 %v951_v48, %v357_v51  ;;  %v341_v57 = vpop.xlane.xlu0 %340  ;;  %v421_v3 = vsel %vm25_vm0, %v391_v55, 0.0  ;;  %v1082_v55 = vld [vmem:[%s1199_s4] ss:$0 sm:$0xff] }
 0x195   :  { %419 = vadd.xlane.f32.xlu0 %v418_v54  ;;  %428 = vadd.xlane.f32.xlu1 %v427_v53  ;;  %v344_v60 = vpop.xlane.xlu1 %343  ;;  %v364_v61 = vmul.f32 0.0625, %v341_v57  ;;  %v388_v63 = vmul.f32 %v1034_v37, %v1034_v37 }
 0x196   :  { %v365_v62 = vmul.f32 0.0625, %v344_v60  ;;  %v389_v47 = vmul.f32 %v1037_v38, %v1037_v38 }
 0x197   :  { %v1047_v48 = vsub.f32 %v954_v49, %v364_v61  ;;  %v412_v1 = vsel %vm25_vm0, %v388_v63, 0.0 }
 0x198   :  { %v1050_v0 = vsub.f32 %v957_v50, %v365_v62  ;;  %v347_v4 = vpop.xlane.xlu0 %346  ;;  %v415_v9 = vsel %vm25_vm0, %v389_v47, 0.0 }
 0x199   :  { %413 = vadd.xlane.f32.xlu0 %v412_v1  ;;  %422 = vadd.xlane.f32.xlu1 %v421_v3  ;;  %v350_v5 = vpop.xlane.xlu1 %349  ;;  %v366_v6 = vmul.f32 0.0625, %v347_v4  ;;  %v396_v12 = vmul.f32 %v1047_v48, %v1047_v48 }
 0x19a   :  { %v367_v7 = vmul.f32 0.0625, %v350_v5  ;;  %v397_v13 = vmul.f32 %v1050_v0, %v1050_v0 }
 0x19b   :  { %v1058_v49 = vsub.f32 %v968_v58, %v366_v6  ;;  %v436_v10 = vsel %vm25_vm0, %v396_v12, 0.0 }
 0x19c   :  { %v1061_v50 = vsub.f32 %v971_v59, %v367_v7  ;;  %v439_v16 = vsel %vm25_vm0, %v397_v13, 0.0 }
 0x19d   :  { %437 = vadd.xlane.f32.xlu0 %v436_v10  ;;  %416 = vadd.xlane.f32.xlu1 %v415_v9  ;;  %v398_v14 = vmul.f32 %v1058_v49, %v1058_v49 }
 0x19e   :  { %v399_v58 = vmul.f32 %v1061_v50, %v1061_v50 }
 0x19f   :  { %v442_v15 = vsel %vm25_vm0, %v398_v14, 0.0 }
 0x1a0   :  { %v445_v59 = vsel %vm25_vm0, %v399_v58, 0.0 }
 0x1a1   :  { %443 = vadd.xlane.f32.xlu0 %v442_v15  ;;  %440 = vadd.xlane.f32.xlu1 %v439_v16 }
 0x1a5   :  { %446 = vadd.xlane.f32.xlu1 %v445_v59 }
 0x212   :  { %v408_v17 = vpop.xlane.xlu0 %407 }
 0x213   :  { %v450_v20 = vmul.f32 0.0625, %v408_v17 }
 0x215   :  { %v466_v21 = vadd.f32 1e-05, %v450_v20 }
 0x216   :  { %v432_v22 = vpop.xlane.xlu0 %431  ;;  %v411_v23 = vpop.xlane.xlu1 %410 }
 0x217   :  { %732 = vrsqrt.f32 %v466_v21  ;;  %v458_v24 = vmul.f32 0.0625, %v432_v22  ;;  %v451_v25 = vmul.f32 0.0625, %v411_v23 }
 0x219   :  { %v474_v26 = vadd.f32 1e-05, %v458_v24  ;;  %v467_v29 = vadd.f32 1e-05, %v451_v25 }
 0x21a   :  { %v402_v30 = vpop.xlane.xlu0 %401  ;;  %v435_v31 = vpop.xlane.xlu1 %434 }
 0x21b   :  { %734 = vrsqrt.f32 %v474_v26  ;;  %v448_v32 = vmul.f32 0.0625, %v402_v30  ;;  %v459_v33 = vmul.f32 0.0625, %v435_v31 }
 0x21c   :  { %736 = vrsqrt.f32 %v467_v29 }
 0x21d   :  { %v464_v34 = vadd.f32 1e-05, %v448_v32  ;;  %v475_v39 = vadd.f32 1e-05, %v459_v33 }
 0x21e   :  { %v426_v40 = vpop.xlane.xlu0 %425  ;;  %v405_v35 = vpop.xlane.xlu1 %404 }
 0x21f   :  { %738 = vrsqrt.f32 %v464_v34  ;;  %v456_v42 = vmul.f32 0.0625, %v426_v40  ;;  %v449_v43 = vmul.f32 0.0625, %v405_v35 }
 0x220   :  { %740 = vrsqrt.f32 %v475_v39 }
 0x221   :  { %v733_v44 = vpop.eup %732  ;;  %v472_v46 = vadd.f32 1e-05, %v456_v42  ;;  %v465_v51 = vadd.f32 1e-05, %v449_v43 }
 0x222   :  { %v498_v52 = vmul.f32 %v733_v44, %v981_v56  ;;  %v420_v53 = vpop.xlane.xlu0 %419  ;;  %v429_v54 = vpop.xlane.xlu1 %428 }
 0x223   :  { %742 = vrsqrt.f32 %v472_v46  ;;  %v454_v57 = vmul.f32 0.0625, %v420_v53  ;;  %v457_v60 = vmul.f32 0.0625, %v429_v54 }
 0x224   :  { %v521_v61 = vmul.f32 %v1076_v45, %v498_v52  ;;  %744 = vrsqrt.f32 %v465_v51 }
 0x225   :  { %v735_v62 = vpop.eup %734  ;;  %v470_v63 = vadd.f32 1e-05, %v454_v57  ;;  %v473_v47 = vadd.f32 1e-05, %v457_v60 }
 0x226   :  { %v737_v1 = vpop.eup %736  ;;  %v544_v56 = vadd.f32 %v1082_v55, %v521_v61  ;;  %v506_v3 = vmul.f32 %v735_v62, %v978_v2  ;;  %v414_v4 = vpop.xlane.xlu0 %413 }
 0x227   :  { %v423_v5 = vpop.xlane.xlu1 %422  ;;  %v499_v6 = vmul.f32 %v737_v1, %v989_v11  ;;  %746 = vrsqrt.f32 %v470_v63  ;;  %v452_v7 = vmul.f32 0.0625, %v414_v4 }
 0x228   :  { %v455_v12 = vmul.f32 0.0625, %v423_v5  ;;  %v675_v9 = vpack.c.bf16 %v544_v56, %v544_v56  ;;  %v529_v10 = vmul.f32 %v1076_v45, %v506_v3  ;;  %748 = vrsqrt.f32 %v473_v47 }
 0x229   :  { %v739_v13 = vpop.eup %738  ;;  %v522_v14 = vmul.f32 %v1076_v45, %v499_v6  ;;  %v468_v15 = vadd.f32 1e-05, %v452_v7 }
 0x22a   :  { %v471_v16 = vadd.f32 1e-05, %v455_v12  ;;  %v741_v58 = vpop.eup %740  ;;  %625 = vst.msk [vmem:[%s1200_s5 + $0x8] sm:$0xf] %vm622_vm2, %v675_v9  ;;  %v552_v2 = vadd.f32 %v1082_v55, %v529_v10  ;;  %v496_v11 = vmul.f32 %v739_v13, %v986_v8  ;;  %v438_v59 = vpop.xlane.xlu0 %437 }
 0x22b   :  { %v417_v17 = vpop.xlane.xlu1 %416  ;;  %v545_v20 = vadd.f32 %v1082_v55, %v522_v14  ;;  %v507_v21 = vmul.f32 %v741_v58, %v1002_v19  ;;  %750 = vrsqrt.f32 %v468_v15  ;;  %v460_v22 = vmul.f32 0.0625, %v438_v59 }
 0x22c   :  { %v683_v23 = vpack.c.bf16 %v552_v2, %v552_v2  ;;  %v519_v24 = vmul.f32 %v1076_v45, %v496_v11  ;;  %752 = vrsqrt.f32 %v471_v16  ;;  %v453_v25 = vmul.f32 0.0625, %v417_v17 }
 0x22d   :  { %v743_v26 = vpop.eup %742  ;;  %v676_v29 = vpack.c.bf16 %v545_v20, %v545_v20  ;;  %v530_v30 = vmul.f32 %v1076_v45, %v507_v21  ;;  %v476_v31 = vadd.f32 1e-05, %v460_v22 }
 0x22e   :  { %v745_v32 = vpop.eup %744  ;;  %633 = vst.msk [vmem:[%s1200_s5 + $0x28] sm:$0xf] %vm622_vm2, %v683_v23  ;;  %v542_v8 = vadd.f32 %v1082_v55, %v519_v24  ;;  %v504_v19 = vmul.f32 %v743_v26, %v999_v18  ;;  %v469_v33 = vadd.f32 1e-05, %v453_v25  ;;  %v444_v34 = vpop.xlane.xlu0 %443 }
 0x22f   :  { %v441_v39 = vpop.xlane.xlu1 %440  ;;  %626 = vst.msk [vmem:[%s1200_s5 + $0xc] sm:$0xf] %vm622_vm2, %v676_v29  ;;  %v553_v40 = vadd.f32 %v1082_v55, %v530_v30  ;;  %v497_v35 = vmul.f32 %v745_v32, %v1013_v28  ;;  %754 = vrsqrt.f32 %v476_v31  ;;  %v462_v42 = vmul.f32 0.0625, %v444_v34 }
 0x230   :  { %v673_v43 = vpack.c.bf16 %v542_v8, %v542_v8  ;;  %v527_v44 = vmul.f32 %v1076_v45, %v504_v19  ;;  %756 = vrsqrt.f32 %v469_v33  ;;  %v461_v46 = vmul.f32 0.0625, %v441_v39 }
 0x231   :  { %v747_v18 = vpop.eup %746  ;;  %v684_v51 = vpack.c.bf16 %v553_v40, %v553_v40  ;;  %v520_v52 = vmul.f32 %v1076_v45, %v497_v35  ;;  %v478_v53 = vadd.f32 1e-05, %v462_v42 }
 0x232   :  { %v749_v54 = vpop.eup %748  ;;  %623 = vst.msk [vmem:[%s1200_s5] sm:$0xf] %vm622_vm2, %v673_v43  ;;  %v550_v28 = vadd.f32 %v1082_v55, %v527_v44  ;;  %v502_v57 = vmul.f32 %v747_v18, %v1023_v36  ;;  %v477_v60 = vadd.f32 1e-05, %v461_v46 }
 0x233   :  { %v447_v61 = vpop.xlane.xlu1 %446  ;;  %634 = vst.msk [vmem:[%s1200_s5 + $0x2c] sm:$0xf] %vm622_vm2, %v684_v51  ;;  %v543_v62 = vadd.f32 %v1082_v55, %v520_v52  ;;  %v505_v63 = vmul.f32 %v749_v54, %v1010_v27  ;;  %758 = vrsqrt.f32 %v478_v53 }
 0x234   :  { %v463_v47 = vmul.f32 0.0625, %v447_v61  ;;  %v681_v1 = vpack.c.bf16 %v550_v28, %v550_v28  ;;  %v525_v56 = vmul.f32 %v1076_v45, %v502_v57  ;;  %760 = vrsqrt.f32 %v477_v60 }
 0x235   :  { %v751_v3 = vpop.eup %750  ;;  %v674_v4 = vpack.c.bf16 %v543_v62, %v543_v62  ;;  %v528_v36 = vmul.f32 %v1076_v45, %v505_v63 }
 0x236   :  { %v479_v5 = vadd.f32 1e-05, %v463_v47  ;;  %v753_v6 = vpop.eup %752  ;;  %631 = vst.msk [vmem:[%s1200_s5 + $0x20] sm:$0xf] %vm622_vm2, %v681_v1  ;;  %v548_v7 = vadd.f32 %v1082_v55, %v525_v56  ;;  %v500_v27 = vmul.f32 %v751_v3, %v1034_v37 }
 0x237   :  { %624 = vst.msk [vmem:[%s1200_s5 + $0x4] sm:$0xf] %vm622_vm2, %v674_v4  ;;  %v551_v12 = vadd.f32 %v1082_v55, %v528_v36  ;;  %v503_v9 = vmul.f32 %v753_v6, %v1026_v41 }
 0x238   :  { %762 = vrsqrt.f32 %v479_v5  ;;  %v679_v10 = vpack.c.bf16 %v548_v7, %v548_v7  ;;  %v523_v13 = vmul.f32 %v1076_v45, %v500_v27 }
 0x239   :  { %v755_v14 = vpop.eup %754  ;;  %v682_v15 = vpack.c.bf16 %v551_v12, %v551_v12  ;;  %v526_v16 = vmul.f32 %v1076_v45, %v503_v9 }
 0x23a   :  { %v757_v58 = vpop.eup %756  ;;  %629 = vst.msk [vmem:[%s1200_s5 + $0x18] sm:$0xf] %vm622_vm2, %v679_v10  ;;  %v546_v37 = vadd.f32 %v1082_v55, %v523_v13  ;;  %v508_v2 = vmul.f32 %v755_v14, %v1047_v48 }
 0x23b   :  { %632 = vst.msk [vmem:[%s1200_s5 + $0x24] sm:$0xf] %vm622_vm2, %v682_v15  ;;  %v549_v41 = vadd.f32 %v1082_v55, %v526_v16  ;;  %v501_v11 = vmul.f32 %v757_v58, %v1037_v38 }
 0x23c   :  { %v677_v59 = vpack.c.bf16 %v546_v37, %v546_v37  ;;  %v531_v17 = vmul.f32 %v1076_v45, %v508_v2 }
 0x23d   :  { %v759_v20 = vpop.eup %758  ;;  %v680_v21 = vpack.c.bf16 %v549_v41, %v549_v41  ;;  %v524_v22 = vmul.f32 %v1076_v45, %v501_v11 }
 0x23e   :  { %v761_v23 = vpop.eup %760  ;;  %627 = vst.msk [vmem:[%s1200_s5 + $0x10] sm:$0xf] %vm622_vm2, %v677_v59  ;;  %v554_v48 = vadd.f32 %v1082_v55, %v531_v17  ;;  %v510_v24 = vmul.f32 %v759_v20, %v1058_v49 }
 0x23f   :  { %630 = vst.msk [vmem:[%s1200_s5 + $0x1c] sm:$0xf] %vm622_vm2, %v680_v21  ;;  %v547_v38 = vadd.f32 %v1082_v55, %v524_v22  ;;  %v509_v25 = vmul.f32 %v761_v23, %v1050_v0 }
 0x240   :  { %v685_v26 = vpack.c.bf16 %v554_v48, %v554_v48  ;;  %v533_v29 = vmul.f32 %v1076_v45, %v510_v24 }
 0x241   :  { %v678_v31 = vpack.c.bf16 %v547_v38, %v547_v38  ;;  %v532_v32 = vmul.f32 %v1076_v45, %v509_v25 }
 0x242   :  { %v763_v30 = vpop.eup %762  ;;  %635 = vst.msk [vmem:[%s1200_s5 + $0x30] sm:$0xf] %vm622_vm2, %v685_v26  ;;  %v556_v49 = vadd.f32 %v1082_v55, %v533_v29 }
 0x243   :  { %v511_v8 = vmul.f32 %v763_v30, %v1061_v50  ;;  %628 = vst.msk [vmem:[%s1200_s5 + $0x14] sm:$0xf] %vm622_vm2, %v678_v31  ;;  %v555_v0 = vadd.f32 %v1082_v55, %v532_v32 }
 0x244   :  { %v687_v19 = vpack.c.bf16 %v556_v49, %v556_v49 }
 0x245   :  { %v534_v33 = vmul.f32 %v1076_v45, %v511_v8  ;;  %v686_v34 = vpack.c.bf16 %v555_v0, %v555_v0 }
 0x246   :  { %637 = vst.msk [vmem:[%s1200_s5 + $0x38] sm:$0xf] %vm622_vm2, %v687_v19 }
 0x247   :  { %v557_v39 = vadd.f32 %v1082_v55, %v534_v33  ;;  %636 = vst.msk [vmem:[%s1200_s5 + $0x34] sm:$0xf] %vm622_vm2, %v686_v34 }
 0x249   :  { %v688_v50 = vpack.c.bf16 %v557_v39, %v557_v39 }
 0x24b   :  { %638 = vst.msk [vmem:[%s1200_s5 + $0x3c] sm:$0xf] %vm622_vm2, %v688_v50 }

// kernel: _lambda_.23
= control target key start
LH: loop header
LB: loop body
LE: loop exit
PB: predicated region body
PF: predicated region fallthrough
CT: control target
= control target key end

     0   :  { %vm19_vm0 = vcmask 392192   ;;  %v487_v1 = vmov 0.0   ;;  %vm116_vm1 = vcmask 130048   ;;  %vm377_vm2 = vcmask 388096   ;;  %s660_s1 = inlined_call_operand.vmem [shape: bf16[16,48], index: 1, kind: input, shape index: {}]   ;;  %s661_s0 = inlined_call_operand.vmem [shape: bf16[128,16], index: 0, kind: input, shape index: {}]   ;;  %s662_s2 = inlined_call_operand.vmem [shape: f32[1,48], index: 2, kind: input, shape index: {}]   ;;  %s663_s3 = inlined_call_operand.vmem [shape: bf16[128,48], index: 3, kind: output, shape index: {}]  }
   0x1   :  { %v478_v0 = vld [vmem:[%s660_s1] sm:$0xff]   ;;  %22 = vst.msk [vmem:[#allocation2 + $0x10] sm:$0xff] %vm19_vm0, %v487_v1  ;;  %20 = vst.msk [vmem:[#allocation2] sm:$0xff] %vm19_vm0, %v487_v1  ;;  %v481_v4 = vld [vmem:[%s661_s0 + $0x8] sm:$0xff]  }
   0x2   :  { %21 = vst.msk [vmem:[#allocation2 + $0x8] sm:$0xff] %vm19_vm0, %v487_v1  ;;  %23 = vst.msk [vmem:[#allocation2 + $0x18] sm:$0xff] %vm19_vm0, %v487_v1  ;;  %v479_v2 = vld [vmem:[%s661_s0] sm:$0xff]   ;;  %457 = vmatprep.subr.bf16.mxu0 %v478_v0  ;;  %475 = vmatprep.subr.bf16.mxu1 %v478_v0  ;;  %v482_v5 = vld [vmem:[%s661_s0 + $0x28] sm:$0xff]  }
   0x3   :  { %24 = vst.msk [vmem:[#allocation2 + $0x20] sm:$0xff] %vm19_vm0, %v487_v1  ;;  %25 = vst.msk [vmem:[#allocation2 + $0x28] sm:$0xff] %vm19_vm0, %v487_v1  ;;  %v480_v3 = vld [vmem:[%s661_s0 + $0x20] sm:$0xff]   ;;  %458 = vmatpush3.bf16.msra.mxu0 %v478_v0  ;;  %476 = vmatpush3.bf16.msra.mxu1 %v478_v0  ;;  %v483_v6 = vld [vmem:[%s661_s0 + $0x10] sm:$0xff]  }
   0x4   :  { %26 = vst.msk [vmem:[#allocation2 + $0x30] sm:$0xff] %vm19_vm0, %v487_v1  ;;  %27 = vst.msk [vmem:[#allocation2 + $0x38] sm:$0xff] %vm19_vm0, %v487_v1  ;;  %459 = vmatprep.mubr.msk.bf16.mxu0 %vm116_vm1, %v479_v2  ;;  %467 = vmatprep.mubr.msk.bf16.mxu1 %vm116_vm1, %v480_v3  ;;  %v484_v7 = vld [vmem:[%s661_s0 + $0x30] sm:$0xff]   ;;  %v485_v8 = vld [vmem:[%s661_s0 + $0x18] sm:$0xff]  }
   0x5   :  { %28 = vst.msk [vmem:[#allocation2 + $0x40] sm:$0xff] %vm19_vm0, %v487_v1  ;;  %29 = vst.msk [vmem:[#allocation2 + $0x48] sm:$0xff] %vm19_vm0, %v487_v1  ;;  %v486_v9 = vld [vmem:[%s661_s0 + $0x38] sm:$0xff]   ;;  %v570_v38 = vld [vmem:[%s662_s2] ss:$0 sm:$0xff] }
   0x6   :  { %30 = vst.msk [vmem:[#allocation2 + $0x50] sm:$0xff] %vm19_vm0, %v487_v1  ;;  %31 = vst.msk [vmem:[#allocation2 + $0x58] sm:$0xff] %vm19_vm0, %v487_v1  ;;  %460 = vmatmul.mubr.msk.bf16.vlgmr.msra.gmra.mrb[0].mxu0 %vm116_vm1, %v481_v4  ;;  %468 = vmatmul.mubr.msk.bf16.vlgmr.msra.gmra.mrb[0].mxu1 %vm116_vm1, %v482_v5 }
   0x7   :  { %32 = vst.msk [vmem:[#allocation2 + $0x60] sm:$0xff] %vm19_vm0, %v487_v1  ;;  %33 = vst.msk [vmem:[#allocation2 + $0x68] sm:$0xff] %vm19_vm0, %v487_v1  ;;  %463 = vmatprep.mubr.msk.bf16.mxu0 %vm116_vm1, %v483_v6  ;;  %471 = vmatprep.mubr.msk.bf16.mxu1 %vm116_vm1, %v484_v7 }
   0x8   :  { %34 = vst.msk [vmem:[#allocation2 + $0x70] sm:$0xff] %vm19_vm0, %v487_v1  ;;  %35 = vst.msk [vmem:[#allocation2 + $0x78] sm:$0xff] %vm19_vm0, %v487_v1  ;;  %v38_v10 = vld [vmem:[#allocation2 + $0x10] sm:$0xff]  ;;  %v36_v12 = vld [vmem:[#allocation2] sm:$0xff] }
   0x9   :  { %v39_v16 = vld [vmem:[#allocation2 + $0x18] sm:$0xff]  ;;  %v37_v22 = vld [vmem:[#allocation2 + $0x8] sm:$0xff] }
   0xa   :  { %v40_v36 = vld [vmem:[#allocation2 + $0x20] sm:$0xff]  ;;  %v41_v47 = vld [vmem:[#allocation2 + $0x28] sm:$0xff] }
   0xb   :  { %v42_v34 = vld [vmem:[#allocation2 + $0x30] sm:$0xff]  ;;  %v43_v41 = vld [vmem:[#allocation2 + $0x38] sm:$0xff] }
   0xc   :  { %v44_v13 = vld [vmem:[#allocation2 + $0x40] sm:$0xff]  ;;  %v45_v23 = vld [vmem:[#allocation2 + $0x48] sm:$0xff] }
   0xd   :  { %v46_v11 = vld [vmem:[#allocation2 + $0x50] sm:$0xff]  ;;  %v47_v17 = vld [vmem:[#allocation2 + $0x58] sm:$0xff] }
   0xe   :  { %464 = vmatmul.mubr.msk.bf16.gmra.mrb[4].mxu0 %vm116_vm1, %v485_v8  ;;  %472 = vmatmul.mubr.msk.bf16.gmra.mrb[4].mxu1 %vm116_vm1, %v486_v9  ;;  %v48_v37 = vld [vmem:[#allocation2 + $0x60] sm:$0xff]  ;;  %v49_v48 = vld [vmem:[#allocation2 + $0x68] sm:$0xff] }
   0xf   :  { %v50_v35 = vld [vmem:[#allocation2 + $0x70] sm:$0xff]  ;;  %v51_v42 = vld [vmem:[#allocation2 + $0x78] sm:$0xff] }
  0xd9   :  { %v461_v14 = vpop.f32.mrb[0].mxu0  ;;  %v469_v15 = vpop.f32.mrb[0].mxu1 }
  0xda   :  { %v240_v18 = vadd.f32 %v461_v14, %v38_v10  ;;  %v248_v19 = vadd.f32 %v469_v15, %v46_v11  ;;  %v175_v20 = vpop.f32.mrb[1].mxu0  ;;  %v207_v21 = vpop.f32.mrb[1].mxu1 }
  0xdb   :  { %v238_v24 = vadd.f32 %v175_v20, %v36_v12  ;;  %v246_v25 = vadd.f32 %v207_v21, %v44_v13  ;;  %v462_v26 = vpop.f32.mrb[2].mxu0  ;;  %v470_v27 = vpop.f32.mrb[2].mxu1 }
  0xdc   :  { %257 = vst.msk [vmem:[#allocation2 + $0x10] sm:$0xff] %vm19_vm0, %v240_v18  ;;  %265 = vst.msk [vmem:[#allocation2 + $0x50] sm:$0xff] %vm19_vm0, %v248_v19  ;;  %v241_v28 = vadd.f32 %v462_v26, %v39_v16  ;;  %v249_v29 = vadd.f32 %v470_v27, %v47_v17  ;;  %v178_v30 = vpop.f32.mrb[3].mxu0  ;;  %v210_v31 = vpop.f32.mrb[3].mxu1 }
  0xdd   :  { %255 = vst.msk [vmem:[#allocation2] sm:$0xff] %vm19_vm0, %v238_v24  ;;  %263 = vst.msk [vmem:[#allocation2 + $0x40] sm:$0xff] %vm19_vm0, %v246_v25  ;;  %v239_v32 = vadd.f32 %v178_v30, %v37_v22  ;;  %v247_v33 = vadd.f32 %v210_v31, %v45_v23 }
  0xde   :  { %258 = vst.msk [vmem:[#allocation2 + $0x18] sm:$0xff] %vm19_vm0, %v241_v28  ;;  %266 = vst.msk [vmem:[#allocation2 + $0x58] sm:$0xff] %vm19_vm0, %v249_v29 }
  0xdf   :  { %256 = vst.msk [vmem:[#allocation2 + $0x8] sm:$0xff] %vm19_vm0, %v239_v32  ;;  %264 = vst.msk [vmem:[#allocation2 + $0x48] sm:$0xff] %vm19_vm0, %v247_v33 }
  0xe1   :  { %v465_v39 = vpop.f32.mrb[4].mxu0  ;;  %v473_v40 = vpop.f32.mrb[4].mxu1 }
  0xe2   :  { %v244_v43 = vadd.f32 %v465_v39, %v42_v34  ;;  %v252_v44 = vadd.f32 %v473_v40, %v50_v35  ;;  %v191_v45 = vpop.f32.mrb[5].mxu0  ;;  %v223_v46 = vpop.f32.mrb[5].mxu1 }
  0xe3   :  { %v276_v49 = vld [vmem:[#allocation2 + $0x10] sm:$0xff]  ;;  %v242_v51 = vadd.f32 %v191_v45, %v40_v36  ;;  %v250_v52 = vadd.f32 %v223_v46, %v48_v37  ;;  %v466_v53 = vpop.f32.mrb[6].mxu0  ;;  %v474_v54 = vpop.f32.mrb[6].mxu1 }
  0xe4   :  { %v284_v50 = vld [vmem:[#allocation2 + $0x50] sm:$0xff]  ;;  %v299_v55 = vadd.f32 %v570_v38, %v276_v49  ;;  %v274_v57 = vld [vmem:[#allocation2] sm:$0xff]  ;;  %261 = vst.msk [vmem:[#allocation2 + $0x30] sm:$0xff] %vm19_vm0, %v244_v43  ;;  %269 = vst.msk [vmem:[#allocation2 + $0x70] sm:$0xff] %vm19_vm0, %v252_v44  ;;  %v245_v59 = vadd.f32 %v466_v53, %v43_v41  ;;  %v253_v60 = vadd.f32 %v474_v54, %v51_v42  ;;  %v194_v61 = vpop.f32.mrb[7].mxu0  ;;  %v226_v62 = vpop.f32.mrb[7].mxu1 }
  0xe5   :  { %v307_v56 = vadd.f32 %v570_v38, %v284_v50  ;;  %v282_v58 = vld [vmem:[#allocation2 + $0x40] sm:$0xff]  ;;  %v297_v63 = vadd.f32 %v570_v38, %v274_v57  ;;  %v277_v1 = vld [vmem:[#allocation2 + $0x18] sm:$0xff]  ;;  %259 = vst.msk [vmem:[#allocation2 + $0x20] sm:$0xff] %vm19_vm0, %v242_v51  ;;  %267 = vst.msk [vmem:[#allocation2 + $0x60] sm:$0xff] %vm19_vm0, %v250_v52  ;;  %v243_v3 = vadd.f32 %v194_v61, %v41_v47 }
  0xe6   :  { %v305_v0 = vadd.f32 %v570_v38, %v282_v58  ;;  %v285_v2 = vld [vmem:[#allocation2 + $0x58] sm:$0xff]  ;;  %v251_v4 = vadd.f32 %v226_v62, %v49_v48  ;;  %v434_v5 = vpack.c.bf16 %v299_v55, %v299_v55  ;;  %v300_v7 = vadd.f32 %v570_v38, %v277_v1  ;;  %v275_v9 = vld [vmem:[#allocation2 + $0x8] sm:$0xff]  ;;  %262 = vst.msk [vmem:[#allocation2 + $0x38] sm:$0xff] %vm19_vm0, %v245_v59 }
  0xe7   :  { %v442_v6 = vpack.c.bf16 %v307_v56, %v307_v56  ;;  %v308_v8 = vadd.f32 %v570_v38, %v285_v2  ;;  %v283_v10 = vld [vmem:[#allocation2 + $0x48] sm:$0xff]  ;;  %270 = vst.msk [vmem:[#allocation2 + $0x78] sm:$0xff] %vm19_vm0, %v253_v60  ;;  %v432_v11 = vpack.c.bf16 %v297_v63, %v297_v63  ;;  %v298_v13 = vadd.f32 %v570_v38, %v275_v9 }
  0xe8   :  { %v440_v12 = vpack.c.bf16 %v305_v0, %v305_v0  ;;  %v306_v14 = vadd.f32 %v570_v38, %v283_v10  ;;  %260 = vst.msk [vmem:[#allocation2 + $0x28] sm:$0xff] %vm19_vm0, %v243_v3  ;;  %268 = vst.msk [vmem:[#allocation2 + $0x68] sm:$0xff] %vm19_vm0, %v251_v4  ;;  %v435_v15 = vpack.c.bf16 %v300_v7, %v300_v7 }
  0xe9   :  { %380 = vst.msk [vmem:[%s663_s3 + $0x8] sm:$0xf] %vm377_vm2, %v434_v5  ;;  %388 = vst.msk [vmem:[%s663_s3 + $0x28] sm:$0xf] %vm377_vm2, %v442_v6  ;;  %v443_v16 = vpack.c.bf16 %v308_v8, %v308_v8  ;;  %v433_v17 = vpack.c.bf16 %v298_v13, %v298_v13 }
  0xea   :  { %378 = vst.msk [vmem:[%s663_s3] sm:$0xf] %vm377_vm2, %v432_v11  ;;  %386 = vst.msk [vmem:[%s663_s3 + $0x20] sm:$0xf] %vm377_vm2, %v440_v12  ;;  %v441_v18 = vpack.c.bf16 %v306_v14, %v306_v14 }
  0xeb   :  { %381 = vst.msk [vmem:[%s663_s3 + $0xc] sm:$0xf] %vm377_vm2, %v435_v15  ;;  %389 = vst.msk [vmem:[%s663_s3 + $0x2c] sm:$0xf] %vm377_vm2, %v443_v16  ;;  %v280_v19 = vld [vmem:[#allocation2 + $0x30] sm:$0xff] }
  0xec   :  { %379 = vst.msk [vmem:[%s663_s3 + $0x4] sm:$0xf] %vm377_vm2, %v433_v17  ;;  %387 = vst.msk [vmem:[%s663_s3 + $0x24] sm:$0xf] %vm377_vm2, %v441_v18  ;;  %v288_v20 = vld [vmem:[#allocation2 + $0x70] sm:$0xff]  ;;  %v303_v21 = vadd.f32 %v570_v38, %v280_v19  ;;  %v278_v23 = vld [vmem:[#allocation2 + $0x20] sm:$0xff] }
  0xed   :  { %v311_v22 = vadd.f32 %v570_v38, %v288_v20  ;;  %v286_v24 = vld [vmem:[#allocation2 + $0x60] sm:$0xff]  ;;  %v301_v25 = vadd.f32 %v570_v38, %v278_v23  ;;  %v281_v27 = vld [vmem:[#allocation2 + $0x38] sm:$0xff] }
  0xee   :  { %v309_v26 = vadd.f32 %v570_v38, %v286_v24  ;;  %v289_v28 = vld [vmem:[#allocation2 + $0x78] sm:$0xff]  ;;  %v438_v29 = vpack.c.bf16 %v303_v21, %v303_v21  ;;  %v304_v31 = vadd.f32 %v570_v38, %v281_v27 }
  0xef   :  { %v446_v30 = vpack.c.bf16 %v311_v22, %v311_v22  ;;  %v312_v32 = vadd.f32 %v570_v38, %v289_v28  ;;  %v279_v33 = vld [vmem:[#allocation2 + $0x28] sm:$0xff]  ;;  %v436_v35 = vpack.c.bf16 %v301_v25, %v301_v25 }
  0xf0   :  { %v287_v34 = vld [vmem:[#allocation2 + $0x68] sm:$0xff]  ;;  %v444_v36 = vpack.c.bf16 %v309_v26, %v309_v26  ;;  %v302_v37 = vadd.f32 %v570_v38, %v279_v33  ;;  %384 = vst.msk [vmem:[%s663_s3 + $0x18] sm:$0xf] %vm377_vm2, %v438_v29  ;;  %v439_v40 = vpack.c.bf16 %v304_v31, %v304_v31 }
  0xf1   :  { %v310_v39 = vadd.f32 %v570_v38, %v287_v34  ;;  %392 = vst.msk [vmem:[%s663_s3 + $0x38] sm:$0xf] %vm377_vm2, %v446_v30  ;;  %v447_v41 = vpack.c.bf16 %v312_v32, %v312_v32  ;;  %382 = vst.msk [vmem:[%s663_s3 + $0x10] sm:$0xf] %vm377_vm2, %v436_v35 }
  0xf2   :  { %390 = vst.msk [vmem:[%s663_s3 + $0x30] sm:$0xf] %vm377_vm2, %v444_v36  ;;  %v437_v38 = vpack.c.bf16 %v302_v37, %v302_v37  ;;  %385 = vst.msk [vmem:[%s663_s3 + $0x1c] sm:$0xf] %vm377_vm2, %v439_v40 }
  0xf3   :  { %v445_v42 = vpack.c.bf16 %v310_v39, %v310_v39  ;;  %393 = vst.msk [vmem:[%s663_s3 + $0x3c] sm:$0xf] %vm377_vm2, %v447_v41 }
  0xf4   :  { %383 = vst.msk [vmem:[%s663_s3 + $0x14] sm:$0xf] %vm377_vm2, %v437_v38 }
  0xf5   :  { %391 = vst.msk [vmem:[%s663_s3 + $0x34] sm:$0xf] %vm377_vm2, %v445_v42 }

// kernel: _lambda_.25
= control target key start
LH: loop header
LB: loop body
LE: loop exit
PB: predicated region body
PF: predicated region fallthrough
CT: control target
= control target key end

     0   :  { %vm28_vm0 = vcmask 130048   ;;  %v871_v1 = vmov 0.0   ;;  %vm688_vm1 = vcmask 125952   ;;  %s1317_s1 = inlined_call_operand.vmem [shape: bf16[16,16], index: 1, kind: input, shape index: {}]   ;;  %s1318_s0 = inlined_call_operand.vmem [shape: bf16[128,16], index: 0, kind: input, shape index: {}]   ;;  %s1319_s2 = inlined_call_operand.vmem [shape: f32[1,16], index: 2, kind: input, shape index: {}, may-alias: {2,4}]   ;;  %s1320_s3 = inlined_call_operand.vmem [shape: f32[1,16], index: 3, kind: input, shape index: {}]   ;;  %s1321_s5 = inlined_call_operand.vmem [shape: bf16[128,16], index: 5, kind: input, shape index: {}]   ;;  %s1322_s4 = inlined_call_operand.vmem [shape: f32[1,16], index: 4, kind: input, shape index: {}, may-alias: {2,4}]   ;;  %s1323_s6 = inlined_call_operand.vmem [shape: bf16[128,16], index: 6, kind: output, shape index: {}]  }
   0x1   :  { %v830_v0 = vld [vmem:[%s1317_s1] sm:$0xff]   ;;  %31 = vst.msk [vmem:[#allocation2 + $0x10] sm:$0xff] %vm28_vm0, %v871_v1  ;;  %29 = vst.msk [vmem:[#allocation2] sm:$0xff] %vm28_vm0, %v871_v1  ;;  %v833_v4 = vld [vmem:[%s1318_s0 + $0x8] sm:$0xff]  }
   0x2   :  { %30 = vst.msk [vmem:[#allocation2 + $0x8] sm:$0xff] %vm28_vm0, %v871_v1  ;;  %32 = vst.msk [vmem:[#allocation2 + $0x18] sm:$0xff] %vm28_vm0, %v871_v1  ;;  %v831_v2 = vld [vmem:[%s1318_s0] sm:$0xff]   ;;  %809 = vmatprep.subr.bf16.mxu0 %v830_v0  ;;  %827 = vmatprep.subr.bf16.mxu1 %v830_v0  ;;  %v834_v5 = vld [vmem:[%s1318_s0 + $0x28] sm:$0xff]  }
   0x3   :  { %33 = vst.msk [vmem:[#allocation2 + $0x20] sm:$0xff] %vm28_vm0, %v871_v1  ;;  %34 = vst.msk [vmem:[#allocation2 + $0x28] sm:$0xff] %vm28_vm0, %v871_v1  ;;  %v832_v3 = vld [vmem:[%s1318_s0 + $0x20] sm:$0xff]   ;;  %810 = vmatpush3.bf16.msra.mxu0 %v830_v0  ;;  %828 = vmatpush3.bf16.msra.mxu1 %v830_v0  ;;  %v835_v6 = vld [vmem:[%s1318_s0 + $0x10] sm:$0xff]  }
   0x4   :  { %35 = vst.msk [vmem:[#allocation2 + $0x30] sm:$0xff] %vm28_vm0, %v871_v1  ;;  %36 = vst.msk [vmem:[#allocation2 + $0x38] sm:$0xff] %vm28_vm0, %v871_v1  ;;  %811 = vmatprep.mubr.msk.bf16.mxu0 %vm28_vm0, %v831_v2  ;;  %819 = vmatprep.mubr.msk.bf16.mxu1 %vm28_vm0, %v832_v3  ;;  %v837_v7 = vld [vmem:[%s1318_s0 + $0x30] sm:$0xff]   ;;  %v836_v8 = vld [vmem:[%s1318_s0 + $0x18] sm:$0xff]  }
   0x5   :  { %37 = vst.msk [vmem:[#allocation2 + $0x40] sm:$0xff] %vm28_vm0, %v871_v1  ;;  %38 = vst.msk [vmem:[#allocation2 + $0x48] sm:$0xff] %vm28_vm0, %v871_v1  ;;  %v838_v9 = vld [vmem:[%s1318_s0 + $0x38] sm:$0xff]   ;;  %v969_v38 = vld [vmem:[%s1319_s2] ss:$0 sm:$0xff] }
   0x6   :  { %39 = vst.msk [vmem:[#allocation2 + $0x50] sm:$0xff] %vm28_vm0, %v871_v1  ;;  %40 = vst.msk [vmem:[#allocation2 + $0x58] sm:$0xff] %vm28_vm0, %v871_v1  ;;  %812 = vmatmul.mubr.msk.bf16.vlgmr.msra.gmra.mrb[0].mxu0 %vm28_vm0, %v833_v4  ;;  %820 = vmatmul.mubr.msk.bf16.vlgmr.msra.gmra.mrb[0].mxu1 %vm28_vm0, %v834_v5 }
   0x7   :  { %41 = vst.msk [vmem:[#allocation2 + $0x60] sm:$0xff] %vm28_vm0, %v871_v1  ;;  %42 = vst.msk [vmem:[#allocation2 + $0x68] sm:$0xff] %vm28_vm0, %v871_v1  ;;  %815 = vmatprep.mubr.msk.bf16.mxu0 %vm28_vm0, %v835_v6  ;;  %823 = vmatprep.mubr.msk.bf16.mxu1 %vm28_vm0, %v837_v7 }
   0x8   :  { %43 = vst.msk [vmem:[#allocation2 + $0x70] sm:$0xff] %vm28_vm0, %v871_v1  ;;  %44 = vst.msk [vmem:[#allocation2 + $0x78] sm:$0xff] %vm28_vm0, %v871_v1  ;;  %v47_v10 = vld [vmem:[#allocation2 + $0x10] sm:$0xff]  ;;  %v45_v12 = vld [vmem:[#allocation2] sm:$0xff] }
   0x9   :  { %v48_v16 = vld [vmem:[#allocation2 + $0x18] sm:$0xff]  ;;  %v46_v22 = vld [vmem:[#allocation2 + $0x8] sm:$0xff] }
   0xa   :  { %v49_v36 = vld [vmem:[#allocation2 + $0x20] sm:$0xff]  ;;  %v50_v45 = vld [vmem:[#allocation2 + $0x28] sm:$0xff] }
   0xb   :  { %v51_v34 = vld [vmem:[#allocation2 + $0x30] sm:$0xff]  ;;  %v52_v40 = vld [vmem:[#allocation2 + $0x38] sm:$0xff] }
   0xc   :  { %v53_v13 = vld [vmem:[#allocation2 + $0x40] sm:$0xff]  ;;  %v54_v23 = vld [vmem:[#allocation2 + $0x48] sm:$0xff] }
   0xd   :  { %v55_v11 = vld [vmem:[#allocation2 + $0x50] sm:$0xff]  ;;  %v56_v17 = vld [vmem:[#allocation2 + $0x58] sm:$0xff] }
   0xe   :  { %816 = vmatmul.mubr.msk.bf16.gmra.mrb[4].mxu0 %vm28_vm0, %v836_v8  ;;  %824 = vmatmul.mubr.msk.bf16.gmra.mrb[4].mxu1 %vm28_vm0, %v838_v9  ;;  %v57_v37 = vld [vmem:[#allocation2 + $0x60] sm:$0xff]  ;;  %v58_v48 = vld [vmem:[#allocation2 + $0x68] sm:$0xff] }
   0xf   :  { %v59_v35 = vld [vmem:[#allocation2 + $0x70] sm:$0xff]  ;;  %v60_v42 = vld [vmem:[#allocation2 + $0x78] sm:$0xff] }
  0xd9   :  { %v813_v14 = vpop.f32.mrb[0].mxu0  ;;  %v821_v15 = vpop.f32.mrb[0].mxu1 }
  0xda   :  { %v249_v18 = vadd.f32 %v813_v14, %v47_v10  ;;  %v257_v19 = vadd.f32 %v821_v15, %v55_v11  ;;  %v184_v20 = vpop.f32.mrb[1].mxu0  ;;  %v216_v21 = vpop.f32.mrb[1].mxu1 }
  0xdb   :  { %v247_v24 = vadd.f32 %v184_v20, %v45_v12  ;;  %v255_v25 = vadd.f32 %v216_v21, %v53_v13  ;;  %v814_v26 = vpop.f32.mrb[2].mxu0  ;;  %v822_v27 = vpop.f32.mrb[2].mxu1 }
  0xdc   :  { %265 = vst.msk [vmem:[#allocation2 + $0x10] sm:$0xff] %vm28_vm0, %v249_v18  ;;  %273 = vst.msk [vmem:[#allocation2 + $0x50] sm:$0xff] %vm28_vm0, %v257_v19  ;;  %v250_v28 = vadd.f32 %v814_v26, %v48_v16  ;;  %v258_v29 = vadd.f32 %v822_v27, %v56_v17  ;;  %v187_v30 = vpop.f32.mrb[3].mxu0  ;;  %v219_v31 = vpop.f32.mrb[3].mxu1 }
  0xdd   :  { %263 = vst.msk [vmem:[#allocation2] sm:$0xff] %vm28_vm0, %v247_v24  ;;  %271 = vst.msk [vmem:[#allocation2 + $0x40] sm:$0xff] %vm28_vm0, %v255_v25  ;;  %v248_v32 = vadd.f32 %v187_v30, %v46_v22  ;;  %v256_v33 = vadd.f32 %v219_v31, %v54_v23 }
  0xde   :  { %266 = vst.msk [vmem:[#allocation2 + $0x18] sm:$0xff] %vm28_vm0, %v250_v28  ;;  %274 = vst.msk [vmem:[#allocation2 + $0x58] sm:$0xff] %vm28_vm0, %v258_v29 }
  0xdf   :  { %264 = vst.msk [vmem:[#allocation2 + $0x8] sm:$0xff] %vm28_vm0, %v248_v32  ;;  %272 = vst.msk [vmem:[#allocation2 + $0x48] sm:$0xff] %vm28_vm0, %v256_v33 }
  0xe1   :  { %v817_v39 = vpop.f32.mrb[4].mxu0  ;;  %v825_v41 = vpop.f32.mrb[4].mxu1 }
  0xe2   :  { %v253_v43 = vadd.f32 %v817_v39, %v51_v34  ;;  %v200_v44 = vpop.f32.mrb[5].mxu0  ;;  %v261_v46 = vadd.f32 %v825_v41, %v59_v35  ;;  %v232_v47 = vpop.f32.mrb[5].mxu1 }
  0xe3   :  { %v292_v49 = vld [vmem:[#allocation2 + $0x50] sm:$0xff]  ;;  %v251_v51 = vadd.f32 %v200_v44, %v49_v36  ;;  %v818_v52 = vpop.f32.mrb[6].mxu0  ;;  %v259_v53 = vadd.f32 %v232_v47, %v57_v37  ;;  %v826_v54 = vpop.f32.mrb[6].mxu1 }
  0xe4   :  { %v284_v50 = vld [vmem:[#allocation2 + $0x10] sm:$0xff]  ;;  %v972_v55 = vadd.f32 %v969_v38, %v292_v49  ;;  %269 = vst.msk [vmem:[#allocation2 + $0x30] sm:$0xff] %vm28_vm0, %v253_v43  ;;  %v254_v57 = vadd.f32 %v818_v52, %v52_v40  ;;  %v282_v58 = vld [vmem:[#allocation2] sm:$0xff]  ;;  %v203_v59 = vpop.f32.mrb[7].mxu0  ;;  %277 = vst.msk [vmem:[#allocation2 + $0x70] sm:$0xff] %vm28_vm0, %v261_v46  ;;  %v262_v60 = vadd.f32 %v826_v54, %v60_v42  ;;  %v235_v61 = vpop.f32.mrb[7].mxu1 }
  0xe5   :  { %v975_v56 = vadd.f32 %v969_v38, %v284_v50  ;;  %267 = vst.msk [vmem:[#allocation2 + $0x20] sm:$0xff] %vm28_vm0, %v251_v51  ;;  %v285_v62 = vld [vmem:[#allocation2 + $0x18] sm:$0xff]  ;;  %v252_v63 = vadd.f32 %v203_v59, %v50_v45  ;;  %275 = vst.msk [vmem:[#allocation2 + $0x60] sm:$0xff] %vm28_vm0, %v259_v53  ;;  %v260_v0 = vadd.f32 %v235_v61, %v58_v48  ;;  %v290_v5 = vld [vmem:[#allocation2 + $0x40] sm:$0xff] }
  0xe6   :  { %v351_v1 = vsel %vm28_vm0, %v972_v55, 0.0  ;;  %270 = vst.msk [vmem:[#allocation2 + $0x38] sm:$0xff] %vm28_vm0, %v254_v57  ;;  %v987_v3 = vadd.f32 %v969_v38, %v282_v58  ;;  %v990_v4 = vadd.f32 %v969_v38, %v285_v62  ;;  %278 = vst.msk [vmem:[#allocation2 + $0x78] sm:$0xff] %vm28_vm0, %v262_v60  ;;  %v293_v6 = vld [vmem:[#allocation2 + $0x58] sm:$0xff]  ;;  %v1000_v9 = vadd.f32 %v969_v38, %v290_v5  ;;  %v291_v11 = vld [vmem:[#allocation2 + $0x48] sm:$0xff] }
  0xe7   :  { %v327_v2 = vsel %vm28_vm0, %v975_v56, 0.0  ;;  %352 = vadd.xlane.f32.xlu0 %v351_v1  ;;  %268 = vst.msk [vmem:[#allocation2 + $0x28] sm:$0xff] %vm28_vm0, %v252_v63  ;;  %276 = vst.msk [vmem:[#allocation2 + $0x68] sm:$0xff] %vm28_vm0, %v260_v0  ;;  %v1003_v10 = vadd.f32 %v969_v38, %v293_v6  ;;  %v283_v12 = vld [vmem:[#allocation2 + $0x8] sm:$0xff]  ;;  %v1010_v17 = vadd.f32 %v969_v38, %v291_v11 }
  0xe8   :  { %328 = vadd.xlane.f32.xlu1 %v327_v2  ;;  %v321_v7 = vsel %vm28_vm0, %v987_v3, 0.0  ;;  %v330_v8 = vsel %vm28_vm0, %v990_v4, 0.0  ;;  %v345_v15 = vsel %vm28_vm0, %v1000_v9, 0.0  ;;  %v1013_v18 = vadd.f32 %v969_v38, %v283_v12 }
  0xe9   :  { %v354_v16 = vsel %vm28_vm0, %v1003_v10, 0.0  ;;  %v348_v21 = vsel %vm28_vm0, %v1010_v17, 0.0 }
  0xea   :  { %v324_v22 = vsel %vm28_vm0, %v1013_v18, 0.0 }
  0xeb   :  { %322 = vadd.xlane.f32.xlu0 %v321_v7  ;;  %v288_v13 = vld [vmem:[#allocation2 + $0x30] sm:$0xff] }
  0xec   :  { %331 = vadd.xlane.f32.xlu1 %v330_v8  ;;  %v1016_v19 = vadd.f32 %v969_v38, %v288_v13  ;;  %v286_v23 = vld [vmem:[#allocation2 + $0x20] sm:$0xff]  ;;  %v296_v35 = vld [vmem:[#allocation2 + $0x70] sm:$0xff] }
  0xed   :  { %v289_v14 = vld [vmem:[#allocation2 + $0x38] sm:$0xff]  ;;  %v294_v27 = vld [vmem:[#allocation2 + $0x60] sm:$0xff]  ;;  %v1030_v29 = vadd.f32 %v969_v38, %v286_v23  ;;  %v1050_v40 = vadd.f32 %v969_v38, %v296_v35 }
  0xee   :  { %v1019_v20 = vadd.f32 %v969_v38, %v289_v14  ;;  %v287_v24 = vld [vmem:[#allocation2 + $0x28] sm:$0xff]  ;;  %v339_v25 = vsel %vm28_vm0, %v1016_v19, 0.0  ;;  %v1036_v31 = vadd.f32 %v969_v38, %v294_v27  ;;  %v297_v36 = vld [vmem:[#allocation2 + $0x78] sm:$0xff] }
  0xef   :  { %346 = vadd.xlane.f32.xlu0 %v345_v15  ;;  %v295_v28 = vld [vmem:[#allocation2 + $0x68] sm:$0xff]  ;;  %v1033_v30 = vadd.f32 %v969_v38, %v287_v24  ;;  %v333_v33 = vsel %vm28_vm0, %v1030_v29, 0.0  ;;  %v1053_v41 = vadd.f32 %v969_v38, %v297_v36  ;;  %v363_v42 = vsel %vm28_vm0, %v1050_v40, 0.0 }
  0xf0   :  { %355 = vadd.xlane.f32.xlu1 %v354_v16  ;;  %v342_v26 = vsel %vm28_vm0, %v1019_v20, 0.0  ;;  %v1039_v32 = vadd.f32 %v969_v38, %v295_v28  ;;  %v357_v37 = vsel %vm28_vm0, %v1036_v31, 0.0 }
  0xf1   :  { %v336_v34 = vsel %vm28_vm0, %v1033_v30, 0.0  ;;  %v366_v43 = vsel %vm28_vm0, %v1053_v41, 0.0 }
  0xf2   :  { %v360_v39 = vsel %vm28_vm0, %v1039_v32, 0.0 }
  0xf3   :  { %325 = vadd.xlane.f32.xlu0 %v324_v22 }
  0xf4   :  { %349 = vadd.xlane.f32.xlu1 %v348_v21 }
  0xf7   :  { %340 = vadd.xlane.f32.xlu0 %v339_v25 }
  0xf8   :  { %343 = vadd.xlane.f32.xlu1 %v342_v26 }
  0xfb   :  { %334 = vadd.xlane.f32.xlu0 %v333_v33 }
  0xfc   :  { %337 = vadd.xlane.f32.xlu1 %v336_v34 }
  0xff   :  { %358 = vadd.xlane.f32.xlu0 %v357_v37 }
 0x100   :  { %361 = vadd.xlane.f32.xlu1 %v360_v39 }
 0x103   :  { %364 = vadd.xlane.f32.xlu0 %v363_v42 }
 0x104   :  { %367 = vadd.xlane.f32.xlu1 %v366_v43 }
 0x174   :  { %v353_v44 = vpop.xlane.xlu0 %352 }
 0x175   :  { %v329_v45 = vpop.xlane.xlu1 %328  ;;  %v380_v46 = vmul.f32 0.0625, %v353_v44 }
 0x176   :  { %v372_v47 = vmul.f32 0.0625, %v329_v45 }
 0x177   :  { %v1060_v48 = vsub.f32 %v972_v55, %v380_v46 }
 0x178   :  { %v1063_v38 = vsub.f32 %v975_v56, %v372_v47  ;;  %v323_v49 = vpop.xlane.xlu0 %322 }
 0x179   :  { %v332_v50 = vpop.xlane.xlu1 %331  ;;  %v370_v51 = vmul.f32 0.0625, %v323_v49  ;;  %v412_v55 = vmul.f32 %v1060_v48, %v1060_v48 }
 0x17a   :  { %v373_v52 = vmul.f32 0.0625, %v332_v50  ;;  %v404_v53 = vmul.f32 %v1063_v38, %v1063_v38 }
 0x17b   :  { %v1068_v54 = vsub.f32 %v987_v3, %v370_v51  ;;  %v448_v2 = vsel %vm28_vm0, %v412_v55, 0.0 }
 0x17c   :  { %v1071_v57 = vsub.f32 %v990_v4, %v373_v52  ;;  %v424_v58 = vsel %vm28_vm0, %v404_v53, 0.0  ;;  %v347_v56 = vpop.xlane.xlu0 %346 }
 0x17d   :  { %v356_v59 = vpop.xlane.xlu1 %355  ;;  %425 = vadd.xlane.f32.xlu0 %v424_v58  ;;  %v378_v60 = vmul.f32 0.0625, %v347_v56  ;;  %v402_v63 = vmul.f32 %v1068_v54, %v1068_v54 }
 0x17e   :  { %v381_v61 = vmul.f32 0.0625, %v356_v59  ;;  %v405_v62 = vmul.f32 %v1071_v57, %v1071_v57 }
 0x17f   :  { %v1081_v0 = vsub.f32 %v1000_v9, %v378_v60  ;;  %v418_v11 = vsel %vm28_vm0, %v402_v63, 0.0 }
 0x180   :  { %v1084_v1 = vsub.f32 %v1003_v10, %v381_v61  ;;  %v427_v3 = vsel %vm28_vm0, %v405_v62, 0.0  ;;  %v326_v5 = vpop.xlane.xlu0 %325 }
 0x181   :  { %v350_v4 = vpop.xlane.xlu1 %349  ;;  %449 = vadd.xlane.f32.xlu0 %v448_v2  ;;  %428 = vadd.xlane.f32.xlu1 %v427_v3  ;;  %v371_v7 = vmul.f32 0.0625, %v326_v5  ;;  %v410_v13 = vmul.f32 %v1081_v0, %v1081_v0 }
 0x182   :  { %v379_v6 = vmul.f32 0.0625, %v350_v4  ;;  %v413_v8 = vmul.f32 %v1084_v1, %v1084_v1 }
 0x183   :  { %v1095_v10 = vsub.f32 %v1013_v18, %v371_v7  ;;  %v442_v24 = vsel %vm28_vm0, %v410_v13, 0.0 }
 0x184   :  { %v1092_v9 = vsub.f32 %v1010_v17, %v379_v6  ;;  %v451_v12 = vsel %vm28_vm0, %v413_v8, 0.0  ;;  %v341_v14 = vpop.xlane.xlu0 %340 }
 0x185   :  { %419 = vadd.xlane.f32.xlu0 %v418_v11  ;;  %v344_v15 = vpop.xlane.xlu1 %343  ;;  %452 = vadd.xlane.f32.xlu1 %v451_v12  ;;  %v376_v16 = vmul.f32 0.0625, %v341_v14  ;;  %v403_v22 = vmul.f32 %v1095_v10, %v1095_v10 }
 0x186   :  { %v377_v21 = vmul.f32 0.0625, %v344_v15  ;;  %v411_v17 = vmul.f32 %v1092_v9, %v1092_v9 }
 0x187   :  { %v1105_v18 = vsub.f32 %v1016_v19, %v376_v16  ;;  %v421_v25 = vsel %vm28_vm0, %v403_v22, 0.0 }
 0x188   :  { %v1108_v23 = vsub.f32 %v1019_v20, %v377_v21  ;;  %v335_v26 = vpop.xlane.xlu0 %334  ;;  %v445_v35 = vsel %vm28_vm0, %v411_v17, 0.0 }
 0x189   :  { %443 = vadd.xlane.f32.xlu0 %v442_v24  ;;  %422 = vadd.xlane.f32.xlu1 %v421_v25  ;;  %v338_v27 = vpop.xlane.xlu1 %337  ;;  %v374_v28 = vmul.f32 0.0625, %v335_v26  ;;  %v408_v34 = vmul.f32 %v1105_v18, %v1105_v18  ;;  %v1158_v26 = vld [vmem:[%s1320_s3] ss:$0 sm:$0xff] }
 0x18a   :  { %v375_v33 = vmul.f32 0.0625, %v338_v27  ;;  %v409_v37 = vmul.f32 %v1108_v23, %v1108_v23 }
 0x18b   :  { %v1116_v19 = vsub.f32 %v1030_v29, %v374_v28  ;;  %v436_v36 = vsel %vm28_vm0, %v408_v34, 0.0  ;;  %v793_v28 = vld [vmem:[%s1321_s5 + $0x8] sm:$0xff]  }
 0x18c   :  { %v1119_v20 = vsub.f32 %v1033_v30, %v375_v33  ;;  %v359_v39 = vpop.xlane.xlu0 %358  ;;  %v439_v49 = vsel %vm28_vm0, %v409_v37, 0.0 }
 0x18d   :  { %437 = vadd.xlane.f32.xlu0 %v436_v36  ;;  %446 = vadd.xlane.f32.xlu1 %v445_v35  ;;  %v362_v42 = vpop.xlane.xlu1 %361  ;;  %v382_v43 = vmul.f32 0.0625, %v359_v39  ;;  %v406_v45 = vmul.f32 %v1116_v19, %v1116_v19  ;;  %v1167_v39 = vld [vmem:[%s1322_s4] ss:$0 sm:$0xff] }
 0x18e   :  { %v383_v44 = vmul.f32 0.0625, %v362_v42  ;;  %v407_v29 = vmul.f32 %v1119_v20, %v1119_v20  ;;  %v1172_v42 = vld [vmem:[%s1321_s5 + $0x28] sm:$0xff]  }
 0x18f   :  { %v1129_v30 = vsub.f32 %v1036_v31, %v382_v43  ;;  %v430_v47 = vsel %vm28_vm0, %v406_v45, 0.0  ;;  %v767_v45 = vunpack.c.l.bf16 %v793_v28 }
 0x190   :  { %v1132_v46 = vsub.f32 %v1039_v32, %v383_v44  ;;  %v365_v50 = vpop.xlane.xlu0 %364  ;;  %v433_v55 = vsel %vm28_vm0, %v407_v29, 0.0 }
 0x191   :  { %431 = vadd.xlane.f32.xlu0 %v430_v47  ;;  %440 = vadd.xlane.f32.xlu1 %v439_v49  ;;  %v368_v51 = vpop.xlane.xlu1 %367  ;;  %v384_v52 = vmul.f32 0.0625, %v365_v50  ;;  %v414_v58 = vmul.f32 %v1129_v30, %v1129_v30  ;;  %v1178_v47 = vld [vmem:[%s1321_s5] sm:$0xff]  }
 0x192   :  { %v385_v53 = vmul.f32 0.0625, %v368_v51  ;;  %v415_v59 = vmul.f32 %v1132_v46, %v1132_v46 }
 0x193   :  { %v1140_v31 = vsub.f32 %v1050_v40, %v384_v52  ;;  %v454_v56 = vsel %vm28_vm0, %v414_v58, 0.0 }
 0x194   :  { %v1143_v32 = vsub.f32 %v1053_v41, %v385_v53  ;;  %v457_v62 = vsel %vm28_vm0, %v415_v59, 0.0  ;;  %v783_v53 = vunpack.c.l.bf16 %v1172_v42 }
 0x195   :  { %455 = vadd.xlane.f32.xlu0 %v454_v56  ;;  %434 = vadd.xlane.f32.xlu1 %v433_v55  ;;  %v416_v60 = vmul.f32 %v1140_v31, %v1140_v31  ;;  %v768_v55 = vunpack.c.h.bf16 %v793_v28  ;;  %v764_v28 = vunpack.c.h.bf16 %v1178_v47 }
 0x196   :  { %v417_v40 = vmul.f32 %v1143_v32, %v1143_v32 }
 0x197   :  { %v460_v61 = vsel %vm28_vm0, %v416_v60, 0.0 }
 0x198   :  { %v463_v41 = vsel %vm28_vm0, %v417_v40, 0.0 }
 0x199   :  { %461 = vadd.xlane.f32.xlu0 %v460_v61  ;;  %458 = vadd.xlane.f32.xlu1 %v457_v62  ;;  %v1187_v61 = vld [vmem:[%s1321_s5 + $0x20] sm:$0xff]  }
 0x19d   :  { %464 = vadd.xlane.f32.xlu1 %v463_v41 }
 0x20a   :  { %v426_v63 = vpop.xlane.xlu0 %425 }
 0x20b   :  { %v468_v2 = vmul.f32 0.0625, %v426_v63 }
 0x20d   :  { %v484_v3 = vadd.f32 1e-05, %v468_v2  ;;  %v763_v2 = vunpack.c.l.bf16 %v1178_v47 }
 0x20e   :  { %v450_v4 = vpop.xlane.xlu0 %449  ;;  %v429_v5 = vpop.xlane.xlu1 %428 }
 0x20f   :  { %839 = vrsqrt.f32 %v484_v3  ;;  %v476_v6 = vmul.f32 0.0625, %v450_v4  ;;  %v469_v7 = vmul.f32 0.0625, %v429_v5  ;;  %v784_v4 = vunpack.c.h.bf16 %v1172_v42 }
 0x211   :  { %v492_v8 = vadd.f32 1e-05, %v476_v6  ;;  %v485_v11 = vadd.f32 1e-05, %v469_v7 }
 0x212   :  { %v420_v12 = vpop.xlane.xlu0 %419  ;;  %v453_v13 = vpop.xlane.xlu1 %452 }
 0x213   :  { %841 = vrsqrt.f32 %v492_v8  ;;  %v466_v14 = vmul.f32 0.0625, %v420_v12  ;;  %v477_v15 = vmul.f32 0.0625, %v453_v13  ;;  %v779_v12 = vunpack.c.l.bf16 %v1187_v61 }
 0x214   :  { %843 = vrsqrt.f32 %v485_v11 }
 0x215   :  { %v482_v16 = vadd.f32 1e-05, %v466_v14  ;;  %v493_v21 = vadd.f32 1e-05, %v477_v15 }
 0x216   :  { %v444_v22 = vpop.xlane.xlu0 %443  ;;  %v423_v17 = vpop.xlane.xlu1 %422 }
 0x217   :  { %845 = vrsqrt.f32 %v482_v16  ;;  %v474_v24 = vmul.f32 0.0625, %v444_v22  ;;  %v467_v25 = vmul.f32 0.0625, %v423_v17 }
 0x218   :  { %847 = vrsqrt.f32 %v493_v21 }
 0x219   :  { %v840_v27 = vpop.eup %839  ;;  %v490_v33 = vadd.f32 1e-05, %v474_v24  ;;  %v483_v34 = vadd.f32 1e-05, %v467_v25 }
 0x21a   :  { %v516_v35 = vmul.f32 %v840_v27, %v1063_v38  ;;  %v438_v36 = vpop.xlane.xlu0 %437  ;;  %v447_v37 = vpop.xlane.xlu1 %446 }
 0x21b   :  { %849 = vrsqrt.f32 %v490_v33  ;;  %v472_v43 = vmul.f32 0.0625, %v438_v36  ;;  %v475_v44 = vmul.f32 0.0625, %v447_v37  ;;  %v1210_v37 = vld [vmem:[%s1321_s5 + $0x18] sm:$0xff]  }
 0x21c   :  { %v539_v29 = vmul.f32 %v1158_v26, %v516_v35  ;;  %851 = vrsqrt.f32 %v483_v34 }
 0x21d   :  { %v842_v38 = vpop.eup %841  ;;  %v488_v49 = vadd.f32 1e-05, %v472_v43  ;;  %v491_v50 = vadd.f32 1e-05, %v475_v44 }
 0x21e   :  { %v844_v51 = vpop.eup %843  ;;  %v562_v52 = vadd.f32 %v1167_v39, %v539_v29  ;;  %v524_v58 = vmul.f32 %v842_v38, %v1060_v48  ;;  %v432_v56 = vpop.xlane.xlu0 %431 }
 0x21f   :  { %v441_v59 = vpop.xlane.xlu1 %440  ;;  %v517_v60 = vmul.f32 %v844_v51, %v1071_v57  ;;  %853 = vrsqrt.f32 %v488_v49  ;;  %v470_v62 = vmul.f32 0.0625, %v432_v56 }
 0x220   :  { %v473_v40 = vmul.f32 0.0625, %v441_v59  ;;  %v610_v41 = vadd.f32 %v767_v45, %v562_v52  ;;  %v547_v63 = vmul.f32 %v1158_v26, %v524_v58  ;;  %855 = vrsqrt.f32 %v491_v50 }
 0x221   :  { %v846_v48 = vpop.eup %845  ;;  %v540_v3 = vmul.f32 %v1158_v26, %v517_v60  ;;  %v486_v57 = vadd.f32 1e-05, %v470_v62  ;;  %v775_v52 = vunpack.c.l.bf16 %v1210_v37 }
 0x222   :  { %v489_v5 = vadd.f32 1e-05, %v473_v40  ;;  %v848_v6 = vpop.eup %847  ;;  %v747_v7 = vpack.c.bf16 %v610_v41, %v610_v41  ;;  %v570_v8 = vadd.f32 %v1167_v39, %v547_v63  ;;  %v514_v11 = vmul.f32 %v846_v48, %v1068_v54  ;;  %v456_v13 = vpop.xlane.xlu0 %455 }
 0x223   :  { %v435_v14 = vpop.xlane.xlu1 %434  ;;  %v563_v15 = vadd.f32 %v1167_v39, %v540_v3  ;;  %v525_v16 = vmul.f32 %v848_v6, %v1084_v1  ;;  %857 = vrsqrt.f32 %v486_v57  ;;  %v478_v21 = vmul.f32 0.0625, %v456_v13  ;;  %v794_v6 = vld [vmem:[%s1321_s5 + $0x10] sm:$0xff]  }
 0x224   :  { %691 = vst.msk [vmem:[%s1323_s6 + $0x8] sm:$0xf] %vm688_vm1, %v747_v7  ;;  %v618_v22 = vadd.f32 %v783_v53, %v570_v8  ;;  %v537_v17 = vmul.f32 %v1158_v26, %v514_v11  ;;  %859 = vrsqrt.f32 %v489_v5  ;;  %v471_v54 = vmul.f32 0.0625, %v435_v14 }
 0x225   :  { %v850_v24 = vpop.eup %849  ;;  %v611_v25 = vadd.f32 %v768_v55, %v563_v15  ;;  %v548_v27 = vmul.f32 %v1158_v26, %v525_v16  ;;  %v494_v33 = vadd.f32 1e-05, %v478_v21  ;;  %v771_v21 = vunpack.c.l.bf16 %v794_v6 }
 0x226   :  { %v852_v1 = vpop.eup %851  ;;  %v755_v34 = vpack.c.bf16 %v618_v22, %v618_v22  ;;  %v560_v35 = vadd.f32 %v1167_v39, %v537_v17  ;;  %v522_v36 = vmul.f32 %v850_v24, %v1081_v0  ;;  %v487_v42 = vadd.f32 1e-05, %v471_v54  ;;  %v462_v43 = vpop.xlane.xlu0 %461  ;;  %v798_v24 = vld [vmem:[%s1321_s5 + $0x30] sm:$0xff]  }
 0x227   :  { %v459_v44 = vpop.xlane.xlu1 %458  ;;  %v748_v45 = vpack.c.bf16 %v611_v25, %v611_v25  ;;  %v571_v29 = vadd.f32 %v1167_v39, %v548_v27  ;;  %v515_v38 = vmul.f32 %v852_v1, %v1095_v10  ;;  %861 = vrsqrt.f32 %v494_v33 }
 0x228   :  { %699 = vst.msk [vmem:[%s1323_s6 + $0x28] sm:$0xf] %vm688_vm1, %v755_v34  ;;  %v608_v0 = vadd.f32 %v763_v2, %v560_v35  ;;  %v545_v47 = vmul.f32 %v1158_v26, %v522_v36  ;;  %863 = vrsqrt.f32 %v487_v42  ;;  %v480_v49 = vmul.f32 0.0625, %v462_v43 }
 0x229   :  { %v854_v50 = vpop.eup %853  ;;  %692 = vst.msk [vmem:[%s1323_s6 + $0xc] sm:$0xf] %vm688_vm1, %v748_v45  ;;  %v619_v51 = vadd.f32 %v784_v4, %v571_v29  ;;  %v538_v10 = vmul.f32 %v1158_v26, %v515_v38  ;;  %v479_v53 = vmul.f32 0.0625, %v459_v44  ;;  %v776_v54 = vunpack.c.h.bf16 %v1210_v37  ;;  %v799_v38 = vld [vmem:[%s1321_s5 + $0x38] sm:$0xff]  }
 0x22a   :  { %v856_v58 = vpop.eup %855  ;;  %v745_v55 = vpack.c.bf16 %v608_v0, %v608_v0  ;;  %v568_v56 = vadd.f32 %v1167_v39, %v545_v47  ;;  %v520_v59 = vmul.f32 %v854_v50, %v1105_v18  ;;  %v496_v60 = vadd.f32 1e-05, %v480_v49 }
 0x22b   :  { %v465_v62 = vpop.xlane.xlu1 %464  ;;  %v756_v40 = vpack.c.bf16 %v619_v51, %v619_v51  ;;  %v561_v41 = vadd.f32 %v1167_v39, %v538_v10  ;;  %v523_v63 = vmul.f32 %v856_v58, %v1092_v9  ;;  %v495_v2 = vadd.f32 1e-05, %v479_v53 }
 0x22c   :  { %689 = vst.msk [vmem:[%s1323_s6] sm:$0xf] %vm688_vm1, %v745_v55  ;;  %v616_v48 = vadd.f32 %v779_v12, %v568_v56  ;;  %v543_v3 = vmul.f32 %v1158_v26, %v520_v59  ;;  %865 = vrsqrt.f32 %v496_v60  ;;  %v481_v4 = vmul.f32 0.0625, %v465_v62 }
 0x22d   :  { %v858_v57 = vpop.eup %857  ;;  %700 = vst.msk [vmem:[%s1323_s6 + $0x2c] sm:$0xf] %vm688_vm1, %v756_v40  ;;  %v609_v18 = vadd.f32 %v764_v28, %v561_v41  ;;  %v780_v9 = vunpack.c.h.bf16 %v1187_v61  ;;  %v546_v5 = vmul.f32 %v1158_v26, %v523_v63  ;;  %867 = vrsqrt.f32 %v495_v2 }
 0x22e   :  { %v860_v7 = vpop.eup %859  ;;  %v753_v8 = vpack.c.bf16 %v616_v48, %v616_v48  ;;  %v566_v11 = vadd.f32 %v1167_v39, %v543_v3  ;;  %v518_v12 = vmul.f32 %v858_v57, %v1116_v19  ;;  %v497_v13 = vadd.f32 1e-05, %v481_v4 }
 0x22f   :  { %v746_v14 = vpack.c.bf16 %v609_v18, %v609_v18  ;;  %v569_v15 = vadd.f32 %v1167_v39, %v546_v5  ;;  %v521_v16 = vmul.f32 %v860_v7, %v1108_v23  ;;  %v787_v37 = vunpack.c.l.bf16 %v798_v24 }
 0x230   :  { %697 = vst.msk [vmem:[%s1323_s6 + $0x20] sm:$0xf] %vm688_vm1, %v753_v8  ;;  %v614_v61 = vadd.f32 %v775_v52, %v566_v11  ;;  %v541_v22 = vmul.f32 %v1158_v26, %v518_v12  ;;  %869 = vrsqrt.f32 %v497_v13  ;;  %v772_v43 = vunpack.c.h.bf16 %v794_v6 }
 0x231   :  { %v862_v17 = vpop.eup %861  ;;  %690 = vst.msk [vmem:[%s1323_s6 + $0x4] sm:$0xf] %vm688_vm1, %v746_v14  ;;  %v617_v19 = vadd.f32 %v780_v9, %v569_v15  ;;  %v544_v23 = vmul.f32 %v1158_v26, %v521_v16  ;;  %v791_v53 = vunpack.c.l.bf16 %v799_v38  ;;  %v792_v63 = vunpack.c.h.bf16 %v799_v38 }
 0x232   :  { %v864_v25 = vpop.eup %863  ;;  %v751_v27 = vpack.c.bf16 %v614_v61, %v614_v61  ;;  %v564_v28 = vadd.f32 %v1167_v39, %v541_v22  ;;  %v526_v33 = vmul.f32 %v862_v17, %v1129_v30 }
 0x233   :  { %v754_v1 = vpack.c.bf16 %v617_v19, %v617_v19  ;;  %v567_v34 = vadd.f32 %v1167_v39, %v544_v23  ;;  %v519_v35 = vmul.f32 %v864_v25, %v1119_v20 }
 0x234   :  { %695 = vst.msk [vmem:[%s1323_s6 + $0x18] sm:$0xf] %vm688_vm1, %v751_v27  ;;  %v612_v36 = vadd.f32 %v771_v21, %v564_v28  ;;  %v549_v42 = vmul.f32 %v1158_v26, %v526_v33 }
 0x235   :  { %698 = vst.msk [vmem:[%s1323_s6 + $0x24] sm:$0xf] %vm688_vm1, %v754_v1  ;;  %v615_v30 = vadd.f32 %v776_v54, %v567_v34  ;;  %v542_v44 = vmul.f32 %v1158_v26, %v519_v35 }
 0x236   :  { %v866_v45 = vpop.eup %865  ;;  %v749_v20 = vpack.c.bf16 %v612_v36, %v612_v36  ;;  %v572_v29 = vadd.f32 %v1167_v39, %v549_v42 }
 0x237   :  { %v868_v0 = vpop.eup %867  ;;  %v752_v47 = vpack.c.bf16 %v615_v30, %v615_v30  ;;  %v565_v49 = vadd.f32 %v1167_v39, %v542_v44  ;;  %v528_v50 = vmul.f32 %v866_v45, %v1140_v31  ;;  %v788_v31 = vunpack.c.h.bf16 %v798_v24 }
 0x238   :  { %693 = vst.msk [vmem:[%s1323_s6 + $0x10] sm:$0xf] %vm688_vm1, %v749_v20  ;;  %v620_v51 = vadd.f32 %v787_v37, %v572_v29  ;;  %v527_v10 = vmul.f32 %v868_v0, %v1132_v46 }
 0x239   :  { %696 = vst.msk [vmem:[%s1323_s6 + $0x1c] sm:$0xf] %vm688_vm1, %v752_v47  ;;  %v613_v52 = vadd.f32 %v772_v43, %v565_v49  ;;  %v551_v58 = vmul.f32 %v1158_v26, %v528_v50 }
 0x23a   :  { %v870_v55 = vpop.eup %869  ;;  %v757_v56 = vpack.c.bf16 %v620_v51, %v620_v51  ;;  %v550_v59 = vmul.f32 %v1158_v26, %v527_v10 }
 0x23b   :  { %v750_v60 = vpack.c.bf16 %v613_v52, %v613_v52  ;;  %v574_v62 = vadd.f32 %v1167_v39, %v551_v58  ;;  %v529_v40 = vmul.f32 %v870_v55, %v1143_v32 }
 0x23c   :  { %701 = vst.msk [vmem:[%s1323_s6 + $0x30] sm:$0xf] %vm688_vm1, %v757_v56  ;;  %v573_v46 = vadd.f32 %v1167_v39, %v550_v59 }
 0x23d   :  { %694 = vst.msk [vmem:[%s1323_s6 + $0x14] sm:$0xf] %vm688_vm1, %v750_v60  ;;  %v622_v41 = vadd.f32 %v791_v53, %v574_v62  ;;  %v552_v2 = vmul.f32 %v1158_v26, %v529_v40 }
 0x23e   :  { %v621_v48 = vadd.f32 %v788_v31, %v573_v46 }
 0x23f   :  { %v759_v3 = vpack.c.bf16 %v622_v41, %v622_v41  ;;  %v575_v32 = vadd.f32 %v1167_v39, %v552_v2 }
 0x240   :  { %v758_v4 = vpack.c.bf16 %v621_v48, %v621_v48 }
 0x241   :  { %703 = vst.msk [vmem:[%s1323_s6 + $0x38] sm:$0xf] %vm688_vm1, %v759_v3  ;;  %v623_v57 = vadd.f32 %v792_v63, %v575_v32 }
 0x242   :  { %702 = vst.msk [vmem:[%s1323_s6 + $0x34] sm:$0xf] %vm688_vm1, %v758_v4 }
 0x243   :  { %v760_v18 = vpack.c.bf16 %v623_v57, %v623_v57 }
 0x245   :  { %704 = vst.msk [vmem:[%s1323_s6 + $0x3c] sm:$0xf] %vm688_vm1, %v760_v18 }

// kernel: _lambda_.24
= control target key start
LH: loop header
LB: loop body
LE: loop exit
PB: predicated region body
PF: predicated region fallthrough
CT: control target
= control target key end

     0   :  { %9 = vsyncpa [#allocation3], 0  ;;  %s4989_s0 = inlined_call_operand.vmem [shape: bf16[8,16,48], index: 0, kind: input, shape index: {}]   ;;  %s4990_s1 = inlined_call_operand.vmem [shape: f32[2,16,16], index: 1, kind: input, shape index: {}]   ;;  %s4991_s2 = inlined_call_operand.vmem [shape: f32[8,16,16], index: 2, kind: input, shape index: {}]   ;;  %s4992_s3 = inlined_call_operand.vmem [shape: f32[2], index: 3, kind: input, shape index: {}]   ;;  %s4993_s4 = inlined_call_operand.vmem [shape: bf16[8,16,16], index: 4, kind: output, shape index: {}]  }
   0x1   :  { %s22_s17 = sshll.u32 %s4992_s3, 4  ;;  %s23_s17 = int_to_ptr.vmem [resolvable:$true] %s22_s17 }
   0x2   :  { %s3589_s18 = scalar_lea.vmem %s23_s17, 16  ;;  %p3594_p1 = scmp.lt.s32.totalorder %s23_s17, %s23_s17 }
   0x3   :  { %p3590_p0 = scmp.ne.s32.totalorder %s23_s17, %s3589_s18  ;;  %p3595_p2 = scmp.lt.s32.totalorder %s3589_s18, %s3589_s18 }
   0x5   :  { %p3596_p3 = por %p3595_p2, %p3594_p1 }
   0x7   :  { %p3597_p4 = pnand %p3596_p3, %p3590_p0 }
   0x9   :  { %3600 = shalt.err (!%p3597_p4)
}
   0xa   :  { %s3603_s19 = smov [#allocation2]  }
   0xb   :  { %25 = dma.vmem_to_smem %s23_s17, 16, %s3603_s19, [#allocation3]  }
   0xc   :  { %3601 = dma.done.wait [#allocation3], 16  }
   0xd   :  { %3602 = vsyncadd [#allocation3], 4294967280 }
   0xe   :  { %29 = sfence }
   0xf   :  { %v31_v0 = vld [vmem:[%s4989_s0] sm:$0xff]   ;;  %v33_v1 = vld [vmem:[%s4989_s0 + $0x8] sm:$0xff]   ;;  %v36_v6 = vld [vmem:[%s4989_s0 + $0x10] sm:$0xff]   ;;  %s3604_s25 = smov 112   ;;  %vm95_vm0 = vcmask 64512   ;;  %s352_s10 = sld [smem:[#allocation2]] }
  0x10   :  { %v3647_v2 = vunpack.c.l.bf16 %v31_v0  ;;  %v3649_v3 = vunpack.c.l.bf16 %v33_v1  ;;  %v3651_v4 = vunpack.c.h.bf16 %v31_v0  ;;  %v3653_v5 = vunpack.c.h.bf16 %v33_v1  ;;  %v38_v13 = vld [vmem:[%s4989_s0 + $0x18] sm:$0xff]   ;;  %v40_v18 = vld [vmem:[%s4989_s0 + $0x20] sm:$0xff]   ;;  %v42_v23 = vld [vmem:[%s4989_s0 + $0x28] sm:$0xff]   ;;  %s2928_s11 = sld [smem:[#allocation2 + $0x1]]  ;;  %s3605_s12 = smov 0.01  }
  0x11   :  { %v3678_v11 = vunpack.c.h.bf16 %v36_v6  ;;  %v3680_v12 = vunpack.c.l.bf16 %v36_v6  ;;  %v3697_v16 = vunpack.c.h.bf16 %v38_v13  ;;  %v3699_v17 = vunpack.c.l.bf16 %v38_v13  ;;  %v44_v28 = vld [vmem:[%s4989_s0 + $0x30] sm:$0xff]   ;;  %v46_v33 = vld [vmem:[%s4989_s0 + $0x38] sm:$0xff]   ;;  %s3608_s15 = smov 104   ;;  %s3609_s16 = smov 120  }
  0x12   :  { %v3660_v7 = vmul.f32 %v3647_v2, %v3647_v2  ;;  %v3664_v8 = vmul.f32 %v3649_v3, %v3649_v3  ;;  %v3672_v9 = vmul.f32 %v3651_v4, %v3651_v4  ;;  %v3676_v10 = vmul.f32 %v3653_v5, %v3653_v5  ;;  %s3610_s20 = smov 96  }
  0x13   :  { %5024 = vst [vmem:[#allocation5_spill] sm:$0xff] %v3678_v11  ;;  %5025 = vst [vmem:[#allocation6_spill] sm:$0xff] %v3680_v12  ;;  %v3691_v14 = vmul.f32 %v3678_v11, %v3678_v11  ;;  %v3695_v15 = vmul.f32 %v3680_v12, %v3680_v12  ;;  %v3710_v19 = vmul.f32 %v3697_v16, %v3697_v16  ;;  %v3716_v21 = vunpack.c.h.bf16 %v40_v18 }
  0x14   :  { %208 = vrot.lane.b32.xlu0 %v3660_v7, %s3604_s25  ;;  %212 = vrot.lane.b32.xlu1 %v3664_v8, %s3604_s25  ;;  %v3714_v20 = vmul.f32 %v3699_v17, %v3699_v17  ;;  %v3718_v22 = vunpack.c.l.bf16 %v40_v18  ;;  %v3735_v26 = vunpack.c.h.bf16 %v42_v23  ;;  %v3737_v27 = vunpack.c.l.bf16 %v42_v23 }
  0x15   :  { %5026 = vst [vmem:[#allocation7_spill] sm:$0xff] %v3716_v21  ;;  %v3729_v24 = vmul.f32 %v3716_v21, %v3716_v21  ;;  %v3754_v31 = vunpack.c.h.bf16 %v44_v28  ;;  %v3756_v32 = vunpack.c.l.bf16 %v44_v28  ;;  %v3773_v36 = vunpack.c.h.bf16 %v46_v33  ;;  %s353_s13 = smax.f32 %s3605_s12, %s352_s10 }
  0x16   :  { %5027 = vst [vmem:[#allocation8_spill] sm:$0xff] %v3718_v22  ;;  %v3733_v25 = vmul.f32 %v3718_v22, %v3718_v22  ;;  %5028 = vst [vmem:[#allocation9_spill] sm:$0xff] %v3735_v26  ;;  %v3748_v29 = vmul.f32 %v3735_v26, %v3735_v26  ;;  %v3752_v30 = vmul.f32 %v3737_v27, %v3737_v27  ;;  %v3775_v37 = vunpack.c.l.bf16 %v46_v33  ;;  %s1698_s14 = smax.f32 %s3605_s12, %s2928_s11 }
  0x17   :  { %5029 = vst [vmem:[#allocation10_spill] sm:$0xff] %v3737_v27  ;;  %5030 = vst [vmem:[#allocation11_spill] sm:$0xff] %v3754_v31  ;;  %v3767_v34 = vmul.f32 %v3754_v31, %v3754_v31  ;;  %v3771_v35 = vmul.f32 %v3756_v32, %v3756_v32  ;;  %v3783_v38 = vmul.f32 %v3773_v36, %v3773_v36  ;;  %vm3607_vm1 = vmmov 0  }
  0x18   :  { %210 = vrot.lane.b32.xlu0 %v3672_v9, %s3604_s25  ;;  %214 = vrot.lane.b32.xlu1 %v3676_v10, %s3604_s25  ;;  %5031 = vst [vmem:[#allocation12_spill] sm:$0xff] %v3756_v32  ;;  %5032 = vst [vmem:[#allocation13_spill] sm:$0xff] %v3773_v36  ;;  %v3787_v39 = vmul.f32 %v3775_v37, %v3775_v37  ;;  %vm808_vm2 = vcmask 130048   ;;  %vm2882_vm3 = vcmask 125952  }
  0x19   :  { %5033 = vst [vmem:[#allocation14_spill] sm:$0xff] %v3775_v37 }
  0x1c   :  { %218 = vrot.lane.b32.xlu1 %v3691_v14, %s3604_s25  ;;  %216 = vrot.lane.b32.xlu0 %v3695_v15, %s3604_s25 }
  0x20   :  { %222 = vrot.lane.b32.xlu1 %v3710_v19, %s3604_s25  ;;  %220 = vrot.lane.b32.xlu0 %v3714_v20, %s3604_s25 }
  0x24   :  { %226 = vrot.lane.b32.xlu1 %v3729_v24, %s3604_s25  ;;  %224 = vrot.lane.b32.xlu0 %v3733_v25, %s3604_s25 }
  0x28   :  { %230 = vrot.lane.b32.xlu1 %v3748_v29, %s3604_s25  ;;  %228 = vrot.lane.b32.xlu0 %v3752_v30, %s3604_s25 }
  0x2c   :  { %234 = vrot.lane.b32.xlu1 %v3767_v34, %s3604_s25  ;;  %232 = vrot.lane.b32.xlu0 %v3771_v35, %s3604_s25 }
  0x30   :  { %238 = vrot.lane.b32.xlu1 %v3783_v38, %s3604_s25  ;;  %236 = vrot.lane.b32.xlu0 %v3787_v39, %s3604_s25 }
  0x86   :  { %v209_v40 = vpop.permute.xlu0 %208  ;;  %v213_v41 = vpop.permute.xlu1 %212 }
  0x87   :  { %v256_v42 = vsel %vm95_vm0, %v209_v40, 0.0  ;;  %v262_v43 = vsel %vm95_vm0, %v213_v41, 0.0  ;;  %v96_v40 = vsel %vm95_vm0, %v3660_v7, 0.0  ;;  %v99_v41 = vsel %vm95_vm0, %v3672_v9, 0.0 }
  0x88   :  { %257 = vadd.xlane.f32.xlu0 %v256_v42  ;;  %v102_v42 = vsel %vm95_vm0, %v3664_v8, 0.0 }
  0x8a   :  { %v211_v44 = vpop.permute.xlu0 %210  ;;  %v215_v45 = vpop.permute.xlu1 %214 }
  0x8b   :  { %v259_v46 = vsel %vm95_vm0, %v211_v44, 0.0  ;;  %v265_v47 = vsel %vm95_vm0, %v215_v45, 0.0  ;;  %v108_v44 = vsel %vm95_vm0, %v3695_v15, 0.0  ;;  %v111_v45 = vsel %vm95_vm0, %v3691_v14, 0.0 }
  0x8c   :  { %263 = vadd.xlane.f32.xlu0 %v262_v43  ;;  %260 = vadd.xlane.f32.xlu1 %v259_v46  ;;  %v105_v43 = vsel %vm95_vm0, %v3676_v10, 0.0  ;;  %v114_v46 = vsel %vm95_vm0, %v3714_v20, 0.0 }
  0x8e   :  { %v219_v48 = vpop.permute.xlu1 %218  ;;  %v217_v49 = vpop.permute.xlu0 %216 }
  0x8f   :  { %v268_v50 = vsel %vm95_vm0, %v217_v49, 0.0  ;;  %v271_v51 = vsel %vm95_vm0, %v219_v48, 0.0  ;;  %v120_v48 = vsel %vm95_vm0, %v3733_v25, 0.0  ;;  %v123_v49 = vsel %vm95_vm0, %v3729_v24, 0.0 }
  0x90   :  { %266 = vadd.xlane.f32.xlu0 %v265_v47  ;;  %269 = vadd.xlane.f32.xlu1 %v268_v50  ;;  %v117_v47 = vsel %vm95_vm0, %v3710_v19, 0.0  ;;  %v126_v50 = vsel %vm95_vm0, %v3752_v30, 0.0 }
  0x92   :  { %v223_v52 = vpop.permute.xlu1 %222  ;;  %v221_v53 = vpop.permute.xlu0 %220 }
  0x93   :  { %v274_v54 = vsel %vm95_vm0, %v221_v53, 0.0  ;;  %v277_v55 = vsel %vm95_vm0, %v223_v52, 0.0  ;;  %v132_v52 = vsel %vm95_vm0, %v3771_v35, 0.0  ;;  %v135_v53 = vsel %vm95_vm0, %v3767_v34, 0.0 }
  0x94   :  { %272 = vadd.xlane.f32.xlu0 %v271_v51  ;;  %275 = vadd.xlane.f32.xlu1 %v274_v54  ;;  %v129_v51 = vsel %vm95_vm0, %v3748_v29, 0.0  ;;  %v138_v54 = vsel %vm95_vm0, %v3787_v39, 0.0 }
  0x96   :  { %v227_v56 = vpop.permute.xlu1 %226  ;;  %v225_v57 = vpop.permute.xlu0 %224 }
  0x97   :  { %v280_v58 = vsel %vm95_vm0, %v225_v57, 0.0  ;;  %v283_v59 = vsel %vm95_vm0, %v227_v56, 0.0  ;;  %v354_v56 = vstv %s353_s13  ;;  %v1699_v57 = vstv %s1698_s14 }
  0x98   :  { %278 = vadd.xlane.f32.xlu0 %v277_v55  ;;  %281 = vadd.xlane.f32.xlu1 %v280_v58  ;;  %v141_v55 = vsel %vm95_vm0, %v3783_v38, 0.0  ;;  %3305 = vrcp.f32 %v354_v56 }
  0x99   :  { %3307 = vrcp.f32 %v1699_v57 }
  0x9a   :  { %v231_v60 = vpop.permute.xlu1 %230  ;;  %v229_v61 = vpop.permute.xlu0 %228 }
  0x9b   :  { %v286_v62 = vsel %vm95_vm0, %v229_v61, 0.0  ;;  %v289_v63 = vsel %vm95_vm0, %v231_v60, 0.0 }
  0x9c   :  { %284 = vadd.xlane.f32.xlu0 %v283_v59  ;;  %287 = vadd.xlane.f32.xlu1 %v286_v62 }
  0x9e   :  { %v235_v0 = vpop.permute.xlu1 %234  ;;  %v233_v1 = vpop.permute.xlu0 %232 }
  0x9f   :  { %v292_v6 = vsel %vm95_vm0, %v233_v1, 0.0  ;;  %v295_v13 = vsel %vm95_vm0, %v235_v0, 0.0 }
  0xa0   :  { %290 = vadd.xlane.f32.xlu0 %v289_v63  ;;  %293 = vadd.xlane.f32.xlu1 %v292_v6 }
  0xa2   :  { %v239_v18 = vpop.permute.xlu1 %238  ;;  %v237_v23 = vpop.permute.xlu0 %236 }
  0xa3   :  { %v298_v28 = vsel %vm95_vm0, %v237_v23, 0.0  ;;  %v301_v33 = vsel %vm95_vm0, %v239_v18, 0.0  ;;  %v3306_v58 = vpop.eup %3305 }
  0xa4   :  { %296 = vadd.xlane.f32.xlu0 %v295_v13  ;;  %299 = vadd.xlane.f32.xlu1 %v298_v28  ;;  %v3308_v59 = vpop.eup %3307  ;;  %3235 = vpush %v3306_v58  ;;  %v4994_v28 = vmov 0.0  }
  0xa5   :  { %3237 = vpush %v3308_v59  ;;  %3043 = vmatprep.subr.bf16.mxu0 %v4994_v28  ;;  %3049 = vmatprep.subr.bf16.mxu1 %v4994_v28 }
  0xa6   :  { %3045 = vmatprep.mubr.msk.bf16.mxu0 %vm3607_vm1, %v4994_v28  ;;  %3051 = vmatprep.mubr.msk.bf16.mxu1 %vm3607_vm1, %v4994_v28 }
  0xa8   :  { %302 = vadd.xlane.f32.xlu0 %v301_v33  ;;  %97 = vadd.xlane.f32.xlu1 %v96_v40 }
  0xac   :  { %100 = vadd.xlane.f32.xlu0 %v99_v41  ;;  %103 = vadd.xlane.f32.xlu1 %v102_v42 }
  0xb0   :  { %106 = vadd.xlane.f32.xlu0 %v105_v43  ;;  %109 = vadd.xlane.f32.xlu1 %v108_v44 }
  0xb4   :  { %112 = vadd.xlane.f32.xlu0 %v111_v45  ;;  %115 = vadd.xlane.f32.xlu1 %v114_v46 }
  0xb8   :  { %118 = vadd.xlane.f32.xlu0 %v117_v47  ;;  %121 = vadd.xlane.f32.xlu1 %v120_v48 }
  0xbc   :  { %124 = vadd.xlane.f32.xlu0 %v123_v49  ;;  %127 = vadd.xlane.f32.xlu1 %v126_v50 }
  0xc0   :  { %130 = vadd.xlane.f32.xlu0 %v129_v51  ;;  %133 = vadd.xlane.f32.xlu1 %v132_v52 }
  0xc4   :  { %136 = vadd.xlane.f32.xlu0 %v135_v53  ;;  %139 = vadd.xlane.f32.xlu1 %v138_v54 }
  0xc8   :  { %142 = vadd.xlane.f32.xlu0 %v141_v55 }
  0xd5   :  { %s3236_s17 = spop %3235 }
 0x115   :  { %v258_v60 = vpop.xlane.xlu0 %257 }
 0x116   :  { %v304_v61 = vmax.f32 %v258_v60, 1e-12 }
 0x118   :  { %3309 = vrsqrt.f32 %v304_v61 }
 0x119   :  { %v261_v62 = vpop.xlane.xlu1 %260  ;;  %v264_v63 = vpop.xlane.xlu0 %263 }
 0x11a   :  { %v305_v0 = vmax.f32 %v261_v62, 1e-12  ;;  %v306_v1 = vmax.f32 %v264_v63, 1e-12 }
 0x11c   :  { %3311 = vrsqrt.f32 %v305_v0 }
 0x11d   :  { %v267_v6 = vpop.xlane.xlu0 %266  ;;  %v270_v13 = vpop.xlane.xlu1 %269  ;;  %3313 = vrsqrt.f32 %v306_v1 }
 0x11e   :  { %v307_v18 = vmax.f32 %v267_v6, 1e-12  ;;  %v308_v23 = vmax.f32 %v270_v13, 1e-12 }
 0x120   :  { %3315 = vrsqrt.f32 %v307_v18 }
 0x121   :  { %3317 = vrsqrt.f32 %v308_v23  ;;  %v273_v33 = vpop.xlane.xlu0 %272  ;;  %v276_v40 = vpop.xlane.xlu1 %275 }
 0x122   :  { %v309_v41 = vmax.f32 %v273_v33, 1e-12  ;;  %v310_v42 = vmax.f32 %v276_v40, 1e-12  ;;  %v3310_v43 = vpop.eup %3309 }
 0x123   :  { %v336_v49 = vmul.f32 %v3310_v43, %v3647_v2 }
 0x124   :  { %3319 = vrsqrt.f32 %v309_v41 }
 0x125   :  { %3321 = vrsqrt.f32 %v310_v42  ;;  %v279_v44 = vpop.xlane.xlu0 %278  ;;  %v282_v45 = vpop.xlane.xlu1 %281 }
 0x126   :  { %v3312_v46 = vpop.eup %3311  ;;  %v311_v47 = vmax.f32 %v279_v44, 1e-12  ;;  %v312_v48 = vmax.f32 %v282_v45, 1e-12 }
 0x127   :  { %v337_v50 = vmul.f32 %v3312_v46, %v3651_v4  ;;  %v3314_v51 = vpop.eup %3313 }
 0x128   :  { %3323 = vrsqrt.f32 %v311_v47  ;;  %v338_v59 = vmul.f32 %v3314_v51, %v3649_v3 }
 0x129   :  { %3325 = vrsqrt.f32 %v312_v48  ;;  %v285_v52 = vpop.xlane.xlu0 %284  ;;  %v382_v53 = vpack.c.bf16 %v337_v50, %v336_v49  ;;  %v288_v54 = vpop.xlane.xlu1 %287 }
 0x12a   :  { %v3316_v55 = vpop.eup %3315  ;;  %v313_v56 = vmax.f32 %v285_v52, 1e-12  ;;  %v314_v57 = vmax.f32 %v288_v54, 1e-12 }
 0x12b   :  { %v3318_v58 = vpop.eup %3317  ;;  %393 = vrot.lane.b32.xlu1 %v382_v53, %s3604_s25  ;;  %v339_v60 = vmul.f32 %v3316_v55, %v3653_v5 }
 0x12c   :  { %3327 = vrsqrt.f32 %v313_v56  ;;  %v340_v0 = vmul.f32 %v3318_v58, %v3680_v12 }
 0x12d   :  { %3329 = vrsqrt.f32 %v314_v57  ;;  %v291_v61 = vpop.xlane.xlu0 %290  ;;  %v383_v62 = vpack.c.bf16 %v339_v60, %v338_v59  ;;  %v294_v63 = vpop.xlane.xlu1 %293 }
 0x12e   :  { %v3320_v1 = vpop.eup %3319  ;;  %v315_v6 = vmax.f32 %v291_v61, 1e-12  ;;  %v316_v13 = vmax.f32 %v294_v63, 1e-12 }
 0x12f   :  { %v3322_v18 = vpop.eup %3321  ;;  %443 = vrot.lane.b32.xlu0 %v383_v62, %s3604_s25  ;;  %v341_v23 = vmul.f32 %v3320_v1, %v3678_v11 }
 0x130   :  { %3331 = vrsqrt.f32 %v315_v6  ;;  %v342_v42 = vmul.f32 %v3322_v18, %v3699_v17 }
 0x131   :  { %3333 = vrsqrt.f32 %v316_v13  ;;  %v297_v33 = vpop.xlane.xlu0 %296  ;;  %v384_v40 = vpack.c.bf16 %v341_v23, %v340_v0  ;;  %v300_v41 = vpop.xlane.xlu1 %299 }
 0x132   :  { %v3324_v43 = vpop.eup %3323  ;;  %v317_v44 = vmax.f32 %v297_v33, 1e-12  ;;  %v318_v45 = vmax.f32 %v300_v41, 1e-12 }
 0x133   :  { %v3326_v46 = vpop.eup %3325  ;;  %493 = vrot.lane.b32.xlu1 %v384_v40, %s3604_s25  ;;  %v343_v47 = vmul.f32 %v3324_v43, %v3697_v16 }
 0x134   :  { %3335 = vrsqrt.f32 %v317_v44  ;;  %v344_v50 = vmul.f32 %v3326_v46, %v3718_v22 }
 0x135   :  { %3337 = vrsqrt.f32 %v318_v45  ;;  %v303_v48 = vpop.xlane.xlu0 %302  ;;  %v385_v49 = vpack.c.bf16 %v343_v47, %v342_v42 }
 0x136   :  { %v3328_v51 = vpop.eup %3327  ;;  %v319_v52 = vmax.f32 %v303_v48, 1e-12 }
 0x137   :  { %v3330_v53 = vpop.eup %3329  ;;  %543 = vrot.lane.b32.xlu1 %v385_v49, %s3604_s25  ;;  %v345_v54 = vmul.f32 %v3328_v51, %v3716_v21 }
 0x138   :  { %3339 = vrsqrt.f32 %v319_v52  ;;  %v346_v56 = vmul.f32 %v3330_v53, %v3737_v27 }
 0x139   :  { %v386_v55 = vpack.c.bf16 %v345_v54, %v344_v50 }
 0x13a   :  { %v3332_v57 = vpop.eup %3331 }
 0x13b   :  { %v3334_v58 = vpop.eup %3333  ;;  %593 = vrot.lane.b32.xlu0 %v386_v55, %s3604_s25  ;;  %v347_v59 = vmul.f32 %v3332_v57, %v3735_v26 }
 0x13c   :  { %v348_v61 = vmul.f32 %v3334_v58, %v3756_v32 }
 0x13d   :  { %v387_v60 = vpack.c.bf16 %v347_v59, %v346_v56 }
 0x13e   :  { %v3336_v62 = vpop.eup %3335 }
 0x13f   :  { %v3338_v63 = vpop.eup %3337  ;;  %643 = vrot.lane.b32.xlu1 %v387_v60, %s3604_s25  ;;  %v349_v0 = vmul.f32 %v3336_v62, %v3754_v31 }
 0x140   :  { %v350_v6 = vmul.f32 %v3338_v63, %v3775_v37 }
 0x141   :  { %v388_v1 = vpack.c.bf16 %v349_v0, %v348_v61 }
 0x142   :  { %v3340_v13 = vpop.eup %3339 }
 0x143   :  { %693 = vrot.lane.b32.xlu0 %v388_v1, %s3604_s25  ;;  %v351_v18 = vmul.f32 %v3340_v13, %v3773_v36 }
 0x145   :  { %v389_v23 = vpack.c.bf16 %v351_v18, %v350_v6 }
 0x147   :  { %743 = vrot.lane.b32.xlu1 %v389_v23, %s3604_s25  ;;  %1553 = vrot.lane.b32.xlu0 %v3660_v7, %s3608_s15 }
 0x14b   :  { %1555 = vrot.lane.b32.xlu1 %v3672_v9, %s3608_s15  ;;  %1557 = vrot.lane.b32.xlu0 %v3664_v8, %s3608_s15 }
 0x14f   :  { %1559 = vrot.lane.b32.xlu1 %v3676_v10, %s3608_s15  ;;  %1409 = vrot.lane.b32.xlu0 %v3660_v7, %s3609_s16  ;;  %v98_v7 = vpop.xlane.xlu1 %97 }
 0x153   :  { %1411 = vrot.lane.b32.xlu1 %v3672_v9, %s3609_s16  ;;  %1413 = vrot.lane.b32.xlu0 %v3664_v8, %s3609_s16  ;;  %v101_v8 = vpop.xlane.xlu0 %100  ;;  %v104_v9 = vpop.xlane.xlu1 %103 }
 0x154   :  { %v145_v33 = vmax.f32 %v101_v8, 1e-12  ;;  %v146_v41 = vmax.f32 %v104_v9, 1e-12 }
 0x157   :  { %1415 = vrot.lane.b32.xlu1 %v3676_v10, %s3609_s16  ;;  %1563 = vrot.lane.b32.xlu0 %v3691_v14, %s3608_s15  ;;  %v107_v10 = vpop.xlane.xlu0 %106 }
 0x15b   :  { %1561 = vrot.lane.b32.xlu1 %v3695_v15, %s3608_s15  ;;  %1417 = vrot.lane.b32.xlu0 %v3695_v15, %s3609_s16  ;;  %v113_v15 = vpop.xlane.xlu0 %112 }
 0x15c   :  { %v149_v43 = vmax.f32 %v113_v15, 1e-12 }
 0x15f   :  { %1565 = vrot.lane.b32.xlu1 %v3714_v20, %s3608_s15  ;;  %1421 = vrot.lane.b32.xlu0 %v3714_v20, %s3609_s16  ;;  %v119_v20 = vpop.xlane.xlu0 %118 }
 0x160   :  { %v151_v45 = vmax.f32 %v119_v20, 1e-12 }
 0x163   :  { %1567 = vrot.lane.b32.xlu1 %v3710_v19, %s3608_s15  ;;  %1571 = vrot.lane.b32.xlu0 %v3729_v24, %s3608_s15  ;;  %v125_v40 = vpop.xlane.xlu0 %124 }
 0x167   :  { %1419 = vrot.lane.b32.xlu1 %v3691_v14, %s3609_s16  ;;  %1425 = vrot.lane.b32.xlu0 %v3733_v25, %s3609_s16  ;;  %v110_v14 = vpop.xlane.xlu1 %109 }
 0x168   :  { %v148_v42 = vmax.f32 %v110_v14, 1e-12 }
 0x16b   :  { %1423 = vrot.lane.b32.xlu1 %v3710_v19, %s3609_s16  ;;  %1429 = vrot.lane.b32.xlu0 %v3752_v30, %s3609_s16  ;;  %v116_v19 = vpop.xlane.xlu1 %115 }
 0x16c   :  { %v150_v44 = vmax.f32 %v116_v19, 1e-12 }
 0x16f   :  { %1569 = vrot.lane.b32.xlu1 %v3733_v25, %s3608_s15  ;;  %1579 = vrot.lane.b32.xlu0 %v3767_v34, %s3608_s15  ;;  %v122_v25 = vpop.xlane.xlu1 %121 }
 0x170   :  { %v152_v50 = vmax.f32 %v122_v25, 1e-12 }
 0x173   :  { %1573 = vrot.lane.b32.xlu1 %v3752_v30, %s3608_s15  ;;  %1433 = vrot.lane.b32.xlu0 %v3771_v35, %s3609_s16  ;;  %v144_v30 = vmax.f32 %v98_v7, 1e-12 }
 0x175   :  { %3341 = vrsqrt.f32 %v144_v30 }
 0x176   :  { %3343 = vrsqrt.f32 %v145_v33 }
 0x177   :  { %1575 = vrot.lane.b32.xlu1 %v3748_v29, %s3608_s15  ;;  %1437 = vrot.lane.b32.xlu0 %v3787_v39, %s3609_s16  ;;  %3345 = vrsqrt.f32 %v146_v41 }
 0x17b   :  { %1427 = vrot.lane.b32.xlu1 %v3729_v24, %s3609_s16  ;;  %v128_v24 = vpop.xlane.xlu1 %127 }
 0x17c   :  { %v154_v57 = vmax.f32 %v128_v24, 1e-12 }
 0x17f   :  { %1431 = vrot.lane.b32.xlu1 %v3748_v29, %s3609_s16  ;;  %v147_v29 = vmax.f32 %v107_v10, 1e-12  ;;  %v3342_v47 = vpop.eup %3341 }
 0x180   :  { %v3344_v48 = vpop.eup %3343  ;;  %v176_v52 = vmul.f32 %v3342_v47, %v3647_v2 }
 0x181   :  { %3347 = vrsqrt.f32 %v147_v29  ;;  %v3346_v51 = vpop.eup %3345  ;;  %v177_v53 = vmul.f32 %v3344_v48, %v3651_v4 }
 0x182   :  { %3349 = vrsqrt.f32 %v148_v42  ;;  %v178_v63 = vmul.f32 %v3346_v51, %v3649_v3 }
 0x183   :  { %1577 = vrot.lane.b32.xlu1 %v3771_v35, %s3608_s15  ;;  %v131_v35 = vpop.xlane.xlu0 %130  ;;  %3351 = vrsqrt.f32 %v149_v43 }
 0x184   :  { %3353 = vrsqrt.f32 %v150_v44  ;;  %v155_v59 = vmax.f32 %v131_v35, 1e-12 }
 0x185   :  { %3355 = vrsqrt.f32 %v151_v45 }
 0x186   :  { %3357 = vrsqrt.f32 %v152_v50 }
 0x187   :  { %1581 = vrot.lane.b32.xlu1 %v3787_v39, %s3608_s15  ;;  %v134_v39 = vpop.xlane.xlu1 %133  ;;  %v137_v46 = vpop.xlane.xlu0 %136 }
 0x188   :  { %v156_v13 = vmax.f32 %v134_v39, 1e-12  ;;  %v157_v7 = vmax.f32 %v137_v46, 1e-12 }
 0x18b   :  { %1583 = vrot.lane.b32.xlu1 %v3783_v38, %s3608_s15  ;;  %v140_v49 = vpop.xlane.xlu1 %139  ;;  %v3348_v54 = vpop.eup %3347 }
 0x18c   :  { %v143_v55 = vpop.xlane.xlu0 %142  ;;  %v3350_v60 = vpop.eup %3349  ;;  %v179_v0 = vmul.f32 %v3348_v54, %v3653_v5  ;;  %v158_v25 = vmax.f32 %v140_v49, 1e-12 }
 0x18d   :  { %v3352_v1 = vpop.eup %3351  ;;  %v180_v23 = vmul.f32 %v3350_v60, %v3680_v12  ;;  %v159_v33 = vmax.f32 %v143_v55, 1e-12 }
 0x18e   :  { %v3354_v8 = vpop.eup %3353  ;;  %v181_v9 = vmul.f32 %v3352_v1, %v3678_v11 }
 0x18f   :  { %1435 = vrot.lane.b32.xlu1 %v3767_v34, %s3609_s16  ;;  %v153_v34 = vmax.f32 %v125_v40, 1e-12  ;;  %v3356_v19 = vpop.eup %3355  ;;  %v182_v29 = vmul.f32 %v3354_v8, %v3699_v17 }
 0x190   :  { %v3358_v24 = vpop.eup %3357  ;;  %v183_v41 = vmul.f32 %v3356_v19, %v3697_v16 }
 0x191   :  { %3359 = vrsqrt.f32 %v153_v34  ;;  %v184_v45 = vmul.f32 %v3358_v24, %v3718_v22 }
 0x192   :  { %3361 = vrsqrt.f32 %v154_v57 }
 0x193   :  { %1439 = vrot.lane.b32.xlu1 %v3783_v38, %s3609_s16  ;;  %v3937_v38 = vstv %s3236_s17  ;;  %3363 = vrsqrt.f32 %v155_v59 }
 0x194   :  { %v358_v61 = vmul.f32 %v3937_v38, %v176_v52  ;;  %v359_v62 = vmul.f32 %v3937_v38, %v177_v53  ;;  %v360_v14 = vmul.f32 %v3937_v38, %v178_v63  ;;  %v361_v15 = vmul.f32 %v3937_v38, %v179_v0 }
 0x195   :  { %3365 = vrsqrt.f32 %v156_v13  ;;  %v362_v40 = vmul.f32 %v3937_v38, %v180_v23  ;;  %v363_v42 = vmul.f32 %v3937_v38, %v181_v9  ;;  %v364_v49 = vmul.f32 %v3937_v38, %v182_v29 }
 0x196   :  { %v374_v10 = vpack.c.bf16 %v359_v62, %v358_v61  ;;  %3367 = vrsqrt.f32 %v157_v7  ;;  %v375_v35 = vpack.c.bf16 %v361_v15, %v360_v14  ;;  %v365_v50 = vmul.f32 %v3937_v38, %v183_v41 }
 0x197   :  { %3369 = vrsqrt.f32 %v158_v25  ;;  %v376_v48 = vpack.c.bf16 %v363_v42, %v362_v40  ;;  %v366_v53 = vmul.f32 %v3937_v38, %v184_v45 }
 0x198   :  { %3371 = vrsqrt.f32 %v159_v33  ;;  %v377_v57 = vpack.c.bf16 %v365_v50, %v364_v49 }
 0x19b   :  { %v3360_v43 = vpop.eup %3359 }
 0x19c   :  { %v3362_v46 = vpop.eup %3361  ;;  %v185_v47 = vmul.f32 %v3360_v43, %v3716_v21 }
 0x19d   :  { %v394_v56 = vpop.permute.xlu1 %393  ;;  %v3364_v34 = vpop.eup %3363 }
 0x19e   :  { %v399_v58 = vsel %vm95_vm0, %v394_v56, 0  ;;  %v187_v55 = vmul.f32 %v3364_v34, %v3735_v26  ;;  %v186_v56 = vmul.f32 %v3362_v46, %v3737_v27 }
 0x19f   :  { %3044 = vmatpush3.bf16.xpose.msra.mxu0 %v399_v58  ;;  %v3366_v54 = vpop.eup %3365  ;;  %v367_v58 = vmul.f32 %v3937_v38, %v185_v47 }
 0x1a0   :  { %3055 = vmatprep.subr.bf16.mxu0 %v4994_v28  ;;  %v3368_v59 = vpop.eup %3367  ;;  %v188_v62 = vmul.f32 %v3366_v54, %v3756_v32  ;;  %v369_v13 = vmul.f32 %v3937_v38, %v187_v55 }
 0x1a1   :  { %v444_v6 = vpop.permute.xlu0 %443  ;;  %v3370_v63 = vpop.eup %3369  ;;  %v189_v0 = vmul.f32 %v3368_v59, %v3754_v31  ;;  %v378_v1 = vpack.c.bf16 %v367_v58, %v366_v53 }
 0x1a2   :  { %v449_v18 = vsel %vm95_vm0, %v444_v6, 0  ;;  %v368_v6 = vmul.f32 %v3937_v38, %v186_v56  ;;  %v370_v8 = vmul.f32 %v3937_v38, %v188_v62 }
 0x1a3   :  { %3050 = vmatpush3.bf16.xpose.msra.mxu1 %v449_v18  ;;  %v3372_v18 = vpop.eup %3371  ;;  %v371_v15 = vmul.f32 %v3937_v38, %v189_v0 }
 0x1a4   :  { %3061 = vmatprep.subr.bf16.mxu1 %v4994_v28  ;;  %v191_v9 = vmul.f32 %v3372_v18, %v3773_v36  ;;  %v379_v14 = vpack.c.bf16 %v369_v13, %v368_v6 }
 0x1a5   :  { %v494_v20 = vpop.permute.xlu1 %493  ;;  %v380_v33 = vpack.c.bf16 %v371_v15, %v370_v8 }
 0x1a6   :  { %v499_v30 = vsel %vm95_vm0, %v494_v20, 0  ;;  %3046 = vmatmul.mubr.msk.bf16.vlgmr.msra.gmra.mrb[0].mxu0 %vm95_vm0, %v374_v10  ;;  %v190_v10 = vmul.f32 %v3370_v63, %v3775_v37  ;;  %v373_v24 = vmul.f32 %v3937_v38, %v191_v9 }
 0x1a7   :  { %3056 = vmatpush3.bf16.xpose.msra.mxu0 %v499_v30  ;;  %3057 = vmatprep.mubr.msk.bf16.mxu0 %vm3607_vm1, %v4994_v28 }
 0x1a8   :  { %3067 = vmatprep.subr.bf16.mxu0 %v4994_v28  ;;  %v372_v40 = vmul.f32 %v3937_v38, %v190_v10 }
 0x1a9   :  { %v544_v39 = vpop.permute.xlu1 %543 }
 0x1aa   :  { %v549_v44 = vsel %vm95_vm0, %v544_v39, 0  ;;  %3052 = vmatmul.mubr.msk.bf16.vlgmr.msra.gmra.mrb[0].mxu1 %vm95_vm0, %v375_v35  ;;  %v381_v43 = vpack.c.bf16 %v373_v24, %v372_v40 }
 0x1ab   :  { %3062 = vmatpush3.bf16.xpose.msra.mxu1 %v549_v44  ;;  %3063 = vmatprep.mubr.msk.bf16.mxu1 %vm3607_vm1, %v4994_v28 }
 0x1ac   :  { %3073 = vmatprep.subr.bf16.mxu1 %v4994_v28 }
 0x1ad   :  { %v594_v51 = vpop.permute.xlu0 %593 }
 0x1ae   :  { %v599_v52 = vsel %vm95_vm0, %v594_v51, 0  ;;  %3058 = vmatmul.mubr.msk.bf16.vlgmr.msra.gmra.mrb[4].mxu0 %vm95_vm0, %v376_v48 }
 0x1af   :  { %3068 = vmatpush3.bf16.xpose.msra.mxu0 %v599_v52  ;;  %3069 = vmatprep.mubr.msk.bf16.mxu0 %vm3607_vm1, %v4994_v28 }
 0x1b0   :  { %3079 = vmatprep.subr.bf16.mxu0 %v4994_v28 }
 0x1b1   :  { %v644_v60 = vpop.permute.xlu1 %643 }
 0x1b2   :  { %v649_v61 = vsel %vm95_vm0, %v644_v60, 0  ;;  %3064 = vmatmul.mubr.msk.bf16.vlgmr.msra.gmra.mrb[4].mxu1 %vm95_vm0, %v377_v57 }
 0x1b3   :  { %3074 = vmatpush3.bf16.xpose.msra.mxu1 %v649_v61  ;;  %3075 = vmatprep.mubr.msk.bf16.mxu1 %vm3607_vm1, %v4994_v28 }
 0x1b4   :  { %3085 = vmatprep.subr.bf16.mxu1 %v4994_v28 }
 0x1b5   :  { %v694_v23 = vpop.permute.xlu0 %693 }
 0x1b6   :  { %v699_v7 = vsel %vm95_vm0, %v694_v23, 0  ;;  %3070 = vmatmul.mubr.msk.bf16.vlgmr.msra.gmra.mrb[8].mxu0 %vm95_vm0, %v378_v1 }
 0x1b7   :  { %3080 = vmatpush3.bf16.xpose.msra.mxu0 %v699_v7  ;;  %3081 = vmatprep.mubr.msk.bf16.mxu0 %vm3607_vm1, %v4994_v28 }
 0x1b8   :  { %3091 = vmatprep.subr.bf16.mxu0 %v4994_v28 }
 0x1b9   :  { %v744_v19 = vpop.permute.xlu1 %743  ;;  %v1554_v20 = vpop.permute.xlu0 %1553 }
 0x1ba   :  { %v749_v25 = vsel %vm95_vm0, %v744_v19, 0  ;;  %3076 = vmatmul.mubr.msk.bf16.vlgmr.msra.gmra.mrb[8].mxu1 %vm95_vm0, %v379_v14  ;;  %v1601_v30 = vsel %vm95_vm0, %v1554_v20, 0.0 }
 0x1bb   :  { %3086 = vmatpush3.bf16.xpose.msra.mxu1 %v749_v25  ;;  %3087 = vmatprep.mubr.msk.bf16.mxu1 %vm3607_vm1, %v4994_v28 }
 0x1bc   :  { %1602 = vadd.xlane.f32.xlu1 %v1601_v30  ;;  %3097 = vmatprep.subr.bf16.mxu1 %v4994_v28 }
 0x1bd   :  { %v1556_v41 = vpop.permute.xlu1 %1555  ;;  %v1558_v29 = vpop.permute.xlu0 %1557 }
 0x1be   :  { %3082 = vmatmul.mubr.msk.bf16.vlgmr.msra.gmra.mrb[12].mxu0 %vm95_vm0, %v380_v33  ;;  %v1607_v35 = vsel %vm95_vm0, %v1558_v29, 0.0  ;;  %v1604_v42 = vsel %vm95_vm0, %v1556_v41, 0.0 }
 0x1bf   :  { %1605 = vadd.xlane.f32.xlu0 %v1604_v42  ;;  %3093 = vmatprep.mubr.msk.bf16.mxu0 %vm3607_vm1, %v4994_v28 }
 0x1c0   :  { %1608 = vadd.xlane.f32.xlu1 %v1607_v35 }
 0x1c1   :  { %v1560_v39 = vpop.permute.xlu1 %1559  ;;  %v1410_v44 = vpop.permute.xlu0 %1409 }
 0x1c2   :  { %3088 = vmatmul.mubr.msk.bf16.vlgmr.msra.gmra.mrb[12].mxu1 %vm95_vm0, %v381_v43  ;;  %v1457_v38 = vsel %vm95_vm0, %v1410_v44, 0.0  ;;  %v1610_v45 = vsel %vm95_vm0, %v1560_v39, 0.0 }
 0x1c3   :  { %1611 = vadd.xlane.f32.xlu0 %v1610_v45  ;;  %3099 = vmatprep.mubr.msk.bf16.mxu1 %vm3607_vm1, %v4994_v28 }
 0x1c4   :  { %1458 = vadd.xlane.f32.xlu1 %v1457_v38 }
 0x1c5   :  { %v1412_v46 = vpop.permute.xlu1 %1411  ;;  %v1414_v47 = vpop.permute.xlu0 %1413 }
 0x1c6   :  { %v1463_v48 = vsel %vm95_vm0, %v1414_v47, 0.0  ;;  %v1460_v49 = vsel %vm95_vm0, %v1412_v46, 0.0 }
 0x1c7   :  { %1461 = vadd.xlane.f32.xlu0 %v1460_v49 }
 0x1c8   :  { %1464 = vadd.xlane.f32.xlu1 %v1463_v48 }
 0x1c9   :  { %v1416_v50 = vpop.permute.xlu1 %1415  ;;  %v1564_v34 = vpop.permute.xlu0 %1563 }
 0x1ca   :  { %v1466_v51 = vsel %vm95_vm0, %v1416_v50, 0.0  ;;  %v1616_v52 = vsel %vm95_vm0, %v1564_v34, 0.0 }
 0x1cb   :  { %1467 = vadd.xlane.f32.xlu0 %v1466_v51 }
 0x1cd   :  { %v1562_v53 = vpop.permute.xlu1 %1561  ;;  %v1418_v55 = vpop.permute.xlu0 %1417 }
 0x1ce   :  { %v1613_v54 = vsel %vm95_vm0, %v1562_v53, 0.0  ;;  %v1469_v58 = vsel %vm95_vm0, %v1418_v55, 0.0 }
 0x1cf   :  { %1614 = vadd.xlane.f32.xlu1 %v1613_v54  ;;  %1617 = vadd.xlane.f32.xlu0 %v1616_v52  ;;  %v4044_v52 = vld [vmem:[%s4989_s0] sm:$0xff]  }
 0x1d0   :  { %5034 = vst [vmem:[#allocation15_spill] sm:$0xff] %v4044_v52 }
 0x1d1   :  { %v1566_v56 = vpop.permute.xlu1 %1565  ;;  %v1422_v60 = vpop.permute.xlu0 %1421 }
 0x1d2   :  { %v1619_v57 = vsel %vm95_vm0, %v1566_v56, 0.0  ;;  %v1475_v62 = vsel %vm95_vm0, %v1422_v60, 0.0 }
 0x1d3   :  { %1620 = vadd.xlane.f32.xlu1 %v1619_v57 }
 0x1d5   :  { %v1568_v59 = vpop.permute.xlu1 %1567  ;;  %v1572_v6 = vpop.permute.xlu0 %1571 }
 0x1d6   :  { %v1622_v61 = vsel %vm95_vm0, %v1568_v59, 0.0  ;;  %v1628_v18 = vsel %vm95_vm0, %v1572_v6, 0.0 }
 0x1d7   :  { %1470 = vadd.xlane.f32.xlu1 %v1469_v58  ;;  %1623 = vadd.xlane.f32.xlu0 %v1622_v61 }
 0x1d9   :  { %v1420_v63 = vpop.permute.xlu1 %1419  ;;  %v1426_v8 = vpop.permute.xlu0 %1425 }
 0x1da   :  { %v1472_v0 = vsel %vm95_vm0, %v1420_v63, 0.0  ;;  %v1481_v14 = vsel %vm95_vm0, %v1426_v8, 0.0  ;;  %v4071_v63 = vld [vmem:[%s4990_s1] sm:$0xff] }
 0x1db   :  { %1476 = vadd.xlane.f32.xlu1 %v1475_v62  ;;  %1473 = vadd.xlane.f32.xlu0 %v1472_v0 }
 0x1dd   :  { %v1424_v1 = vpop.permute.xlu1 %1423  ;;  %v1430_v19 = vpop.permute.xlu0 %1429 }
 0x1de   :  { %v1478_v13 = vsel %vm95_vm0, %v1424_v1, 0.0  ;;  %v1487_v25 = vsel %vm95_vm0, %v1430_v19, 0.0  ;;  %v47_v1 = vld [vmem:[%s4991_s2] sm:$0xff] }
 0x1df   :  { %1479 = vadd.xlane.f32.xlu0 %v1478_v13  ;;  %v4081_v13 = vld [vmem:[%s4990_s1 + $0x8] sm:$0xff] }
 0x1e1   :  { %v1570_v23 = vpop.permute.xlu1 %1569  ;;  %v1580_v24 = vpop.permute.xlu0 %1579 }
 0x1e2   :  { %v1625_v7 = vsel %vm95_vm0, %v1570_v23, 0.0  ;;  %v1640_v29 = vsel %vm95_vm0, %v1580_v24, 0.0  ;;  %v50_v24 = vld [vmem:[%s4991_s2 + $0x18] sm:$0xff] }
 0x1e3   :  { %1626 = vadd.xlane.f32.xlu1 %v1625_v7  ;;  %1629 = vadd.xlane.f32.xlu0 %v1628_v18  ;;  %v48_v7 = vld [vmem:[%s4991_s2 + $0x8] sm:$0xff] }
 0x1e5   :  { %v1574_v9 = vpop.permute.xlu1 %1573  ;;  %v1434_v43 = vpop.permute.xlu0 %1433 }
 0x1e6   :  { %v1631_v10 = vsel %vm95_vm0, %v1574_v9, 0.0  ;;  %v1493_v38 = vsel %vm95_vm0, %v1434_v43, 0.0 }
 0x1e7   :  { %1632 = vadd.xlane.f32.xlu1 %v1631_v10 }
 0x1e9   :  { %v1576_v15 = vpop.permute.xlu1 %1575  ;;  %v1438_v45 = vpop.permute.xlu0 %1437 }
 0x1ea   :  { %v1634_v20 = vsel %vm95_vm0, %v1576_v15, 0.0  ;;  %v1499_v48 = vsel %vm95_vm0, %v1438_v45, 0.0  ;;  %v49_v15 = vld [vmem:[%s4991_s2 + $0x10] sm:$0xff] }
 0x1eb   :  { %1482 = vadd.xlane.f32.xlu1 %v1481_v14  ;;  %1635 = vadd.xlane.f32.xlu0 %v1634_v20 }
 0x1ed   :  { %v1428_v30 = vpop.permute.xlu1 %1427 }
 0x1ee   :  { %v1484_v33 = vsel %vm95_vm0, %v1428_v30, 0.0 }
 0x1ef   :  { %1488 = vadd.xlane.f32.xlu1 %v1487_v25  ;;  %1485 = vadd.xlane.f32.xlu0 %v1484_v33 }
 0x1f1   :  { %v1432_v40 = vpop.permute.xlu1 %1431 }
 0x1f2   :  { %v1490_v41 = vsel %vm95_vm0, %v1432_v40, 0.0 }
 0x1f3   :  { %1491 = vadd.xlane.f32.xlu0 %v1490_v41 }
 0x1f5   :  { %v1578_v35 = vpop.permute.xlu1 %1577 }
 0x1f6   :  { %v1637_v42 = vsel %vm95_vm0, %v1578_v35, 0.0 }
 0x1f7   :  { %1638 = vadd.xlane.f32.xlu1 %v1637_v42  ;;  %1641 = vadd.xlane.f32.xlu0 %v1640_v29 }
 0x1f9   :  { %v1582_v39 = vpop.permute.xlu1 %1581 }
 0x1fa   :  { %v1643_v44 = vsel %vm95_vm0, %v1582_v39, 0.0 }
 0x1fb   :  { %1644 = vadd.xlane.f32.xlu1 %v1643_v44 }
 0x1fd   :  { %v1584_v46 = vpop.permute.xlu1 %1583 }
 0x1fe   :  { %v1646_v47 = vsel %vm95_vm0, %v1584_v46, 0.0 }
 0x1ff   :  { %1494 = vadd.xlane.f32.xlu1 %v1493_v38  ;;  %1647 = vadd.xlane.f32.xlu0 %v1646_v47  ;;  %v51_v47 = vld [vmem:[%s4991_s2 + $0x20] sm:$0xff] }
 0x201   :  { %v1436_v49 = vpop.permute.xlu1 %1435 }
 0x202   :  { %v1496_v50 = vsel %vm95_vm0, %v1436_v49, 0.0 }
 0x203   :  { %1500 = vadd.xlane.f32.xlu1 %v1499_v48  ;;  %1497 = vadd.xlane.f32.xlu0 %v1496_v50  ;;  %v52_v48 = vld [vmem:[%s4991_s2 + $0x28] sm:$0xff] }
 0x205   :  { %v1440_v34 = vpop.permute.xlu1 %1439 }
 0x206   :  { %v1502_v51 = vsel %vm95_vm0, %v1440_v34, 0.0 }
 0x207   :  { %1503 = vadd.xlane.f32.xlu0 %v1502_v51 }
 0x214   :  { %998 = vrot.lane.b32.xlu1 %v4044_v52, %s3610_s20 }
 0x249   :  { %v4048_v53 = vpop.xlane.xlu1 %1602 }
 0x24d   :  { %v4050_v54 = vpop.xlane.xlu1 %1608 }
 0x251   :  { %v4052_v55 = vpop.xlane.xlu1 %1458 }
 0x255   :  { %v4054_v56 = vpop.xlane.xlu1 %1464 }
 0x25c   :  { %v4056_v57 = vpop.xlane.xlu1 %1614 }
 0x260   :  { %v4058_v58 = vpop.xlane.xlu1 %1620 }
 0x264   :  { %v4060_v59 = vpop.xlane.xlu1 %1470 }
 0x268   :  { %v4062_v60 = vpop.xlane.xlu1 %1476 }
 0x270   :  { %v4064_v61 = vpop.xlane.xlu1 %1626 }
 0x274   :  { %v4066_v62 = vpop.xlane.xlu1 %1632 }
 0x278   :  { %v4073_v0 = vpop.xlane.xlu1 %1482 }
 0x279   :  { %v435_v6 = vpop.f32.mrb[0].mxu0 }
 0x27a   :  { %v436_v18 = vadd.f32 %v435_v6, %v4071_v63  ;;  %v3047_v23 = vpop.f32.mrb[1].mxu0 }
 0x27b   :  { %v438_v8 = vpop.f32.mrb[2].mxu0 }
 0x27c   :  { %v4087_v9 = vadd.f32 %v436_v18, %v47_v1  ;;  %v439_v10 = vadd.f32 %v438_v8, %v4081_v13  ;;  %v3048_v14 = vpop.f32.mrb[3].mxu0  ;;  %v4098_v40 = vpop.xlane.xlu1 %1488 }
 0x27d   :  { %v485_v19 = vpop.f32.mrb[0].mxu1 }
 0x27e   :  { %v4093_v20 = vadd.f32 %v439_v10, %v48_v7  ;;  %v486_v25 = vadd.f32 %v485_v19, %v4071_v63  ;;  %v3053_v30 = vpop.f32.mrb[1].mxu1  ;;  %v809_v33 = vsel %vm808_vm2, %v4087_v9, -inf  ;;  %v53_v10 = vld [vmem:[%s4991_s2 + $0x30] sm:$0xff] }
 0x27f   :  { %v488_v41 = vpop.f32.mrb[2].mxu1  ;;  %810 = vmax.xlane.f32.xlu0 %v809_v33 }
 0x280   :  { %v4103_v29 = vadd.f32 %v486_v25, %v49_v15  ;;  %v489_v35 = vadd.f32 %v488_v41, %v4081_v13  ;;  %v3054_v42 = vpop.f32.mrb[3].mxu1  ;;  %v812_v43 = vsel %vm808_vm2, %v4093_v20, -inf }
 0x281   :  { %v535_v39 = vpop.f32.mrb[4].mxu0  ;;  %813 = vmax.xlane.f32.xlu1 %v812_v43  ;;  %v54_v42 = vld [vmem:[%s4991_s2 + $0x38] sm:$0xff]  ;;  %v56_v43 = vld [vmem:[%s4991_s2 + $0x48] sm:$0xff] }
 0x282   :  { %v4108_v44 = vadd.f32 %v489_v35, %v50_v24  ;;  %v536_v38 = vadd.f32 %v535_v39, %v4071_v63  ;;  %v3059_v45 = vpop.f32.mrb[5].mxu0  ;;  %v815_v46 = vsel %vm808_vm2, %v4103_v29, -inf }
 0x283   :  { %v538_v49 = vpop.f32.mrb[6].mxu0  ;;  %816 = vmax.xlane.f32.xlu0 %v815_v46 }
 0x284   :  { %v539_v50 = vadd.f32 %v538_v49, %v4081_v13  ;;  %v3060_v34 = vpop.f32.mrb[7].mxu0  ;;  %v4120_v51 = vpop.xlane.xlu1 %1638  ;;  %v4122_v6 = vadd.f32 %v536_v38, %v51_v47  ;;  %v818_v8 = vsel %vm808_vm2, %v4108_v44, -inf }
 0x285   :  { %5035 = vst [vmem:[#allocation16_spill] sm:$0xff] %v4120_v51  ;;  %v585_v1 = vpop.f32.mrb[4].mxu1 }
 0x286   :  { %v4124_v18 = vadd.f32 %v539_v50, %v52_v48  ;;  %v586_v23 = vadd.f32 %v585_v1, %v4071_v63  ;;  %v3065_v7 = vpop.f32.mrb[5].mxu1  ;;  %v821_v35 = vsel %vm808_vm2, %v4122_v6, -inf }
 0x287   :  { %v588_v14 = vpop.f32.mrb[6].mxu1  ;;  %819 = vmax.xlane.f32.xlu0 %v818_v8 }
 0x288   :  { %v3066_v15 = vpop.f32.mrb[7].mxu1  ;;  %v824_v19 = vsel %vm808_vm2, %v4124_v18, -inf  ;;  %v4134_v25 = vpop.xlane.xlu1 %1644  ;;  %v4136_v33 = vadd.f32 %v586_v23, %v53_v10  ;;  %v589_v24 = vadd.f32 %v588_v14, %v4081_v13  ;;  %v55_v23 = vld [vmem:[%s4991_s2 + $0x40] sm:$0xff] }
 0x289   :  { %v635_v30 = vpop.f32.mrb[8].mxu0  ;;  %825 = vmax.xlane.f32.xlu1 %v824_v19 }
 0x28a   :  { %v3071_v41 = vpop.f32.mrb[9].mxu0  ;;  %v4150_v48 = vadd.f32 %v589_v24, %v54_v42  ;;  %v636_v49 = vadd.f32 %v635_v30, %v4071_v63  ;;  %v827_v1 = vsel %vm808_vm2, %v4136_v33, -inf  ;;  %v60_v42 = vld [vmem:[%s4991_s2 + $0x68] sm:$0xff] }
 0x28b   :  { %v638_v39 = vpop.f32.mrb[10].mxu0  ;;  %822 = vmax.xlane.f32.xlu0 %v821_v35  ;;  %v57_v35 = vld [vmem:[%s4991_s2 + $0x50] sm:$0xff] }
 0x28c   :  { %v639_v38 = vadd.f32 %v638_v39, %v4081_v13  ;;  %v3072_v45 = vpop.f32.mrb[11].mxu0  ;;  %v4148_v46 = vpop.xlane.xlu1 %1494  ;;  %v4164_v19 = vadd.f32 %v636_v49, %v55_v23  ;;  %v830_v41 = vsel %vm808_vm2, %v4150_v48, -inf }
 0x28d   :  { %5036 = vst [vmem:[#allocation17_spill] sm:$0xff] %v4148_v46  ;;  %v685_v47 = vpop.f32.mrb[8].mxu1 }
 0x28e   :  { %v4153_v50 = vadd.f32 %v639_v38, %v56_v43  ;;  %v3077_v34 = vpop.f32.mrb[9].mxu1  ;;  %v686_v30 = vadd.f32 %v685_v47, %v4071_v63 }
 0x28f   :  { %v688_v7 = vpop.f32.mrb[10].mxu1  ;;  %828 = vmax.xlane.f32.xlu0 %v827_v1 }
 0x290   :  { %v3078_v8 = vpop.f32.mrb[11].mxu1  ;;  %v836_v10 = vsel %vm808_vm2, %v4153_v50, -inf  ;;  %v4162_v14 = vpop.xlane.xlu1 %1500  ;;  %v4176_v47 = vadd.f32 %v686_v30, %v57_v35  ;;  %v689_v34 = vadd.f32 %v688_v7, %v4081_v13 }
 0x291   :  { %v735_v15 = vpop.f32.mrb[12].mxu0  ;;  %837 = vmax.xlane.f32.xlu1 %v836_v10  ;;  %v833_v8 = vsel %vm808_vm2, %v4164_v19, -inf  ;;  %v58_v10 = vld [vmem:[%s4991_s2 + $0x58] sm:$0xff] }
 0x292   :  { %v3083_v24 = vpop.f32.mrb[13].mxu0  ;;  %v4189_v7 = vadd.f32 %v689_v34, %v58_v10  ;;  %v736_v35 = vadd.f32 %v735_v15, %v4071_v63  ;;  %v61_v34 = vld [vmem:[%s4991_s2 + $0x70] sm:$0xff]  ;;  %v62_v10 = vld [vmem:[%s4991_s2 + $0x78] sm:$0xff] }
 0x293   :  { %v738_v43 = vpop.f32.mrb[14].mxu0  ;;  %831 = vmax.xlane.f32.xlu0 %v830_v41 }
 0x294   :  { %v739_v39 = vadd.f32 %v738_v43, %v4081_v13  ;;  %v3084_v38 = vpop.f32.mrb[15].mxu0  ;;  %v999_v45 = vpop.permute.xlu1 %998  ;;  %v59_v43 = vld [vmem:[%s4991_s2 + $0x60] sm:$0xff] }
 0x295   :  { %v785_v49 = vpop.f32.mrb[12].mxu1  ;;  %3092 = vmatpush3.bf16.msra.mxu0 %v999_v45  ;;  %v842_v45 = vsel %vm808_vm2, %v4189_v7, -inf }
 0x296   :  { %v4179_v1 = vadd.f32 %v739_v39, %v60_v42  ;;  %v3089_v23 = vpop.f32.mrb[13].mxu1  ;;  %3103 = vmatprep.subr.bf16.mxu0 %v4994_v28  ;;  %v839_v42 = vsel %vm808_vm2, %v4176_v47, -inf  ;;  %v4197_v39 = vadd.f32 %v736_v35, %v59_v43  ;;  %v786_v38 = vadd.f32 %v785_v49, %v4071_v63  ;;  %v4238_v35 = vpop.xlane.xlu0 %1605 }
 0x297   :  { %v788_v24 = vpop.f32.mrb[14].mxu1  ;;  %834 = vmax.xlane.f32.xlu0 %v833_v8 }
 0x298   :  { %v3090_v41 = vpop.f32.mrb[15].mxu1  ;;  %v848_v30 = vsel %vm808_vm2, %v4179_v1, -inf  ;;  %v4205_v15 = vadd.f32 %v786_v38, %v61_v34  ;;  %v789_v23 = vadd.f32 %v788_v24, %v4081_v13  ;;  %v845_v8 = vsel %vm808_vm2, %v4197_v39, -inf  ;;  %v4229_v24 = vld [vmem:[%s4989_s0 + $0x18] sm:$0xff]   ;;  %v4254_v38 = vld [vmem:[%s4989_s0 + $0x8] sm:$0xff]   ;;  %v4263_v34 = vld [vmem:[%s4989_s0 + $0x20] sm:$0xff]  }
 0x299   :  { %849 = vmax.xlane.f32.xlu1 %v848_v30  ;;  %v4220_v41 = vld [vmem:[%s4989_s0 + $0x10] sm:$0xff]   ;;  %5038 = vst [vmem:[#allocation19_spill] sm:$0xff] %v4229_v24  ;;  %v4236_v30 = vld [vmem:[%s4989_s0 + $0x28] sm:$0xff]   ;;  %5041 = vst [vmem:[#allocation22_spill] sm:$0xff] %v4254_v38 }
 0x29a   :  { %v4213_v63 = vadd.f32 %v789_v23, %v62_v10  ;;  %v851_v49 = vsel %vm808_vm2, %v4205_v15, -inf  ;;  %5037 = vst [vmem:[#allocation18_spill] sm:$0xff] %v4220_v41  ;;  %5039 = vst [vmem:[#allocation20_spill] sm:$0xff] %v4236_v30  ;;  %v4249_v43 = vpop.xlane.xlu0 %1611 }
 0x29b   :  { %840 = vmax.xlane.f32.xlu0 %v839_v42  ;;  %v4245_v42 = vld [vmem:[%s4989_s0 + $0x38] sm:$0xff]   ;;  %5042 = vst [vmem:[#allocation23_spill] sm:$0xff] %v4263_v34 }
 0x29c   :  { %v854_v13 = vsel %vm808_vm2, %v4213_v63, -inf  ;;  %5040 = vst [vmem:[#allocation21_spill] sm:$0xff] %v4245_v42 }
 0x29f   :  { %843 = vmax.xlane.f32.xlu0 %v842_v45  ;;  %v4256_v45 = vpop.xlane.xlu0 %1461 }
 0x2a3   :  { %846 = vmax.xlane.f32.xlu0 %v845_v8  ;;  %v4265_v23 = vpop.xlane.xlu0 %1467  ;;  %v4272_v8 = vld [vmem:[%s4989_s0 + $0x30] sm:$0xff]   ;;  %s3238_s0 = spop %3237 }
 0x2a4   :  { %5043 = vst [vmem:[#allocation24_spill] sm:$0xff] %v4272_v8 }
 0x2a7   :  { %852 = vmax.xlane.f32.xlu0 %v851_v49  ;;  %v4276_v10 = vpop.xlane.xlu0 %1617 }
 0x2aa   :  { %1102 = vrot.lane.b32.xlu1 %v4220_v41, %s3610_s20 }
 0x2ab   :  { %855 = vmax.xlane.f32.xlu0 %v854_v13  ;;  %v4278_v49 = vpop.xlane.xlu0 %1623 }
 0x2ae   :  { %1154 = vrot.lane.b32.xlu1 %v4229_v24, %s3610_s20 }
 0x2af   :  { %v4280_v13 = vpop.xlane.xlu0 %1473 }
 0x2b2   :  { %1258 = vrot.lane.b32.xlu1 %v4236_v30, %s3610_s20 }
 0x2b3   :  { %v4282_v28 = vpop.xlane.xlu0 %1479 }
 0x2b6   :  { %1362 = vrot.lane.b32.xlu1 %v4245_v42, %s3610_s20 }
 0x2b7   :  { %v4284_v42 = vpop.xlane.xlu0 %1629 }
 0x2c1   :  { %1050 = vrot.lane.b32.xlu0 %v4254_v38, %s3610_s20  ;;  %v4286_v38 = vpop.xlane.xlu0 %1635 }
 0x2c5   :  { %1206 = vrot.lane.b32.xlu0 %v4263_v34, %s3610_s20  ;;  %v4288_v34 = vpop.xlane.xlu0 %1485 }
 0x2c9   :  { %1310 = vrot.lane.b32.xlu0 %v4272_v8, %s3610_s20  ;;  %v4290_v30 = vpop.xlane.xlu0 %1491 }
 0x2cd   :  { %v4292_v24 = vpop.xlane.xlu0 %1641 }
 0x2ce   :  { %5044 = vst [vmem:[#allocation25_spill] sm:$0xff] %v4292_v24 }
 0x2d1   :  { %v4294_v41 = vpop.xlane.xlu0 %1647 }
 0x2d5   :  { %v4296_v8 = vpop.xlane.xlu0 %1497 }
 0x2d6   :  { %5045 = vst [vmem:[#allocation26_spill] sm:$0xff] %v4296_v8 }
 0x2d9   :  { %v4298_v52 = vpop.xlane.xlu0 %1503 }
 0x30c   :  { %v811_v31 = vpop.xlane.xlu0 %810 }
 0x30d   :  { %v857_v32 = vsub.f32 %v4087_v9, %v811_v31 }
 0x30e   :  { %v814_v36 = vpop.xlane.xlu1 %813 }
 0x30f   :  { %v873_v37 = vmul.f32 1.442695, %v857_v32  ;;  %v858_v21 = vsub.f32 %v4093_v20, %v814_v36 }
 0x310   :  { %v817_v22 = vpop.xlane.xlu0 %816 }
 0x311   :  { %3373 = vpow2.f32 %v873_v37  ;;  %v875_v11 = vmul.f32 1.442695, %v858_v21  ;;  %v859_v26 = vsub.f32 %v4103_v29, %v817_v22 }
 0x313   :  { %3375 = vpow2.f32 %v875_v11  ;;  %v877_v27 = vmul.f32 1.442695, %v859_v26 }
 0x314   :  { %v820_v12 = vpop.xlane.xlu0 %819 }
 0x315   :  { %3377 = vpow2.f32 %v877_v27  ;;  %v860_v8 = vsub.f32 %v4108_v44, %v820_v12 }
 0x316   :  { %v826_v46 = vpop.xlane.xlu1 %825 }
 0x317   :  { %v879_v24 = vmul.f32 1.442695, %v860_v8  ;;  %v862_v51 = vsub.f32 %v4124_v18, %v826_v46 }
 0x318   :  { %v823_v31 = vpop.xlane.xlu0 %822 }
 0x319   :  { %3379 = vpow2.f32 %v879_v24  ;;  %v883_v32 = vmul.f32 1.442695, %v862_v51  ;;  %v861_v36 = vsub.f32 %v4122_v6, %v823_v31 }
 0x31b   :  { %v4306_v9 = vpop.eup %3373  ;;  %3381 = vpow2.f32 %v883_v32  ;;  %v881_v21 = vmul.f32 1.442695, %v861_v36 }
 0x31c   :  { %v829_v22 = vpop.xlane.xlu0 %828  ;;  %v905_v11 = vsel %vm808_vm2, %v4306_v9, 0.0 }
 0x31d   :  { %v4310_v26 = vpop.eup %3375  ;;  %3383 = vpow2.f32 %v881_v21  ;;  %v863_v12 = vsub.f32 %v4136_v33, %v829_v22  ;;  %906 = vadd.xlane.f32.xlu1 %v905_v11 }
 0x31e   :  { %v838_v27 = vpop.xlane.xlu1 %837  ;;  %v908_v37 = vsel %vm808_vm2, %v4310_v26, 0.0 }
 0x31f   :  { %v4315_v20 = vpop.eup %3377  ;;  %v885_v29 = vmul.f32 1.442695, %v863_v12  ;;  %v866_v44 = vsub.f32 %v4153_v50, %v838_v27  ;;  %909 = vadd.xlane.f32.xlu0 %v908_v37 }
 0x320   :  { %v832_v51 = vpop.xlane.xlu0 %831  ;;  %v911_v6 = vsel %vm808_vm2, %v4315_v20, 0.0 }
 0x321   :  { %3385 = vpow2.f32 %v885_v29  ;;  %v864_v18 = vsub.f32 %v4150_v48, %v832_v51  ;;  %912 = vadd.xlane.f32.xlu1 %v911_v6  ;;  %v891_v46 = vmul.f32 1.442695, %v866_v44 }
 0x323   :  { %v4321_v33 = vpop.eup %3379  ;;  %v887_v24 = vmul.f32 1.442695, %v864_v18 }
 0x324   :  { %v835_v8 = vpop.xlane.xlu0 %834  ;;  %v914_v31 = vsel %vm808_vm2, %v4321_v33, 0.0 }
 0x325   :  { %v4325_v32 = vpop.eup %3381  ;;  %3387 = vpow2.f32 %v887_v24  ;;  %v865_v50 = vsub.f32 %v4164_v19, %v835_v8  ;;  %915 = vadd.xlane.f32.xlu0 %v914_v31 }
 0x326   :  { %3389 = vpow2.f32 %v891_v46  ;;  %v850_v48 = vpop.xlane.xlu1 %849  ;;  %v920_v12 = vsel %vm808_vm2, %v4325_v32, 0.0 }
 0x327   :  { %v4328_v36 = vpop.eup %3383  ;;  %v889_v21 = vmul.f32 1.442695, %v865_v50  ;;  %v870_v19 = vsub.f32 %v4179_v1, %v850_v48 }
 0x328   :  { %v841_v22 = vpop.xlane.xlu0 %840  ;;  %v917_v11 = vsel %vm808_vm2, %v4328_v36, 0.0 }
 0x329   :  { %3391 = vpow2.f32 %v889_v21  ;;  %v867_v27 = vsub.f32 %v4176_v47, %v841_v22  ;;  %918 = vadd.xlane.f32.xlu1 %v917_v11  ;;  %921 = vadd.xlane.f32.xlu0 %v920_v12  ;;  %v899_v46 = vmul.f32 1.442695, %v870_v19 }
 0x32b   :  { %v4335_v37 = vpop.eup %3385  ;;  %v893_v29 = vmul.f32 1.442695, %v867_v27 }
 0x32c   :  { %v844_v44 = vpop.xlane.xlu0 %843  ;;  %v923_v51 = vsel %vm808_vm2, %v4335_v37, 0.0 }
 0x32d   :  { %3393 = vpow2.f32 %v893_v29  ;;  %v868_v6 = vsub.f32 %v4189_v7, %v844_v44  ;;  %924 = vadd.xlane.f32.xlu1 %v923_v51 }
 0x32f   :  { %v4341_v18 = vpop.eup %3387  ;;  %v895_v24 = vmul.f32 1.442695, %v868_v6  ;;  %v1507_v6 = vmax.f32 %v4054_v56, 1e-12 }
 0x330   :  { %v847_v47 = vpop.xlane.xlu0 %846  ;;  %v926_v8 = vsel %vm808_vm2, %v4341_v18, 0.0  ;;  %v4345_v31 = vpop.eup %3389 }
 0x331   :  { %3395 = vpow2.f32 %v895_v24  ;;  %v869_v1 = vsub.f32 %v4197_v39, %v847_v47  ;;  %927 = vadd.xlane.f32.xlu0 %v926_v8  ;;  %v932_v22 = vsel %vm808_vm2, %v4345_v31, 0.0  ;;  %v1508_v47 = vmax.f32 %v4265_v23, 1e-12 }
 0x332   :  { %3397 = vpow2.f32 %v899_v46  ;;  %v1651_v8 = vmax.f32 %v4050_v54, 1e-12  ;;  %v1649_v23 = vmax.f32 %v4048_v53, 1e-12  ;;  %v1505_v54 = vmax.f32 %v4052_v55, 1e-12 }
 0x333   :  { %v4348_v50 = vpop.eup %3391  ;;  %v897_v21 = vmul.f32 1.442695, %v869_v1  ;;  %v1511_v53 = vmax.f32 %v4062_v60, 1e-12  ;;  %v1512_v55 = vmax.f32 %v4282_v28, 1e-12 }
 0x334   :  { %v853_v7 = vpop.xlane.xlu0 %852  ;;  %v929_v48 = vsel %vm808_vm2, %v4348_v50, 0.0  ;;  %v1659_v28 = vmax.f32 %v4066_v62, 1e-12 }
 0x335   :  { %3399 = vpow2.f32 %v897_v21  ;;  %v871_v11 = vsub.f32 %v4205_v15, %v853_v7  ;;  %930 = vadd.xlane.f32.xlu1 %v929_v48  ;;  %933 = vadd.xlane.f32.xlu0 %v932_v22  ;;  %v1652_v21 = vmax.f32 %v4249_v43, 1e-12  ;;  %v1506_v43 = vmax.f32 %v4256_v45, 1e-12 }
 0x336   :  { %v1655_v22 = vmax.f32 %v4058_v58, 1e-12  ;;  %v1653_v45 = vmax.f32 %v4056_v57, 1e-12  ;;  %v1516_v57 = vmax.f32 %v4290_v30, 1e-12 }
 0x337   :  { %v4355_v12 = vpop.eup %3393  ;;  %v901_v39 = vmul.f32 1.442695, %v871_v11  ;;  %v1657_v30 = vmax.f32 %v4064_v61, 1e-12  ;;  %v1664_v61 = vmax.f32 %v4294_v41, 1e-12 }
 0x338   :  { %v856_v27 = vpop.xlane.xlu0 %855  ;;  %v935_v19 = vsel %vm808_vm2, %v4355_v12, 0.0 }
 0x339   :  { %3401 = vpow2.f32 %v901_v39  ;;  %v872_v29 = vsub.f32 %v4213_v63, %v856_v27  ;;  %936 = vadd.xlane.f32.xlu1 %v935_v19  ;;  %v5046_v63 = vmov 0.0   ;;  %v1656_v39 = vmax.f32 %v4278_v49, 1e-12 }
 0x33a   :  { %v1650_v19 = vmax.f32 %v4238_v35, 1e-12 }
 0x33b   :  { %v4360_v44 = vpop.eup %3395  ;;  %v903_v51 = vmul.f32 1.442695, %v872_v29  ;;  %v1654_v29 = vmax.f32 %v4276_v10, 1e-12 }
 0x33c   :  { %v938_v15 = vsel %vm808_vm2, %v4360_v44, 0.0  ;;  %v1051_v46 = vpop.permute.xlu0 %1050  ;;  %v4365_v24 = vpop.eup %3397 }
 0x33d   :  { %3403 = vpow2.f32 %v903_v51  ;;  %939 = vadd.xlane.f32.xlu0 %v938_v15  ;;  %3098 = vmatpush3.bf16.msra.mxu1 %v1051_v46  ;;  %v944_v7 = vsel %vm808_vm2, %v4365_v24, 0.0  ;;  %v1509_v51 = vmax.f32 %v4060_v59, 1e-12  ;;  %v1515_v15 = vmax.f32 %v4098_v40, 1e-12 }
 0x33e   :  { %3109 = vmatprep.subr.bf16.mxu1 %v5046_v63  ;;  %3405 = vrsqrt.f32 %v1507_v6  ;;  %v1660_v59 = vmax.f32 %v4286_v38, 1e-12 }
 0x33f   :  { %v4370_v1 = vpop.eup %3399  ;;  %3407 = vrsqrt.f32 %v1508_v47 }
 0x340   :  { %v941_v56 = vsel %vm808_vm2, %v4370_v1, 0.0  ;;  %3409 = vrsqrt.f32 %v1651_v8 }
 0x341   :  { %942 = vadd.xlane.f32.xlu1 %v941_v56  ;;  %945 = vadd.xlane.f32.xlu0 %v944_v7  ;;  %3411 = vrsqrt.f32 %v1652_v21  ;;  %v1510_v21 = vmax.f32 %v4280_v13, 1e-12  ;;  %v4405_v7 = vstv %s3238_s0 }
 0x342   :  { %3413 = vrsqrt.f32 %v1649_v23 }
 0x343   :  { %v4379_v48 = vpop.eup %3401  ;;  %3415 = vrsqrt.f32 %v1505_v54  ;;  %v1513_v54 = vmax.f32 %v4073_v0, 1e-12 }
 0x344   :  { %v947_v11 = vsel %vm808_vm2, %v4379_v48, 0.0  ;;  %3417 = vrsqrt.f32 %v1506_v43 }
 0x345   :  { %948 = vadd.xlane.f32.xlu1 %v947_v11  ;;  %3419 = vrsqrt.f32 %v1655_v22 }
 0x346   :  { %3421 = vrsqrt.f32 %v1656_v39 }
 0x347   :  { %v4387_v27 = vpop.eup %3403  ;;  %3423 = vrsqrt.f32 %v1511_v53 }
 0x348   :  { %v950_v58 = vsel %vm808_vm2, %v4387_v27, 0.0  ;;  %v3406_v49 = vpop.eup %3405  ;;  %3425 = vrsqrt.f32 %v1512_v55  ;;  %v1519_v55 = vmax.f32 %v4162_v14, 1e-12 }
 0x349   :  { %951 = vadd.xlane.f32.xlu0 %v950_v58  ;;  %v3408_v60 = vpop.eup %3407  ;;  %3427 = vrsqrt.f32 %v1650_v19  ;;  %v1539_v46 = vmul.f32 %v3406_v49, %v3649_v3 }
 0x34a   :  { %v3410_v6 = vpop.eup %3409  ;;  %3429 = vrsqrt.f32 %v1653_v45  ;;  %v1540_v10 = vmul.f32 %v3408_v60, %v3653_v5  ;;  %v1658_v45 = vmax.f32 %v4284_v42, 1e-12 }
 0x34b   :  { %v3412_v35 = vpop.eup %3411  ;;  %3431 = vrsqrt.f32 %v1654_v29  ;;  %v1683_v62 = vmul.f32 %v3410_v6, %v3649_v3  ;;  %v1705_v38 = vmul.f32 %v4405_v7, %v1539_v46  ;;  %v1514_v3 = vmax.f32 %v4288_v34, 1e-12 }
 0x34c   :  { %v3414_v47 = vpop.eup %3413  ;;  %3433 = vrsqrt.f32 %v1509_v51  ;;  %v1684_v40 = vmul.f32 %v3412_v35, %v3653_v5  ;;  %v1706_v43 = vmul.f32 %v4405_v7, %v1540_v10  ;;  %v1663_v5 = vmax.f32 %v4134_v25, 1e-12  ;;  %v5047_v10 = vld [vmem:[#allocation16_spill] sm:$0xff] }
 0x34d   :  { %v3416_v8 = vpop.eup %3415  ;;  %3435 = vrsqrt.f32 %v1659_v28  ;;  %v1520_v25 = vmax.f32 %v4298_v52, 1e-12  ;;  %v1681_v6 = vmul.f32 %v3414_v47, %v3647_v2 }
 0x34e   :  { %v3418_v56 = vpop.eup %3417  ;;  %3437 = vrsqrt.f32 %v1515_v15  ;;  %v1728_v11 = vpack.c.bf16 %v1684_v40, %v1683_v62  ;;  %v1537_v0 = vmul.f32 %v3416_v8, %v3647_v2  ;;  %v1720_v19 = vpack.c.bf16 %v1706_v43, %v1705_v38  ;;  %v5048_v8 = vld [vmem:[#allocation25_spill] sm:$0xff]  ;;  %v5051_v38 = vld [vmem:[#allocation10_spill] sm:$0xff] }
 0x34f   :  { %v3420_v23 = vpop.eup %3419  ;;  %3439 = vrsqrt.f32 %v1516_v57  ;;  %v1538_v34 = vmul.f32 %v3418_v56, %v3651_v4  ;;  %v5049_v56 = vld [vmem:[#allocation17_spill] sm:$0xff] }
 0x350   :  { %v3422_v13 = vpop.eup %3421  ;;  %3441 = vrsqrt.f32 %v1660_v59  ;;  %v1687_v49 = vmul.f32 %v3420_v23, %v3699_v17  ;;  %v1703_v52 = vmul.f32 %v4405_v7, %v1537_v0  ;;  %v5050_v23 = vld [vmem:[#allocation6_spill] sm:$0xff] }
 0x351   :  { %v3424_v22 = vpop.eup %3423  ;;  %3443 = vrsqrt.f32 %v1510_v21  ;;  %v1688_v29 = vmul.f32 %v3422_v13, %v3697_v16  ;;  %v1704_v35 = vmul.f32 %v4405_v7, %v1538_v34  ;;  %v1662_v21 = vmax.f32 %v5048_v8, 1e-12  ;;  %v5052_v13 = vld [vmem:[#allocation9_spill] sm:$0xff] }
 0x352   :  { %v3426_v39 = vpop.eup %3425  ;;  %3445 = vrsqrt.f32 %v1657_v30  ;;  %v1543_v60 = vmul.f32 %v3424_v22, %v3699_v17  ;;  %v1517_v30 = vmax.f32 %v5049_v56, 1e-12 }
 0x353   :  { %v3428_v53 = vpop.eup %3427  ;;  %3447 = vrsqrt.f32 %v1513_v54  ;;  %v1544_v14 = vmul.f32 %v3426_v39, %v3697_v16  ;;  %v1730_v17 = vpack.c.bf16 %v1688_v29, %v1687_v49  ;;  %v1719_v62 = vpack.c.bf16 %v1704_v35, %v1703_v52  ;;  %v5055_v35 = vld [vmem:[#allocation8_spill] sm:$0xff] }
 0x354   :  { %v3430_v58 = vpop.eup %3429  ;;  %3449 = vrsqrt.f32 %v1514_v3  ;;  %v1682_v28 = vmul.f32 %v3428_v53, %v3651_v4  ;;  %v1709_v16 = vmul.f32 %v4405_v7, %v1543_v60  ;;  %v1661_v4 = vmax.f32 %v5047_v10, 1e-12 }
 0x355   :  { %v3432_v41 = vpop.eup %3431  ;;  %3451 = vrsqrt.f32 %v1663_v5  ;;  %v1710_v46 = vmul.f32 %v4405_v7, %v1544_v14  ;;  %v1685_v54 = vmul.f32 %v3430_v58, %v5050_v23  ;;  %v5053_v5 = vld [vmem:[#allocation26_spill] sm:$0xff] }
 0x356   :  { %1795 = vrot.lane.b32.xlu1 %v1728_v11, %s3608_s15  ;;  %v3434_v51 = vpop.eup %3433  ;;  %3453 = vrsqrt.f32 %v1664_v61  ;;  %v1727_v47 = vpack.c.bf16 %v1682_v28, %v1681_v6  ;;  %v1518_v11 = vmax.f32 %v5053_v5, 1e-12 }
 0x357   :  { %v3436_v42 = vpop.eup %3435  ;;  %3455 = vrsqrt.f32 %v1519_v55  ;;  %v1722_v39 = vpack.c.bf16 %v1710_v46, %v1709_v16  ;;  %v5054_v55 = vld [vmem:[#allocation5_spill] sm:$0xff]  ;;  %v1541_v34 = vmul.f32 %v3434_v51, %v5050_v23  ;;  %v5057_v16 = vld [vmem:[#allocation14_spill] sm:$0xff] }
 0x358   :  { %v3438_v15 = vpop.eup %3437  ;;  %3457 = vrsqrt.f32 %v1520_v25  ;;  %v1691_v61 = vmul.f32 %v3436_v42, %v5051_v38 }
 0x359   :  { %v3440_v57 = vpop.eup %3439  ;;  %3459 = vrsqrt.f32 %v1658_v45  ;;  %v1547_v43 = vmul.f32 %v3438_v15, %v5051_v38  ;;  %v1707_v51 = vmul.f32 %v4405_v7, %v1541_v34 }
 0x35a   :  { %1792 = vrot.lane.b32.xlu1 %v1720_v19, %s3609_s16  ;;  %v3442_v2 = vpop.eup %3441  ;;  %v1548_v3 = vmul.f32 %v3440_v57, %v5052_v13  ;;  %3461 = vrsqrt.f32 %v1661_v4  ;;  %v1686_v19 = vmul.f32 %v3432_v41, %v5054_v55  ;;  %v5056_v57 = vld [vmem:[#allocation7_spill] sm:$0xff] }
 0x35b   :  { %v3444_v59 = vpop.eup %3443  ;;  %v1692_v0 = vmul.f32 %v3442_v2, %v5052_v13  ;;  %3463 = vrsqrt.f32 %v1662_v21  ;;  %v1713_v49 = vmul.f32 %v4405_v7, %v1547_v43  ;;  %v5058_v2 = vld [vmem:[#allocation13_spill] sm:$0xff] }
 0x35c   :  { %v3446_v40 = vpop.eup %3445  ;;  %v1542_v58 = vmul.f32 %v3444_v59, %v5054_v55  ;;  %3465 = vrsqrt.f32 %v1517_v30  ;;  %v1714_v29 = vmul.f32 %v4405_v7, %v1548_v3  ;;  %v1729_v6 = vpack.c.bf16 %v1686_v19, %v1685_v54 }
 0x35d   :  { %v3448_v22 = vpop.eup %3447  ;;  %3467 = vrsqrt.f32 %v1518_v11  ;;  %v1732_v14 = vpack.c.bf16 %v1692_v0, %v1691_v61  ;;  %v1689_v8 = vmul.f32 %v3446_v40, %v5055_v35  ;;  %v5059_v11 = vld [vmem:[#allocation12_spill] sm:$0xff]  ;;  %v5060_v61 = vld [vmem:[#allocation11_spill] sm:$0xff] }
 0x35e   :  { %1901 = vrot.lane.b32.xlu1 %v1730_v17, %s3608_s15  ;;  %v3450_v53 = vpop.eup %3449  ;;  %v1708_v28 = vmul.f32 %v4405_v7, %v1542_v58  ;;  %v1724_v52 = vpack.c.bf16 %v1714_v29, %v1713_v49  ;;  %v1545_v15 = vmul.f32 %v3448_v22, %v5055_v35 }
 0x35f   :  { %1742 = vrot.lane.b32.xlu0 %v1727_v47, %s3608_s15  ;;  %v3452_v45 = vpop.eup %3451  ;;  %v1546_v17 = vmul.f32 %v3450_v53, %v5056_v57 }
 0x360   :  { %v3454_v25 = vpop.eup %3453  ;;  %v1695_v46 = vmul.f32 %v3452_v45, %v5057_v16  ;;  %v1721_v59 = vpack.c.bf16 %v1708_v28, %v1707_v51  ;;  %v1711_v56 = vmul.f32 %v4405_v7, %v1545_v15 }
 0x361   :  { %v3456_v60 = vpop.eup %3455  ;;  %v1696_v10 = vmul.f32 %v3454_v25, %v5058_v2  ;;  %v1712_v43 = vmul.f32 %v4405_v7, %v1546_v17  ;;  %v1103_v25 = vpop.permute.xlu1 %1102 }
 0x362   :  { %1898 = vrot.lane.b32.xlu1 %v1722_v39, %s3609_s16  ;;  %v3458_v41 = vpop.eup %3457  ;;  %v1551_v4 = vmul.f32 %v3456_v60, %v5057_v16  ;;  %v1207_v60 = vpop.permute.xlu0 %1206 }
 0x363   :  { %1739 = vrot.lane.b32.xlu0 %v1719_v62, %s3609_s16  ;;  %v3460_v42 = vpop.eup %3459  ;;  %v1552_v47 = vmul.f32 %v3458_v41, %v5058_v2  ;;  %v1734_v23 = vpack.c.bf16 %v1696_v10, %v1695_v46  ;;  %v1723_v5 = vpack.c.bf16 %v1712_v43, %v1711_v56 }
 0x364   :  { %v1690_v21 = vmul.f32 %v3460_v42, %v5056_v57  ;;  %v3462_v62 = vpop.eup %3461  ;;  %v1717_v54 = vmul.f32 %v4405_v7, %v1551_v4 }
 0x365   :  { %v3464_v30 = vpop.eup %3463  ;;  %v1718_v38 = vmul.f32 %v4405_v7, %v1552_v47  ;;  %v1693_v39 = vmul.f32 %v3462_v62, %v5059_v11  ;;  %v1155_v49 = vpop.permute.xlu1 %1154 }
 0x366   :  { %2007 = vrot.lane.b32.xlu1 %v1732_v14, %s3608_s15  ;;  %v3466_v13 = vpop.eup %3465  ;;  %v1731_v3 = vpack.c.bf16 %v1690_v21, %v1689_v8  ;;  %v1694_v0 = vmul.f32 %v3464_v30, %v5060_v61  ;;  %v4483_v41 = vpop.permute.xlu0 %1310 }
 0x367   :  { %1848 = vrot.lane.b32.xlu0 %v1729_v6, %s3608_s15  ;;  %v3468_v40 = vpop.eup %3467  ;;  %v1726_v22 = vpack.c.bf16 %v1718_v38, %v1717_v54  ;;  %v1549_v53 = vmul.f32 %v3466_v13, %v5059_v11 }
 0x368   :  { %v1550_v55 = vmul.f32 %v3468_v40, %v5060_v61  ;;  %v1733_v19 = vpack.c.bf16 %v1694_v0, %v1693_v39 }
 0x369   :  { %v1715_v34 = vmul.f32 %v4405_v7, %v1549_v53  ;;  %v4479_v29 = vpop.permute.xlu1 %1258 }
 0x36a   :  { %2004 = vrot.lane.b32.xlu1 %v1724_v52, %s3609_s16  ;;  %v1716_v58 = vmul.f32 %v4405_v7, %v1550_v55 }
 0x36b   :  { %1845 = vrot.lane.b32.xlu0 %v1721_v59, %s3609_s16 }
 0x36c   :  { %v1725_v45 = vpack.c.bf16 %v1716_v58, %v1715_v34 }
 0x36d   :  { %v4481_v14 = vpop.permute.xlu1 %1362 }
 0x36e   :  { %2113 = vrot.lane.b32.xlu1 %v1734_v23, %s3608_s15 }
 0x36f   :  { %1954 = vrot.lane.b32.xlu0 %v1731_v3, %s3608_s15 }
 0x372   :  { %2110 = vrot.lane.b32.xlu1 %v1726_v22, %s3609_s16 }
 0x373   :  { %1951 = vrot.lane.b32.xlu0 %v1723_v5, %s3609_s16 }
 0x377   :  { %2060 = vrot.lane.b32.xlu0 %v1733_v19, %s3608_s15  ;;  %s3611_s15 = smov 88  }
 0x37b   :  { %2057 = vrot.lane.b32.xlu0 %v1725_v45, %s3609_s16 }
 0x3aa   :  { %v907_v6 = vpop.xlane.xlu1 %906 }
 0x3ab   :  { %3469 = vrcp.f32 %v907_v6 }
 0x3ac   :  { %v910_v51 = vpop.xlane.xlu0 %909 }
 0x3ad   :  { %3471 = vrcp.f32 %v910_v51 }
 0x3ae   :  { %v913_v28 = vpop.xlane.xlu1 %912 }
 0x3af   :  { %3473 = vrcp.f32 %v913_v28 }
 0x3b2   :  { %v916_v7 = vpop.xlane.xlu0 %915 }
 0x3b3   :  { %3475 = vrcp.f32 %v916_v7 }
 0x3b5   :  { %v3470_v42 = vpop.eup %3469 }
 0x3b6   :  { %v922_v52 = vpop.xlane.xlu0 %921  ;;  %v919_v35 = vpop.xlane.xlu1 %918  ;;  %v969_v57 = vmul.f32 %v3470_v42, %v4306_v9 }
 0x3b7   :  { %v3472_v15 = vpop.eup %3471  ;;  %3477 = vrcp.f32 %v922_v52 }
 0x3b8   :  { %v970_v17 = vmul.f32 %v3472_v15, %v4310_v26  ;;  %3479 = vrcp.f32 %v919_v35 }
 0x3b9   :  { %v3474_v2 = vpop.eup %3473 }
 0x3ba   :  { %v925_v16 = vpop.xlane.xlu1 %924  ;;  %v985_v46 = vpack.c.bf16 %v970_v17, %v969_v57  ;;  %v971_v4 = vmul.f32 %v3474_v2, %v4315_v20 }
 0x3bb   :  { %3481 = vrcp.f32 %v925_v16 }
 0x3bc   :  { %3094 = vmatmul.mubr.msk.bf16.vlgmr.msra.gmra.mrb[16].mxu0 %vm808_vm2, %v985_v46 }
 0x3bd   :  { %v3476_v10 = vpop.eup %3475  ;;  %3104 = vmatpush3.bf16.msra.mxu0 %v1103_v25  ;;  %3105 = vmatprep.mubr.msk.bf16.mxu0 %vm3607_vm1, %v5046_v63 }
 0x3be   :  { %v972_v47 = vmul.f32 %v3476_v10, %v4321_v33  ;;  %v928_v59 = vpop.xlane.xlu0 %927  ;;  %3115 = vmatprep.subr.bf16.mxu0 %v5046_v63 }
 0x3bf   :  { %3483 = vrcp.f32 %v928_v59 }
 0x3c0   :  { %v986_v9 = vpack.c.bf16 %v972_v47, %v971_v4 }
 0x3c1   :  { %v3478_v26 = vpop.eup %3477 }
 0x3c2   :  { %v3480_v8 = vpop.eup %3479  ;;  %v974_v21 = vmul.f32 %v3478_v26, %v4325_v32  ;;  %v934_v62 = vpop.xlane.xlu0 %933  ;;  %3100 = vmatmul.mubr.msk.bf16.vlgmr.msra.gmra.mrb[16].mxu1 %vm808_vm2, %v986_v9  ;;  %v5061_v9 = vld [vmem:[#allocation15_spill] sm:$0xff] }
 0x3c3   :  { %v931_v56 = vpop.xlane.xlu1 %930  ;;  %v973_v30 = vmul.f32 %v3480_v8, %v4328_v36  ;;  %3485 = vrcp.f32 %v934_v62  ;;  %3110 = vmatpush3.bf16.msra.mxu1 %v1155_v49  ;;  %3111 = vmatprep.mubr.msk.bf16.mxu1 %vm3607_vm1, %v5046_v63 }
 0x3c4   :  { %3487 = vrcp.f32 %v931_v56  ;;  %3121 = vmatprep.subr.bf16.mxu1 %v5046_v63  ;;  %2362 = vrot.lane.b32.xlu1 %v5061_v9, %s3611_s15  ;;  %v3577_v9 = vld [vmem:[%s4991_s2 + $0x18] sm:$0xff] }
 0x3c5   :  { %v987_v20 = vpack.c.bf16 %v974_v21, %v973_v30  ;;  %v3482_v23 = vpop.eup %3481 }
 0x3c6   :  { %v975_v36 = vmul.f32 %v3482_v23, %v4335_v37 }
 0x3c7   :  { %v937_v33 = vpop.xlane.xlu1 %936  ;;  %3106 = vmatmul.mubr.msk.bf16.vlgmr.msra.gmra.mrb[20].mxu0 %vm808_vm2, %v987_v20 }
 0x3c8   :  { %3116 = vmatpush3.bf16.msra.mxu0 %v1207_v60  ;;  %3117 = vmatprep.mubr.msk.bf16.mxu0 %vm3607_vm1, %v5046_v63  ;;  %3489 = vrcp.f32 %v937_v33 }
 0x3c9   :  { %v3484_v32 = vpop.eup %3483  ;;  %3127 = vmatprep.subr.bf16.mxu0 %v5046_v63 }
 0x3ca   :  { %v976_v54 = vmul.f32 %v3484_v32, %v4341_v18  ;;  %v940_v38 = vpop.xlane.xlu0 %939 }
 0x3cb   :  { %3491 = vrcp.f32 %v940_v38 }
 0x3cc   :  { %v988_v43 = vpack.c.bf16 %v976_v54, %v975_v36 }
 0x3cd   :  { %v3486_v13 = vpop.eup %3485 }
 0x3ce   :  { %v3488_v3 = vpop.eup %3487  ;;  %v978_v40 = vmul.f32 %v3486_v13, %v4345_v31  ;;  %v946_v22 = vpop.xlane.xlu0 %945  ;;  %3112 = vmatmul.mubr.msk.bf16.vlgmr.msra.gmra.mrb[20].mxu1 %vm808_vm2, %v988_v43 }
 0x3cf   :  { %v943_v5 = vpop.xlane.xlu1 %942  ;;  %v977_v11 = vmul.f32 %v3488_v3, %v4348_v50  ;;  %3493 = vrcp.f32 %v946_v22  ;;  %3122 = vmatpush3.bf16.msra.mxu1 %v4479_v29  ;;  %3123 = vmatprep.mubr.msk.bf16.mxu1 %vm3607_vm1, %v5046_v63 }
 0x3d0   :  { %3495 = vrcp.f32 %v943_v5  ;;  %3133 = vmatprep.subr.bf16.mxu1 %v5046_v63 }
 0x3d1   :  { %v989_v37 = vpack.c.bf16 %v978_v40, %v977_v11 }
 0x3d2   :  { %v3490_v39 = vpop.eup %3489 }
 0x3d3   :  { %v949_v18 = vpop.xlane.xlu1 %948  ;;  %3118 = vmatmul.mubr.msk.bf16.vlgmr.msra.gmra.mrb[24].mxu0 %vm808_vm2, %v989_v37  ;;  %v979_v50 = vmul.f32 %v3490_v39, %v4355_v12 }
 0x3d4   :  { %3128 = vmatpush3.bf16.msra.mxu0 %v4483_v41  ;;  %3129 = vmatprep.mubr.msk.bf16.mxu0 %vm3607_vm1, %v5046_v63  ;;  %3497 = vrcp.f32 %v949_v18 }
 0x3d5   :  { %v3492_v31 = vpop.eup %3491  ;;  %3139 = vmatprep.subr.bf16.mxu0 %v5046_v63 }
 0x3d6   :  { %v980_v61 = vmul.f32 %v3492_v31, %v4360_v44  ;;  %v952_v0 = vpop.xlane.xlu0 %951 }
 0x3d7   :  { %3499 = vrcp.f32 %v952_v0  ;;  %v1796_v53 = vpop.permute.xlu1 %1795 }
 0x3d8   :  { %v990_v55 = vpack.c.bf16 %v980_v61, %v979_v50  ;;  %v1801_v28 = vsel %vm95_vm0, %v1796_v53, 0 }
 0x3d9   :  { %v3494_v19 = vpop.eup %3493 }
 0x3da   :  { %v3496_v34 = vpop.eup %3495  ;;  %v982_v58 = vmul.f32 %v3494_v19, %v4365_v24  ;;  %v1743_v45 = vpop.permute.xlu0 %1742  ;;  %3124 = vmatmul.mubr.msk.bf16.vlgmr.msra.gmra.mrb[24].mxu1 %vm808_vm2, %v990_v55  ;;  %v4608_v19 = vld [vmem:[%s4990_s1 + $0x10] sm:$0xff] }
 0x3db   :  { %v981_v25 = vmul.f32 %v3496_v34, %v4370_v1  ;;  %3134 = vmatpush3.bf16.msra.mxu1 %v4481_v14  ;;  %3135 = vmatprep.mubr.msk.bf16.mxu1 %vm3607_vm1, %v5046_v63  ;;  %v1793_v12 = vpop.permute.xlu1 %1792  ;;  %v1748_v60 = vsel %vm95_vm0, %v1743_v45, 0 }
 0x3dc   :  { %3145 = vmatprep.subr.bf16.mxu1 %v5046_v63 }
 0x3dd   :  { %v991_v44 = vpack.c.bf16 %v982_v58, %v981_v25  ;;  %v4615_v25 = vld [vmem:[%s4990_s1 + $0x18] sm:$0xff] }
 0x3de   :  { %v1740_v49 = vpop.permute.xlu0 %1739  ;;  %v3498_v29 = vpop.eup %3497 }
 0x3df   :  { %3130 = vmatmul.mubr.msk.bf16.vlgmr.msra.gmra.mrb[28].mxu0 %vm808_vm2, %v991_v44  ;;  %v983_v1 = vmul.f32 %v3498_v29, %v4379_v48  ;;  %v1902_v6 = vpop.permute.xlu1 %1901 }
 0x3e0   :  { %3140 = vmatpush3.bf16.xpose.msra.mxu0 %v1748_v60  ;;  %3141 = vmatprep.mubr.msk.bf16.mxu0 %vm3607_vm1, %v5046_v63  ;;  %v1907_v52 = vsel %vm95_vm0, %v1902_v6, 0  ;;  %v3574_v6 = vld [vmem:[%s4991_s2 + $0x8] sm:$0xff] }
 0x3e1   :  { %v3500_v24 = vpop.eup %3499  ;;  %3151 = vmatprep.subr.bf16.mxu0 %v5046_v63 }
 0x3e2   :  { %v984_v14 = vmul.f32 %v3500_v24, %v4387_v27  ;;  %v1849_v41 = vpop.permute.xlu0 %1848  ;;  %v3573_v24 = vld [vmem:[%s4991_s2] sm:$0xff] }
 0x3e3   :  { %v1854_v42 = vsel %vm95_vm0, %v1849_v41, 0  ;;  %v1899_v48 = vpop.permute.xlu1 %1898 }
 0x3e4   :  { %v992_v51 = vpack.c.bf16 %v984_v14, %v983_v1 }
 0x3e6   :  { %v1846_v7 = vpop.permute.xlu0 %1845  ;;  %3136 = vmatmul.mubr.msk.bf16.vlgmr.msra.gmra.mrb[28].mxu1 %vm808_vm2, %v992_v51 }
 0x3e7   :  { %3142 = vmatmul.mubr.msk.bf16.vlgmr.msra.gmra.mrb[32].mxu0 %vm95_vm0, %v1740_v49  ;;  %3146 = vmatpush3.bf16.xpose.msra.mxu1 %v1801_v28  ;;  %v2008_v15 = vpop.permute.xlu1 %2007 }
 0x3e8   :  { %3152 = vmatpush3.bf16.xpose.msra.mxu0 %v1854_v42  ;;  %3147 = vmatprep.mubr.msk.bf16.mxu1 %vm3607_vm1, %v5046_v63  ;;  %v2013_v46 = vsel %vm95_vm0, %v2008_v15, 0 }
 0x3e9   :  { %3153 = vmatprep.mubr.msk.bf16.mxu0 %vm3607_vm1, %v5046_v63  ;;  %3157 = vmatprep.subr.bf16.mxu1 %v5046_v63 }
 0x3ea   :  { %v1955_v27 = vpop.permute.xlu0 %1954  ;;  %3163 = vmatprep.subr.bf16.mxu0 %v5046_v63 }
 0x3eb   :  { %v1960_v57 = vsel %vm95_vm0, %v1955_v27, 0  ;;  %v2005_v16 = vpop.permute.xlu1 %2004 }
 0x3ee   :  { %v1952_v35 = vpop.permute.xlu0 %1951  ;;  %3148 = vmatmul.mubr.msk.bf16.vlgmr.msra.gmra.mrb[32].mxu1 %vm95_vm0, %v1793_v12 }
 0x3ef   :  { %3154 = vmatmul.mubr.msk.bf16.vlgmr.msra.gmra.mrb[36].mxu0 %vm95_vm0, %v1846_v7  ;;  %3158 = vmatpush3.bf16.xpose.msra.mxu1 %v1907_v52  ;;  %v2114_v10 = vpop.permute.xlu1 %2113 }
 0x3f0   :  { %3164 = vmatpush3.bf16.xpose.msra.mxu0 %v1960_v57  ;;  %3159 = vmatprep.mubr.msk.bf16.mxu1 %vm3607_vm1, %v5046_v63  ;;  %v2119_v4 = vsel %vm95_vm0, %v2114_v10, 0 }
 0x3f1   :  { %3165 = vmatprep.mubr.msk.bf16.mxu0 %vm3607_vm1, %v5046_v63  ;;  %3169 = vmatprep.subr.bf16.mxu1 %v5046_v63 }
 0x3f2   :  { %3175 = vmatprep.subr.bf16.mxu0 %v5046_v63  ;;  %v2061_v17 = vpop.permute.xlu0 %2060 }
 0x3f3   :  { %v2066_v2 = vsel %vm95_vm0, %v2061_v17, 0  ;;  %v2111_v59 = vpop.permute.xlu1 %2110  ;;  %v3575_v17 = vld [vmem:[%s4991_s2 + $0x10] sm:$0xff] }
 0x3f6   :  { %3160 = vmatmul.mubr.msk.bf16.vlgmr.msra.gmra.mrb[36].mxu1 %vm95_vm0, %v1899_v48  ;;  %v2058_v47 = vpop.permute.xlu0 %2057 }
 0x3f7   :  { %3166 = vmatmul.mubr.msk.bf16.vlgmr.msra.gmra.mrb[40].mxu0 %vm95_vm0, %v1952_v35  ;;  %3170 = vmatpush3.bf16.xpose.msra.mxu1 %v2013_v46 }
 0x3f8   :  { %3176 = vmatpush3.bf16.xpose.msra.mxu0 %v2066_v2  ;;  %3171 = vmatprep.mubr.msk.bf16.mxu1 %vm3607_vm1, %v5046_v63 }
 0x3f9   :  { %3177 = vmatprep.mubr.msk.bf16.mxu0 %vm3607_vm1, %v5046_v63  ;;  %3181 = vmatprep.subr.bf16.mxu1 %v5046_v63 }
 0x3fa   :  { %3187 = vmatprep.subr.bf16.mxu0 %v5046_v63 }
 0x3fe   :  { %3172 = vmatmul.mubr.msk.bf16.vlgmr.msra.gmra.mrb[40].mxu1 %vm95_vm0, %v2005_v16 }
 0x3ff   :  { %3178 = vmatmul.mubr.msk.bf16.vlgmr.msra.gmra.mrb[44].mxu0 %vm95_vm0, %v2058_v47  ;;  %3182 = vmatpush3.bf16.xpose.msra.mxu1 %v2119_v4  ;;  %v3576_v4 = vld [vmem:[%s4991_s2 + $0x20] sm:$0xff] }
 0x400   :  { %3183 = vmatprep.mubr.msk.bf16.mxu1 %vm3607_vm1, %v5046_v63  ;;  %3193 = vmatprep.subr.bf16.mxu1 %v5046_v63 }
 0x401   :  { %3189 = vmatprep.mubr.msk.bf16.mxu0 %vm3607_vm1, %v5046_v63 }
 0x406   :  { %3184 = vmatmul.mubr.msk.bf16.vlgmr.msra.gmra.mrb[44].mxu1 %vm95_vm0, %v2111_v59 }
 0x407   :  { %3195 = vmatprep.mubr.msk.bf16.mxu1 %vm3607_vm1, %v5046_v63 }
 0x436   :  { %v2363_v21 = vpop.permute.xlu1 %2362 }
 0x437   :  { %3188 = vmatpush3.bf16.msra.mxu0 %v2363_v21 }
 0x438   :  { %3199 = vmatprep.subr.bf16.mxu0 %v5046_v63 }
 0x48f   :  { %v4576_v26 = vpop.f32.mrb[16].mxu0 }
 0x490   :  { %v3095_v8 = vpop.f32.mrb[17].mxu0 }
 0x491   :  { %v4578_v62 = vpop.f32.mrb[18].mxu0 }
 0x492   :  { %v3096_v56 = vpop.f32.mrb[19].mxu0 }
 0x495   :  { %v4581_v30 = vpop.f32.mrb[16].mxu1 }
 0x496   :  { %v3101_v20 = vpop.f32.mrb[17].mxu1 }
 0x497   :  { %v4583_v33 = vpop.f32.mrb[18].mxu1 }
 0x498   :  { %v3102_v23 = vpop.f32.mrb[19].mxu1 }
 0x49a   :  { %v4585_v32 = vpop.f32.mrb[20].mxu0 }
 0x49b   :  { %v3107_v36 = vpop.f32.mrb[21].mxu0 }
 0x49c   :  { %v4587_v54 = vpop.f32.mrb[22].mxu0  ;;  %v3578_v36 = vld [vmem:[%s4991_s2 + $0x28] sm:$0xff] }
 0x49d   :  { %v3108_v38 = vpop.f32.mrb[23].mxu0 }
 0x4a1   :  { %v4589_v43 = vpop.f32.mrb[20].mxu1 }
 0x4a2   :  { %v3113_v13 = vpop.f32.mrb[21].mxu1 }
 0x4a3   :  { %v4591_v3 = vpop.f32.mrb[22].mxu1 }
 0x4a4   :  { %v3114_v40 = vpop.f32.mrb[23].mxu1 }
 0x4a6   :  { %v4593_v22 = vpop.f32.mrb[24].mxu0 }
 0x4a7   :  { %v3119_v5 = vpop.f32.mrb[25].mxu0 }
 0x4a8   :  { %v4595_v11 = vpop.f32.mrb[26].mxu0 }
 0x4a9   :  { %v3120_v37 = vpop.f32.mrb[27].mxu0 }
 0x4ad   :  { %v4597_v18 = vpop.f32.mrb[24].mxu1 }
 0x4ae   :  { %v3125_v39 = vpop.f32.mrb[25].mxu1 }
 0x4af   :  { %v4599_v31 = vpop.f32.mrb[26].mxu1 }
 0x4b0   :  { %v3126_v50 = vpop.f32.mrb[27].mxu1 }
 0x4b2   :  { %v4601_v61 = vpop.f32.mrb[28].mxu0 }
 0x4b3   :  { %v3131_v0 = vpop.f32.mrb[29].mxu0 }
 0x4b4   :  { %v4603_v53 = vpop.f32.mrb[30].mxu0 }
 0x4b5   :  { %v3132_v55 = vpop.f32.mrb[31].mxu0 }
 0x4b6   :  { %v3579_v55 = vld [vmem:[%s4991_s2 + $0x30] sm:$0xff] }
 0x4b9   :  { %v4610_v34 = vpop.f32.mrb[28].mxu1 }
 0x4ba   :  { %v1784_v58 = vpop.f32.mrb[32].mxu0  ;;  %v3137_v45 = vpop.f32.mrb[29].mxu1 }
 0x4bb   :  { %v1785_v12 = vadd.f32 %v4608_v19, %v1784_v58  ;;  %v3143_v44 = vpop.f32.mrb[33].mxu0  ;;  %v4618_v49 = vpop.f32.mrb[30].mxu1 }
 0x4bc   :  { %v1787_v29 = vpop.f32.mrb[34].mxu0  ;;  %v3138_v60 = vpop.f32.mrb[31].mxu1 }
 0x4bd   :  { %v4623_v1 = vadd.f32 %v3573_v24, %v1785_v12  ;;  %v1788_v14 = vadd.f32 %v4615_v25, %v1787_v29  ;;  %v3144_v41 = vpop.f32.mrb[35].mxu0  ;;  %v3580_v24 = vld [vmem:[%s4991_s2 + $0x40] sm:$0xff] }
 0x4be   :  { %v3581_v41 = vld [vmem:[%s4991_s2 + $0x38] sm:$0xff] }
 0x4bf   :  { %v4629_v51 = vadd.f32 %v3574_v6, %v1788_v14  ;;  %v2178_v28 = vsel %vm808_vm2, %v4623_v1, -inf }
 0x4c0   :  { %2179 = vmax.xlane.f32.xlu0 %v2178_v28 }
 0x4c1   :  { %v2181_v7 = vsel %vm808_vm2, %v4629_v51, -inf  ;;  %v1837_v42 = vpop.f32.mrb[32].mxu1 }
 0x4c2   :  { %2182 = vmax.xlane.f32.xlu1 %v2181_v7  ;;  %v1838_v48 = vadd.f32 %v4608_v19, %v1837_v42  ;;  %v1890_v27 = vpop.f32.mrb[36].mxu0  ;;  %v3149_v52 = vpop.f32.mrb[33].mxu1  ;;  %v3582_v42 = vld [vmem:[%s4991_s2 + $0x48] sm:$0xff] }
 0x4c3   :  { %v1891_v35 = vadd.f32 %v4608_v19, %v1890_v27  ;;  %v3155_v15 = vpop.f32.mrb[37].mxu0  ;;  %v1840_v57 = vpop.f32.mrb[34].mxu1 }
 0x4c4   :  { %v4640_v16 = vadd.f32 %v3575_v17, %v1838_v48  ;;  %v1841_v46 = vadd.f32 %v4615_v25, %v1840_v57  ;;  %v1893_v2 = vpop.f32.mrb[38].mxu0  ;;  %v3150_v10 = vpop.f32.mrb[35].mxu1 }
 0x4c5   :  { %v4646_v47 = vadd.f32 %v3576_v4, %v1891_v35  ;;  %v3156_v59 = vpop.f32.mrb[39].mxu0  ;;  %v1894_v21 = vadd.f32 %v4615_v25, %v1893_v2  ;;  %v3583_v4 = vld [vmem:[%s4991_s2 + $0x50] sm:$0xff] }
 0x4c6   :  { %v4651_v8 = vadd.f32 %v3577_v9, %v1841_v46  ;;  %v2184_v56 = vsel %vm808_vm2, %v4640_v16, -inf }
 0x4c7   :  { %v2190_v20 = vsel %vm808_vm2, %v4646_v47, -inf  ;;  %2185 = vmax.xlane.f32.xlu0 %v2184_v56  ;;  %v4661_v38 = vadd.f32 %v3578_v36, %v1894_v21  ;;  %v3584_v36 = vld [vmem:[%s4991_s2 + $0x60] sm:$0xff] }
 0x4c8   :  { %2191 = vmax.xlane.f32.xlu1 %v2190_v20  ;;  %v2187_v37 = vsel %vm808_vm2, %v4651_v8, -inf }
 0x4c9   :  { %v1943_v23 = vpop.f32.mrb[36].mxu1  ;;  %v2193_v28 = vsel %vm808_vm2, %v4661_v38, -inf }
 0x4ca   :  { %v1944_v13 = vadd.f32 %v4608_v19, %v1943_v23  ;;  %v1996_v40 = vpop.f32.mrb[40].mxu0  ;;  %v3161_v5 = vpop.f32.mrb[37].mxu1 }
 0x4cb   :  { %v1997_v39 = vadd.f32 %v4608_v19, %v1996_v40  ;;  %v3167_v50 = vpop.f32.mrb[41].mxu0  ;;  %2188 = vmax.xlane.f32.xlu0 %v2187_v37  ;;  %v1946_v0 = vpop.f32.mrb[38].mxu1  ;;  %v3585_v5 = vld [vmem:[%s4991_s2 + $0x58] sm:$0xff] }
 0x4cc   :  { %v4670_v58 = vadd.f32 %v3579_v55, %v1944_v13  ;;  %v1999_v45 = vpop.f32.mrb[42].mxu0  ;;  %v1947_v12 = vadd.f32 %v4615_v25, %v1946_v0  ;;  %v3162_v44 = vpop.f32.mrb[39].mxu1  ;;  %v3586_v0 = vld [vmem:[%s4991_s2 + $0x68] sm:$0xff] }
 0x4cd   :  { %v2000_v29 = vadd.f32 %v4615_v25, %v1999_v45  ;;  %v3168_v60 = vpop.f32.mrb[43].mxu0  ;;  %v4677_v14 = vadd.f32 %v3580_v24, %v1997_v39  ;;  %v3587_v24 = vld [vmem:[%s4991_s2 + $0x70] sm:$0xff] }
 0x4ce   :  { %v4682_v6 = vadd.f32 %v3581_v41, %v1947_v12  ;;  %v2196_v7 = vsel %vm808_vm2, %v4670_v58, -inf }
 0x4cf   :  { %2194 = vmax.xlane.f32.xlu0 %v2193_v28  ;;  %2197 = vmax.xlane.f32.xlu1 %v2196_v7  ;;  %v4691_v48 = vadd.f32 %v3582_v42, %v2000_v29  ;;  %v2202_v57 = vsel %vm808_vm2, %v4677_v14, -inf }
 0x4d0   :  { %v2199_v17 = vsel %vm808_vm2, %v4682_v6, -inf }
 0x4d1   :  { %v2049_v27 = vpop.f32.mrb[40].mxu1  ;;  %v2205_v23 = vsel %vm808_vm2, %v4691_v48, -inf }
 0x4d2   :  { %v2050_v52 = vadd.f32 %v4608_v19, %v2049_v27  ;;  %v2102_v35 = vpop.f32.mrb[44].mxu0  ;;  %v3173_v15 = vpop.f32.mrb[41].mxu1 }
 0x4d3   :  { %v2103_v46 = vadd.f32 %v4608_v19, %v2102_v35  ;;  %v3179_v2 = vpop.f32.mrb[45].mxu0  ;;  %2203 = vmax.xlane.f32.xlu1 %v2202_v57  ;;  %2200 = vmax.xlane.f32.xlu0 %v2199_v17  ;;  %v2052_v10 = vpop.f32.mrb[42].mxu1  ;;  %v5063_v15 = vld [vmem:[#allocation19_spill] sm:$0xff]  ;;  %v5064_v57 = vld [vmem:[#allocation20_spill] sm:$0xff]  ;;  %v5065_v17 = vld [vmem:[#allocation22_spill] sm:$0xff] }
 0x4d4   :  { %v4702_v59 = vadd.f32 %v3583_v4, %v2050_v52  ;;  %v2105_v9 = vpop.f32.mrb[46].mxu0  ;;  %v2053_v21 = vadd.f32 %v4615_v25, %v2052_v10  ;;  %v3174_v56 = vpop.f32.mrb[43].mxu1 }
 0x4d5   :  { %v3180_v20 = vpop.f32.mrb[47].mxu0  ;;  %v4710_v13 = vadd.f32 %v3584_v36, %v2103_v46  ;;  %v2106_v40 = vadd.f32 %v4615_v25, %v2105_v9  ;;  %v5066_v46 = vld [vmem:[#allocation23_spill] sm:$0xff] }
 0x4d6   :  { %v4716_v37 = vadd.f32 %v3585_v5, %v2053_v21  ;;  %v2208_v39 = vsel %vm808_vm2, %v4702_v59, -inf }
 0x4d7   :  { %2206 = vmax.xlane.f32.xlu0 %v2205_v23  ;;  %2209 = vmax.xlane.f32.xlu1 %v2208_v39  ;;  %v4723_v55 = vadd.f32 %v3586_v0, %v2106_v40  ;;  %v2214_v44 = vsel %vm808_vm2, %v4710_v13, -inf }
 0x4d8   :  { %v2211_v29 = vsel %vm808_vm2, %v4716_v37, -inf }
 0x4d9   :  { %v2155_v50 = vpop.f32.mrb[44].mxu1  ;;  %v2217_v27 = vsel %vm808_vm2, %v4723_v55, -inf }
 0x4da   :  { %v2156_v45 = vadd.f32 %v4608_v19, %v2155_v50  ;;  %v3185_v12 = vpop.f32.mrb[45].mxu1  ;;  %v3588_v19 = vld [vmem:[%s4991_s2 + $0x78] sm:$0xff]  ;;  %s3612_s2 = smov 8  }
 0x4db   :  { %2215 = vmax.xlane.f32.xlu1 %v2214_v44  ;;  %2212 = vmax.xlane.f32.xlu0 %v2211_v29  ;;  %v2158_v60 = vpop.f32.mrb[46].mxu1 }
 0x4dc   :  { %v4733_v41 = vadd.f32 %v3587_v24, %v2156_v45  ;;  %v2159_v28 = vadd.f32 %v4615_v25, %v2158_v60  ;;  %v3186_v7 = vpop.f32.mrb[47].mxu1  ;;  %v5062_v25 = vld [vmem:[#allocation18_spill] sm:$0xff] }
 0x4de   :  { %v4739_v42 = vadd.f32 %v3588_v19, %v2159_v28  ;;  %v2220_v52 = vsel %vm808_vm2, %v4733_v41, -inf }
 0x4df   :  { %2218 = vmax.xlane.f32.xlu0 %v2217_v27  ;;  %2221 = vmax.xlane.f32.xlu1 %v2220_v52 }
 0x4e0   :  { %v2223_v35 = vsel %vm808_vm2, %v4739_v42, -inf }
 0x4e3   :  { %2224 = vmax.xlane.f32.xlu0 %v2223_v35 }
 0x4f0   :  { %2456 = vrot.lane.b32.xlu1 %v5062_v25, %s3611_s15 }
 0x4f4   :  { %2503 = vrot.lane.b32.xlu1 %v5063_v15, %s3611_s15 }
 0x4f8   :  { %2597 = vrot.lane.b32.xlu1 %v5064_v57, %s3611_s15 }
 0x4f9   :  { %2409 = vrot.lane.b32.xlu0 %v5065_v17, %s3611_s15 }
 0x4fd   :  { %2550 = vrot.lane.b32.xlu0 %v5066_v46, %s3611_s15 }
 0x54d   :  { %v2180_v2 = vpop.xlane.xlu0 %2179 }
 0x54e   :  { %v2226_v10 = vsub.f32 %v4623_v1, %v2180_v2 }
 0x54f   :  { %v2183_v4 = vpop.xlane.xlu1 %2182 }
 0x550   :  { %v2242_v9 = vmul.f32 1.442695, %v2226_v10  ;;  %v2227_v21 = vsub.f32 %v4629_v51, %v2183_v4 }
 0x552   :  { %3501 = vpow2.f32 %v2242_v9  ;;  %v2244_v56 = vmul.f32 1.442695, %v2227_v21 }
 0x554   :  { %3503 = vpow2.f32 %v2244_v56  ;;  %v2186_v20 = vpop.xlane.xlu0 %2185 }
 0x555   :  { %v2228_v23 = vsub.f32 %v4640_v16, %v2186_v20  ;;  %v2192_v36 = vpop.xlane.xlu1 %2191 }
 0x556   :  { %v2230_v40 = vsub.f32 %v4646_v47, %v2192_v36 }
 0x557   :  { %v2246_v5 = vmul.f32 1.442695, %v2228_v23 }
 0x558   :  { %v2250_v39 = vmul.f32 1.442695, %v2230_v40  ;;  %v2189_v50 = vpop.xlane.xlu0 %2188 }
 0x559   :  { %3505 = vpow2.f32 %v2246_v5  ;;  %v2229_v0 = vsub.f32 %v4651_v8, %v2189_v50 }
 0x55a   :  { %3507 = vpow2.f32 %v2250_v39 }
 0x55b   :  { %v2248_v1 = vmul.f32 1.442695, %v2229_v0 }
 0x55c   :  { %v4762_v45 = vpop.eup %3501  ;;  %v2195_v51 = vpop.xlane.xlu0 %2194 }
 0x55d   :  { %v2198_v12 = vpop.xlane.xlu1 %2197  ;;  %3509 = vpow2.f32 %v2248_v1  ;;  %v2231_v44 = vsub.f32 %v4661_v38, %v2195_v51  ;;  %v2274_v47 = vsel %vm808_vm2, %v4762_v45, 0.0 }
 0x55e   :  { %v2232_v16 = vsub.f32 %v4670_v58, %v2198_v12  ;;  %v4768_v29 = vpop.eup %3503  ;;  %2275 = vadd.xlane.f32.xlu1 %v2274_v47 }
 0x55f   :  { %v2252_v60 = vmul.f32 1.442695, %v2231_v44  ;;  %v2277_v8 = vsel %vm808_vm2, %v4768_v29, 0.0 }
 0x560   :  { %v2254_v24 = vmul.f32 1.442695, %v2232_v16  ;;  %2278 = vadd.xlane.f32.xlu0 %v2277_v8  ;;  %v2201_v28 = vpop.xlane.xlu0 %2200 }
 0x561   :  { %v2204_v7 = vpop.xlane.xlu1 %2203  ;;  %3511 = vpow2.f32 %v2252_v60  ;;  %v2233_v19 = vsub.f32 %v4682_v6, %v2201_v28 }
 0x562   :  { %v2234_v38 = vsub.f32 %v4677_v14, %v2204_v7  ;;  %3513 = vpow2.f32 %v2254_v24 }
 0x563   :  { %v4774_v58 = vpop.eup %3505  ;;  %v2256_v27 = vmul.f32 1.442695, %v2233_v19 }
 0x564   :  { %v2258_v52 = vmul.f32 1.442695, %v2234_v38  ;;  %v2207_v35 = vpop.xlane.xlu0 %2206  ;;  %v2280_v15 = vsel %vm808_vm2, %v4774_v58, 0.0  ;;  %v4778_v57 = vpop.eup %3507 }
 0x565   :  { %v2210_v25 = vpop.xlane.xlu1 %2209  ;;  %3515 = vpow2.f32 %v2256_v27  ;;  %v2235_v17 = vsub.f32 %v4691_v48, %v2207_v35  ;;  %2281 = vadd.xlane.f32.xlu1 %v2280_v15  ;;  %v2286_v21 = vsel %vm808_vm2, %v4778_v57, 0.0 }
 0x566   :  { %v2236_v46 = vsub.f32 %v4702_v59, %v2210_v25  ;;  %3517 = vpow2.f32 %v2258_v52 }
 0x567   :  { %v4782_v14 = vpop.eup %3509  ;;  %v2260_v6 = vmul.f32 1.442695, %v2235_v17 }
 0x568   :  { %v2262_v2 = vmul.f32 1.442695, %v2236_v46  ;;  %v2213_v10 = vpop.xlane.xlu0 %2212  ;;  %v2283_v9 = vsel %vm808_vm2, %v4782_v14, 0.0 }
 0x569   :  { %v2216_v4 = vpop.xlane.xlu1 %2215  ;;  %3519 = vpow2.f32 %v2260_v6  ;;  %v2237_v56 = vsub.f32 %v4716_v37, %v2213_v10  ;;  %2284 = vadd.xlane.f32.xlu0 %v2283_v9  ;;  %2287 = vadd.xlane.f32.xlu1 %v2286_v21  ;;  %v5067_v6 = vld [vmem:[#allocation21_spill] sm:$0xff] }
 0x56a   :  { %v2238_v48 = vsub.f32 %v4710_v13, %v2216_v4  ;;  %3521 = vpow2.f32 %v2262_v2  ;;  %v5068_v2 = vld [vmem:[#allocation24_spill] sm:$0xff] }
 0x56b   :  { %v4790_v59 = vpop.eup %3511  ;;  %v2264_v20 = vmul.f32 1.442695, %v2237_v56 }
 0x56c   :  { %v2266_v23 = vmul.f32 1.442695, %v2238_v48  ;;  %v4792_v36 = vpop.eup %3513  ;;  %v2219_v40 = vpop.xlane.xlu0 %2218  ;;  %v2289_v39 = vsel %vm808_vm2, %v4790_v59, 0.0 }
 0x56d   :  { %v2222_v5 = vpop.xlane.xlu1 %2221  ;;  %3523 = vpow2.f32 %v2264_v20  ;;  %v2239_v50 = vsub.f32 %v4723_v55, %v2219_v40  ;;  %2290 = vadd.xlane.f32.xlu0 %v2289_v39  ;;  %v2292_v13 = vsel %vm808_vm2, %v4792_v36, 0.0 }
 0x56e   :  { %v2240_v37 = vsub.f32 %v4733_v41, %v2222_v5  ;;  %3525 = vpow2.f32 %v2266_v23  ;;  %2293 = vadd.xlane.f32.xlu1 %v2292_v13 }
 0x56f   :  { %v4800_v0 = vpop.eup %3515  ;;  %v2268_v1 = vmul.f32 1.442695, %v2239_v50 }
 0x570   :  { %v2270_v51 = vmul.f32 1.442695, %v2240_v37  ;;  %v4802_v12 = vpop.eup %3517  ;;  %v2225_v44 = vpop.xlane.xlu0 %2224  ;;  %v2295_v16 = vsel %vm808_vm2, %v4800_v0, 0.0 }
 0x571   :  { %3527 = vpow2.f32 %v2268_v1  ;;  %v2241_v55 = vsub.f32 %v4739_v42, %v2225_v44  ;;  %2296 = vadd.xlane.f32.xlu0 %v2295_v16  ;;  %v2298_v41 = vsel %vm808_vm2, %v4802_v12, 0.0  ;;  %v2457_v10 = vpop.permute.xlu1 %2456 }
 0x572   :  { %3529 = vpow2.f32 %v2270_v51  ;;  %2299 = vadd.xlane.f32.xlu1 %v2298_v41 }
 0x573   :  { %v4809_v47 = vpop.eup %3519  ;;  %v2272_v60 = vmul.f32 1.442695, %v2241_v55 }
 0x574   :  { %v4811_v24 = vpop.eup %3521  ;;  %v2301_v8 = vsel %vm808_vm2, %v4809_v47, 0.0  ;;  %v2410_v28 = vpop.permute.xlu0 %2409 }
 0x575   :  { %3531 = vpow2.f32 %v2272_v60  ;;  %2302 = vadd.xlane.f32.xlu0 %v2301_v8  ;;  %v2304_v42 = vsel %vm808_vm2, %v4811_v24, 0.0  ;;  %3194 = vmatpush3.bf16.msra.mxu1 %v2410_v28  ;;  %v2504_v4 = vpop.permute.xlu1 %2503 }
 0x576   :  { %2305 = vadd.xlane.f32.xlu1 %v2304_v42  ;;  %3205 = vmatprep.subr.bf16.mxu1 %v5046_v63 }
 0x577   :  { %v4818_v7 = vpop.eup %3523 }
 0x578   :  { %v4820_v19 = vpop.eup %3525  ;;  %v2307_v38 = vsel %vm808_vm2, %v4818_v7, 0.0  ;;  %v2551_v21 = vpop.permute.xlu0 %2550 }
 0x579   :  { %2308 = vadd.xlane.f32.xlu0 %v2307_v38  ;;  %v2310_v27 = vsel %vm808_vm2, %v4820_v19, 0.0  ;;  %v4842_v9 = vpop.permute.xlu1 %2597 }
 0x57a   :  { %2311 = vadd.xlane.f32.xlu1 %v2310_v27 }
 0x57b   :  { %v4826_v52 = vpop.eup %3527 }
 0x57c   :  { %v4828_v35 = vpop.eup %3529  ;;  %v2313_v25 = vsel %vm808_vm2, %v4826_v52, 0.0 }
 0x57d   :  { %2314 = vadd.xlane.f32.xlu0 %v2313_v25  ;;  %v2316_v15 = vsel %vm808_vm2, %v4828_v35, 0.0 }
 0x57e   :  { %2317 = vadd.xlane.f32.xlu1 %v2316_v15 }
 0x57f   :  { %v4834_v17 = vpop.eup %3531 }
 0x580   :  { %v2319_v46 = vsel %vm808_vm2, %v4834_v17, 0.0 }
 0x581   :  { %2320 = vadd.xlane.f32.xlu0 %v2319_v46 }
 0x58f   :  { %2691 = vrot.lane.b32.xlu1 %v5067_v6, %s3611_s15 }
 0x597   :  { %2644 = vrot.lane.b32.xlu0 %v5068_v2, %s3611_s15 }
 0x5eb   :  { %v2276_v56 = vpop.xlane.xlu1 %2275 }
 0x5ec   :  { %3533 = vrcp.f32 %v2276_v56 }
 0x5ed   :  { %v2279_v48 = vpop.xlane.xlu0 %2278 }
 0x5ee   :  { %3535 = vrcp.f32 %v2279_v48 }
 0x5f2   :  { %v2282_v20 = vpop.xlane.xlu1 %2281 }
 0x5f3   :  { %3537 = vrcp.f32 %v2282_v20 }
 0x5f6   :  { %v3534_v23 = vpop.eup %3533  ;;  %v2285_v40 = vpop.xlane.xlu0 %2284 }
 0x5f7   :  { %v2288_v5 = vpop.xlane.xlu1 %2287  ;;  %3539 = vrcp.f32 %v2285_v40  ;;  %v2338_v50 = vmul.f32 %v3534_v23, %v4762_v45 }
 0x5f8   :  { %v3536_v39 = vpop.eup %3535  ;;  %3541 = vrcp.f32 %v2288_v5 }
 0x5f9   :  { %v2339_v37 = vmul.f32 %v3536_v39, %v4768_v29 }
 0x5fa   :  { %v2291_v13 = vpop.xlane.xlu0 %2290 }
 0x5fb   :  { %3543 = vrcp.f32 %v2291_v13  ;;  %v2294_v1 = vpop.xlane.xlu1 %2293  ;;  %v2354_v51 = vpack.c.bf16 %v2339_v37, %v2338_v50 }
 0x5fc   :  { %3545 = vrcp.f32 %v2294_v1 }
 0x5fd   :  { %3190 = vmatmul.mubr.msk.bf16.vlgmr.msra.gmra.mrb[48].mxu0 %vm808_vm2, %v2354_v51  ;;  %v3538_v16 = vpop.eup %3537 }
 0x5fe   :  { %3200 = vmatpush3.bf16.msra.mxu0 %v2457_v10  ;;  %v2297_v44 = vpop.xlane.xlu0 %2296  ;;  %3201 = vmatprep.mubr.msk.bf16.mxu0 %vm3607_vm1, %v5046_v63  ;;  %v2340_v29 = vmul.f32 %v3538_v16, %v4774_v58 }
 0x5ff   :  { %3547 = vrcp.f32 %v2297_v44  ;;  %v2300_v55 = vpop.xlane.xlu1 %2299  ;;  %3211 = vmatprep.subr.bf16.mxu0 %v5046_v63 }
 0x600   :  { %3549 = vrcp.f32 %v2300_v55 }
 0x601   :  { %v3540_v45 = vpop.eup %3539 }
 0x602   :  { %v2341_v41 = vmul.f32 %v3540_v45, %v4782_v14  ;;  %v2303_v60 = vpop.xlane.xlu0 %2302  ;;  %v3542_v8 = vpop.eup %3541 }
 0x603   :  { %3551 = vrcp.f32 %v2303_v60  ;;  %v2306_v28 = vpop.xlane.xlu1 %2305  ;;  %v2342_v27 = vmul.f32 %v3542_v8, %v4778_v57 }
 0x604   :  { %v2355_v42 = vpack.c.bf16 %v2341_v41, %v2340_v29  ;;  %3553 = vrcp.f32 %v2306_v28 }
 0x605   :  { %v3544_v38 = vpop.eup %3543 }
 0x606   :  { %v2343_v25 = vmul.f32 %v3544_v38, %v4790_v59  ;;  %v2309_v15 = vpop.xlane.xlu0 %2308  ;;  %3196 = vmatmul.mubr.msk.bf16.vlgmr.msra.gmra.mrb[48].mxu1 %vm808_vm2, %v2355_v42  ;;  %v3546_v46 = vpop.eup %3545 }
 0x607   :  { %3555 = vrcp.f32 %v2309_v15  ;;  %3206 = vmatpush3.bf16.msra.mxu1 %v2504_v4  ;;  %v2312_v58 = vpop.xlane.xlu1 %2311  ;;  %3207 = vmatprep.mubr.msk.bf16.mxu1 %vm3607_vm1, %v5046_v63  ;;  %v2344_v2 = vmul.f32 %v3546_v46, %v4792_v36 }
 0x608   :  { %v2356_v14 = vpack.c.bf16 %v2343_v25, %v2342_v27  ;;  %3217 = vmatprep.subr.bf16.mxu1 %v5046_v63  ;;  %3557 = vrcp.f32 %v2312_v58 }
 0x609   :  { %v3548_v6 = vpop.eup %3547 }
 0x60a   :  { %v2345_v57 = vmul.f32 %v3548_v6, %v4800_v0  ;;  %v2315_v59 = vpop.xlane.xlu0 %2314  ;;  %3202 = vmatmul.mubr.msk.bf16.vlgmr.msra.gmra.mrb[52].mxu0 %vm808_vm2, %v2356_v14  ;;  %v3550_v10 = vpop.eup %3549 }
 0x60b   :  { %3559 = vrcp.f32 %v2315_v59  ;;  %3212 = vmatpush3.bf16.msra.mxu0 %v2551_v21  ;;  %v2318_v4 = vpop.xlane.xlu1 %2317  ;;  %3213 = vmatprep.mubr.msk.bf16.mxu0 %vm3607_vm1, %v5046_v63  ;;  %v2346_v20 = vmul.f32 %v3550_v10, %v4802_v12 }
 0x60c   :  { %v2357_v56 = vpack.c.bf16 %v2345_v57, %v2344_v2  ;;  %3223 = vmatprep.subr.bf16.mxu0 %v5046_v63  ;;  %3561 = vrcp.f32 %v2318_v4 }
 0x60d   :  { %v3552_v48 = vpop.eup %3551 }
 0x60e   :  { %v2347_v36 = vmul.f32 %v3552_v48, %v4809_v47  ;;  %v2321_v0 = vpop.xlane.xlu0 %2320  ;;  %3208 = vmatmul.mubr.msk.bf16.vlgmr.msra.gmra.mrb[52].mxu1 %vm808_vm2, %v2357_v56  ;;  %v3554_v23 = vpop.eup %3553 }
 0x60f   :  { %3563 = vrcp.f32 %v2321_v0  ;;  %3218 = vmatpush3.bf16.msra.mxu1 %v4842_v9  ;;  %3219 = vmatprep.mubr.msk.bf16.mxu1 %vm3607_vm1, %v5046_v63  ;;  %v2348_v5 = vmul.f32 %v3554_v23, %v4811_v24  ;;  %v2692_v9 = vpop.permute.xlu1 %2691 }
 0x610   :  { %v2358_v21 = vpack.c.bf16 %v2347_v36, %v2346_v20  ;;  %3229 = vmatprep.subr.bf16.mxu1 %v5046_v63 }
 0x611   :  { %v3556_v40 = vpop.eup %3555 }
 0x612   :  { %v2349_v12 = vmul.f32 %v3556_v40, %v4818_v7  ;;  %3214 = vmatmul.mubr.msk.bf16.vlgmr.msra.gmra.mrb[56].mxu0 %vm808_vm2, %v2358_v21  ;;  %v2645_v47 = vpop.permute.xlu0 %2644  ;;  %v3558_v39 = vpop.eup %3557 }
 0x613   :  { %3224 = vmatpush3.bf16.msra.mxu0 %v2645_v47  ;;  %3225 = vmatprep.mubr.msk.bf16.mxu0 %vm3607_vm1, %v5046_v63  ;;  %v2350_v13 = vmul.f32 %v3558_v39, %v4820_v19 }
 0x614   :  { %v2359_v50 = vpack.c.bf16 %v2349_v12, %v2348_v5 }
 0x615   :  { %v3560_v37 = vpop.eup %3559 }
 0x616   :  { %v2351_v1 = vmul.f32 %v3560_v37, %v4826_v52  ;;  %3220 = vmatmul.mubr.msk.bf16.vlgmr.msra.gmra.mrb[56].mxu1 %vm808_vm2, %v2359_v50  ;;  %v3562_v24 = vpop.eup %3561 }
 0x617   :  { %3230 = vmatpush3.bf16.msra.mxu1 %v2692_v9  ;;  %3231 = vmatprep.mubr.msk.bf16.mxu1 %vm3607_vm1, %v5046_v63  ;;  %v2352_v44 = vmul.f32 %v3562_v24, %v4828_v35 }
 0x618   :  { %v2360_v7 = vpack.c.bf16 %v2351_v1, %v2350_v13 }
 0x619   :  { %v3564_v51 = vpop.eup %3563 }
 0x61a   :  { %v2353_v16 = vmul.f32 %v3564_v51, %v4834_v17  ;;  %3226 = vmatmul.mubr.msk.bf16.vlgmr.msra.gmra.mrb[60].mxu0 %vm808_vm2, %v2360_v7 }
 0x61c   :  { %v2361_v55 = vpack.c.bf16 %v2353_v16, %v2352_v44 }
 0x61e   :  { %3232 = vmatmul.mubr.msk.bf16.vlgmr.msra.gmra.mrb[60].mxu1 %vm808_vm2, %v2361_v55 }
 0x6d0   :  { %v2402_v19 = vpop.f32.mrb[48].mxu0 }
 0x6d1   :  { %v3191_v52 = vpop.f32.mrb[49].mxu0 }
 0x6d2   :  { %v2405_v45 = vpop.f32.mrb[50].mxu0 }
 0x6d3   :  { %v3249_v29 = vpack.i.bf16 %v2405_v45, %v2402_v19  ;;  %v3192_v41 = vpop.f32.mrb[51].mxu0 }
 0x6d5   :  { %3250 = vrot.lane.b32.xlu0 %v3249_v29, %s3612_s2 }
 0x6d9   :  { %v2449_v63 = vpop.f32.mrb[48].mxu1 }
 0x6da   :  { %v3197_v60 = vpop.f32.mrb[49].mxu1 }
 0x6db   :  { %v2452_v8 = vpop.f32.mrb[50].mxu1 }
 0x6dc   :  { %v3254_v28 = vpack.i.bf16 %v2452_v8, %v2449_v63  ;;  %v3198_v35 = vpop.f32.mrb[51].mxu1 }
 0x6dd   :  { %v2496_v42 = vpop.f32.mrb[52].mxu0 }
 0x6de   :  { %3255 = vrot.lane.b32.xlu1 %v3254_v28, %s3612_s2  ;;  %v3203_v17 = vpop.f32.mrb[53].mxu0 }
 0x6df   :  { %v2499_v38 = vpop.f32.mrb[54].mxu0 }
 0x6e0   :  { %v3259_v27 = vpack.i.bf16 %v2499_v38, %v2496_v42  ;;  %v3204_v25 = vpop.f32.mrb[55].mxu0 }
 0x6e1   :  { %v2543_v15 = vpop.f32.mrb[52].mxu1 }
 0x6e2   :  { %3260 = vrot.lane.b32.xlu0 %v3259_v27, %s3612_s2  ;;  %v3209_v46 = vpop.f32.mrb[53].mxu1 }
 0x6e3   :  { %v2546_v58 = vpop.f32.mrb[54].mxu1 }
 0x6e4   :  { %v3264_v14 = vpack.i.bf16 %v2546_v58, %v2543_v15  ;;  %v3210_v6 = vpop.f32.mrb[55].mxu1 }
 0x6e5   :  { %v2590_v2 = vpop.f32.mrb[56].mxu0 }
 0x6e6   :  { %3265 = vrot.lane.b32.xlu1 %v3264_v14, %s3612_s2  ;;  %v3215_v57 = vpop.f32.mrb[57].mxu0 }
 0x6e7   :  { %v2593_v59 = vpop.f32.mrb[58].mxu0 }
 0x6e8   :  { %v3269_v10 = vpack.i.bf16 %v2593_v59, %v2590_v2  ;;  %v3216_v4 = vpop.f32.mrb[59].mxu0 }
 0x6e9   :  { %v2637_v56 = vpop.f32.mrb[56].mxu1 }
 0x6ea   :  { %3270 = vrot.lane.b32.xlu0 %v3269_v10, %s3612_s2  ;;  %v3221_v48 = vpop.f32.mrb[57].mxu1 }
 0x6eb   :  { %v2640_v20 = vpop.f32.mrb[58].mxu1 }
 0x6ec   :  { %v3274_v36 = vpack.i.bf16 %v2640_v20, %v2637_v56  ;;  %v3222_v0 = vpop.f32.mrb[59].mxu1 }
 0x6ed   :  { %v2684_v23 = vpop.f32.mrb[60].mxu0 }
 0x6ee   :  { %3275 = vrot.lane.b32.xlu1 %v3274_v36, %s3612_s2  ;;  %v3227_v21 = vpop.f32.mrb[61].mxu0 }
 0x6ef   :  { %v2687_v40 = vpop.f32.mrb[62].mxu0 }
 0x6f0   :  { %v3279_v5 = vpack.i.bf16 %v2687_v40, %v2684_v23  ;;  %v3228_v12 = vpop.f32.mrb[63].mxu0 }
 0x6f1   :  { %v2731_v47 = vpop.f32.mrb[60].mxu1 }
 0x6f2   :  { %3280 = vrot.lane.b32.xlu0 %v3279_v5, %s3612_s2  ;;  %v3233_v39 = vpop.f32.mrb[61].mxu1 }
 0x6f3   :  { %v2734_v9 = vpop.f32.mrb[62].mxu1 }
 0x6f4   :  { %v3284_v50 = vpack.i.bf16 %v2734_v9, %v2731_v47  ;;  %v3234_v37 = vpop.f32.mrb[63].mxu1 }
 0x6f6   :  { %3285 = vrot.lane.b32.xlu1 %v3284_v50, %s3612_s2 }
 0x747   :  { %v3251_v13 = vpop.permute.xlu0 %3250 }
 0x748   :  { %v3253_v1 = vunpack.i.h.bf16 %v3251_v13  ;;  %v3252_v24 = vunpack.i.l.bf16 %v3251_v13 }
 0x74a   :  { %v2803_v7 = vsel %vm95_vm0, %v4578_v62, %v3253_v1  ;;  %v2802_v51 = vsel %vm95_vm0, %v4576_v26, %v3252_v24 }
 0x74b   :  { %v2964_v44 = vpack.c.bf16 %v2803_v7, %v2803_v7  ;;  %v2963_v16 = vpack.c.bf16 %v2802_v51, %v2802_v51 }
 0x74d   :  { %2884 = vst.msk [vmem:[%s4993_s4 + $0x4] sm:$0xf] %vm2882_vm3, %v2964_v44  ;;  %2883 = vst.msk [vmem:[%s4993_s4] sm:$0xf] %vm2882_vm3, %v2963_v16 }
 0x750   :  { %v3256_v55 = vpop.permute.xlu1 %3255 }
 0x751   :  { %v3258_v19 = vunpack.i.h.bf16 %v3256_v55  ;;  %v3257_v52 = vunpack.i.l.bf16 %v3256_v55 }
 0x753   :  { %v2805_v62 = vsel %vm95_vm0, %v4583_v33, %v3258_v19  ;;  %v2804_v26 = vsel %vm95_vm0, %v4581_v30, %v3257_v52 }
 0x754   :  { %v2966_v45 = vpack.c.bf16 %v2805_v62, %v2805_v62  ;;  %v2965_v29 = vpack.c.bf16 %v2804_v26, %v2804_v26  ;;  %v3261_v41 = vpop.permute.xlu0 %3260 }
 0x755   :  { %v3263_v63 = vunpack.i.h.bf16 %v3261_v41  ;;  %v3262_v60 = vunpack.i.l.bf16 %v3261_v41 }
 0x756   :  { %2886 = vst.msk [vmem:[%s4993_s4 + $0xc] sm:$0xf] %vm2882_vm3, %v2966_v45  ;;  %2885 = vst.msk [vmem:[%s4993_s4 + $0x8] sm:$0xf] %vm2882_vm3, %v2965_v29 }
 0x757   :  { %v2807_v33 = vsel %vm95_vm0, %v4587_v54, %v3263_v63  ;;  %v2806_v30 = vsel %vm95_vm0, %v4585_v32, %v3262_v60 }
 0x758   :  { %v2968_v8 = vpack.c.bf16 %v2807_v33, %v2807_v33  ;;  %v2967_v28 = vpack.c.bf16 %v2806_v30, %v2806_v30  ;;  %v3266_v35 = vpop.permute.xlu1 %3265 }
 0x759   :  { %v3268_v42 = vunpack.i.h.bf16 %v3266_v35  ;;  %v3267_v17 = vunpack.i.l.bf16 %v3266_v35 }
 0x75a   :  { %2888 = vst.msk [vmem:[%s4993_s4 + $0x14] sm:$0xf] %vm2882_vm3, %v2968_v8  ;;  %2887 = vst.msk [vmem:[%s4993_s4 + $0x10] sm:$0xf] %vm2882_vm3, %v2967_v28 }
 0x75b   :  { %v2809_v54 = vsel %vm95_vm0, %v4591_v3, %v3268_v42  ;;  %v2808_v32 = vsel %vm95_vm0, %v4589_v43, %v3267_v17 }
 0x75c   :  { %v2970_v38 = vpack.c.bf16 %v2809_v54, %v2809_v54  ;;  %v2969_v27 = vpack.c.bf16 %v2808_v32, %v2808_v32  ;;  %v3271_v25 = vpop.permute.xlu0 %3270 }
 0x75d   :  { %v3273_v15 = vunpack.i.h.bf16 %v3271_v25  ;;  %v3272_v46 = vunpack.i.l.bf16 %v3271_v25 }
 0x75e   :  { %2890 = vst.msk [vmem:[%s4993_s4 + $0x1c] sm:$0xf] %vm2882_vm3, %v2970_v38  ;;  %2889 = vst.msk [vmem:[%s4993_s4 + $0x18] sm:$0xf] %vm2882_vm3, %v2969_v27 }
 0x75f   :  { %v2811_v3 = vsel %vm95_vm0, %v4595_v11, %v3273_v15  ;;  %v2810_v43 = vsel %vm95_vm0, %v4593_v22, %v3272_v46 }
 0x760   :  { %v2972_v58 = vpack.c.bf16 %v2811_v3, %v2811_v3  ;;  %v2971_v14 = vpack.c.bf16 %v2810_v43, %v2810_v43  ;;  %v3276_v6 = vpop.permute.xlu1 %3275 }
 0x761   :  { %v3278_v2 = vunpack.i.h.bf16 %v3276_v6  ;;  %v3277_v57 = vunpack.i.l.bf16 %v3276_v6 }
 0x762   :  { %2892 = vst.msk [vmem:[%s4993_s4 + $0x24] sm:$0xf] %vm2882_vm3, %v2972_v58  ;;  %2891 = vst.msk [vmem:[%s4993_s4 + $0x20] sm:$0xf] %vm2882_vm3, %v2971_v14 }
 0x763   :  { %v2813_v11 = vsel %vm95_vm0, %v4599_v31, %v3278_v2  ;;  %v2812_v22 = vsel %vm95_vm0, %v4597_v18, %v3277_v57 }
 0x764   :  { %v2974_v59 = vpack.c.bf16 %v2813_v11, %v2813_v11  ;;  %v2973_v10 = vpack.c.bf16 %v2812_v22, %v2812_v22  ;;  %v3281_v4 = vpop.permute.xlu0 %3280 }
 0x765   :  { %v3283_v56 = vunpack.i.h.bf16 %v3281_v4  ;;  %v3282_v48 = vunpack.i.l.bf16 %v3281_v4 }
 0x766   :  { %2894 = vst.msk [vmem:[%s4993_s4 + $0x2c] sm:$0xf] %vm2882_vm3, %v2974_v59  ;;  %2893 = vst.msk [vmem:[%s4993_s4 + $0x28] sm:$0xf] %vm2882_vm3, %v2973_v10 }
 0x767   :  { %v2815_v31 = vsel %vm95_vm0, %v4603_v53, %v3283_v56  ;;  %v2814_v18 = vsel %vm95_vm0, %v4601_v61, %v3282_v48 }
 0x768   :  { %v2976_v20 = vpack.c.bf16 %v2815_v31, %v2815_v31  ;;  %v2975_v36 = vpack.c.bf16 %v2814_v18, %v2814_v18  ;;  %v3286_v0 = vpop.permute.xlu1 %3285 }
 0x769   :  { %v3288_v23 = vunpack.i.h.bf16 %v3286_v0  ;;  %v3287_v21 = vunpack.i.l.bf16 %v3286_v0 }
 0x76a   :  { %2896 = vst.msk [vmem:[%s4993_s4 + $0x34] sm:$0xf] %vm2882_vm3, %v2976_v20  ;;  %2895 = vst.msk [vmem:[%s4993_s4 + $0x30] sm:$0xf] %vm2882_vm3, %v2975_v36 }
 0x76b   :  { %v2817_v53 = vsel %vm95_vm0, %v4618_v49, %v3288_v23  ;;  %v2816_v61 = vsel %vm95_vm0, %v4610_v34, %v3287_v21 }
 0x76c   :  { %v2978_v40 = vpack.c.bf16 %v2817_v53, %v2817_v53  ;;  %v2977_v5 = vpack.c.bf16 %v2816_v61, %v2816_v61 }
 0x76e   :  { %2898 = vst.msk [vmem:[%s4993_s4 + $0x3c] sm:$0xf] %vm2882_vm3, %v2978_v40  ;;  %2897 = vst.msk [vmem:[%s4993_s4 + $0x38] sm:$0xf] %vm2882_vm3, %v2977_v5 }
 0x76f   :  { %2903 = vsyncpa [#allocation3], 1 }

// kernel: _lambda_.26
= control target key start
LH: loop header
LB: loop body
LE: loop exit
PB: predicated region body
PF: predicated region fallthrough
CT: control target
= control target key end

     0   :  { %vm19_vm0 = vcmask 523264   ;;  %v663_v1 = vmov 0.0   ;;  %vm116_vm1 = vcmask 130048   ;;  %vm521_vm2 = vcmask 519168   ;;  %s944_s1 = inlined_call_operand.vmem [shape: bf16[16,64], index: 1, kind: input, shape index: {}]   ;;  %s945_s0 = inlined_call_operand.vmem [shape: bf16[128,16], index: 0, kind: input, shape index: {}]   ;;  %s946_s2 = inlined_call_operand.vmem [shape: f32[1,64], index: 2, kind: input, shape index: {}]   ;;  %s947_s3 = inlined_call_operand.vmem [shape: bf16[128,64], index: 3, kind: output, shape index: {}]  }
   0x1   :  { %v622_v0 = vld [vmem:[%s944_s1] sm:$0xff]   ;;  %22 = vst.msk [vmem:[#allocation2 + $0x10] sm:$0xff] %vm19_vm0, %v663_v1  ;;  %20 = vst.msk [vmem:[#allocation2] sm:$0xff] %vm19_vm0, %v663_v1  ;;  %v625_v4 = vld [vmem:[%s945_s0 + $0x8] sm:$0xff]  }
   0x2   :  { %21 = vst.msk [vmem:[#allocation2 + $0x8] sm:$0xff] %vm19_vm0, %v663_v1  ;;  %23 = vst.msk [vmem:[#allocation2 + $0x18] sm:$0xff] %vm19_vm0, %v663_v1  ;;  %v623_v2 = vld [vmem:[%s945_s0] sm:$0xff]   ;;  %601 = vmatprep.subr.bf16.mxu0 %v622_v0  ;;  %619 = vmatprep.subr.bf16.mxu1 %v622_v0  ;;  %v626_v5 = vld [vmem:[%s945_s0 + $0x28] sm:$0xff]  }
   0x3   :  { %24 = vst.msk [vmem:[#allocation2 + $0x20] sm:$0xff] %vm19_vm0, %v663_v1  ;;  %25 = vst.msk [vmem:[#allocation2 + $0x28] sm:$0xff] %vm19_vm0, %v663_v1  ;;  %v624_v3 = vld [vmem:[%s945_s0 + $0x20] sm:$0xff]   ;;  %602 = vmatpush3.bf16.msra.mxu0 %v622_v0  ;;  %620 = vmatpush3.bf16.msra.mxu1 %v622_v0  ;;  %v627_v6 = vld [vmem:[%s945_s0 + $0x10] sm:$0xff]  }
   0x4   :  { %26 = vst.msk [vmem:[#allocation2 + $0x30] sm:$0xff] %vm19_vm0, %v663_v1  ;;  %27 = vst.msk [vmem:[#allocation2 + $0x38] sm:$0xff] %vm19_vm0, %v663_v1  ;;  %603 = vmatprep.mubr.msk.bf16.mxu0 %vm116_vm1, %v623_v2  ;;  %611 = vmatprep.mubr.msk.bf16.mxu1 %vm116_vm1, %v624_v3  ;;  %v628_v7 = vld [vmem:[%s945_s0 + $0x30] sm:$0xff]   ;;  %v629_v8 = vld [vmem:[%s945_s0 + $0x18] sm:$0xff]  }
   0x5   :  { %28 = vst.msk [vmem:[#allocation2 + $0x40] sm:$0xff] %vm19_vm0, %v663_v1  ;;  %29 = vst.msk [vmem:[#allocation2 + $0x48] sm:$0xff] %vm19_vm0, %v663_v1  ;;  %v630_v9 = vld [vmem:[%s945_s0 + $0x38] sm:$0xff]   ;;  %v746_v38 = vld [vmem:[%s946_s2] ss:$0 sm:$0xff] }
   0x6   :  { %30 = vst.msk [vmem:[#allocation2 + $0x50] sm:$0xff] %vm19_vm0, %v663_v1  ;;  %31 = vst.msk [vmem:[#allocation2 + $0x58] sm:$0xff] %vm19_vm0, %v663_v1  ;;  %604 = vmatmul.mubr.msk.bf16.vlgmr.msra.gmra.mrb[0].mxu0 %vm116_vm1, %v625_v4  ;;  %612 = vmatmul.mubr.msk.bf16.vlgmr.msra.gmra.mrb[0].mxu1 %vm116_vm1, %v626_v5 }
   0x7   :  { %32 = vst.msk [vmem:[#allocation2 + $0x60] sm:$0xff] %vm19_vm0, %v663_v1  ;;  %33 = vst.msk [vmem:[#allocation2 + $0x68] sm:$0xff] %vm19_vm0, %v663_v1  ;;  %607 = vmatprep.mubr.msk.bf16.mxu0 %vm116_vm1, %v627_v6  ;;  %615 = vmatprep.mubr.msk.bf16.mxu1 %vm116_vm1, %v628_v7 }
   0x8   :  { %34 = vst.msk [vmem:[#allocation2 + $0x70] sm:$0xff] %vm19_vm0, %v663_v1  ;;  %35 = vst.msk [vmem:[#allocation2 + $0x78] sm:$0xff] %vm19_vm0, %v663_v1  ;;  %v38_v10 = vld [vmem:[#allocation2 + $0x10] sm:$0xff]  ;;  %v36_v12 = vld [vmem:[#allocation2] sm:$0xff] }
   0x9   :  { %v39_v16 = vld [vmem:[#allocation2 + $0x18] sm:$0xff]  ;;  %v37_v22 = vld [vmem:[#allocation2 + $0x8] sm:$0xff] }
   0xa   :  { %v40_v36 = vld [vmem:[#allocation2 + $0x20] sm:$0xff]  ;;  %v41_v47 = vld [vmem:[#allocation2 + $0x28] sm:$0xff] }
   0xb   :  { %v42_v34 = vld [vmem:[#allocation2 + $0x30] sm:$0xff]  ;;  %v43_v41 = vld [vmem:[#allocation2 + $0x38] sm:$0xff] }
   0xc   :  { %v44_v13 = vld [vmem:[#allocation2 + $0x40] sm:$0xff]  ;;  %v45_v23 = vld [vmem:[#allocation2 + $0x48] sm:$0xff] }
   0xd   :  { %v46_v11 = vld [vmem:[#allocation2 + $0x50] sm:$0xff]  ;;  %v47_v17 = vld [vmem:[#allocation2 + $0x58] sm:$0xff] }
   0xe   :  { %608 = vmatmul.mubr.msk.bf16.gmra.mrb[4].mxu0 %vm116_vm1, %v629_v8  ;;  %616 = vmatmul.mubr.msk.bf16.gmra.mrb[4].mxu1 %vm116_vm1, %v630_v9  ;;  %v48_v37 = vld [vmem:[#allocation2 + $0x60] sm:$0xff]  ;;  %v49_v48 = vld [vmem:[#allocation2 + $0x68] sm:$0xff] }
   0xf   :  { %v50_v35 = vld [vmem:[#allocation2 + $0x70] sm:$0xff]  ;;  %v51_v42 = vld [vmem:[#allocation2 + $0x78] sm:$0xff] }
  0xd9   :  { %v605_v14 = vpop.f32.mrb[0].mxu0  ;;  %v613_v15 = vpop.f32.mrb[0].mxu1 }
  0xda   :  { %v240_v18 = vadd.f32 %v605_v14, %v38_v10  ;;  %v248_v19 = vadd.f32 %v613_v15, %v46_v11  ;;  %v175_v20 = vpop.f32.mrb[1].mxu0  ;;  %v207_v21 = vpop.f32.mrb[1].mxu1 }
  0xdb   :  { %v238_v24 = vadd.f32 %v175_v20, %v36_v12  ;;  %v246_v25 = vadd.f32 %v207_v21, %v44_v13  ;;  %v606_v26 = vpop.f32.mrb[2].mxu0  ;;  %v614_v27 = vpop.f32.mrb[2].mxu1 }
  0xdc   :  { %257 = vst.msk [vmem:[#allocation2 + $0x10] sm:$0xff] %vm19_vm0, %v240_v18  ;;  %265 = vst.msk [vmem:[#allocation2 + $0x50] sm:$0xff] %vm19_vm0, %v248_v19  ;;  %v241_v28 = vadd.f32 %v606_v26, %v39_v16  ;;  %v249_v29 = vadd.f32 %v614_v27, %v47_v17  ;;  %v178_v30 = vpop.f32.mrb[3].mxu0  ;;  %v210_v31 = vpop.f32.mrb[3].mxu1 }
  0xdd   :  { %255 = vst.msk [vmem:[#allocation2] sm:$0xff] %vm19_vm0, %v238_v24  ;;  %263 = vst.msk [vmem:[#allocation2 + $0x40] sm:$0xff] %vm19_vm0, %v246_v25  ;;  %v239_v32 = vadd.f32 %v178_v30, %v37_v22  ;;  %v247_v33 = vadd.f32 %v210_v31, %v45_v23 }
  0xde   :  { %258 = vst.msk [vmem:[#allocation2 + $0x18] sm:$0xff] %vm19_vm0, %v241_v28  ;;  %266 = vst.msk [vmem:[#allocation2 + $0x58] sm:$0xff] %vm19_vm0, %v249_v29 }
  0xdf   :  { %256 = vst.msk [vmem:[#allocation2 + $0x8] sm:$0xff] %vm19_vm0, %v239_v32  ;;  %264 = vst.msk [vmem:[#allocation2 + $0x48] sm:$0xff] %vm19_vm0, %v247_v33 }
  0xe1   :  { %v609_v39 = vpop.f32.mrb[4].mxu0  ;;  %v617_v40 = vpop.f32.mrb[4].mxu1 }
  0xe2   :  { %v244_v43 = vadd.f32 %v609_v39, %v42_v34  ;;  %v252_v44 = vadd.f32 %v617_v40, %v50_v35  ;;  %v191_v45 = vpop.f32.mrb[5].mxu0  ;;  %v223_v46 = vpop.f32.mrb[5].mxu1 }
  0xe3   :  { %v276_v49 = vld [vmem:[#allocation2 + $0x10] sm:$0xff]  ;;  %v242_v51 = vadd.f32 %v191_v45, %v40_v36  ;;  %v250_v52 = vadd.f32 %v223_v46, %v48_v37  ;;  %v610_v53 = vpop.f32.mrb[6].mxu0  ;;  %v618_v54 = vpop.f32.mrb[6].mxu1 }
  0xe4   :  { %v284_v50 = vld [vmem:[#allocation2 + $0x50] sm:$0xff]  ;;  %v299_v55 = vadd.f32 %v746_v38, %v276_v49  ;;  %v274_v57 = vld [vmem:[#allocation2] sm:$0xff]  ;;  %261 = vst.msk [vmem:[#allocation2 + $0x30] sm:$0xff] %vm19_vm0, %v244_v43  ;;  %269 = vst.msk [vmem:[#allocation2 + $0x70] sm:$0xff] %vm19_vm0, %v252_v44  ;;  %v245_v59 = vadd.f32 %v610_v53, %v43_v41  ;;  %v253_v60 = vadd.f32 %v618_v54, %v51_v42  ;;  %v194_v61 = vpop.f32.mrb[7].mxu0  ;;  %v226_v62 = vpop.f32.mrb[7].mxu1 }
  0xe5   :  { %v750_v56 = vadd.f32 %v746_v38, %v284_v50  ;;  %v282_v58 = vld [vmem:[#allocation2 + $0x40] sm:$0xff]  ;;  %v755_v63 = vadd.f32 %v746_v38, %v274_v57  ;;  %v277_v1 = vld [vmem:[#allocation2 + $0x18] sm:$0xff]  ;;  %259 = vst.msk [vmem:[#allocation2 + $0x20] sm:$0xff] %vm19_vm0, %v242_v51  ;;  %267 = vst.msk [vmem:[#allocation2 + $0x60] sm:$0xff] %vm19_vm0, %v250_v52  ;;  %v243_v3 = vadd.f32 %v194_v61, %v41_v47 }
  0xe6   :  { %v758_v0 = vadd.f32 %v746_v38, %v282_v58  ;;  %v285_v2 = vld [vmem:[#allocation2 + $0x58] sm:$0xff]  ;;  %v251_v4 = vadd.f32 %v226_v62, %v49_v48  ;;  %v331_v5 = vmul.f32 0.044715, %v299_v55  ;;  %262 = vst.msk [vmem:[#allocation2 + $0x38] sm:$0xff] %vm19_vm0, %v245_v59  ;;  %270 = vst.msk [vmem:[#allocation2 + $0x78] sm:$0xff] %vm19_vm0, %v253_v60  ;;  %v771_v11 = vadd.f32 %v746_v38, %v277_v1  ;;  %v275_v13 = vld [vmem:[#allocation2 + $0x8] sm:$0xff] }
  0xe7   :  { %v339_v6 = vmul.f32 0.044715, %v750_v56  ;;  %v329_v7 = vmul.f32 0.044715, %v755_v63  ;;  %260 = vst.msk [vmem:[#allocation2 + $0x28] sm:$0xff] %vm19_vm0, %v243_v3  ;;  %v774_v12 = vadd.f32 %v746_v38, %v285_v2  ;;  %v779_v16 = vadd.f32 %v746_v38, %v275_v13  ;;  %v283_v17 = vld [vmem:[#allocation2 + $0x48] sm:$0xff] }
  0xe8   :  { %v337_v8 = vmul.f32 0.044715, %v758_v0  ;;  %268 = vst.msk [vmem:[#allocation2 + $0x68] sm:$0xff] %vm19_vm0, %v251_v4  ;;  %v347_v9 = vmul.f32 %v331_v5, %v299_v55  ;;  %v332_v20 = vmul.f32 0.044715, %v771_v11  ;;  %v789_v27 = vadd.f32 %v746_v38, %v283_v17 }
  0xe9   :  { %v355_v10 = vmul.f32 %v339_v6, %v750_v56  ;;  %v345_v14 = vmul.f32 %v329_v7, %v755_v63  ;;  %v340_v23 = vmul.f32 0.044715, %v774_v12  ;;  %v330_v31 = vmul.f32 0.044715, %v779_v16 }
  0xea   :  { %v353_v15 = vmul.f32 %v337_v8, %v758_v0  ;;  %v363_v18 = vmul.f32 %v347_v9, %v299_v55  ;;  %v348_v26 = vmul.f32 %v332_v20, %v771_v11  ;;  %v795_v33 = vmul.f32 0.5, %v299_v55 }
  0xeb   :  { %v371_v19 = vmul.f32 %v355_v10, %v750_v56  ;;  %v361_v21 = vmul.f32 %v345_v14, %v755_v63  ;;  %v356_v30 = vmul.f32 %v340_v23, %v774_v12  ;;  %v280_v32 = vld [vmem:[#allocation2 + $0x30] sm:$0xff]  ;;  %v346_v42 = vmul.f32 %v330_v31, %v779_v16 }
  0xec   :  { %v369_v22 = vmul.f32 %v353_v15, %v758_v0  ;;  %v379_v24 = vadd.f32 %v363_v18, %v299_v55  ;;  %v364_v36 = vmul.f32 %v348_v26, %v771_v11  ;;  %v288_v37 = vld [vmem:[#allocation2 + $0x70] sm:$0xff]  ;;  %v338_v44 = vmul.f32 0.044715, %v789_v27  ;;  %v278_v52 = vld [vmem:[#allocation2 + $0x20] sm:$0xff] }
  0xed   :  { %v387_v25 = vadd.f32 %v371_v19, %v750_v56  ;;  %v377_v28 = vadd.f32 %v361_v21, %v755_v63  ;;  %v372_v41 = vmul.f32 %v356_v30, %v774_v12  ;;  %v803_v45 = vadd.f32 %v746_v38, %v280_v32  ;;  %v286_v57 = vld [vmem:[#allocation2 + $0x60] sm:$0xff]  ;;  %v281_v58 = vld [vmem:[#allocation2 + $0x38] sm:$0xff] }
  0xee   :  { %v385_v29 = vadd.f32 %v369_v22, %v758_v0  ;;  %v395_v34 = vmul.f32 0.7978846, %v379_v24  ;;  %v380_v43 = vadd.f32 %v364_v36, %v771_v11  ;;  %v362_v47 = vmul.f32 %v346_v42, %v779_v16  ;;  %v289_v14 = vld [vmem:[#allocation2 + $0x78] sm:$0xff] }
  0xef   :  { %v403_v35 = vmul.f32 0.7978846, %v387_v25  ;;  %v393_v39 = vmul.f32 0.7978846, %v377_v28  ;;  %v388_v46 = vadd.f32 %v372_v41, %v774_v12  ;;  %v808_v48 = vadd.f32 %v746_v38, %v288_v37 }
  0xf0   :  { %v401_v40 = vmul.f32 0.7978846, %v385_v29  ;;  %631 = vtanh.f32 %v395_v34  ;;  %v323_v49 = vmul.f32 0.5, %v750_v56  ;;  %v396_v50 = vmul.f32 0.7978846, %v380_v43 }
  0xf1   :  { %633 = vtanh.f32 %v403_v35  ;;  %v354_v51 = vmul.f32 %v338_v44, %v789_v27  ;;  %v404_v53 = vmul.f32 0.7978846, %v388_v46  ;;  %v378_v54 = vadd.f32 %v362_v47, %v779_v16 }
  0xf2   :  { %635 = vtanh.f32 %v393_v39  ;;  %v335_v55 = vmul.f32 0.044715, %v803_v45  ;;  %v313_v59 = vmul.f32 0.5, %v755_v63  ;;  %v343_v56 = vmul.f32 0.044715, %v808_v48 }
  0xf3   :  { %637 = vtanh.f32 %v401_v40  ;;  %v370_v60 = vmul.f32 %v354_v51, %v789_v27  ;;  %v394_v61 = vmul.f32 0.7978846, %v378_v54  ;;  %v819_v1 = vadd.f32 %v746_v38, %v278_v52 }
  0xf4   :  { %639 = vtanh.f32 %v396_v50  ;;  %v351_v62 = vmul.f32 %v335_v55, %v803_v45  ;;  %v359_v3 = vmul.f32 %v343_v56, %v808_v48  ;;  %v824_v4 = vadd.f32 %v746_v38, %v286_v57  ;;  %v287_v57 = vld [vmem:[#allocation2 + $0x68] sm:$0xff] }
  0xf5   :  { %641 = vtanh.f32 %v404_v53  ;;  %v386_v2 = vadd.f32 %v370_v60, %v789_v27  ;;  %v827_v63 = vadd.f32 %v746_v38, %v281_v58  ;;  %v321_v5 = vmul.f32 0.5, %v758_v0 }
  0xf6   :  { %643 = vtanh.f32 %v394_v61  ;;  %v367_v6 = vmul.f32 %v351_v62, %v803_v45  ;;  %v333_v7 = vmul.f32 0.044715, %v819_v1  ;;  %v316_v8 = vmul.f32 0.5, %v771_v11 }
  0xf7   :  { %v402_v9 = vmul.f32 0.7978846, %v386_v2  ;;  %v375_v10 = vmul.f32 %v359_v3, %v808_v48  ;;  %v341_v13 = vmul.f32 0.044715, %v824_v4  ;;  %v324_v15 = vmul.f32 0.5, %v774_v12 }
  0xf8   :  { %v383_v17 = vadd.f32 %v367_v6, %v803_v45  ;;  %v349_v18 = vmul.f32 %v333_v7, %v819_v1  ;;  %v336_v0 = vmul.f32 0.044715, %v827_v63  ;;  %v314_v20 = vmul.f32 0.5, %v779_v16 }
  0xf9   :  { %645 = vtanh.f32 %v402_v9  ;;  %v391_v11 = vadd.f32 %v375_v10, %v808_v48  ;;  %v357_v21 = vmul.f32 %v341_v13, %v824_v4  ;;  %v844_v12 = vadd.f32 %v746_v38, %v289_v14 }
  0xfa   :  { %v632_v19 = vpop.eup %631  ;;  %v399_v24 = vmul.f32 0.7978846, %v383_v17  ;;  %v365_v25 = vmul.f32 %v349_v18, %v819_v1  ;;  %v352_v16 = vmul.f32 %v336_v0, %v827_v63  ;;  %v874_v7 = vadd.f32 %v746_v38, %v287_v57 }
  0xfb   :  { %v634_v22 = vpop.eup %633  ;;  %v427_v23 = vadd.f32 1.0, %v632_v19  ;;  %v407_v29 = vmul.f32 0.7978846, %v391_v11  ;;  %v373_v30 = vmul.f32 %v357_v21, %v824_v4  ;;  %v344_v62 = vmul.f32 0.044715, %v844_v12 }
  0xfc   :  { %v636_v26 = vpop.eup %635  ;;  %v435_v28 = vadd.f32 1.0, %v634_v22  ;;  %647 = vtanh.f32 %v399_v24  ;;  %v381_v35 = vadd.f32 %v365_v25, %v819_v1  ;;  %v368_v55 = vmul.f32 %v352_v16, %v827_v63 }
  0xfd   :  { %v638_v31 = vpop.eup %637  ;;  %v443_v32 = vmul.f32 %v427_v23, %v795_v33  ;;  %v425_v34 = vadd.f32 1.0, %v636_v26  ;;  %649 = vtanh.f32 %v407_v29  ;;  %v389_v40 = vadd.f32 %v373_v30, %v824_v4  ;;  %v279_v33 = vld [vmem:[#allocation2 + $0x28] sm:$0xff] }
  0xfe   :  { %v640_v36 = vpop.eup %639  ;;  %v451_v37 = vmul.f32 %v435_v28, %v323_v49  ;;  %v433_v39 = vadd.f32 1.0, %v638_v31  ;;  %v397_v46 = vmul.f32 0.7978846, %v381_v35  ;;  %v384_v61 = vadd.f32 %v368_v55, %v827_v63 }
  0xff   :  { %v642_v41 = vpop.eup %641  ;;  %v578_v42 = vpack.c.bf16 %v443_v32, %v443_v32  ;;  %v441_v43 = vmul.f32 %v425_v34, %v313_v59  ;;  %v428_v44 = vadd.f32 1.0, %v640_v36  ;;  %v405_v52 = vmul.f32 0.7978846, %v389_v40 }
 0x100   :  { %v586_v47 = vpack.c.bf16 %v451_v37, %v451_v37  ;;  %v449_v50 = vmul.f32 %v433_v39, %v321_v5  ;;  %v436_v51 = vadd.f32 1.0, %v642_v41  ;;  %v644_v53 = vpop.eup %643  ;;  %651 = vtanh.f32 %v397_v46 }
 0x101   :  { %524 = vst.msk [vmem:[%s947_s3 + $0x8] sm:$0xf] %vm521_vm2, %v578_v42  ;;  %v576_v49 = vpack.c.bf16 %v441_v43, %v441_v43  ;;  %v444_v54 = vmul.f32 %v428_v44, %v316_v8  ;;  %v426_v60 = vadd.f32 1.0, %v644_v53  ;;  %653 = vtanh.f32 %v405_v52 }
 0x102   :  { %532 = vst.msk [vmem:[%s947_s3 + $0x28] sm:$0xf] %vm521_vm2, %v586_v47  ;;  %v584_v58 = vpack.c.bf16 %v449_v50, %v449_v50  ;;  %v452_v59 = vmul.f32 %v436_v51, %v324_v15  ;;  %v867_v2 = vadd.f32 %v746_v38, %v279_v33  ;;  %v322_v8 = vmul.f32 0.5, %v789_v27 }
 0x103   :  { %522 = vst.msk [vmem:[%s947_s3] sm:$0xf] %vm521_vm2, %v576_v49  ;;  %v579_v56 = vpack.c.bf16 %v444_v54, %v444_v54  ;;  %v646_v3 = vpop.eup %645  ;;  %v442_v6 = vmul.f32 %v426_v60, %v314_v20  ;;  %v400_v10 = vmul.f32 0.7978846, %v384_v61  ;;  %v360_v13 = vmul.f32 %v344_v62, %v844_v12 }
 0x104   :  { %530 = vst.msk [vmem:[%s947_s3 + $0x20] sm:$0xf] %vm521_vm2, %v584_v58  ;;  %v587_v5 = vpack.c.bf16 %v452_v59, %v452_v59  ;;  %v434_v9 = vadd.f32 1.0, %v646_v3  ;;  %v334_v38 = vmul.f32 0.044715, %v867_v2  ;;  %v319_v19 = vmul.f32 0.5, %v803_v45 }
 0x105   :  { %525 = vst.msk [vmem:[%s947_s3 + $0xc] sm:$0xf] %vm521_vm2, %v579_v56  ;;  %v577_v14 = vpack.c.bf16 %v442_v6, %v442_v6  ;;  %v342_v15 = vmul.f32 0.044715, %v874_v7  ;;  %655 = vtanh.f32 %v400_v10  ;;  %v376_v0 = vmul.f32 %v360_v13, %v844_v12 }
 0x106   :  { %533 = vst.msk [vmem:[%s947_s3 + $0x2c] sm:$0xf] %vm521_vm2, %v587_v5  ;;  %v648_v17 = vpop.eup %647  ;;  %v450_v18 = vmul.f32 %v434_v9, %v322_v8  ;;  %v350_v11 = vmul.f32 %v334_v38, %v867_v2  ;;  %v327_v23 = vmul.f32 0.5, %v808_v48  ;;  %v317_v16 = vmul.f32 0.5, %v819_v1 }
 0x107   :  { %v650_v27 = vpop.eup %649  ;;  %523 = vst.msk [vmem:[%s947_s3 + $0x4] sm:$0xf] %vm521_vm2, %v577_v14  ;;  %v431_v20 = vadd.f32 1.0, %v648_v17  ;;  %v358_v21 = vmul.f32 %v342_v15, %v874_v7  ;;  %v392_v25 = vadd.f32 %v376_v0, %v844_v12  ;;  %v325_v39 = vmul.f32 0.5, %v824_v4 }
 0x108   :  { %v585_v22 = vpack.c.bf16 %v450_v18, %v450_v18  ;;  %v439_v24 = vadd.f32 1.0, %v650_v27  ;;  %v366_v28 = vmul.f32 %v350_v11, %v867_v2  ;;  %v320_v47 = vmul.f32 0.5, %v827_v63 }
 0x109   :  { %v447_v26 = vmul.f32 %v431_v20, %v319_v19  ;;  %v374_v29 = vmul.f32 %v358_v21, %v874_v7  ;;  %v408_v31 = vmul.f32 0.7978846, %v392_v25  ;;  %v328_v53 = vmul.f32 0.5, %v844_v12 }
 0x10a   :  { %v652_v30 = vpop.eup %651  ;;  %531 = vst.msk [vmem:[%s947_s3 + $0x24] sm:$0xf] %vm521_vm2, %v585_v22  ;;  %v455_v45 = vmul.f32 %v439_v24, %v327_v23  ;;  %v382_v35 = vadd.f32 %v366_v28, %v867_v2  ;;  %v318_v57 = vmul.f32 0.5, %v867_v2  ;;  %v326_v60 = vmul.f32 0.5, %v874_v7 }
 0x10b   :  { %v654_v32 = vpop.eup %653  ;;  %v582_v48 = vpack.c.bf16 %v447_v26, %v447_v26  ;;  %v429_v34 = vadd.f32 1.0, %v652_v30  ;;  %v390_v36 = vadd.f32 %v374_v29, %v874_v7  ;;  %657 = vtanh.f32 %v408_v31 }
 0x10c   :  { %v590_v37 = vpack.c.bf16 %v455_v45, %v455_v45  ;;  %v437_v40 = vadd.f32 1.0, %v654_v32  ;;  %v398_v1 = vmul.f32 0.7978846, %v382_v35 }
 0x10d   :  { %528 = vst.msk [vmem:[%s947_s3 + $0x18] sm:$0xf] %vm521_vm2, %v582_v48  ;;  %v445_v41 = vmul.f32 %v429_v34, %v317_v16  ;;  %v406_v42 = vmul.f32 0.7978846, %v390_v36 }
 0x10e   :  { %536 = vst.msk [vmem:[%s947_s3 + $0x38] sm:$0xf] %vm521_vm2, %v590_v37  ;;  %v453_v43 = vmul.f32 %v437_v40, %v325_v39  ;;  %659 = vtanh.f32 %v398_v1 }
 0x10f   :  { %v580_v44 = vpack.c.bf16 %v445_v41, %v445_v41  ;;  %v656_v46 = vpop.eup %655  ;;  %661 = vtanh.f32 %v406_v42 }
 0x110   :  { %v588_v4 = vpack.c.bf16 %v453_v43, %v453_v43  ;;  %v432_v50 = vadd.f32 1.0, %v656_v46 }
 0x111   :  { %526 = vst.msk [vmem:[%s947_s3 + $0x10] sm:$0xf] %vm521_vm2, %v580_v44 }
 0x112   :  { %534 = vst.msk [vmem:[%s947_s3 + $0x30] sm:$0xf] %vm521_vm2, %v588_v4  ;;  %v448_v51 = vmul.f32 %v432_v50, %v320_v47 }
 0x114   :  { %v583_v52 = vpack.c.bf16 %v448_v51, %v448_v51 }
 0x115   :  { %v658_v33 = vpop.eup %657 }
 0x116   :  { %529 = vst.msk [vmem:[%s947_s3 + $0x1c] sm:$0xf] %vm521_vm2, %v583_v52  ;;  %v440_v49 = vadd.f32 1.0, %v658_v33 }
 0x118   :  { %v660_v54 = vpop.eup %659  ;;  %v456_v55 = vmul.f32 %v440_v49, %v328_v53 }
 0x119   :  { %v662_v63 = vpop.eup %661  ;;  %v430_v58 = vadd.f32 1.0, %v660_v54 }
 0x11a   :  { %v591_v59 = vpack.c.bf16 %v456_v55, %v456_v55  ;;  %v438_v56 = vadd.f32 1.0, %v662_v63 }
 0x11b   :  { %v446_v61 = vmul.f32 %v430_v58, %v318_v57 }
 0x11c   :  { %537 = vst.msk [vmem:[%s947_s3 + $0x3c] sm:$0xf] %vm521_vm2, %v591_v59  ;;  %v454_v62 = vmul.f32 %v438_v56, %v326_v60 }
 0x11d   :  { %v581_v3 = vpack.c.bf16 %v446_v61, %v446_v61 }
 0x11e   :  { %v589_v12 = vpack.c.bf16 %v454_v62, %v454_v62 }
 0x11f   :  { %527 = vst.msk [vmem:[%s947_s3 + $0x14] sm:$0xf] %vm521_vm2, %v581_v3 }
 0x120   :  { %535 = vst.msk [vmem:[%s947_s3 + $0x34] sm:$0xf] %vm521_vm2, %v589_v12 }

// kernel: _lambda_.27
= control target key start
LH: loop header
LB: loop body
LE: loop exit
PB: predicated region body
PF: predicated region fallthrough
CT: control target
= control target key end

     0   :  { %vm28_vm0 = vcmask 130048   ;;  %v917_v1 = vmov 0.0   ;;  %vm149_vm1 = vcmask 523264   ;;  %vm713_vm2 = vcmask 125952   ;;  %s1372_s1 = inlined_call_operand.vmem [shape: bf16[64,16], index: 1, kind: input, shape index: {}]   ;;  %s1373_s0 = inlined_call_operand.vmem [shape: bf16[128,64], index: 0, kind: input, shape index: {}]   ;;  %s1374_s2 = inlined_call_operand.vmem [shape: f32[1,16], index: 2, kind: input, shape index: {}, may-alias: {2,4}]   ;;  %s1375_s3 = inlined_call_operand.vmem [shape: f32[1,16], index: 3, kind: input, shape index: {}]   ;;  %s1376_s5 = inlined_call_operand.vmem [shape: bf16[128,16], index: 5, kind: input, shape index: {}]   ;;  %s1377_s4 = inlined_call_operand.vmem [shape: f32[1,16], index: 4, kind: input, shape index: {}, may-alias: {2,4}]   ;;  %s1378_s6 = inlined_call_operand.vmem [shape: bf16[128,16], index: 6, kind: output, shape index: {}]  }
   0x1   :  { %v873_v0 = vld [vmem:[%s1372_s1] sm:$0xff]   ;;  %31 = vst.msk [vmem:[#allocation2 + $0x10] sm:$0xff] %vm28_vm0, %v917_v1  ;;  %29 = vst.msk [vmem:[#allocation2] sm:$0xff] %vm28_vm0, %v917_v1  ;;  %v874_v2 = vld [vmem:[%s1372_s1 + $0x8] sm:$0xff]  }
   0x2   :  { %30 = vst.msk [vmem:[#allocation2 + $0x8] sm:$0xff] %vm28_vm0, %v917_v1  ;;  %32 = vst.msk [vmem:[#allocation2 + $0x18] sm:$0xff] %vm28_vm0, %v917_v1  ;;  %840 = vmatprep.subr.bf16.mxu0 %v873_v0  ;;  %864 = vmatprep.subr.bf16.mxu1 %v873_v0  ;;  %v875_v3 = vld [vmem:[%s1372_s1 + $0x10] sm:$0xff]   ;;  %v877_v4 = vld [vmem:[%s1373_s0] sm:$0xff]  }
   0x3   :  { %33 = vst.msk [vmem:[#allocation2 + $0x20] sm:$0xff] %vm28_vm0, %v917_v1  ;;  %34 = vst.msk [vmem:[#allocation2 + $0x28] sm:$0xff] %vm28_vm0, %v917_v1  ;;  %841 = vmatpush3.bf16.msra.mxu0 %v873_v0  ;;  %868 = vmatpush3.bf16.msra.mxu1 %v873_v0  ;;  %v878_v5 = vld [vmem:[%s1373_s0 + $0x20] sm:$0xff]   ;;  %v876_v6 = vld [vmem:[%s1372_s1 + $0x18] sm:$0xff]  }
   0x4   :  { %35 = vst.msk [vmem:[#allocation2 + $0x30] sm:$0xff] %vm28_vm0, %v917_v1  ;;  %36 = vst.msk [vmem:[#allocation2 + $0x38] sm:$0xff] %vm28_vm0, %v917_v1  ;;  %842 = vmatprep.subr.bf16.mxu0 %v874_v2  ;;  %865 = vmatprep.subr.bf16.mxu1 %v874_v2  ;;  %v879_v7 = vld [vmem:[%s1373_s0 + $0x8] sm:$0xff]   ;;  %v881_v9 = vld [vmem:[%s1373_s0 + $0x10] sm:$0xff]  }
   0x5   :  { %37 = vst.msk [vmem:[#allocation2 + $0x40] sm:$0xff] %vm28_vm0, %v917_v1  ;;  %38 = vst.msk [vmem:[#allocation2 + $0x48] sm:$0xff] %vm28_vm0, %v917_v1  ;;  %848 = vmatprep.mubr.msk.bf16.mxu0 %vm149_vm1, %v877_v4  ;;  %856 = vmatprep.mubr.msk.bf16.mxu1 %vm149_vm1, %v878_v5  ;;  %v880_v8 = vld [vmem:[%s1373_s0 + $0x28] sm:$0xff]   ;;  %v883_v10 = vld [vmem:[%s1373_s0 + $0x30] sm:$0xff]  }
   0x6   :  { %39 = vst.msk [vmem:[#allocation2 + $0x50] sm:$0xff] %vm28_vm0, %v917_v1  ;;  %40 = vst.msk [vmem:[#allocation2 + $0x58] sm:$0xff] %vm28_vm0, %v917_v1  ;;  %v882_v11 = vld [vmem:[%s1373_s0 + $0x18] sm:$0xff]   ;;  %v1024_v41 = vld [vmem:[%s1374_s2] ss:$0 sm:$0xff] }
   0x7   :  { %41 = vst.msk [vmem:[#allocation2 + $0x60] sm:$0xff] %vm28_vm0, %v917_v1  ;;  %42 = vst.msk [vmem:[#allocation2 + $0x68] sm:$0xff] %vm28_vm0, %v917_v1  ;;  %843 = vmatpush3.bf16.msra.mxu0 %v874_v2  ;;  %869 = vmatpush3.bf16.msra.mxu1 %v874_v2  ;;  %v884_v12 = vld [vmem:[%s1373_s0 + $0x38] sm:$0xff]  }
   0x8   :  { %43 = vst.msk [vmem:[#allocation2 + $0x70] sm:$0xff] %vm28_vm0, %v917_v1  ;;  %44 = vst.msk [vmem:[#allocation2 + $0x78] sm:$0xff] %vm28_vm0, %v917_v1  ;;  %844 = vmatprep.subr.bf16.mxu0 %v875_v3  ;;  %866 = vmatprep.subr.bf16.mxu1 %v875_v3  ;;  %v47_v13 = vld [vmem:[#allocation2 + $0x10] sm:$0xff]  ;;  %v45_v15 = vld [vmem:[#allocation2] sm:$0xff] }
   0x9   :  { %v48_v19 = vld [vmem:[#allocation2 + $0x18] sm:$0xff]  ;;  %v46_v25 = vld [vmem:[#allocation2 + $0x8] sm:$0xff] }
   0xa   :  { %v49_v39 = vld [vmem:[#allocation2 + $0x20] sm:$0xff]  ;;  %v50_v48 = vld [vmem:[#allocation2 + $0x28] sm:$0xff] }
   0xb   :  { %845 = vmatpush3.bf16.msra.mxu0 %v875_v3  ;;  %870 = vmatpush3.bf16.msra.mxu1 %v875_v3  ;;  %v51_v37 = vld [vmem:[#allocation2 + $0x30] sm:$0xff]  ;;  %v52_v43 = vld [vmem:[#allocation2 + $0x38] sm:$0xff] }
   0xc   :  { %846 = vmatprep.subr.bf16.mxu0 %v876_v6  ;;  %867 = vmatprep.subr.bf16.mxu1 %v876_v6  ;;  %v53_v16 = vld [vmem:[#allocation2 + $0x40] sm:$0xff]  ;;  %v54_v26 = vld [vmem:[#allocation2 + $0x48] sm:$0xff] }
   0xd   :  { %v55_v14 = vld [vmem:[#allocation2 + $0x50] sm:$0xff]  ;;  %v56_v20 = vld [vmem:[#allocation2 + $0x58] sm:$0xff] }
   0xe   :  { %v57_v40 = vld [vmem:[#allocation2 + $0x60] sm:$0xff]  ;;  %v58_v51 = vld [vmem:[#allocation2 + $0x68] sm:$0xff] }
   0xf   :  { %847 = vmatpush3.bf16.msra.mxu0 %v876_v6  ;;  %871 = vmatpush3.bf16.msra.mxu1 %v876_v6  ;;  %v59_v38 = vld [vmem:[#allocation2 + $0x70] sm:$0xff]  ;;  %v60_v45 = vld [vmem:[#allocation2 + $0x78] sm:$0xff] }
  0x12   :  { %849 = vmatmul.mubr.msk.bf16.vlgmr.msra.gmra.mrb[0].mxu0 %vm149_vm1, %v879_v7  ;;  %857 = vmatmul.mubr.msk.bf16.vlgmr.msra.gmra.mrb[0].mxu1 %vm149_vm1, %v880_v8 }
  0x13   :  { %852 = vmatprep.mubr.msk.bf16.mxu0 %vm149_vm1, %v881_v9  ;;  %860 = vmatprep.mubr.msk.bf16.mxu1 %vm149_vm1, %v883_v10 }
  0x1a   :  { %853 = vmatmul.mubr.msk.bf16.gmra.mrb[4].mxu0 %vm149_vm1, %v882_v11  ;;  %861 = vmatmul.mubr.msk.bf16.gmra.mrb[4].mxu1 %vm149_vm1, %v884_v12 }
  0xe5   :  { %v850_v17 = vpop.f32.mrb[0].mxu0  ;;  %v858_v18 = vpop.f32.mrb[0].mxu1 }
  0xe6   :  { %v273_v21 = vadd.f32 %v850_v17, %v47_v13  ;;  %v281_v22 = vadd.f32 %v858_v18, %v55_v14  ;;  %v208_v23 = vpop.f32.mrb[1].mxu0  ;;  %v240_v24 = vpop.f32.mrb[1].mxu1 }
  0xe7   :  { %v271_v27 = vadd.f32 %v208_v23, %v45_v15  ;;  %v279_v28 = vadd.f32 %v240_v24, %v53_v16  ;;  %v851_v29 = vpop.f32.mrb[2].mxu0  ;;  %v859_v30 = vpop.f32.mrb[2].mxu1 }
  0xe8   :  { %290 = vst.msk [vmem:[#allocation2 + $0x10] sm:$0xff] %vm28_vm0, %v273_v21  ;;  %298 = vst.msk [vmem:[#allocation2 + $0x50] sm:$0xff] %vm28_vm0, %v281_v22  ;;  %v274_v31 = vadd.f32 %v851_v29, %v48_v19  ;;  %v282_v32 = vadd.f32 %v859_v30, %v56_v20  ;;  %v211_v33 = vpop.f32.mrb[3].mxu0  ;;  %v243_v34 = vpop.f32.mrb[3].mxu1 }
  0xe9   :  { %288 = vst.msk [vmem:[#allocation2] sm:$0xff] %vm28_vm0, %v271_v27  ;;  %296 = vst.msk [vmem:[#allocation2 + $0x40] sm:$0xff] %vm28_vm0, %v279_v28  ;;  %v272_v35 = vadd.f32 %v211_v33, %v46_v25  ;;  %v280_v36 = vadd.f32 %v243_v34, %v54_v26 }
  0xea   :  { %291 = vst.msk [vmem:[#allocation2 + $0x18] sm:$0xff] %vm28_vm0, %v274_v31  ;;  %299 = vst.msk [vmem:[#allocation2 + $0x58] sm:$0xff] %vm28_vm0, %v282_v32 }
  0xeb   :  { %289 = vst.msk [vmem:[#allocation2 + $0x8] sm:$0xff] %vm28_vm0, %v272_v35  ;;  %297 = vst.msk [vmem:[#allocation2 + $0x48] sm:$0xff] %vm28_vm0, %v280_v36 }
  0xed   :  { %v854_v42 = vpop.f32.mrb[4].mxu0  ;;  %v862_v44 = vpop.f32.mrb[4].mxu1 }
  0xee   :  { %v277_v46 = vadd.f32 %v854_v42, %v51_v37  ;;  %v224_v47 = vpop.f32.mrb[5].mxu0  ;;  %v285_v49 = vadd.f32 %v862_v44, %v59_v38  ;;  %v256_v50 = vpop.f32.mrb[5].mxu1 }
  0xef   :  { %v317_v52 = vld [vmem:[#allocation2 + $0x50] sm:$0xff]  ;;  %v275_v54 = vadd.f32 %v224_v47, %v49_v39  ;;  %v855_v55 = vpop.f32.mrb[6].mxu0  ;;  %v283_v56 = vadd.f32 %v256_v50, %v57_v40  ;;  %v863_v57 = vpop.f32.mrb[6].mxu1 }
  0xf0   :  { %v309_v53 = vld [vmem:[#allocation2 + $0x10] sm:$0xff]  ;;  %v1027_v58 = vadd.f32 %v1024_v41, %v317_v52  ;;  %294 = vst.msk [vmem:[#allocation2 + $0x30] sm:$0xff] %vm28_vm0, %v277_v46  ;;  %v278_v60 = vadd.f32 %v855_v55, %v52_v43  ;;  %v307_v61 = vld [vmem:[#allocation2] sm:$0xff]  ;;  %v227_v62 = vpop.f32.mrb[7].mxu0  ;;  %302 = vst.msk [vmem:[#allocation2 + $0x70] sm:$0xff] %vm28_vm0, %v285_v49  ;;  %v286_v63 = vadd.f32 %v863_v57, %v60_v45  ;;  %v259_v0 = vpop.f32.mrb[7].mxu1 }
  0xf1   :  { %v1030_v59 = vadd.f32 %v1024_v41, %v309_v53  ;;  %292 = vst.msk [vmem:[#allocation2 + $0x20] sm:$0xff] %vm28_vm0, %v275_v54  ;;  %v310_v1 = vld [vmem:[#allocation2 + $0x18] sm:$0xff]  ;;  %v276_v2 = vadd.f32 %v227_v62, %v50_v48  ;;  %300 = vst.msk [vmem:[#allocation2 + $0x60] sm:$0xff] %vm28_vm0, %v283_v56  ;;  %v284_v3 = vadd.f32 %v259_v0, %v58_v51  ;;  %v315_v8 = vld [vmem:[#allocation2 + $0x40] sm:$0xff] }
  0xf2   :  { %v376_v4 = vsel %vm28_vm0, %v1027_v58, 0.0  ;;  %295 = vst.msk [vmem:[#allocation2 + $0x38] sm:$0xff] %vm28_vm0, %v278_v60  ;;  %v1042_v6 = vadd.f32 %v1024_v41, %v307_v61  ;;  %v1045_v7 = vadd.f32 %v1024_v41, %v310_v1  ;;  %303 = vst.msk [vmem:[#allocation2 + $0x78] sm:$0xff] %vm28_vm0, %v286_v63  ;;  %v318_v9 = vld [vmem:[#allocation2 + $0x58] sm:$0xff]  ;;  %v1055_v12 = vadd.f32 %v1024_v41, %v315_v8  ;;  %v316_v14 = vld [vmem:[#allocation2 + $0x48] sm:$0xff] }
  0xf3   :  { %v352_v5 = vsel %vm28_vm0, %v1030_v59, 0.0  ;;  %377 = vadd.xlane.f32.xlu0 %v376_v4  ;;  %293 = vst.msk [vmem:[#allocation2 + $0x28] sm:$0xff] %vm28_vm0, %v276_v2  ;;  %301 = vst.msk [vmem:[#allocation2 + $0x68] sm:$0xff] %vm28_vm0, %v284_v3  ;;  %v1058_v13 = vadd.f32 %v1024_v41, %v318_v9  ;;  %v308_v15 = vld [vmem:[#allocation2 + $0x8] sm:$0xff]  ;;  %v1065_v20 = vadd.f32 %v1024_v41, %v316_v14 }
  0xf4   :  { %353 = vadd.xlane.f32.xlu1 %v352_v5  ;;  %v346_v10 = vsel %vm28_vm0, %v1042_v6, 0.0  ;;  %v355_v11 = vsel %vm28_vm0, %v1045_v7, 0.0  ;;  %v370_v18 = vsel %vm28_vm0, %v1055_v12, 0.0  ;;  %v1068_v21 = vadd.f32 %v1024_v41, %v308_v15 }
  0xf5   :  { %v379_v19 = vsel %vm28_vm0, %v1058_v13, 0.0  ;;  %v373_v24 = vsel %vm28_vm0, %v1065_v20, 0.0 }
  0xf6   :  { %v349_v25 = vsel %vm28_vm0, %v1068_v21, 0.0 }
  0xf7   :  { %347 = vadd.xlane.f32.xlu0 %v346_v10  ;;  %v313_v16 = vld [vmem:[#allocation2 + $0x30] sm:$0xff] }
  0xf8   :  { %356 = vadd.xlane.f32.xlu1 %v355_v11  ;;  %v1071_v22 = vadd.f32 %v1024_v41, %v313_v16  ;;  %v311_v26 = vld [vmem:[#allocation2 + $0x20] sm:$0xff]  ;;  %v321_v38 = vld [vmem:[#allocation2 + $0x70] sm:$0xff] }
  0xf9   :  { %v314_v17 = vld [vmem:[#allocation2 + $0x38] sm:$0xff]  ;;  %v319_v30 = vld [vmem:[#allocation2 + $0x60] sm:$0xff]  ;;  %v1085_v32 = vadd.f32 %v1024_v41, %v311_v26  ;;  %v1105_v43 = vadd.f32 %v1024_v41, %v321_v38 }
  0xfa   :  { %v1074_v23 = vadd.f32 %v1024_v41, %v314_v17  ;;  %v312_v27 = vld [vmem:[#allocation2 + $0x28] sm:$0xff]  ;;  %v364_v28 = vsel %vm28_vm0, %v1071_v22, 0.0  ;;  %v1091_v34 = vadd.f32 %v1024_v41, %v319_v30  ;;  %v322_v39 = vld [vmem:[#allocation2 + $0x78] sm:$0xff] }
  0xfb   :  { %371 = vadd.xlane.f32.xlu0 %v370_v18  ;;  %v320_v31 = vld [vmem:[#allocation2 + $0x68] sm:$0xff]  ;;  %v1088_v33 = vadd.f32 %v1024_v41, %v312_v27  ;;  %v358_v36 = vsel %vm28_vm0, %v1085_v32, 0.0  ;;  %v1108_v44 = vadd.f32 %v1024_v41, %v322_v39  ;;  %v388_v45 = vsel %vm28_vm0, %v1105_v43, 0.0 }
  0xfc   :  { %380 = vadd.xlane.f32.xlu1 %v379_v19  ;;  %v367_v29 = vsel %vm28_vm0, %v1074_v23, 0.0  ;;  %v1094_v35 = vadd.f32 %v1024_v41, %v320_v31  ;;  %v382_v40 = vsel %vm28_vm0, %v1091_v34, 0.0 }
  0xfd   :  { %v361_v37 = vsel %vm28_vm0, %v1088_v33, 0.0  ;;  %v391_v46 = vsel %vm28_vm0, %v1108_v44, 0.0 }
  0xfe   :  { %v385_v42 = vsel %vm28_vm0, %v1094_v35, 0.0 }
  0xff   :  { %350 = vadd.xlane.f32.xlu0 %v349_v25 }
 0x100   :  { %374 = vadd.xlane.f32.xlu1 %v373_v24 }
 0x103   :  { %365 = vadd.xlane.f32.xlu0 %v364_v28 }
 0x104   :  { %368 = vadd.xlane.f32.xlu1 %v367_v29 }
 0x107   :  { %359 = vadd.xlane.f32.xlu0 %v358_v36 }
 0x108   :  { %362 = vadd.xlane.f32.xlu1 %v361_v37 }
 0x10b   :  { %383 = vadd.xlane.f32.xlu0 %v382_v40 }
 0x10c   :  { %386 = vadd.xlane.f32.xlu1 %v385_v42 }
 0x10f   :  { %389 = vadd.xlane.f32.xlu0 %v388_v45 }
 0x110   :  { %392 = vadd.xlane.f32.xlu1 %v391_v46 }
 0x180   :  { %v378_v47 = vpop.xlane.xlu0 %377 }
 0x181   :  { %v354_v48 = vpop.xlane.xlu1 %353  ;;  %v405_v49 = vmul.f32 0.0625, %v378_v47 }
 0x182   :  { %v397_v50 = vmul.f32 0.0625, %v354_v48 }
 0x183   :  { %v1115_v51 = vsub.f32 %v1027_v58, %v405_v49 }
 0x184   :  { %v1118_v41 = vsub.f32 %v1030_v59, %v397_v50  ;;  %v348_v52 = vpop.xlane.xlu0 %347 }
 0x185   :  { %v357_v53 = vpop.xlane.xlu1 %356  ;;  %v395_v54 = vmul.f32 0.0625, %v348_v52  ;;  %v437_v58 = vmul.f32 %v1115_v51, %v1115_v51 }
 0x186   :  { %v398_v55 = vmul.f32 0.0625, %v357_v53  ;;  %v429_v56 = vmul.f32 %v1118_v41, %v1118_v41 }
 0x187   :  { %v1123_v57 = vsub.f32 %v1042_v6, %v395_v54  ;;  %v473_v5 = vsel %vm28_vm0, %v437_v58, 0.0 }
 0x188   :  { %v1126_v60 = vsub.f32 %v1045_v7, %v398_v55  ;;  %v449_v61 = vsel %vm28_vm0, %v429_v56, 0.0  ;;  %v372_v59 = vpop.xlane.xlu0 %371 }
 0x189   :  { %v381_v62 = vpop.xlane.xlu1 %380  ;;  %450 = vadd.xlane.f32.xlu0 %v449_v61  ;;  %v403_v63 = vmul.f32 0.0625, %v372_v59  ;;  %v427_v2 = vmul.f32 %v1123_v57, %v1123_v57 }
 0x18a   :  { %v406_v0 = vmul.f32 0.0625, %v381_v62  ;;  %v430_v1 = vmul.f32 %v1126_v60, %v1126_v60 }
 0x18b   :  { %v1136_v3 = vsub.f32 %v1055_v12, %v403_v63  ;;  %v443_v14 = vsel %vm28_vm0, %v427_v2, 0.0 }
 0x18c   :  { %v1139_v4 = vsub.f32 %v1058_v13, %v406_v0  ;;  %v452_v6 = vsel %vm28_vm0, %v430_v1, 0.0  ;;  %v351_v8 = vpop.xlane.xlu0 %350 }
 0x18d   :  { %v375_v7 = vpop.xlane.xlu1 %374  ;;  %474 = vadd.xlane.f32.xlu0 %v473_v5  ;;  %453 = vadd.xlane.f32.xlu1 %v452_v6  ;;  %v396_v10 = vmul.f32 0.0625, %v351_v8  ;;  %v435_v16 = vmul.f32 %v1136_v3, %v1136_v3 }
 0x18e   :  { %v404_v9 = vmul.f32 0.0625, %v375_v7  ;;  %v438_v11 = vmul.f32 %v1139_v4, %v1139_v4 }
 0x18f   :  { %v1150_v13 = vsub.f32 %v1068_v21, %v396_v10  ;;  %v467_v27 = vsel %vm28_vm0, %v435_v16, 0.0 }
 0x190   :  { %v1147_v12 = vsub.f32 %v1065_v20, %v404_v9  ;;  %v476_v15 = vsel %vm28_vm0, %v438_v11, 0.0  ;;  %v366_v17 = vpop.xlane.xlu0 %365 }
 0x191   :  { %444 = vadd.xlane.f32.xlu0 %v443_v14  ;;  %v369_v18 = vpop.xlane.xlu1 %368  ;;  %477 = vadd.xlane.f32.xlu1 %v476_v15  ;;  %v401_v19 = vmul.f32 0.0625, %v366_v17  ;;  %v428_v25 = vmul.f32 %v1150_v13, %v1150_v13 }
 0x192   :  { %v402_v24 = vmul.f32 0.0625, %v369_v18  ;;  %v436_v20 = vmul.f32 %v1147_v12, %v1147_v12 }
 0x193   :  { %v1160_v21 = vsub.f32 %v1071_v22, %v401_v19  ;;  %v446_v28 = vsel %vm28_vm0, %v428_v25, 0.0 }
 0x194   :  { %v1163_v26 = vsub.f32 %v1074_v23, %v402_v24  ;;  %v360_v29 = vpop.xlane.xlu0 %359  ;;  %v470_v38 = vsel %vm28_vm0, %v436_v20, 0.0 }
 0x195   :  { %468 = vadd.xlane.f32.xlu0 %v467_v27  ;;  %447 = vadd.xlane.f32.xlu1 %v446_v28  ;;  %v363_v30 = vpop.xlane.xlu1 %362  ;;  %v399_v31 = vmul.f32 0.0625, %v360_v29  ;;  %v433_v37 = vmul.f32 %v1160_v21, %v1160_v21  ;;  %v1213_v29 = vld [vmem:[%s1375_s3] ss:$0 sm:$0xff] }
 0x196   :  { %v400_v36 = vmul.f32 0.0625, %v363_v30  ;;  %v434_v40 = vmul.f32 %v1163_v26, %v1163_v26 }
 0x197   :  { %v1171_v22 = vsub.f32 %v1085_v32, %v399_v31  ;;  %v461_v39 = vsel %vm28_vm0, %v433_v37, 0.0  ;;  %v821_v31 = vld [vmem:[%s1376_s5 + $0x8] sm:$0xff]  }
 0x198   :  { %v1174_v23 = vsub.f32 %v1088_v33, %v400_v36  ;;  %v384_v42 = vpop.xlane.xlu0 %383  ;;  %v464_v52 = vsel %vm28_vm0, %v434_v40, 0.0 }
 0x199   :  { %462 = vadd.xlane.f32.xlu0 %v461_v39  ;;  %471 = vadd.xlane.f32.xlu1 %v470_v38  ;;  %v387_v45 = vpop.xlane.xlu1 %386  ;;  %v407_v46 = vmul.f32 0.0625, %v384_v42  ;;  %v431_v48 = vmul.f32 %v1171_v22, %v1171_v22  ;;  %v1222_v42 = vld [vmem:[%s1377_s4] ss:$0 sm:$0xff] }
 0x19a   :  { %v408_v47 = vmul.f32 0.0625, %v387_v45  ;;  %v432_v32 = vmul.f32 %v1174_v23, %v1174_v23  ;;  %v1227_v45 = vld [vmem:[%s1376_s5 + $0x28] sm:$0xff]  }
 0x19b   :  { %v1184_v33 = vsub.f32 %v1091_v34, %v407_v46  ;;  %v455_v50 = vsel %vm28_vm0, %v431_v48, 0.0  ;;  %v795_v48 = vunpack.c.l.bf16 %v821_v31 }
 0x19c   :  { %v1187_v49 = vsub.f32 %v1094_v35, %v408_v47  ;;  %v390_v53 = vpop.xlane.xlu0 %389  ;;  %v458_v58 = vsel %vm28_vm0, %v432_v32, 0.0 }
 0x19d   :  { %456 = vadd.xlane.f32.xlu0 %v455_v50  ;;  %465 = vadd.xlane.f32.xlu1 %v464_v52  ;;  %v393_v54 = vpop.xlane.xlu1 %392  ;;  %v409_v55 = vmul.f32 0.0625, %v390_v53  ;;  %v439_v61 = vmul.f32 %v1184_v33, %v1184_v33  ;;  %v1233_v50 = vld [vmem:[%s1376_s5] sm:$0xff]  }
 0x19e   :  { %v410_v56 = vmul.f32 0.0625, %v393_v54  ;;  %v440_v62 = vmul.f32 %v1187_v49, %v1187_v49 }
 0x19f   :  { %v1195_v34 = vsub.f32 %v1105_v43, %v409_v55  ;;  %v479_v59 = vsel %vm28_vm0, %v439_v61, 0.0 }
 0x1a0   :  { %v1198_v35 = vsub.f32 %v1108_v44, %v410_v56  ;;  %v482_v1 = vsel %vm28_vm0, %v440_v62, 0.0  ;;  %v811_v56 = vunpack.c.l.bf16 %v1227_v45 }
 0x1a1   :  { %480 = vadd.xlane.f32.xlu0 %v479_v59  ;;  %459 = vadd.xlane.f32.xlu1 %v458_v58  ;;  %v441_v63 = vmul.f32 %v1195_v34, %v1195_v34  ;;  %v796_v58 = vunpack.c.h.bf16 %v821_v31  ;;  %v792_v31 = vunpack.c.h.bf16 %v1233_v50 }
 0x1a2   :  { %v442_v43 = vmul.f32 %v1198_v35, %v1198_v35 }
 0x1a3   :  { %v485_v0 = vsel %vm28_vm0, %v441_v63, 0.0 }
 0x1a4   :  { %v488_v44 = vsel %vm28_vm0, %v442_v43, 0.0 }
 0x1a5   :  { %486 = vadd.xlane.f32.xlu0 %v485_v0  ;;  %483 = vadd.xlane.f32.xlu1 %v482_v1  ;;  %v1242_v0 = vld [vmem:[%s1376_s5 + $0x20] sm:$0xff]  }
 0x1a9   :  { %489 = vadd.xlane.f32.xlu1 %v488_v44 }
 0x216   :  { %v451_v2 = vpop.xlane.xlu0 %450 }
 0x217   :  { %v493_v5 = vmul.f32 0.0625, %v451_v2 }
 0x219   :  { %v509_v6 = vadd.f32 1e-05, %v493_v5  ;;  %v791_v5 = vunpack.c.l.bf16 %v1233_v50 }
 0x21a   :  { %v475_v7 = vpop.xlane.xlu0 %474  ;;  %v454_v8 = vpop.xlane.xlu1 %453 }
 0x21b   :  { %885 = vrsqrt.f32 %v509_v6  ;;  %v501_v9 = vmul.f32 0.0625, %v475_v7  ;;  %v494_v10 = vmul.f32 0.0625, %v454_v8  ;;  %v812_v7 = vunpack.c.h.bf16 %v1227_v45 }
 0x21d   :  { %v517_v11 = vadd.f32 1e-05, %v501_v9  ;;  %v510_v14 = vadd.f32 1e-05, %v494_v10 }
 0x21e   :  { %v445_v15 = vpop.xlane.xlu0 %444  ;;  %v478_v16 = vpop.xlane.xlu1 %477 }
 0x21f   :  { %887 = vrsqrt.f32 %v517_v11  ;;  %v491_v17 = vmul.f32 0.0625, %v445_v15  ;;  %v502_v18 = vmul.f32 0.0625, %v478_v16  ;;  %v807_v15 = vunpack.c.l.bf16 %v1242_v0 }
 0x220   :  { %889 = vrsqrt.f32 %v510_v14 }
 0x221   :  { %v507_v19 = vadd.f32 1e-05, %v491_v17  ;;  %v518_v24 = vadd.f32 1e-05, %v502_v18 }
 0x222   :  { %v469_v25 = vpop.xlane.xlu0 %468  ;;  %v448_v20 = vpop.xlane.xlu1 %447 }
 0x223   :  { %891 = vrsqrt.f32 %v507_v19  ;;  %v499_v27 = vmul.f32 0.0625, %v469_v25  ;;  %v492_v28 = vmul.f32 0.0625, %v448_v20 }
 0x224   :  { %893 = vrsqrt.f32 %v518_v24 }
 0x225   :  { %v886_v30 = vpop.eup %885  ;;  %v515_v36 = vadd.f32 1e-05, %v499_v27  ;;  %v508_v37 = vadd.f32 1e-05, %v492_v28 }
 0x226   :  { %v541_v38 = vmul.f32 %v886_v30, %v1118_v41  ;;  %v463_v39 = vpop.xlane.xlu0 %462  ;;  %v472_v40 = vpop.xlane.xlu1 %471 }
 0x227   :  { %895 = vrsqrt.f32 %v515_v36  ;;  %v497_v46 = vmul.f32 0.0625, %v463_v39  ;;  %v500_v47 = vmul.f32 0.0625, %v472_v40  ;;  %v1265_v40 = vld [vmem:[%s1376_s5 + $0x18] sm:$0xff]  }
 0x228   :  { %v564_v32 = vmul.f32 %v1213_v29, %v541_v38  ;;  %897 = vrsqrt.f32 %v508_v37 }
 0x229   :  { %v888_v41 = vpop.eup %887  ;;  %v513_v52 = vadd.f32 1e-05, %v497_v46  ;;  %v516_v53 = vadd.f32 1e-05, %v500_v47 }
 0x22a   :  { %v890_v54 = vpop.eup %889  ;;  %v587_v55 = vadd.f32 %v1222_v42, %v564_v32  ;;  %v549_v61 = vmul.f32 %v888_v41, %v1115_v51  ;;  %v457_v59 = vpop.xlane.xlu0 %456 }
 0x22b   :  { %v466_v62 = vpop.xlane.xlu1 %465  ;;  %v542_v63 = vmul.f32 %v890_v54, %v1126_v60  ;;  %899 = vrsqrt.f32 %v513_v52  ;;  %v495_v1 = vmul.f32 0.0625, %v457_v59 }
 0x22c   :  { %v498_v43 = vmul.f32 0.0625, %v466_v62  ;;  %v635_v44 = vadd.f32 %v795_v48, %v587_v55  ;;  %v572_v2 = vmul.f32 %v1213_v29, %v549_v61  ;;  %901 = vrsqrt.f32 %v516_v53 }
 0x22d   :  { %v892_v51 = vpop.eup %891  ;;  %v565_v6 = vmul.f32 %v1213_v29, %v542_v63  ;;  %v511_v60 = vadd.f32 1e-05, %v495_v1  ;;  %v803_v55 = vunpack.c.l.bf16 %v1265_v40 }
 0x22e   :  { %v514_v8 = vadd.f32 1e-05, %v498_v43  ;;  %v894_v9 = vpop.eup %893  ;;  %v775_v10 = vpack.c.bf16 %v635_v44, %v635_v44  ;;  %v595_v11 = vadd.f32 %v1222_v42, %v572_v2  ;;  %v539_v14 = vmul.f32 %v892_v51, %v1123_v57  ;;  %v481_v16 = vpop.xlane.xlu0 %480 }
 0x22f   :  { %v460_v17 = vpop.xlane.xlu1 %459  ;;  %v588_v18 = vadd.f32 %v1222_v42, %v565_v6  ;;  %v550_v19 = vmul.f32 %v894_v9, %v1139_v4  ;;  %903 = vrsqrt.f32 %v511_v60  ;;  %v503_v24 = vmul.f32 0.0625, %v481_v16  ;;  %v822_v9 = vld [vmem:[%s1376_s5 + $0x10] sm:$0xff]  }
 0x230   :  { %716 = vst.msk [vmem:[%s1378_s6 + $0x8] sm:$0xf] %vm713_vm2, %v775_v10  ;;  %v643_v25 = vadd.f32 %v811_v56, %v595_v11  ;;  %v562_v20 = vmul.f32 %v1213_v29, %v539_v14  ;;  %905 = vrsqrt.f32 %v514_v8  ;;  %v496_v57 = vmul.f32 0.0625, %v460_v17 }
 0x231   :  { %v896_v27 = vpop.eup %895  ;;  %v636_v28 = vadd.f32 %v796_v58, %v588_v18  ;;  %v573_v30 = vmul.f32 %v1213_v29, %v550_v19  ;;  %v519_v36 = vadd.f32 1e-05, %v503_v24  ;;  %v799_v24 = vunpack.c.l.bf16 %v822_v9 }
 0x232   :  { %v898_v4 = vpop.eup %897  ;;  %v783_v37 = vpack.c.bf16 %v643_v25, %v643_v25  ;;  %v585_v38 = vadd.f32 %v1222_v42, %v562_v20  ;;  %v547_v39 = vmul.f32 %v896_v27, %v1136_v3  ;;  %v512_v45 = vadd.f32 1e-05, %v496_v57  ;;  %v487_v46 = vpop.xlane.xlu0 %486  ;;  %v826_v27 = vld [vmem:[%s1376_s5 + $0x30] sm:$0xff]  }
 0x233   :  { %v484_v47 = vpop.xlane.xlu1 %483  ;;  %v776_v48 = vpack.c.bf16 %v636_v28, %v636_v28  ;;  %v596_v32 = vadd.f32 %v1222_v42, %v573_v30  ;;  %v540_v41 = vmul.f32 %v898_v4, %v1150_v13  ;;  %907 = vrsqrt.f32 %v519_v36 }
 0x234   :  { %724 = vst.msk [vmem:[%s1378_s6 + $0x28] sm:$0xf] %vm713_vm2, %v783_v37  ;;  %v633_v3 = vadd.f32 %v791_v5, %v585_v38  ;;  %v570_v50 = vmul.f32 %v1213_v29, %v547_v39  ;;  %909 = vrsqrt.f32 %v512_v45  ;;  %v505_v52 = vmul.f32 0.0625, %v487_v46 }
 0x235   :  { %v900_v53 = vpop.eup %899  ;;  %717 = vst.msk [vmem:[%s1378_s6 + $0xc] sm:$0xf] %vm713_vm2, %v776_v48  ;;  %v644_v54 = vadd.f32 %v812_v7, %v596_v32  ;;  %v563_v13 = vmul.f32 %v1213_v29, %v540_v41  ;;  %v504_v56 = vmul.f32 0.0625, %v484_v47  ;;  %v804_v57 = vunpack.c.h.bf16 %v1265_v40  ;;  %v827_v41 = vld [vmem:[%s1376_s5 + $0x38] sm:$0xff]  }
 0x236   :  { %v902_v61 = vpop.eup %901  ;;  %v773_v58 = vpack.c.bf16 %v633_v3, %v633_v3  ;;  %v593_v59 = vadd.f32 %v1222_v42, %v570_v50  ;;  %v545_v62 = vmul.f32 %v900_v53, %v1160_v21  ;;  %v521_v63 = vadd.f32 1e-05, %v505_v52 }
 0x237   :  { %v490_v1 = vpop.xlane.xlu1 %489  ;;  %v784_v43 = vpack.c.bf16 %v644_v54, %v644_v54  ;;  %v586_v44 = vadd.f32 %v1222_v42, %v563_v13  ;;  %v548_v2 = vmul.f32 %v902_v61, %v1147_v12  ;;  %v520_v5 = vadd.f32 1e-05, %v504_v56 }
 0x238   :  { %714 = vst.msk [vmem:[%s1378_s6] sm:$0xf] %vm713_vm2, %v773_v58  ;;  %v641_v51 = vadd.f32 %v807_v15, %v593_v59  ;;  %v568_v6 = vmul.f32 %v1213_v29, %v545_v62  ;;  %911 = vrsqrt.f32 %v521_v63  ;;  %v506_v7 = vmul.f32 0.0625, %v490_v1 }
 0x239   :  { %v904_v60 = vpop.eup %903  ;;  %725 = vst.msk [vmem:[%s1378_s6 + $0x2c] sm:$0xf] %vm713_vm2, %v784_v43  ;;  %v634_v21 = vadd.f32 %v792_v31, %v586_v44  ;;  %v808_v12 = vunpack.c.h.bf16 %v1242_v0  ;;  %v571_v8 = vmul.f32 %v1213_v29, %v548_v2  ;;  %913 = vrsqrt.f32 %v520_v5 }
 0x23a   :  { %v906_v10 = vpop.eup %905  ;;  %v781_v11 = vpack.c.bf16 %v641_v51, %v641_v51  ;;  %v591_v14 = vadd.f32 %v1222_v42, %v568_v6  ;;  %v543_v15 = vmul.f32 %v904_v60, %v1171_v22  ;;  %v522_v16 = vadd.f32 1e-05, %v506_v7 }
 0x23b   :  { %v774_v17 = vpack.c.bf16 %v634_v21, %v634_v21  ;;  %v594_v18 = vadd.f32 %v1222_v42, %v571_v8  ;;  %v546_v19 = vmul.f32 %v906_v10, %v1163_v26  ;;  %v815_v40 = vunpack.c.l.bf16 %v826_v27 }
 0x23c   :  { %722 = vst.msk [vmem:[%s1378_s6 + $0x20] sm:$0xf] %vm713_vm2, %v781_v11  ;;  %v639_v0 = vadd.f32 %v803_v55, %v591_v14  ;;  %v566_v25 = vmul.f32 %v1213_v29, %v543_v15  ;;  %915 = vrsqrt.f32 %v522_v16  ;;  %v800_v46 = vunpack.c.h.bf16 %v822_v9 }
 0x23d   :  { %v908_v20 = vpop.eup %907  ;;  %715 = vst.msk [vmem:[%s1378_s6 + $0x4] sm:$0xf] %vm713_vm2, %v774_v17  ;;  %v642_v22 = vadd.f32 %v808_v12, %v594_v18  ;;  %v569_v26 = vmul.f32 %v1213_v29, %v546_v19  ;;  %v819_v56 = vunpack.c.l.bf16 %v827_v41  ;;  %v820_v2 = vunpack.c.h.bf16 %v827_v41 }
 0x23e   :  { %v910_v28 = vpop.eup %909  ;;  %v779_v30 = vpack.c.bf16 %v639_v0, %v639_v0  ;;  %v589_v31 = vadd.f32 %v1222_v42, %v566_v25  ;;  %v551_v36 = vmul.f32 %v908_v20, %v1184_v33 }
 0x23f   :  { %v782_v4 = vpack.c.bf16 %v642_v22, %v642_v22  ;;  %v592_v37 = vadd.f32 %v1222_v42, %v569_v26  ;;  %v544_v38 = vmul.f32 %v910_v28, %v1174_v23 }
 0x240   :  { %720 = vst.msk [vmem:[%s1378_s6 + $0x18] sm:$0xf] %vm713_vm2, %v779_v30  ;;  %v637_v39 = vadd.f32 %v799_v24, %v589_v31  ;;  %v574_v45 = vmul.f32 %v1213_v29, %v551_v36 }
 0x241   :  { %723 = vst.msk [vmem:[%s1378_s6 + $0x24] sm:$0xf] %vm713_vm2, %v782_v4  ;;  %v640_v33 = vadd.f32 %v804_v57, %v592_v37  ;;  %v567_v47 = vmul.f32 %v1213_v29, %v544_v38 }
 0x242   :  { %v912_v48 = vpop.eup %911  ;;  %v777_v23 = vpack.c.bf16 %v637_v39, %v637_v39  ;;  %v597_v32 = vadd.f32 %v1222_v42, %v574_v45 }
 0x243   :  { %v914_v3 = vpop.eup %913  ;;  %v780_v50 = vpack.c.bf16 %v640_v33, %v640_v33  ;;  %v590_v52 = vadd.f32 %v1222_v42, %v567_v47  ;;  %v553_v53 = vmul.f32 %v912_v48, %v1195_v34  ;;  %v816_v34 = vunpack.c.h.bf16 %v826_v27 }
 0x244   :  { %718 = vst.msk [vmem:[%s1378_s6 + $0x10] sm:$0xf] %vm713_vm2, %v777_v23  ;;  %v645_v54 = vadd.f32 %v815_v40, %v597_v32  ;;  %v552_v13 = vmul.f32 %v914_v3, %v1187_v49 }
 0x245   :  { %721 = vst.msk [vmem:[%s1378_s6 + $0x1c] sm:$0xf] %vm713_vm2, %v780_v50  ;;  %v638_v55 = vadd.f32 %v800_v46, %v590_v52  ;;  %v576_v61 = vmul.f32 %v1213_v29, %v553_v53 }
 0x246   :  { %v916_v58 = vpop.eup %915  ;;  %v785_v59 = vpack.c.bf16 %v645_v54, %v645_v54  ;;  %v575_v62 = vmul.f32 %v1213_v29, %v552_v13 }
 0x247   :  { %v778_v63 = vpack.c.bf16 %v638_v55, %v638_v55  ;;  %v599_v1 = vadd.f32 %v1222_v42, %v576_v61  ;;  %v554_v43 = vmul.f32 %v916_v58, %v1198_v35 }
 0x248   :  { %726 = vst.msk [vmem:[%s1378_s6 + $0x30] sm:$0xf] %vm713_vm2, %v785_v59  ;;  %v598_v49 = vadd.f32 %v1222_v42, %v575_v62 }
 0x249   :  { %719 = vst.msk [vmem:[%s1378_s6 + $0x14] sm:$0xf] %vm713_vm2, %v778_v63  ;;  %v647_v44 = vadd.f32 %v819_v56, %v599_v1  ;;  %v577_v5 = vmul.f32 %v1213_v29, %v554_v43 }
 0x24a   :  { %v646_v51 = vadd.f32 %v816_v34, %v598_v49 }
 0x24b   :  { %v787_v6 = vpack.c.bf16 %v647_v44, %v647_v44  ;;  %v600_v35 = vadd.f32 %v1222_v42, %v577_v5 }
 0x24c   :  { %v786_v7 = vpack.c.bf16 %v646_v51, %v646_v51 }
 0x24d   :  { %728 = vst.msk [vmem:[%s1378_s6 + $0x38] sm:$0xf] %vm713_vm2, %v787_v6  ;;  %v648_v60 = vadd.f32 %v820_v2, %v600_v35 }
 0x24e   :  { %727 = vst.msk [vmem:[%s1378_s6 + $0x34] sm:$0xf] %vm713_vm2, %v786_v7 }
 0x24f   :  { %v788_v21 = vpack.c.bf16 %v648_v60, %v648_v60 }
 0x251   :  { %729 = vst.msk [vmem:[%s1378_s6 + $0x3c] sm:$0xf] %vm713_vm2, %v788_v21 }

// kernel: _lambda_.33
= control target key start
LH: loop header
LB: loop body
LE: loop exit
PB: predicated region body
PF: predicated region fallthrough
CT: control target
= control target key end

     0   :  { %vm19_vm0 = vcmask 261120   ;;  %v224_v1 = vmov 0.0   ;;  %vm74_vm1 = vcmask 523264   ;;  %vm173_vm2 = vcmask 257024   ;;  %s286_s1 = inlined_call_operand.vmem [shape: bf16[64,32], index: 1, kind: input, shape index: {}]   ;;  %s287_s0 = inlined_call_operand.vmem [shape: bf16[32,64], index: 0, kind: input, shape index: {}]   ;;  %s288_s2 = inlined_call_operand.vmem [shape: f32[1,32], index: 2, kind: input, shape index: {}]   ;;  %s289_s3 = inlined_call_operand.vmem [shape: bf16[32,32], index: 3, kind: output, shape index: {}]  }
   0x1   :  { %v218_v0 = vld [vmem:[%s286_s1] sm:$0xff]   ;;  %22 = vst.msk [vmem:[#allocation2 + $0x10] sm:$0xff] %vm19_vm0, %v224_v1  ;;  %20 = vst.msk [vmem:[#allocation2] sm:$0xff] %vm19_vm0, %v224_v1  ;;  %v219_v2 = vld [vmem:[%s286_s1 + $0x8] sm:$0xff]  }
   0x2   :  { %21 = vst.msk [vmem:[#allocation2 + $0x8] sm:$0xff] %vm19_vm0, %v224_v1  ;;  %23 = vst.msk [vmem:[#allocation2 + $0x18] sm:$0xff] %vm19_vm0, %v224_v1  ;;  %205 = vmatprep.subr.bf16.mxu0 %v218_v0  ;;  %v220_v3 = vld [vmem:[%s286_s1 + $0x10] sm:$0xff]   ;;  %v222_v4 = vld [vmem:[%s287_s0] sm:$0xff]  }
   0x3   :  { %206 = vmatpush3.bf16.msra.mxu0 %v218_v0  ;;  %213 = vmatprep.mubr.msk.bf16.mxu0 %vm74_vm1, %v222_v4  ;;  %v221_v5 = vld [vmem:[%s286_s1 + $0x18] sm:$0xff]   ;;  %v223_v6 = vld [vmem:[%s287_s0 + $0x8] sm:$0xff]   ;;  %v190_v19 = vld [vmem:[%s288_s2] ss:$0 sm:$0xff] }
   0x4   :  { %207 = vmatprep.subr.bf16.mxu0 %v219_v2 }
   0x7   :  { %208 = vmatpush3.bf16.msra.mxu0 %v219_v2 }
   0x8   :  { %209 = vmatprep.subr.bf16.mxu0 %v220_v3  ;;  %v26_v7 = vld [vmem:[#allocation2 + $0x10] sm:$0xff]  ;;  %v24_v8 = vld [vmem:[#allocation2] sm:$0xff] }
   0x9   :  { %v27_v10 = vld [vmem:[#allocation2 + $0x18] sm:$0xff]  ;;  %v25_v13 = vld [vmem:[#allocation2 + $0x8] sm:$0xff] }
   0xb   :  { %210 = vmatpush3.bf16.msra.mxu0 %v220_v3 }
   0xc   :  { %211 = vmatprep.subr.bf16.mxu0 %v221_v5 }
   0xf   :  { %212 = vmatpush3.bf16.msra.mxu0 %v221_v5 }
  0x12   :  { %214 = vmatmul.mubr.msk.bf16.vlgmr.msra.gmra.mrb[0].mxu0 %vm74_vm1, %v223_v6 }
  0xe5   :  { %v215_v9 = vpop.f32.mrb[0].mxu0 }
  0xe6   :  { %v132_v11 = vadd.f32 %v215_v9, %v26_v7  ;;  %v115_v12 = vpop.f32.mrb[1].mxu0 }
  0xe7   :  { %v130_v14 = vadd.f32 %v115_v12, %v24_v8  ;;  %v216_v15 = vpop.f32.mrb[2].mxu0 }
  0xe8   :  { %137 = vst.msk [vmem:[#allocation2 + $0x10] sm:$0xff] %vm19_vm0, %v132_v11  ;;  %v133_v16 = vadd.f32 %v216_v15, %v27_v10  ;;  %v118_v17 = vpop.f32.mrb[3].mxu0 }
  0xe9   :  { %135 = vst.msk [vmem:[#allocation2] sm:$0xff] %vm19_vm0, %v130_v14  ;;  %v131_v18 = vadd.f32 %v118_v17, %v25_v13 }
  0xea   :  { %138 = vst.msk [vmem:[#allocation2 + $0x18] sm:$0xff] %vm19_vm0, %v133_v16 }
  0xeb   :  { %136 = vst.msk [vmem:[#allocation2 + $0x8] sm:$0xff] %vm19_vm0, %v131_v18 }
  0xef   :  { %v144_v20 = vld [vmem:[#allocation2 + $0x10] sm:$0xff] }
  0xf0   :  { %v155_v21 = vadd.f32 %v190_v19, %v144_v20  ;;  %v142_v22 = vld [vmem:[#allocation2] sm:$0xff] }
  0xf1   :  { %v153_v23 = vadd.f32 %v190_v19, %v142_v22  ;;  %v145_v24 = vld [vmem:[#allocation2 + $0x18] sm:$0xff] }
  0xf2   :  { %v197_v25 = vpack.c.bf16 %v155_v21, %v155_v21  ;;  %v156_v26 = vadd.f32 %v190_v19, %v145_v24  ;;  %v143_v27 = vld [vmem:[#allocation2 + $0x8] sm:$0xff] }
  0xf3   :  { %v195_v28 = vpack.c.bf16 %v153_v23, %v153_v23  ;;  %v154_v29 = vadd.f32 %v190_v19, %v143_v27 }
  0xf4   :  { %176 = vst.msk [vmem:[%s289_s3 + $0x8] sm:$0xf] %vm173_vm2, %v197_v25  ;;  %v198_v30 = vpack.c.bf16 %v156_v26, %v156_v26 }
  0xf5   :  { %174 = vst.msk [vmem:[%s289_s3] sm:$0xf] %vm173_vm2, %v195_v28  ;;  %v196_v31 = vpack.c.bf16 %v154_v29, %v154_v29 }
  0xf6   :  { %177 = vst.msk [vmem:[%s289_s3 + $0xc] sm:$0xf] %vm173_vm2, %v198_v30 }
  0xf7   :  { %175 = vst.msk [vmem:[%s289_s3 + $0x4] sm:$0xf] %vm173_vm2, %v196_v31 }

// kernel: _lambda_.34
= control target key start
LH: loop header
LB: loop body
LE: loop exit
PB: predicated region body
PF: predicated region fallthrough
CT: control target
= control target key end

     0   :  { %vm19_vm0 = vcmask 785408   ;;  %v198_v1 = vmov 0.0   ;;  %vm58_vm1 = vcmask 261120   ;;  %vm157_vm2 = vcmask 781312   ;;  %s254_s1 = inlined_call_operand.vmem [shape: bf16[32,96], index: 1, kind: input, shape index: {}]   ;;  %s255_s0 = inlined_call_operand.vmem [shape: bf16[32,32], index: 0, kind: input, shape index: {}]   ;;  %s256_s2 = inlined_call_operand.vmem [shape: f32[1,96], index: 2, kind: input, shape index: {}]   ;;  %s257_s3 = inlined_call_operand.vmem [shape: bf16[32,96], index: 3, kind: output, shape index: {}]  }
   0x1   :  { %v194_v0 = vld [vmem:[%s254_s1] sm:$0xff]   ;;  %22 = vst.msk [vmem:[#allocation2 + $0x10] sm:$0xff] %vm19_vm0, %v198_v1  ;;  %20 = vst.msk [vmem:[#allocation2] sm:$0xff] %vm19_vm0, %v198_v1  ;;  %v195_v2 = vld [vmem:[%s254_s1 + $0x8] sm:$0xff]  }
   0x2   :  { %21 = vst.msk [vmem:[#allocation2 + $0x8] sm:$0xff] %vm19_vm0, %v198_v1  ;;  %23 = vst.msk [vmem:[#allocation2 + $0x18] sm:$0xff] %vm19_vm0, %v198_v1  ;;  %185 = vmatprep.subr.bf16.mxu0 %v194_v0  ;;  %v196_v3 = vld [vmem:[%s255_s0] sm:$0xff]   ;;  %v197_v4 = vld [vmem:[%s255_s0 + $0x8] sm:$0xff]  }
   0x3   :  { %186 = vmatpush3.bf16.msra.mxu0 %v194_v0  ;;  %189 = vmatprep.mubr.msk.bf16.mxu0 %vm58_vm1, %v196_v3  ;;  %v172_v17 = vld [vmem:[%s256_s2] ss:$0 sm:$0xff] }
   0x4   :  { %187 = vmatprep.subr.bf16.mxu0 %v195_v2 }
   0x7   :  { %188 = vmatpush3.bf16.msra.mxu0 %v195_v2 }
   0x8   :  { %v26_v5 = vld [vmem:[#allocation2 + $0x10] sm:$0xff]  ;;  %v24_v6 = vld [vmem:[#allocation2] sm:$0xff] }
   0x9   :  { %v27_v8 = vld [vmem:[#allocation2 + $0x18] sm:$0xff]  ;;  %v25_v11 = vld [vmem:[#allocation2 + $0x8] sm:$0xff] }
   0xa   :  { %190 = vmatmul.mubr.msk.bf16.vlgmr.msra.gmra.mrb[0].mxu0 %vm58_vm1, %v197_v4 }
  0xdd   :  { %v191_v7 = vpop.f32.mrb[0].mxu0 }
  0xde   :  { %v116_v9 = vadd.f32 %v191_v7, %v26_v5  ;;  %v99_v10 = vpop.f32.mrb[1].mxu0 }
  0xdf   :  { %v114_v12 = vadd.f32 %v99_v10, %v24_v6  ;;  %v192_v13 = vpop.f32.mrb[2].mxu0 }
  0xe0   :  { %121 = vst.msk [vmem:[#allocation2 + $0x10] sm:$0xff] %vm19_vm0, %v116_v9  ;;  %v117_v14 = vadd.f32 %v192_v13, %v27_v8  ;;  %v102_v15 = vpop.f32.mrb[3].mxu0 }
  0xe1   :  { %119 = vst.msk [vmem:[#allocation2] sm:$0xff] %vm19_vm0, %v114_v12  ;;  %v115_v16 = vadd.f32 %v102_v15, %v25_v11 }
  0xe2   :  { %122 = vst.msk [vmem:[#allocation2 + $0x18] sm:$0xff] %vm19_vm0, %v117_v14 }
  0xe3   :  { %120 = vst.msk [vmem:[#allocation2 + $0x8] sm:$0xff] %vm19_vm0, %v115_v16 }
  0xe7   :  { %v128_v18 = vld [vmem:[#allocation2 + $0x10] sm:$0xff] }
  0xe8   :  { %v139_v19 = vadd.f32 %v172_v17, %v128_v18  ;;  %v126_v20 = vld [vmem:[#allocation2] sm:$0xff] }
  0xe9   :  { %v137_v21 = vadd.f32 %v172_v17, %v126_v20  ;;  %v129_v22 = vld [vmem:[#allocation2 + $0x18] sm:$0xff] }
  0xea   :  { %v179_v23 = vpack.c.bf16 %v139_v19, %v139_v19  ;;  %v140_v24 = vadd.f32 %v172_v17, %v129_v22  ;;  %v127_v25 = vld [vmem:[#allocation2 + $0x8] sm:$0xff] }
  0xeb   :  { %v177_v26 = vpack.c.bf16 %v137_v21, %v137_v21  ;;  %v138_v27 = vadd.f32 %v172_v17, %v127_v25 }
  0xec   :  { %160 = vst.msk [vmem:[%s257_s3 + $0x8] sm:$0xf] %vm157_vm2, %v179_v23  ;;  %v180_v28 = vpack.c.bf16 %v140_v24, %v140_v24 }
  0xed   :  { %158 = vst.msk [vmem:[%s257_s3] sm:$0xf] %vm157_vm2, %v177_v26  ;;  %v178_v29 = vpack.c.bf16 %v138_v27, %v138_v27 }
  0xee   :  { %161 = vst.msk [vmem:[%s257_s3 + $0xc] sm:$0xf] %vm157_vm2, %v180_v28 }
  0xef   :  { %159 = vst.msk [vmem:[%s257_s3 + $0x4] sm:$0xf] %vm157_vm2, %v178_v29 }

// kernel: _lambda_.36
= control target key start
LH: loop header
LB: loop body
LE: loop exit
PB: predicated region body
PF: predicated region fallthrough
CT: control target
= control target key end

     0   :  { %vm28_vm0 = vcmask 261120   ;;  %v312_v1 = vmov 0.0   ;;  %vm252_vm1 = vcmask 257024   ;;  %s409_s1 = inlined_call_operand.vmem [shape: bf16[32,32], index: 1, kind: input, shape index: {}]   ;;  %s410_s0 = inlined_call_operand.vmem [shape: bf16[32,32], index: 0, kind: input, shape index: {}]   ;;  %s411_s2 = inlined_call_operand.vmem [shape: f32[1,32], index: 2, kind: input, shape index: {}, may-alias: {2,4}]   ;;  %s412_s3 = inlined_call_operand.vmem [shape: f32[1,32], index: 3, kind: input, shape index: {}]   ;;  %s413_s5 = inlined_call_operand.vmem [shape: bf16[32,32], index: 5, kind: input, shape index: {}]   ;;  %s414_s4 = inlined_call_operand.vmem [shape: f32[1,32], index: 4, kind: input, shape index: {}, may-alias: {2,4}]   ;;  %s415_s6 = inlined_call_operand.vmem [shape: bf16[32,32], index: 6, kind: output, shape index: {}]  }
   0x1   :  { %v300_v0 = vld [vmem:[%s409_s1] sm:$0xff]   ;;  %31 = vst.msk [vmem:[#allocation2 + $0x10] sm:$0xff] %vm28_vm0, %v312_v1  ;;  %29 = vst.msk [vmem:[#allocation2] sm:$0xff] %vm28_vm0, %v312_v1  ;;  %v301_v2 = vld [vmem:[%s409_s1 + $0x8] sm:$0xff]  }
   0x2   :  { %30 = vst.msk [vmem:[#allocation2 + $0x8] sm:$0xff] %vm28_vm0, %v312_v1  ;;  %32 = vst.msk [vmem:[#allocation2 + $0x18] sm:$0xff] %vm28_vm0, %v312_v1  ;;  %291 = vmatprep.subr.bf16.mxu0 %v300_v0  ;;  %v302_v3 = vld [vmem:[%s410_s0] sm:$0xff]   ;;  %v303_v4 = vld [vmem:[%s410_s0 + $0x8] sm:$0xff]  }
   0x3   :  { %292 = vmatpush3.bf16.msra.mxu0 %v300_v0  ;;  %295 = vmatprep.mubr.msk.bf16.mxu0 %vm28_vm0, %v302_v3  ;;  %v267_v17 = vld [vmem:[%s411_s2] ss:$0 sm:$0xff] }
   0x4   :  { %293 = vmatprep.subr.bf16.mxu0 %v301_v2  ;;  %v268_v63 = vld [vmem:[%s412_s3] ss:$0 sm:$0xff] }
   0x5   :  { %v279_v0 = vld [vmem:[%s413_s5] sm:$0xff]  }
   0x6   :  { %v280_v3 = vunpack.c.l.bf16 %v279_v0 }
   0x7   :  { %294 = vmatpush3.bf16.msra.mxu0 %v301_v2  ;;  %v269_v2 = vld [vmem:[%s414_s4] ss:$0 sm:$0xff] }
   0x8   :  { %v35_v5 = vld [vmem:[#allocation2 + $0x10] sm:$0xff]  ;;  %v33_v6 = vld [vmem:[#allocation2] sm:$0xff] }
   0x9   :  { %v36_v8 = vld [vmem:[#allocation2 + $0x18] sm:$0xff]  ;;  %v34_v11 = vld [vmem:[#allocation2 + $0x8] sm:$0xff] }
   0xa   :  { %296 = vmatmul.mubr.msk.bf16.vlgmr.msra.gmra.mrb[0].mxu0 %vm28_vm0, %v303_v4 }
  0xdd   :  { %v297_v7 = vpop.f32.mrb[0].mxu0 }
  0xde   :  { %v125_v9 = vadd.f32 %v297_v7, %v35_v5  ;;  %v108_v10 = vpop.f32.mrb[1].mxu0 }
  0xdf   :  { %v123_v12 = vadd.f32 %v108_v10, %v33_v6  ;;  %v298_v13 = vpop.f32.mrb[2].mxu0 }
  0xe0   :  { %129 = vst.msk [vmem:[#allocation2 + $0x10] sm:$0xff] %vm28_vm0, %v125_v9  ;;  %v126_v14 = vadd.f32 %v298_v13, %v36_v8  ;;  %v111_v15 = vpop.f32.mrb[3].mxu0  ;;  %v286_v9 = vld [vmem:[%s413_s5 + $0x8] sm:$0xff]  }
  0xe1   :  { %127 = vst.msk [vmem:[#allocation2] sm:$0xff] %vm28_vm0, %v123_v12  ;;  %v124_v16 = vadd.f32 %v111_v15, %v34_v11  ;;  %v281_v12 = vunpack.c.h.bf16 %v279_v0  ;;  %v284_v15 = vunpack.c.l.bf16 %v286_v9 }
  0xe2   :  { %130 = vst.msk [vmem:[#allocation2 + $0x18] sm:$0xff] %vm28_vm0, %v126_v14 }
  0xe3   :  { %128 = vst.msk [vmem:[#allocation2 + $0x8] sm:$0xff] %vm28_vm0, %v124_v16 }
  0xe7   :  { %v136_v18 = vld [vmem:[#allocation2 + $0x10] sm:$0xff] }
  0xe8   :  { %v147_v19 = vadd.f32 %v267_v17, %v136_v18  ;;  %v134_v20 = vld [vmem:[#allocation2] sm:$0xff] }
  0xe9   :  { %v145_v21 = vadd.f32 %v267_v17, %v134_v20  ;;  %v137_v22 = vld [vmem:[#allocation2 + $0x18] sm:$0xff] }
  0xea   :  { %v155_v23 = vsel %vm28_vm0, %v147_v19, 0.0  ;;  %v148_v24 = vadd.f32 %v267_v17, %v137_v22  ;;  %v135_v25 = vld [vmem:[#allocation2 + $0x8] sm:$0xff]  ;;  %v285_v22 = vunpack.c.h.bf16 %v286_v9 }
  0xeb   :  { %156 = vadd.xlane.f32.xlu1 %v155_v23  ;;  %v149_v26 = vsel %vm28_vm0, %v145_v21, 0.0  ;;  %v146_v27 = vadd.f32 %v267_v17, %v135_v25 }
  0xec   :  { %150 = vadd.xlane.f32.xlu0 %v149_v26  ;;  %v158_v28 = vsel %vm28_vm0, %v148_v24, 0.0 }
  0xed   :  { %v152_v29 = vsel %vm28_vm0, %v146_v27, 0.0 }
  0xef   :  { %159 = vadd.xlane.f32.xlu1 %v158_v28 }
  0xf0   :  { %153 = vadd.xlane.f32.xlu0 %v152_v29 }
 0x178   :  { %v157_v30 = vpop.xlane.xlu1 %156 }
 0x179   :  { %v164_v31 = vmul.f32 0.03125, %v157_v30  ;;  %v151_v32 = vpop.xlane.xlu0 %150 }
 0x17a   :  { %v162_v33 = vmul.f32 0.03125, %v151_v32 }
 0x17b   :  { %v168_v34 = vsub.f32 %v147_v19, %v164_v31 }
 0x17c   :  { %v166_v35 = vsub.f32 %v145_v21, %v162_v33  ;;  %v160_v36 = vpop.xlane.xlu1 %159 }
 0x17d   :  { %v165_v37 = vmul.f32 0.03125, %v160_v36  ;;  %v154_v38 = vpop.xlane.xlu0 %153  ;;  %v172_v44 = vmul.f32 %v168_v34, %v168_v34 }
 0x17e   :  { %v163_v39 = vmul.f32 0.03125, %v154_v38  ;;  %v170_v40 = vmul.f32 %v166_v35, %v166_v35 }
 0x17f   :  { %v169_v41 = vsub.f32 %v148_v24, %v165_v37  ;;  %v180_v46 = vsel %vm28_vm0, %v172_v44, 0.0 }
 0x180   :  { %v167_v42 = vsub.f32 %v146_v27, %v163_v39  ;;  %v174_v43 = vsel %vm28_vm0, %v170_v40, 0.0 }
 0x181   :  { %175 = vadd.xlane.f32.xlu0 %v174_v43  ;;  %v173_v48 = vmul.f32 %v169_v41, %v169_v41 }
 0x182   :  { %v171_v45 = vmul.f32 %v167_v42, %v167_v42 }
 0x183   :  { %v183_v49 = vsel %vm28_vm0, %v173_v48, 0.0 }
 0x184   :  { %v177_v47 = vsel %vm28_vm0, %v171_v45, 0.0 }
 0x185   :  { %181 = vadd.xlane.f32.xlu0 %v180_v46  ;;  %178 = vadd.xlane.f32.xlu1 %v177_v47 }
 0x189   :  { %184 = vadd.xlane.f32.xlu1 %v183_v49 }
 0x20e   :  { %v176_v50 = vpop.xlane.xlu0 %175 }
 0x20f   :  { %v186_v51 = vmul.f32 0.03125, %v176_v50 }
 0x211   :  { %v190_v52 = vadd.f32 1e-05, %v186_v51 }
 0x212   :  { %v179_v53 = vpop.xlane.xlu1 %178  ;;  %v182_v54 = vpop.xlane.xlu0 %181 }
 0x213   :  { %304 = vrsqrt.f32 %v190_v52  ;;  %v187_v55 = vmul.f32 0.03125, %v179_v53  ;;  %v188_v56 = vmul.f32 0.03125, %v182_v54 }
 0x215   :  { %v191_v57 = vadd.f32 1e-05, %v187_v55  ;;  %v192_v58 = vadd.f32 1e-05, %v188_v56 }
 0x216   :  { %v185_v59 = vpop.xlane.xlu1 %184 }
 0x217   :  { %306 = vrsqrt.f32 %v191_v57  ;;  %v189_v60 = vmul.f32 0.03125, %v185_v59 }
 0x218   :  { %308 = vrsqrt.f32 %v192_v58 }
 0x219   :  { %v193_v61 = vadd.f32 1e-05, %v189_v60 }
 0x21b   :  { %310 = vrsqrt.f32 %v193_v61 }
 0x21d   :  { %v305_v62 = vpop.eup %304 }
 0x21e   :  { %v198_v1 = vmul.f32 %v305_v62, %v166_v35 }
 0x220   :  { %v209_v4 = vmul.f32 %v268_v63, %v198_v1 }
 0x221   :  { %v307_v5 = vpop.eup %306 }
 0x222   :  { %v309_v6 = vpop.eup %308  ;;  %v220_v7 = vadd.f32 %v269_v2, %v209_v4  ;;  %v199_v8 = vmul.f32 %v307_v5, %v167_v42 }
 0x223   :  { %v200_v10 = vmul.f32 %v309_v6, %v168_v34 }
 0x224   :  { %v232_v11 = vadd.f32 %v280_v3, %v220_v7  ;;  %v210_v13 = vmul.f32 %v268_v63, %v199_v8 }
 0x225   :  { %v311_v14 = vpop.eup %310  ;;  %v211_v16 = vmul.f32 %v268_v63, %v200_v10 }
 0x226   :  { %v274_v17 = vpack.c.bf16 %v232_v11, %v232_v11  ;;  %v221_v18 = vadd.f32 %v269_v2, %v210_v13  ;;  %v201_v19 = vmul.f32 %v311_v14, %v169_v41 }
 0x227   :  { %v222_v20 = vadd.f32 %v269_v2, %v211_v16 }
 0x228   :  { %253 = vst.msk [vmem:[%s415_s6] sm:$0xf] %vm252_vm1, %v274_v17  ;;  %v233_v21 = vadd.f32 %v281_v12, %v221_v18  ;;  %v212_v23 = vmul.f32 %v268_v63, %v201_v19 }
 0x229   :  { %v234_v24 = vadd.f32 %v284_v15, %v222_v20 }
 0x22a   :  { %v275_v25 = vpack.c.bf16 %v233_v21, %v233_v21  ;;  %v223_v26 = vadd.f32 %v269_v2, %v212_v23 }
 0x22b   :  { %v276_v27 = vpack.c.bf16 %v234_v24, %v234_v24 }
 0x22c   :  { %254 = vst.msk [vmem:[%s415_s6 + $0x4] sm:$0xf] %vm252_vm1, %v275_v25  ;;  %v235_v28 = vadd.f32 %v285_v22, %v223_v26 }
 0x22d   :  { %255 = vst.msk [vmem:[%s415_s6 + $0x8] sm:$0xf] %vm252_vm1, %v276_v27 }
 0x22e   :  { %v277_v29 = vpack.c.bf16 %v235_v28, %v235_v28 }
 0x230   :  { %256 = vst.msk [vmem:[%s415_s6 + $0xc] sm:$0xf] %vm252_vm1, %v277_v29 }

// kernel: _lambda_.37
= control target key start
LH: loop header
LB: loop body
LE: loop exit
PB: predicated region body
PF: predicated region fallthrough
CT: control target
= control target key end

     0   :  { %vm57_vm0 = vcmask 261120   ;;  %s290_s1 = inlined_call_operand.vmem [shape: bf16[32,128], index: 1, kind: input, shape index: {}]   ;;  %s291_s0 = inlined_call_operand.vmem [shape: bf16[32,32], index: 0, kind: input, shape index: {}]   ;;  %s292_s2 = inlined_call_operand.vmem [shape: f32[1,128], index: 2, kind: input, shape index: {}]   ;;  %s293_s3 = inlined_call_operand.vmem [shape: bf16[32,128], index: 3, kind: output, shape index: {}]  }
   0x1   :  { %v237_v0 = vld [vmem:[%s290_s1] sm:$0xff]   ;;  %v238_v1 = vld [vmem:[%s290_s1 + $0x8] sm:$0xff]  }
   0x2   :  { %229 = vmatprep.subr.bf16.mxu0 %v237_v0  ;;  %v239_v2 = vld [vmem:[%s291_s0] sm:$0xff]   ;;  %v240_v3 = vld [vmem:[%s291_s0 + $0x8] sm:$0xff]  }
   0x3   :  { %230 = vmatpush3.bf16.msra.mxu0 %v237_v0  ;;  %233 = vmatprep.mubr.msk.bf16.mxu0 %vm57_vm0, %v239_v2  ;;  %v205_v4 = vld [vmem:[%s292_s2] ss:$0 sm:$0xff] }
   0x4   :  { %231 = vmatprep.subr.bf16.mxu0 %v238_v1 }
   0x7   :  { %232 = vmatpush3.bf16.msra.mxu0 %v238_v1 }
   0xa   :  { %234 = vmatmul.mubr.msk.bf16.vlgmr.msra.gmra.mrb[0].mxu0 %vm57_vm0, %v240_v3 }
  0xdd   :  { %v235_v5 = vpop.f32.mrb[0].mxu0 }
  0xde   :  { %v137_v6 = vadd.f32 %v235_v5, %v205_v4  ;;  %v98_v7 = vpop.f32.mrb[1].mxu0 }
  0xdf   :  { %v135_v8 = vadd.f32 %v205_v4, %v98_v7  ;;  %v236_v9 = vpop.f32.mrb[2].mxu0 }
  0xe0   :  { %v145_v10 = vmul.f32 0.044715, %v137_v6  ;;  %v138_v11 = vadd.f32 %v236_v9, %v205_v4  ;;  %v101_v12 = vpop.f32.mrb[3].mxu0  ;;  %v141_v39 = vmul.f32 0.5, %v137_v6 }
  0xe1   :  { %v143_v13 = vmul.f32 0.044715, %v135_v8  ;;  %v136_v14 = vadd.f32 %v205_v4, %v101_v12  ;;  %v139_v42 = vmul.f32 0.5, %v135_v8 }
  0xe2   :  { %v149_v15 = vmul.f32 %v145_v10, %v137_v6  ;;  %v146_v16 = vmul.f32 0.044715, %v138_v11  ;;  %v142_v40 = vmul.f32 0.5, %v138_v11 }
  0xe3   :  { %v147_v17 = vmul.f32 %v143_v13, %v135_v8  ;;  %v144_v18 = vmul.f32 0.044715, %v136_v14  ;;  %v140_v43 = vmul.f32 0.5, %v136_v14 }
  0xe4   :  { %v153_v19 = vmul.f32 %v149_v15, %v137_v6  ;;  %v150_v20 = vmul.f32 %v146_v16, %v138_v11 }
  0xe5   :  { %v151_v21 = vmul.f32 %v147_v17, %v135_v8  ;;  %v148_v22 = vmul.f32 %v144_v18, %v136_v14 }
  0xe6   :  { %v157_v23 = vadd.f32 %v153_v19, %v137_v6  ;;  %v154_v24 = vmul.f32 %v150_v20, %v138_v11 }
  0xe7   :  { %v155_v25 = vadd.f32 %v151_v21, %v135_v8  ;;  %v152_v26 = vmul.f32 %v148_v22, %v136_v14 }
  0xe8   :  { %v161_v27 = vmul.f32 0.7978846, %v157_v23  ;;  %v158_v28 = vadd.f32 %v154_v24, %v138_v11 }
  0xe9   :  { %v159_v29 = vmul.f32 0.7978846, %v155_v25  ;;  %v156_v30 = vadd.f32 %v152_v26, %v136_v14 }
  0xea   :  { %241 = vtanh.f32 %v161_v27  ;;  %v162_v31 = vmul.f32 0.7978846, %v158_v28 }
  0xeb   :  { %243 = vtanh.f32 %v159_v29  ;;  %v160_v32 = vmul.f32 0.7978846, %v156_v30 }
  0xec   :  { %245 = vtanh.f32 %v162_v31 }
  0xed   :  { %247 = vtanh.f32 %v160_v32 }
  0xf4   :  { %v242_v33 = vpop.eup %241 }
  0xf5   :  { %v244_v34 = vpop.eup %243  ;;  %v169_v35 = vadd.f32 1.0, %v242_v33 }
  0xf6   :  { %v246_v36 = vpop.eup %245  ;;  %v167_v37 = vadd.f32 1.0, %v244_v34 }
  0xf7   :  { %v248_v38 = vpop.eup %247  ;;  %v170_v41 = vadd.f32 1.0, %v246_v36  ;;  %v173_v45 = vmul.f32 %v169_v35, %v141_v39 }
  0xf8   :  { %v168_v44 = vadd.f32 1.0, %v248_v38  ;;  %v171_v47 = vmul.f32 %v167_v37, %v139_v42 }
  0xf9   :  { %v174_v46 = vmul.f32 %v170_v41, %v142_v40 }
  0xfa   :  { %v172_v48 = vmul.f32 %v168_v44, %v140_v43 }
  0xfb   :  { %v222_v49 = vpack.c.bf16 %v174_v46, %v173_v45 }
  0xfc   :  { %v217_v50 = vpack.c.bf16 %v172_v48, %v171_v47 }
  0xfd   :  { %224 = vst [vmem:[%s293_s3 + $0x8] sm:$0xff] %v222_v49  }
  0xfe   :  { %218 = vst [vmem:[%s293_s3] sm:$0xff] %v217_v50  }

// kernel: _lambda_.38
= control target key start
LH: loop header
LB: loop body
LE: loop exit
PB: predicated region body
PF: predicated region fallthrough
CT: control target
= control target key end

     0   :  { %vm28_vm0 = vcmask 261120   ;;  %v384_v1 = vmov 0.0   ;;  %vm296_vm1 = vcmask 257024   ;;  %s497_s1 = inlined_call_operand.vmem [shape: bf16[128,32], index: 1, kind: input, shape index: {}]   ;;  %s498_s0 = inlined_call_operand.vmem [shape: bf16[32,128], index: 0, kind: input, shape index: {}]   ;;  %s499_s2 = inlined_call_operand.vmem [shape: f32[1,32], index: 2, kind: input, shape index: {}, may-alias: {2,4}]   ;;  %s500_s3 = inlined_call_operand.vmem [shape: f32[1,32], index: 3, kind: input, shape index: {}]   ;;  %s501_s5 = inlined_call_operand.vmem [shape: bf16[32,32], index: 5, kind: input, shape index: {}]   ;;  %s502_s4 = inlined_call_operand.vmem [shape: f32[1,32], index: 4, kind: input, shape index: {}, may-alias: {2,4}]   ;;  %s503_s6 = inlined_call_operand.vmem [shape: bf16[32,32], index: 6, kind: output, shape index: {}]  }
   0x1   :  { %v366_v0 = vld [vmem:[%s497_s1] sm:$0xff]   ;;  %31 = vst.msk [vmem:[#allocation2 + $0x10] sm:$0xff] %vm28_vm0, %v384_v1  ;;  %29 = vst.msk [vmem:[#allocation2] sm:$0xff] %vm28_vm0, %v384_v1  ;;  %v367_v2 = vld [vmem:[%s497_s1 + $0x8] sm:$0xff]  }
   0x2   :  { %30 = vst.msk [vmem:[#allocation2 + $0x8] sm:$0xff] %vm28_vm0, %v384_v1  ;;  %32 = vst.msk [vmem:[#allocation2 + $0x18] sm:$0xff] %vm28_vm0, %v384_v1  ;;  %345 = vmatprep.subr.bf16.mxu0 %v366_v0  ;;  %v368_v3 = vld [vmem:[%s497_s1 + $0x10] sm:$0xff]   ;;  %v369_v4 = vld [vmem:[%s497_s1 + $0x18] sm:$0xff]  }
   0x3   :  { %346 = vmatpush3.bf16.msra.mxu0 %v366_v0  ;;  %v374_v5 = vld [vmem:[%s498_s0] sm:$0xff]   ;;  %v371_v7 = vld [vmem:[%s497_s1 + $0x28] sm:$0xff]   ;;  %v372_v8 = vld [vmem:[%s497_s1 + $0x30] sm:$0xff]  }
   0x4   :  { %347 = vmatprep.subr.bf16.mxu0 %v367_v2  ;;  %361 = vmatprep.mubr.bf16.mxu0 %v374_v5  ;;  %v370_v6 = vld [vmem:[%s497_s1 + $0x20] sm:$0xff]   ;;  %v373_v9 = vld [vmem:[%s497_s1 + $0x38] sm:$0xff]   ;;  %v375_v10 = vld [vmem:[%s498_s0 + $0x8] sm:$0xff]  }
   0x5   :  { %v315_v23 = vld [vmem:[%s499_s2] ss:$0 sm:$0xff] }
   0x6   :  { %v316_v5 = vld [vmem:[%s500_s3] ss:$0 sm:$0xff] }
   0x7   :  { %348 = vmatpush3.bf16.msra.mxu0 %v367_v2 }
   0x8   :  { %349 = vmatprep.subr.bf16.mxu0 %v368_v3  ;;  %v35_v11 = vld [vmem:[#allocation2 + $0x10] sm:$0xff]  ;;  %v33_v12 = vld [vmem:[#allocation2] sm:$0xff] }
   0x9   :  { %v36_v14 = vld [vmem:[#allocation2 + $0x18] sm:$0xff]  ;;  %v34_v17 = vld [vmem:[#allocation2 + $0x8] sm:$0xff] }
   0xb   :  { %350 = vmatpush3.bf16.msra.mxu0 %v368_v3 }
   0xc   :  { %351 = vmatprep.subr.bf16.mxu0 %v369_v4 }
   0xf   :  { %352 = vmatpush3.bf16.msra.mxu0 %v369_v4 }
  0x10   :  { %353 = vmatprep.subr.bf16.mxu0 %v370_v6 }
  0x13   :  { %354 = vmatpush3.bf16.msra.mxu0 %v370_v6  ;;  %v327_v6 = vld [vmem:[%s501_s5] sm:$0xff]  }
  0x14   :  { %355 = vmatprep.subr.bf16.mxu0 %v371_v7 }
  0x17   :  { %356 = vmatpush3.bf16.msra.mxu0 %v371_v7 }
  0x18   :  { %357 = vmatprep.subr.bf16.mxu0 %v372_v8 }
  0x1b   :  { %358 = vmatpush3.bf16.msra.mxu0 %v372_v8  ;;  %v317_v8 = vld [vmem:[%s502_s4] ss:$0 sm:$0xff] }
  0x1c   :  { %359 = vmatprep.subr.bf16.mxu0 %v373_v9 }
  0x1f   :  { %360 = vmatpush3.bf16.msra.mxu0 %v373_v9  ;;  %v328_v9 = vunpack.c.l.bf16 %v327_v6 }
  0x22   :  { %362 = vmatmul.mubr.bf16.vlgmr.msra.gmra.mrb[0].mxu0 %v375_v10 }
  0xf5   :  { %v363_v13 = vpop.f32.mrb[0].mxu0 }
  0xf6   :  { %v168_v15 = vadd.f32 %v363_v13, %v35_v11  ;;  %v151_v16 = vpop.f32.mrb[1].mxu0 }
  0xf7   :  { %v166_v18 = vadd.f32 %v151_v16, %v33_v12  ;;  %v364_v19 = vpop.f32.mrb[2].mxu0 }
  0xf8   :  { %173 = vst.msk [vmem:[#allocation2 + $0x10] sm:$0xff] %vm28_vm0, %v168_v15  ;;  %v169_v20 = vadd.f32 %v364_v19, %v36_v14  ;;  %v154_v21 = vpop.f32.mrb[3].mxu0  ;;  %v334_v15 = vld [vmem:[%s501_s5 + $0x8] sm:$0xff]  }
  0xf9   :  { %171 = vst.msk [vmem:[#allocation2] sm:$0xff] %vm28_vm0, %v166_v18  ;;  %v167_v22 = vadd.f32 %v154_v21, %v34_v17  ;;  %v329_v18 = vunpack.c.h.bf16 %v327_v6  ;;  %v332_v21 = vunpack.c.l.bf16 %v334_v15 }
  0xfa   :  { %174 = vst.msk [vmem:[#allocation2 + $0x18] sm:$0xff] %vm28_vm0, %v169_v20 }
  0xfb   :  { %172 = vst.msk [vmem:[#allocation2 + $0x8] sm:$0xff] %vm28_vm0, %v167_v22 }
  0xff   :  { %v180_v24 = vld [vmem:[#allocation2 + $0x10] sm:$0xff] }
 0x100   :  { %v191_v25 = vadd.f32 %v315_v23, %v180_v24  ;;  %v178_v26 = vld [vmem:[#allocation2] sm:$0xff] }
 0x101   :  { %v189_v27 = vadd.f32 %v315_v23, %v178_v26  ;;  %v181_v28 = vld [vmem:[#allocation2 + $0x18] sm:$0xff] }
 0x102   :  { %v199_v29 = vsel %vm28_vm0, %v191_v25, 0.0  ;;  %v192_v30 = vadd.f32 %v315_v23, %v181_v28  ;;  %v179_v31 = vld [vmem:[#allocation2 + $0x8] sm:$0xff]  ;;  %v333_v28 = vunpack.c.h.bf16 %v334_v15 }
 0x103   :  { %200 = vadd.xlane.f32.xlu1 %v199_v29  ;;  %v193_v32 = vsel %vm28_vm0, %v189_v27, 0.0  ;;  %v190_v33 = vadd.f32 %v315_v23, %v179_v31 }
 0x104   :  { %194 = vadd.xlane.f32.xlu0 %v193_v32  ;;  %v202_v34 = vsel %vm28_vm0, %v192_v30, 0.0 }
 0x105   :  { %v196_v35 = vsel %vm28_vm0, %v190_v33, 0.0 }
 0x107   :  { %203 = vadd.xlane.f32.xlu1 %v202_v34 }
 0x108   :  { %197 = vadd.xlane.f32.xlu0 %v196_v35 }
 0x190   :  { %v201_v36 = vpop.xlane.xlu1 %200 }
 0x191   :  { %v208_v37 = vmul.f32 0.03125, %v201_v36  ;;  %v195_v38 = vpop.xlane.xlu0 %194 }
 0x192   :  { %v206_v39 = vmul.f32 0.03125, %v195_v38 }
 0x193   :  { %v212_v40 = vsub.f32 %v191_v25, %v208_v37 }
 0x194   :  { %v210_v41 = vsub.f32 %v189_v27, %v206_v39  ;;  %v204_v42 = vpop.xlane.xlu1 %203 }
 0x195   :  { %v209_v43 = vmul.f32 0.03125, %v204_v42  ;;  %v198_v44 = vpop.xlane.xlu0 %197  ;;  %v216_v50 = vmul.f32 %v212_v40, %v212_v40 }
 0x196   :  { %v207_v45 = vmul.f32 0.03125, %v198_v44  ;;  %v214_v46 = vmul.f32 %v210_v41, %v210_v41 }
 0x197   :  { %v213_v47 = vsub.f32 %v192_v30, %v209_v43  ;;  %v224_v52 = vsel %vm28_vm0, %v216_v50, 0.0 }
 0x198   :  { %v211_v48 = vsub.f32 %v190_v33, %v207_v45  ;;  %v218_v49 = vsel %vm28_vm0, %v214_v46, 0.0 }
 0x199   :  { %219 = vadd.xlane.f32.xlu0 %v218_v49  ;;  %v217_v54 = vmul.f32 %v213_v47, %v213_v47 }
 0x19a   :  { %v215_v51 = vmul.f32 %v211_v48, %v211_v48 }
 0x19b   :  { %v227_v55 = vsel %vm28_vm0, %v217_v54, 0.0 }
 0x19c   :  { %v221_v53 = vsel %vm28_vm0, %v215_v51, 0.0 }
 0x19d   :  { %225 = vadd.xlane.f32.xlu0 %v224_v52  ;;  %222 = vadd.xlane.f32.xlu1 %v221_v53 }
 0x1a1   :  { %228 = vadd.xlane.f32.xlu1 %v227_v55 }
 0x226   :  { %v220_v56 = vpop.xlane.xlu0 %219 }
 0x227   :  { %v230_v57 = vmul.f32 0.03125, %v220_v56 }
 0x229   :  { %v234_v58 = vadd.f32 1e-05, %v230_v57 }
 0x22a   :  { %v223_v59 = vpop.xlane.xlu1 %222  ;;  %v226_v60 = vpop.xlane.xlu0 %225 }
 0x22b   :  { %376 = vrsqrt.f32 %v234_v58  ;;  %v231_v61 = vmul.f32 0.03125, %v223_v59  ;;  %v232_v62 = vmul.f32 0.03125, %v226_v60 }
 0x22d   :  { %v235_v63 = vadd.f32 1e-05, %v231_v61  ;;  %v236_v0 = vadd.f32 1e-05, %v232_v62 }
 0x22e   :  { %v229_v1 = vpop.xlane.xlu1 %228 }
 0x22f   :  { %378 = vrsqrt.f32 %v235_v63  ;;  %v233_v2 = vmul.f32 0.03125, %v229_v1 }
 0x230   :  { %380 = vrsqrt.f32 %v236_v0 }
 0x231   :  { %v237_v3 = vadd.f32 1e-05, %v233_v2 }
 0x233   :  { %382 = vrsqrt.f32 %v237_v3 }
 0x235   :  { %v377_v4 = vpop.eup %376 }
 0x236   :  { %v242_v7 = vmul.f32 %v377_v4, %v210_v41 }
 0x238   :  { %v253_v10 = vmul.f32 %v316_v5, %v242_v7 }
 0x239   :  { %v379_v11 = vpop.eup %378 }
 0x23a   :  { %v381_v12 = vpop.eup %380  ;;  %v264_v13 = vadd.f32 %v317_v8, %v253_v10  ;;  %v243_v14 = vmul.f32 %v379_v11, %v211_v48 }
 0x23b   :  { %v244_v16 = vmul.f32 %v381_v12, %v212_v40 }
 0x23c   :  { %v276_v17 = vadd.f32 %v328_v9, %v264_v13  ;;  %v254_v19 = vmul.f32 %v316_v5, %v243_v14 }
 0x23d   :  { %v383_v20 = vpop.eup %382  ;;  %v255_v22 = vmul.f32 %v316_v5, %v244_v16 }
 0x23e   :  { %v322_v23 = vpack.c.bf16 %v276_v17, %v276_v17  ;;  %v265_v24 = vadd.f32 %v317_v8, %v254_v19  ;;  %v245_v25 = vmul.f32 %v383_v20, %v213_v47 }
 0x23f   :  { %v266_v26 = vadd.f32 %v317_v8, %v255_v22 }
 0x240   :  { %297 = vst.msk [vmem:[%s503_s6] sm:$0xf] %vm296_vm1, %v322_v23  ;;  %v277_v27 = vadd.f32 %v329_v18, %v265_v24  ;;  %v256_v29 = vmul.f32 %v316_v5, %v245_v25 }
 0x241   :  { %v278_v30 = vadd.f32 %v332_v21, %v266_v26 }
 0x242   :  { %v323_v31 = vpack.c.bf16 %v277_v27, %v277_v27  ;;  %v267_v32 = vadd.f32 %v317_v8, %v256_v29 }
 0x243   :  { %v324_v33 = vpack.c.bf16 %v278_v30, %v278_v30 }
 0x244   :  { %298 = vst.msk [vmem:[%s503_s6 + $0x4] sm:$0xf] %vm296_vm1, %v323_v31  ;;  %v279_v34 = vadd.f32 %v333_v28, %v267_v32 }
 0x245   :  { %299 = vst.msk [vmem:[%s503_s6 + $0x8] sm:$0xf] %vm296_vm1, %v324_v33 }
 0x246   :  { %v325_v35 = vpack.c.bf16 %v279_v34, %v279_v34 }
 0x248   :  { %300 = vst.msk [vmem:[%s503_s6 + $0xc] sm:$0xf] %vm296_vm1, %v325_v35 }

// kernel: _lambda_.35
= control target key start
LH: loop header
LB: loop body
LE: loop exit
PB: predicated region body
PF: predicated region fallthrough
CT: control target
= control target key end

     0   :  { %9 = vsyncpa [#allocation3], 0  ;;  %s2394_s0 = inlined_call_operand.vmem [shape: bf16[2,16,96], index: 0, kind: input, shape index: {}]   ;;  %s2395_s1 = inlined_call_operand.vmem [shape: f32[4,16,16], index: 1, kind: input, shape index: {}]   ;;  %s2396_s2 = inlined_call_operand.vmem [shape: f32[2,16,16], index: 2, kind: input, shape index: {}]   ;;  %s2397_s3 = inlined_call_operand.vmem [shape: f32[4], index: 3, kind: input, shape index: {}]   ;;  %s2398_s4 = inlined_call_operand.vmem [shape: bf16[2,16,32], index: 4, kind: output, shape index: {}]  }
   0x1   :  { %s22_s17 = sshll.u32 %s2397_s3, 4  ;;  %s23_s17 = int_to_ptr.vmem [resolvable:$true] %s22_s17 }
   0x2   :  { %s1850_s18 = scalar_lea.vmem %s23_s17, 16  ;;  %p1855_p1 = scmp.lt.s32.totalorder %s23_s17, %s23_s17 }
   0x3   :  { %p1851_p0 = scmp.ne.s32.totalorder %s23_s17, %s1850_s18  ;;  %p1856_p2 = scmp.lt.s32.totalorder %s1850_s18, %s1850_s18 }
   0x5   :  { %p1857_p3 = por %p1856_p2, %p1855_p1 }
   0x7   :  { %p1858_p4 = pnand %p1857_p3, %p1851_p0 }
   0x9   :  { %1861 = shalt.err (!%p1858_p4)
}
   0xa   :  { %s1864_s19 = smov [#allocation2]  }
   0xb   :  { %25 = dma.vmem_to_smem %s23_s17, 16, %s1864_s19, [#allocation3]  }
   0xc   :  { %1862 = dma.done.wait [#allocation3], 16  }
   0xd   :  { %1863 = vsyncadd [#allocation3], 4294967280 }
   0xe   :  { %29 = sfence }
   0xf   :  { %v1913_v0 = vld [vmem:[%s2394_s0] sm:$0xff]   ;;  %v1918_v1 = vld [vmem:[%s2394_s0 + $0x8] sm:$0xff]   ;;  %s1865_s0 = smov 96   ;;  %vm47_vm0 = vcmask 64512   ;;  %s112_s23 = sld [smem:[#allocation2]]  ;;  %v1867_v32 = vmov 0.0  }
  0x10   :  { %v1921_v2 = vunpack.c.l.bf16 %v1913_v0  ;;  %v1924_v3 = vunpack.c.l.bf16 %v1918_v1  ;;  %v1927_v4 = vunpack.c.h.bf16 %v1913_v0  ;;  %v1930_v5 = vunpack.c.h.bf16 %v1918_v1  ;;  %s1866_s24 = smov 0.01   ;;  %1554 = vmatprep.subr.bf16.mxu0 %v1867_v32  ;;  %1560 = vmatprep.subr.bf16.mxu1 %v1867_v32  ;;  %s1869_s26 = smov 88  }
  0x11   :  { %vm1868_vm1 = vmmov 0   ;;  %s1870_s27 = smov 120   ;;  %vm232_vm2 = vcmask 130048   ;;  %s1493_s15 = sld [smem:[#allocation2 + $0x1]]  ;;  %vm1456_vm3 = vcmask 195584   ;;  %vm1477_vm4 = vcmask 257024  }
  0x12   :  { %v1934_v6 = vmul.f32 %v1921_v2, %v1921_v2  ;;  %v1938_v7 = vmul.f32 %v1924_v3, %v1924_v3  ;;  %v1946_v8 = vmul.f32 %v1927_v4, %v1927_v4  ;;  %v1950_v9 = vmul.f32 %v1930_v5, %v1930_v5  ;;  %1556 = vmatprep.mubr.msk.bf16.mxu0 %vm1868_vm1, %v1867_v32  ;;  %s1871_s17 = smov 64   ;;  %s1872_s19 = smov 80  }
  0x13   :  { %1562 = vmatprep.mubr.msk.bf16.mxu1 %vm1868_vm1, %v1867_v32  ;;  %s1873_s20 = smov 112   ;;  %s1876_s29 = smov 104  }
  0x14   :  { %76 = vrot.lane.b32.xlu0 %v1934_v6, %s1865_s0  ;;  %80 = vrot.lane.b32.xlu1 %v1938_v7, %s1865_s0  ;;  %v48_v18 = vsel %vm47_vm0, %v1934_v6, 0.0  ;;  %v51_v19 = vsel %vm47_vm0, %v1946_v8, 0.0  ;;  %v54_v20 = vsel %vm47_vm0, %v1938_v7, 0.0  ;;  %v57_v21 = vsel %vm47_vm0, %v1950_v9, 0.0  ;;  %s1507_s8 = sld [smem:[#allocation2 + $0x3]]  ;;  %s1879_s22 = smov 8  }
  0x15   :  { %s113_s25 = smax.f32 %s1866_s24, %s112_s23  ;;  %s1500_s23 = sld [smem:[#allocation2 + $0x2]] }
  0x16   :  { %v114_v22 = vstv %s113_s25  ;;  %s1880_s3 = smov 16  }
  0x17   :  { %1710 = vrcp.f32 %v114_v22  ;;  %s456_s16 = smax.f32 %s1866_s24, %s1493_s15 }
  0x18   :  { %78 = vrot.lane.b32.xlu0 %v1946_v8, %s1865_s0  ;;  %82 = vrot.lane.b32.xlu1 %v1950_v9, %s1865_s0 }
  0x1a   :  { %s1134_s9 = smax.f32 %s1866_s24, %s1507_s8 }
  0x1b   :  { %s795_s25 = smax.f32 %s1866_s24, %s1500_s23  ;;  %s1877_s24 = smov 48  }
  0x21   :  { %v1711_v23 = vpop.eup %1710 }
  0x22   :  { %1650 = vpush %v1711_v23 }
  0x53   :  { %s1651_s28 = spop %1650 }
  0x54   :  { %v117_v55 = vstv %s1651_s28  ;;  %s1875_s28 = smov 72  }
  0x86   :  { %v77_v10 = vpop.permute.xlu0 %76  ;;  %v81_v11 = vpop.permute.xlu1 %80 }
  0x87   :  { %v88_v12 = vsel %vm47_vm0, %v77_v10, 0.0  ;;  %v94_v13 = vsel %vm47_vm0, %v81_v11, 0.0 }
  0x88   :  { %89 = vadd.xlane.f32.xlu0 %v88_v12 }
  0x8a   :  { %v79_v14 = vpop.permute.xlu0 %78  ;;  %v83_v15 = vpop.permute.xlu1 %82 }
  0x8b   :  { %v91_v16 = vsel %vm47_vm0, %v79_v14, 0.0  ;;  %v97_v17 = vsel %vm47_vm0, %v83_v15, 0.0 }
  0x8c   :  { %95 = vadd.xlane.f32.xlu0 %v94_v13  ;;  %92 = vadd.xlane.f32.xlu1 %v91_v16  ;;  %v126_v16 = vld [vmem:[%s2395_s1] sm:$0xff] }
  0x90   :  { %98 = vadd.xlane.f32.xlu0 %v97_v17  ;;  %49 = vadd.xlane.f32.xlu1 %v48_v18 }
  0x94   :  { %52 = vadd.xlane.f32.xlu0 %v51_v19  ;;  %55 = vadd.xlane.f32.xlu1 %v54_v20  ;;  %v127_v19 = vld [vmem:[%s2395_s1 + $0x8] sm:$0xff]  ;;  %v2020_v20 = vld [vmem:[%s2396_s2] sm:$0xff] }
  0x98   :  { %58 = vadd.xlane.f32.xlu0 %v57_v21 }
 0x115   :  { %v90_v24 = vpop.xlane.xlu0 %89 }
 0x116   :  { %v100_v25 = vmax.f32 %v90_v24, 1e-12  ;;  %v2025_v24 = vld [vmem:[%s2396_s2 + $0x8] sm:$0xff] }
 0x118   :  { %1712 = vrsqrt.f32 %v100_v25 }
 0x119   :  { %v93_v26 = vpop.xlane.xlu1 %92  ;;  %v96_v27 = vpop.xlane.xlu0 %95 }
 0x11a   :  { %v101_v28 = vmax.f32 %v93_v26, 1e-12  ;;  %v102_v29 = vmax.f32 %v96_v27, 1e-12 }
 0x11c   :  { %1714 = vrsqrt.f32 %v101_v28 }
 0x11d   :  { %v99_v30 = vpop.xlane.xlu0 %98  ;;  %1716 = vrsqrt.f32 %v102_v29  ;;  %v50_v43 = vpop.xlane.xlu1 %49  ;;  %v2031_v29 = vld [vmem:[%s2396_s2 + $0x10] sm:$0xff] }
 0x11e   :  { %v103_v31 = vmax.f32 %v99_v30, 1e-12  ;;  %v60_v45 = vmax.f32 %v50_v43, 1e-12 }
 0x120   :  { %1718 = vrsqrt.f32 %v103_v31 }
 0x121   :  { %v53_v44 = vpop.xlane.xlu0 %52  ;;  %v56_v47 = vpop.xlane.xlu1 %55  ;;  %1720 = vrsqrt.f32 %v60_v45 }
 0x122   :  { %v1713_v33 = vpop.eup %1712  ;;  %v61_v46 = vmax.f32 %v53_v44, 1e-12  ;;  %v62_v49 = vmax.f32 %v56_v47, 1e-12 }
 0x123   :  { %v108_v35 = vmul.f32 %v1713_v33, %v1921_v2 }
 0x124   :  { %1722 = vrsqrt.f32 %v61_v46 }
 0x125   :  { %v59_v48 = vpop.xlane.xlu0 %58  ;;  %1724 = vrsqrt.f32 %v62_v49 }
 0x126   :  { %v1715_v34 = vpop.eup %1714  ;;  %v63_v50 = vmax.f32 %v59_v48, 1e-12 }
 0x127   :  { %v109_v36 = vmul.f32 %v1715_v34, %v1927_v4  ;;  %v1717_v37 = vpop.eup %1716 }
 0x128   :  { %v110_v40 = vmul.f32 %v1717_v37, %v1924_v3  ;;  %1726 = vrsqrt.f32 %v63_v50  ;;  %v2038_v37 = vld [vmem:[%s2396_s2 + $0x18] sm:$0xff] }
 0x129   :  { %v124_v38 = vpack.c.bf16 %v109_v36, %v108_v35 }
 0x12a   :  { %v1719_v39 = vpop.eup %1718 }
 0x12b   :  { %129 = vrot.lane.b32.xlu1 %v124_v38, %s1865_s0  ;;  %v111_v41 = vmul.f32 %v1719_v39, %v1930_v5  ;;  %v1721_v51 = vpop.eup %1720 }
 0x12c   :  { %v68_v53 = vmul.f32 %v1721_v51, %v1921_v2 }
 0x12d   :  { %v125_v42 = vpack.c.bf16 %v111_v41, %v110_v40 }
 0x12e   :  { %v1723_v52 = vpop.eup %1722  ;;  %v118_v60 = vmul.f32 %v117_v55, %v68_v53 }
 0x12f   :  { %179 = vrot.lane.b32.xlu0 %v125_v42, %s1865_s0  ;;  %419 = vrot.lane.b32.xlu1 %v1934_v6, %s1869_s26  ;;  %v69_v54 = vmul.f32 %v1723_v52, %v1927_v4  ;;  %v1725_v56 = vpop.eup %1724  ;;  %s1881_s0 = smov 24  }
 0x130   :  { %v70_v62 = vmul.f32 %v1725_v56, %v1924_v3  ;;  %v457_v56 = vstv %s456_s16 }
 0x131   :  { %v119_v61 = vmul.f32 %v117_v55, %v69_v54  ;;  %1728 = vrcp.f32 %v457_v56 }
 0x132   :  { %v1727_v57 = vpop.eup %1726  ;;  %v120_v13 = vmul.f32 %v117_v55, %v70_v62 }
 0x133   :  { %421 = vrot.lane.b32.xlu1 %v1946_v8, %s1869_s26  ;;  %423 = vrot.lane.b32.xlu0 %v1938_v7, %s1869_s26  ;;  %v71_v63 = vmul.f32 %v1727_v57, %v1930_v5  ;;  %v122_v11 = vpack.c.bf16 %v119_v61, %v118_v60 }
 0x135   :  { %v121_v14 = vmul.f32 %v117_v55, %v71_v63 }
 0x137   :  { %425 = vrot.lane.b32.xlu1 %v1950_v9, %s1869_s26  ;;  %383 = vrot.lane.b32.xlu0 %v1934_v6, %s1870_s27  ;;  %v123_v15 = vpack.c.bf16 %v121_v14, %v120_v13 }
 0x13b   :  { %385 = vrot.lane.b32.xlu1 %v1946_v8, %s1870_s27  ;;  %387 = vrot.lane.b32.xlu0 %v1938_v7, %s1870_s27  ;;  %v1729_v60 = vpop.eup %1728 }
 0x13c   :  { %1652 = vpush %v1729_v60 }
 0x13f   :  { %389 = vrot.lane.b32.xlu1 %v1950_v9, %s1870_s27 }
 0x16d   :  { %s1653_s18 = spop %1652 }
 0x19d   :  { %v130_v58 = vpop.permute.xlu1 %129 }
 0x19e   :  { %v135_v59 = vsel %vm47_vm0, %v130_v58, 0 }
 0x19f   :  { %1555 = vmatpush3.bf16.xpose.msra.mxu0 %v135_v59 }
 0x1a0   :  { %1566 = vmatprep.subr.bf16.mxu0 %v1867_v32 }
 0x1a1   :  { %v180_v10 = vpop.permute.xlu0 %179  ;;  %v420_v17 = vpop.permute.xlu1 %419 }
 0x1a2   :  { %v185_v12 = vsel %vm47_vm0, %v180_v10, 0  ;;  %v431_v45 = vsel %vm47_vm0, %v420_v17, 0.0 }
 0x1a3   :  { %1561 = vmatpush3.bf16.xpose.msra.mxu1 %v185_v12 }
 0x1a4   :  { %1572 = vmatprep.subr.bf16.mxu1 %v1867_v32 }
 0x1a5   :  { %v422_v35 = vpop.permute.xlu1 %421  ;;  %v424_v38 = vpop.permute.xlu0 %423 }
 0x1a6   :  { %1557 = vmatmul.mubr.msk.bf16.vlgmr.msra.gmra.mrb[0].mxu0 %vm47_vm0, %v122_v11  ;;  %v437_v49 = vsel %vm47_vm0, %v424_v38, 0.0  ;;  %v434_v50 = vsel %vm47_vm0, %v422_v35, 0.0 }
 0x1a7   :  { %1568 = vmatprep.mubr.msk.bf16.mxu0 %vm1868_vm1, %v1867_v32 }
 0x1a9   :  { %v426_v46 = vpop.permute.xlu1 %425  ;;  %v384_v47 = vpop.permute.xlu0 %383 }
 0x1aa   :  { %1563 = vmatmul.mubr.msk.bf16.vlgmr.msra.gmra.mrb[0].mxu1 %vm47_vm0, %v123_v15  ;;  %v395_v51 = vsel %vm47_vm0, %v384_v47, 0.0  ;;  %v440_v54 = vsel %vm47_vm0, %v426_v46, 0.0 }
 0x1ab   :  { %1574 = vmatprep.mubr.msk.bf16.mxu1 %vm1868_vm1, %v1867_v32 }
 0x1ad   :  { %v386_v52 = vpop.permute.xlu1 %385  ;;  %v388_v53 = vpop.permute.xlu0 %387 }
 0x1ae   :  { %v401_v55 = vsel %vm47_vm0, %v388_v53, 0.0  ;;  %v398_v57 = vsel %vm47_vm0, %v386_v52, 0.0 }
 0x1b1   :  { %v390_v58 = vpop.permute.xlu1 %389 }
 0x1b2   :  { %v404_v59 = vsel %vm47_vm0, %v390_v58, 0.0 }
 0x279   :  { %v171_v18 = vpop.f32.mrb[0].mxu0 }
 0x27a   :  { %v172_v21 = vadd.f32 %v171_v18, %v126_v16  ;;  %v1558_v22 = vpop.f32.mrb[1].mxu0 }
 0x27b   :  { %v174_v23 = vpop.f32.mrb[2].mxu0 }
 0x27c   :  { %v175_v25 = vadd.f32 %v174_v23, %v127_v19  ;;  %v1559_v26 = vpop.f32.mrb[3].mxu0  ;;  %v228_v27 = vadd.f32 %v172_v21, %v2020_v20 }
 0x27d   :  { %v221_v28 = vpop.f32.mrb[0].mxu1 }
 0x27e   :  { %v222_v30 = vadd.f32 %v221_v28, %v126_v16  ;;  %v1564_v31 = vpop.f32.mrb[1].mxu1  ;;  %v233_v33 = vsel %vm232_vm2, %v228_v27, -inf  ;;  %v229_v34 = vadd.f32 %v175_v25, %v2025_v24 }
 0x27f   :  { %v224_v36 = vpop.f32.mrb[2].mxu1  ;;  %234 = vmax.xlane.f32.xlu0 %v233_v33 }
 0x280   :  { %v225_v39 = vadd.f32 %v224_v36, %v127_v19  ;;  %v1565_v40 = vpop.f32.mrb[3].mxu1  ;;  %v236_v41 = vsel %vm232_vm2, %v229_v34, -inf  ;;  %v230_v42 = vadd.f32 %v222_v30, %v2031_v29 }
 0x281   :  { %237 = vmax.xlane.f32.xlu1 %v236_v41 }
 0x282   :  { %v239_v43 = vsel %vm232_vm2, %v230_v42, -inf  ;;  %v231_v44 = vadd.f32 %v225_v39, %v2038_v37 }
 0x283   :  { %240 = vmax.xlane.f32.xlu0 %v239_v43 }
 0x284   :  { %v242_v48 = vsel %vm232_vm2, %v231_v44, -inf }
 0x285   :  { %432 = vadd.xlane.f32.xlu1 %v431_v45 }
 0x287   :  { %243 = vmax.xlane.f32.xlu0 %v242_v48 }
 0x289   :  { %438 = vadd.xlane.f32.xlu1 %v437_v49 }
 0x28b   :  { %435 = vadd.xlane.f32.xlu0 %v434_v50 }
 0x28d   :  { %396 = vadd.xlane.f32.xlu1 %v395_v51 }
 0x28f   :  { %441 = vadd.xlane.f32.xlu0 %v440_v54 }
 0x291   :  { %402 = vadd.xlane.f32.xlu1 %v401_v55 }
 0x293   :  { %399 = vadd.xlane.f32.xlu0 %v398_v57 }
 0x297   :  { %405 = vadd.xlane.f32.xlu0 %v404_v59 }
 0x2a2   :  { %284 = vrot.lane.b32.xlu1 %v1913_v0, %s1871_s17 }
 0x30c   :  { %v235_v61 = vpop.xlane.xlu0 %234 }
 0x30d   :  { %v245_v62 = vsub.f32 %v228_v27, %v235_v61 }
 0x30e   :  { %v238_v63 = vpop.xlane.xlu1 %237 }
 0x30f   :  { %v249_v10 = vmul.f32 1.442695, %v245_v62  ;;  %v246_v11 = vsub.f32 %v229_v34, %v238_v63  ;;  %v460_v63 = vstv %s1653_s18 }
 0x310   :  { %v241_v12 = vpop.xlane.xlu0 %240 }
 0x311   :  { %1730 = vpow2.f32 %v249_v10  ;;  %v251_v13 = vmul.f32 1.442695, %v246_v11  ;;  %v247_v14 = vsub.f32 %v230_v42, %v241_v12 }
 0x312   :  { %v433_v15 = vpop.xlane.xlu1 %432 }
 0x313   :  { %1732 = vpow2.f32 %v251_v13  ;;  %v253_v16 = vmul.f32 1.442695, %v247_v14  ;;  %v443_v23 = vmax.f32 %v433_v15, 1e-12 }
 0x314   :  { %v244_v17 = vpop.xlane.xlu0 %243 }
 0x315   :  { %1734 = vpow2.f32 %v253_v16  ;;  %v248_v18 = vsub.f32 %v231_v44, %v244_v17 }
 0x316   :  { %v439_v19 = vpop.xlane.xlu1 %438 }
 0x317   :  { %v255_v21 = vmul.f32 1.442695, %v248_v18  ;;  %v445_v28 = vmax.f32 %v439_v19, 1e-12 }
 0x318   :  { %v436_v22 = vpop.xlane.xlu0 %435 }
 0x319   :  { %1736 = vpow2.f32 %v255_v21  ;;  %v444_v25 = vmax.f32 %v436_v22, 1e-12 }
 0x31a   :  { %v397_v26 = vpop.xlane.xlu1 %396  ;;  %1738 = vrsqrt.f32 %v443_v23 }
 0x31b   :  { %v2056_v27 = vpop.eup %1730  ;;  %1740 = vrsqrt.f32 %v444_v25  ;;  %v407_v42 = vmax.f32 %v397_v26, 1e-12 }
 0x31c   :  { %v257_v30 = vsel %vm232_vm2, %v2056_v27, 0.0  ;;  %v442_v31 = vpop.xlane.xlu0 %441  ;;  %1742 = vrsqrt.f32 %v445_v28 }
 0x31d   :  { %v2060_v33 = vpop.eup %1732  ;;  %258 = vadd.xlane.f32.xlu1 %v257_v30  ;;  %v446_v34 = vmax.f32 %v442_v31, 1e-12 }
 0x31e   :  { %v260_v35 = vsel %vm232_vm2, %v2060_v33, 0.0  ;;  %v403_v36 = vpop.xlane.xlu1 %402 }
 0x31f   :  { %v2064_v38 = vpop.eup %1734  ;;  %261 = vadd.xlane.f32.xlu0 %v260_v35  ;;  %v409_v39 = vmax.f32 %v403_v36, 1e-12  ;;  %1744 = vrsqrt.f32 %v446_v34 }
 0x320   :  { %v263_v40 = vsel %vm232_vm2, %v2064_v38, 0.0  ;;  %v400_v41 = vpop.xlane.xlu0 %399 }
 0x321   :  { %264 = vadd.xlane.f32.xlu1 %v263_v40  ;;  %1746 = vrsqrt.f32 %v409_v39  ;;  %v408_v43 = vmax.f32 %v400_v41, 1e-12 }
 0x322   :  { %v285_v44 = vpop.permute.xlu1 %284  ;;  %1748 = vrsqrt.f32 %v407_v42 }
 0x323   :  { %v2068_v45 = vpop.eup %1736  ;;  %1567 = vmatpush3.bf16.msra.mxu0 %v285_v44  ;;  %1750 = vrsqrt.f32 %v408_v43 }
 0x324   :  { %v266_v46 = vsel %vm232_vm2, %v2068_v45, 0.0  ;;  %v406_v47 = vpop.xlane.xlu0 %405  ;;  %1578 = vmatprep.subr.bf16.mxu0 %v1867_v32  ;;  %v1739_v49 = vpop.eup %1738 }
 0x325   :  { %267 = vadd.xlane.f32.xlu0 %v266_v46  ;;  %v410_v48 = vmax.f32 %v406_v47, 1e-12  ;;  %v1741_v50 = vpop.eup %1740  ;;  %v451_v53 = vmul.f32 %v1739_v49, %v1921_v2 }
 0x326   :  { %v1743_v51 = vpop.eup %1742  ;;  %v452_v54 = vmul.f32 %v1741_v50, %v1927_v4 }
 0x327   :  { %1752 = vrsqrt.f32 %v410_v48  ;;  %v453_v58 = vmul.f32 %v1743_v51, %v1924_v3  ;;  %v1494_v51 = vld [vmem:[%s2395_s1 + $0x10] sm:$0xff] }
 0x328   :  { %v467_v56 = vpack.c.bf16 %v452_v54, %v451_v53 }
 0x329   :  { %v1745_v52 = vpop.eup %1744 }
 0x32a   :  { %v454_v59 = vmul.f32 %v1745_v52, %v1930_v5 }
 0x32b   :  { %v1747_v55 = vpop.eup %1746 }
 0x32c   :  { %v417_v57 = vmul.f32 %v1747_v55, %v1924_v3  ;;  %v1749_v60 = vpop.eup %1748  ;;  %v468_v12 = vpack.c.bf16 %v454_v59, %v453_v58 }
 0x32d   :  { %v1751_v61 = vpop.eup %1750  ;;  %v415_v13 = vmul.f32 %v1749_v60, %v1921_v2 }
 0x32e   :  { %v463_v11 = vmul.f32 %v460_v63, %v417_v57  ;;  %v416_v14 = vmul.f32 %v1751_v61, %v1927_v4 }
 0x32f   :  { %v461_v17 = vmul.f32 %v460_v63, %v415_v13 }
 0x330   :  { %v462_v18 = vmul.f32 %v460_v63, %v416_v14 }
 0x331   :  { %v1753_v62 = vpop.eup %1752 }
 0x332   :  { %476 = vrot.lane.b32.xlu1 %v467_v56, %s1869_s26  ;;  %v418_v10 = vmul.f32 %v1753_v62, %v1930_v5  ;;  %v465_v19 = vpack.c.bf16 %v462_v18, %v461_v17  ;;  %v1495_v56 = vld [vmem:[%s2395_s1 + $0x18] sm:$0xff] }
 0x334   :  { %v464_v15 = vmul.f32 %v460_v63, %v418_v10 }
 0x336   :  { %529 = vrot.lane.b32.xlu1 %v468_v12, %s1869_s26  ;;  %v466_v16 = vpack.c.bf16 %v464_v15, %v463_v11  ;;  %s1874_s26 = smov 56  }
 0x33a   :  { %526 = vrot.lane.b32.xlu1 %v466_v16, %s1870_s27 }
 0x33b   :  { %336 = vrot.lane.b32.xlu0 %v1918_v1, %s1871_s17 }
 0x33e   :  { %760 = vrot.lane.b32.xlu1 %v1946_v8, %s1872_s19 }
 0x33f   :  { %473 = vrot.lane.b32.xlu0 %v465_v19, %s1870_s27 }
 0x342   :  { %764 = vrot.lane.b32.xlu1 %v1950_v9, %s1872_s19 }
 0x343   :  { %758 = vrot.lane.b32.xlu0 %v1934_v6, %s1872_s19 }
 0x346   :  { %724 = vrot.lane.b32.xlu1 %v1946_v8, %s1873_s20 }
 0x347   :  { %762 = vrot.lane.b32.xlu0 %v1938_v7, %s1872_s19 }
 0x34a   :  { %728 = vrot.lane.b32.xlu1 %v1950_v9, %s1873_s20 }
 0x34b   :  { %722 = vrot.lane.b32.xlu0 %v1934_v6, %s1873_s20 }
 0x34f   :  { %726 = vrot.lane.b32.xlu0 %v1938_v7, %s1873_s20 }
 0x3aa   :  { %v259_v21 = vpop.xlane.xlu1 %258 }
 0x3ab   :  { %1754 = vrcp.f32 %v259_v21 }
 0x3ac   :  { %v262_v22 = vpop.xlane.xlu0 %261 }
 0x3ad   :  { %1756 = vrcp.f32 %v262_v22 }
 0x3ae   :  { %v265_v23 = vpop.xlane.xlu1 %264 }
 0x3af   :  { %1758 = vrcp.f32 %v265_v23 }
 0x3b2   :  { %v268_v25 = vpop.xlane.xlu0 %267  ;;  %v477_v35 = vpop.permute.xlu1 %476 }
 0x3b3   :  { %1760 = vrcp.f32 %v268_v25  ;;  %v482_v40 = vsel %vm47_vm0, %v477_v35, 0 }
 0x3b5   :  { %v1755_v26 = vpop.eup %1754 }
 0x3b6   :  { %v337_v28 = vpop.permute.xlu0 %336  ;;  %v273_v31 = vmul.f32 %v1755_v26, %v2056_v27  ;;  %v530_v42 = vpop.permute.xlu1 %529 }
 0x3b7   :  { %v1757_v30 = vpop.eup %1756  ;;  %1573 = vmatpush3.bf16.msra.mxu1 %v337_v28 }
 0x3b8   :  { %v274_v34 = vmul.f32 %v1757_v30, %v2060_v33  ;;  %1584 = vmatprep.subr.bf16.mxu1 %v1867_v32  ;;  %v535_v33 = vsel %vm47_vm0, %v530_v42, 0 }
 0x3b9   :  { %v1759_v39 = vpop.eup %1758 }
 0x3ba   :  { %v277_v36 = vpack.c.bf16 %v274_v34, %v273_v31  ;;  %v275_v43 = vmul.f32 %v1759_v39, %v2064_v38  ;;  %v474_v46 = vpop.permute.xlu0 %473  ;;  %v527_v38 = vpop.permute.xlu1 %526 }
 0x3bc   :  { %1569 = vmatmul.mubr.msk.bf16.vlgmr.msra.gmra.mrb[4].mxu0 %vm232_vm2, %v277_v36 }
 0x3bd   :  { %v1761_v41 = vpop.eup %1760  ;;  %1579 = vmatpush3.bf16.xpose.msra.mxu0 %v482_v40  ;;  %1580 = vmatprep.mubr.msk.bf16.mxu0 %vm1868_vm1, %v1867_v32 }
 0x3be   :  { %v276_v27 = vmul.f32 %v1761_v41, %v2068_v45  ;;  %1590 = vmatprep.subr.bf16.mxu0 %v1867_v32  ;;  %v759_v53 = vpop.permute.xlu0 %758  ;;  %v761_v18 = vpop.permute.xlu1 %760 }
 0x3bf   :  { %v770_v23 = vsel %vm47_vm0, %v759_v53, 0.0  ;;  %v773_v35 = vsel %vm47_vm0, %v761_v18, 0.0 }
 0x3c0   :  { %v278_v44 = vpack.c.bf16 %v276_v27, %v275_v43  ;;  %v796_v43 = vstv %s795_s25 }
 0x3c1   :  { %1762 = vrcp.f32 %v796_v43 }
 0x3c2   :  { %1575 = vmatmul.mubr.msk.bf16.vlgmr.msra.gmra.mrb[4].mxu1 %vm232_vm2, %v278_v44  ;;  %v763_v13 = vpop.permute.xlu0 %762  ;;  %v765_v31 = vpop.permute.xlu1 %764 }
 0x3c3   :  { %1585 = vmatpush3.bf16.xpose.msra.mxu1 %v535_v33  ;;  %1586 = vmatprep.mubr.msk.bf16.mxu1 %vm1868_vm1, %v1867_v32  ;;  %v776_v30 = vsel %vm47_vm0, %v763_v13, 0.0  ;;  %v779_v41 = vsel %vm47_vm0, %v765_v31, 0.0 }
 0x3c4   :  { %1581 = vmatmul.mubr.msk.bf16.vlgmr.msra.gmra.mrb[8].mxu0 %vm47_vm0, %v474_v46  ;;  %1596 = vmatprep.subr.bf16.mxu1 %v1867_v32 }
 0x3c5   :  { %1592 = vmatprep.mubr.msk.bf16.mxu0 %vm1868_vm1, %v1867_v32 }
 0x3c6   :  { %v723_v28 = vpop.permute.xlu0 %722  ;;  %v725_v40 = vpop.permute.xlu1 %724 }
 0x3c7   :  { %v734_v36 = vsel %vm47_vm0, %v723_v28, 0.0  ;;  %v737_v27 = vsel %vm47_vm0, %v725_v40, 0.0 }
 0x3ca   :  { %1587 = vmatmul.mubr.msk.bf16.vlgmr.msra.gmra.mrb[8].mxu1 %vm47_vm0, %v527_v38  ;;  %v727_v39 = vpop.permute.xlu0 %726  ;;  %v729_v33 = vpop.permute.xlu1 %728 }
 0x3cb   :  { %1598 = vmatprep.mubr.msk.bf16.mxu1 %vm1868_vm1, %v1867_v32  ;;  %v740_v42 = vsel %vm47_vm0, %v727_v39, 0.0  ;;  %v743_v44 = vsel %vm47_vm0, %v729_v33, 0.0  ;;  %v1763_v46 = vpop.eup %1762 }
 0x3cc   :  { %1654 = vpush %v1763_v46 }
 0x3fd   :  { %s1655_s27 = spop %1654 }
 0x48f   :  { %v2124_v45 = vpop.f32.mrb[4].mxu0 }
 0x490   :  { %v1570_v47 = vpop.f32.mrb[5].mxu0 }
 0x491   :  { %v2126_v48 = vpop.f32.mrb[6].mxu0 }
 0x492   :  { %v1571_v49 = vpop.f32.mrb[7].mxu0 }
 0x495   :  { %v2128_v50 = vpop.f32.mrb[4].mxu1 }
 0x496   :  { %v1576_v52 = vpop.f32.mrb[5].mxu1 }
 0x497   :  { %v2133_v54 = vpop.f32.mrb[6].mxu1  ;;  %v518_v55 = vpop.f32.mrb[8].mxu0 }
 0x498   :  { %v519_v57 = vadd.f32 %v1494_v51, %v518_v55  ;;  %v1577_v58 = vpop.f32.mrb[7].mxu1  ;;  %v1582_v59 = vpop.f32.mrb[9].mxu0 }
 0x499   :  { %v521_v60 = vpop.f32.mrb[10].mxu0 }
 0x49a   :  { %v522_v61 = vadd.f32 %v1495_v56, %v521_v60  ;;  %v1583_v62 = vpop.f32.mrb[11].mxu0  ;;  %v578_v63 = vadd.f32 %v519_v57, %v2020_v20 }
 0x49c   :  { %v582_v10 = vsel %vm232_vm2, %v578_v63, -inf  ;;  %v579_v11 = vadd.f32 %v522_v61, %v2025_v24 }
 0x49d   :  { %583 = vmax.xlane.f32.xlu0 %v582_v10  ;;  %v571_v12 = vpop.f32.mrb[8].mxu1 }
 0x49e   :  { %v572_v14 = vadd.f32 %v1494_v51, %v571_v12  ;;  %v1588_v15 = vpop.f32.mrb[9].mxu1  ;;  %v585_v16 = vsel %vm232_vm2, %v579_v11, -inf }
 0x49f   :  { %586 = vmax.xlane.f32.xlu1 %v585_v16  ;;  %v574_v17 = vpop.f32.mrb[10].mxu1 }
 0x4a0   :  { %v575_v19 = vadd.f32 %v1495_v56, %v574_v17  ;;  %v1589_v21 = vpop.f32.mrb[11].mxu1  ;;  %v580_v22 = vadd.f32 %v572_v14, %v2031_v29 }
 0x4a2   :  { %v588_v25 = vsel %vm232_vm2, %v580_v22, -inf  ;;  %v581_v26 = vadd.f32 %v575_v19, %v2038_v37 }
 0x4a3   :  { %589 = vmax.xlane.f32.xlu0 %v588_v25  ;;  %771 = vadd.xlane.f32.xlu1 %v770_v23 }
 0x4a4   :  { %v591_v34 = vsel %vm232_vm2, %v581_v26, -inf }
 0x4a7   :  { %592 = vmax.xlane.f32.xlu0 %v591_v34  ;;  %777 = vadd.xlane.f32.xlu1 %v776_v30 }
 0x4ab   :  { %774 = vadd.xlane.f32.xlu0 %v773_v35  ;;  %735 = vadd.xlane.f32.xlu1 %v734_v36 }
 0x4af   :  { %780 = vadd.xlane.f32.xlu0 %v779_v41  ;;  %741 = vadd.xlane.f32.xlu1 %v740_v42 }
 0x4b3   :  { %738 = vadd.xlane.f32.xlu0 %v737_v27 }
 0x4b7   :  { %744 = vadd.xlane.f32.xlu0 %v743_v44 }
 0x4c0   :  { %628 = vrot.lane.b32.xlu1 %v1913_v0, %s1874_s26 }
 0x52a   :  { %v584_v38 = vpop.xlane.xlu0 %583 }
 0x52b   :  { %v594_v47 = vsub.f32 %v578_v63, %v584_v38 }
 0x52c   :  { %v587_v49 = vpop.xlane.xlu1 %586 }
 0x52d   :  { %v598_v51 = vmul.f32 1.442695, %v594_v47  ;;  %v595_v52 = vsub.f32 %v579_v11, %v587_v49 }
 0x52f   :  { %1764 = vpow2.f32 %v598_v51  ;;  %v600_v53 = vmul.f32 1.442695, %v595_v52 }
 0x530   :  { %v590_v55 = vpop.xlane.xlu0 %589  ;;  %v772_v56 = vpop.xlane.xlu1 %771 }
 0x531   :  { %1766 = vpow2.f32 %v600_v53  ;;  %v596_v57 = vsub.f32 %v580_v22, %v590_v55  ;;  %v782_v12 = vmax.f32 %v772_v56, 1e-12  ;;  %v799_v55 = vstv %s1655_s27 }
 0x533   :  { %v602_v58 = vmul.f32 1.442695, %v596_v57 }
 0x534   :  { %v593_v59 = vpop.xlane.xlu0 %592  ;;  %v778_v60 = vpop.xlane.xlu1 %777 }
 0x535   :  { %1768 = vpow2.f32 %v602_v58  ;;  %v597_v61 = vsub.f32 %v581_v26, %v593_v59  ;;  %v784_v16 = vmax.f32 %v778_v60, 1e-12 }
 0x537   :  { %v604_v62 = vmul.f32 1.442695, %v597_v61 }
 0x538   :  { %v775_v10 = vpop.xlane.xlu0 %774  ;;  %v736_v13 = vpop.xlane.xlu1 %735 }
 0x539   :  { %v2157_v14 = vpop.eup %1764  ;;  %1770 = vpow2.f32 %v604_v62  ;;  %v783_v63 = vmax.f32 %v775_v10, 1e-12  ;;  %v746_v30 = vmax.f32 %v736_v13, 1e-12 }
 0x53a   :  { %v606_v11 = vsel %vm232_vm2, %v2157_v14, 0.0  ;;  %1772 = vrsqrt.f32 %v782_v12 }
 0x53b   :  { %v2161_v15 = vpop.eup %1766  ;;  %607 = vadd.xlane.f32.xlu1 %v606_v11  ;;  %1774 = vrsqrt.f32 %v783_v63 }
 0x53c   :  { %v609_v17 = vsel %vm232_vm2, %v2161_v15, 0.0  ;;  %v781_v18 = vpop.xlane.xlu0 %780  ;;  %v742_v19 = vpop.xlane.xlu1 %741  ;;  %1776 = vrsqrt.f32 %v784_v16 }
 0x53d   :  { %610 = vadd.xlane.f32.xlu0 %v609_v17  ;;  %v785_v21 = vmax.f32 %v781_v18, 1e-12  ;;  %v748_v22 = vmax.f32 %v742_v19, 1e-12 }
 0x53f   :  { %v2165_v23 = vpop.eup %1768  ;;  %1778 = vrsqrt.f32 %v785_v21 }
 0x540   :  { %v612_v25 = vsel %vm232_vm2, %v2165_v23, 0.0  ;;  %v739_v26 = vpop.xlane.xlu0 %738  ;;  %v629_v28 = vpop.permute.xlu1 %628  ;;  %1780 = vrsqrt.f32 %v748_v22 }
 0x541   :  { %613 = vadd.xlane.f32.xlu1 %v612_v25  ;;  %1591 = vmatpush3.bf16.msra.mxu0 %v629_v28  ;;  %v747_v31 = vmax.f32 %v739_v26, 1e-12  ;;  %1782 = vrsqrt.f32 %v746_v30 }
 0x542   :  { %1602 = vmatprep.subr.bf16.mxu0 %v1867_v32 }
 0x543   :  { %v2170_v34 = vpop.eup %1770  ;;  %1784 = vrsqrt.f32 %v747_v31 }
 0x544   :  { %v615_v35 = vsel %vm232_vm2, %v2170_v34, 0.0  ;;  %v745_v36 = vpop.xlane.xlu0 %744  ;;  %v1773_v40 = vpop.eup %1772 }
 0x545   :  { %616 = vadd.xlane.f32.xlu0 %v615_v35  ;;  %v749_v39 = vmax.f32 %v745_v36, 1e-12  ;;  %v1775_v41 = vpop.eup %1774  ;;  %v790_v27 = vmul.f32 %v1773_v40, %v1921_v2 }
 0x546   :  { %v1777_v42 = vpop.eup %1776  ;;  %v791_v33 = vmul.f32 %v1775_v41, %v1927_v4 }
 0x547   :  { %1786 = vrsqrt.f32 %v749_v39  ;;  %v792_v47 = vmul.f32 %v1777_v42, %v1924_v3  ;;  %v1501_v42 = vld [vmem:[%s2395_s1 + $0x20] sm:$0xff] }
 0x548   :  { %v806_v46 = vpack.c.bf16 %v791_v33, %v790_v27 }
 0x549   :  { %v1779_v43 = vpop.eup %1778 }
 0x54a   :  { %v1781_v44 = vpop.eup %1780  ;;  %v793_v49 = vmul.f32 %v1779_v43, %v1930_v5 }
 0x54b   :  { %v756_v38 = vmul.f32 %v1781_v44, %v1924_v3  ;;  %v1783_v51 = vpop.eup %1782  ;;  %v1502_v44 = vld [vmem:[%s2395_s1 + $0x28] sm:$0xff] }
 0x54c   :  { %v807_v58 = vpack.c.bf16 %v793_v49, %v792_v47  ;;  %v754_v59 = vmul.f32 %v1783_v51, %v1921_v2 }
 0x54d   :  { %v1785_v52 = vpop.eup %1784  ;;  %v802_v57 = vmul.f32 %v799_v55, %v756_v38 }
 0x54e   :  { %v755_v60 = vmul.f32 %v1785_v52, %v1927_v4  ;;  %v800_v10 = vmul.f32 %v799_v55, %v754_v59 }
 0x550   :  { %v801_v12 = vmul.f32 %v799_v55, %v755_v60 }
 0x551   :  { %v1787_v53 = vpop.eup %1786 }
 0x552   :  { %815 = vrot.lane.b32.xlu1 %v806_v46, %s1872_s19  ;;  %v757_v56 = vmul.f32 %v1787_v53, %v1930_v5  ;;  %v804_v13 = vpack.c.bf16 %v801_v12, %v800_v10 }
 0x554   :  { %v803_v61 = vmul.f32 %v799_v55, %v757_v56 }
 0x556   :  { %868 = vrot.lane.b32.xlu1 %v807_v58, %s1872_s19  ;;  %v805_v62 = vpack.c.bf16 %v803_v61, %v802_v57 }
 0x55a   :  { %865 = vrot.lane.b32.xlu1 %v805_v62, %s1873_s20 }
 0x55b   :  { %675 = vrot.lane.b32.xlu0 %v1918_v1, %s1874_s26 }
 0x55e   :  { %1099 = vrot.lane.b32.xlu1 %v1946_v8, %s1875_s28 }
 0x55f   :  { %812 = vrot.lane.b32.xlu0 %v804_v13, %s1873_s20 }
 0x562   :  { %1103 = vrot.lane.b32.xlu1 %v1950_v9, %s1875_s28 }
 0x563   :  { %1097 = vrot.lane.b32.xlu0 %v1934_v6, %s1875_s28 }
 0x566   :  { %1063 = vrot.lane.b32.xlu1 %v1946_v8, %s1876_s29 }
 0x567   :  { %1101 = vrot.lane.b32.xlu0 %v1938_v7, %s1875_s28 }
 0x56a   :  { %1067 = vrot.lane.b32.xlu1 %v1950_v9, %s1876_s29 }
 0x56b   :  { %1061 = vrot.lane.b32.xlu0 %v1934_v6, %s1876_s29 }
 0x56f   :  { %1065 = vrot.lane.b32.xlu0 %v1938_v7, %s1876_s29 }
 0x5c8   :  { %v608_v63 = vpop.xlane.xlu1 %607 }
 0x5c9   :  { %1788 = vrcp.f32 %v608_v63 }
 0x5ca   :  { %v611_v11 = vpop.xlane.xlu0 %610 }
 0x5cb   :  { %1790 = vrcp.f32 %v611_v11 }
 0x5ce   :  { %v614_v16 = vpop.xlane.xlu1 %613 }
 0x5cf   :  { %1792 = vrcp.f32 %v614_v16 }
 0x5d2   :  { %v617_v17 = vpop.xlane.xlu0 %616  ;;  %v816_v6 = vpop.permute.xlu1 %815 }
 0x5d3   :  { %v1789_v18 = vpop.eup %1788  ;;  %1794 = vrcp.f32 %v617_v17  ;;  %v821_v7 = vsel %vm47_vm0, %v816_v6, 0 }
 0x5d4   :  { %v622_v21 = vmul.f32 %v1789_v18, %v2157_v14 }
 0x5d5   :  { %v1791_v19 = vpop.eup %1790 }
 0x5d6   :  { %v623_v8 = vmul.f32 %v1791_v19, %v2161_v15  ;;  %v676_v22 = vpop.permute.xlu0 %675  ;;  %v869_v14 = vpop.permute.xlu1 %868 }
 0x5d7   :  { %1597 = vmatpush3.bf16.msra.mxu1 %v676_v22  ;;  %v874_v31 = vsel %vm47_vm0, %v869_v14, 0 }
 0x5d8   :  { %v626_v9 = vpack.c.bf16 %v623_v8, %v622_v21  ;;  %1608 = vmatprep.subr.bf16.mxu1 %v1867_v32 }
 0x5d9   :  { %v1793_v25 = vpop.eup %1792 }
 0x5da   :  { %1593 = vmatmul.mubr.msk.bf16.vlgmr.msra.gmra.mrb[12].mxu0 %vm232_vm2, %v626_v9  ;;  %v624_v15 = vmul.f32 %v1793_v25, %v2165_v23  ;;  %v813_v30 = vpop.permute.xlu0 %812  ;;  %v866_v23 = vpop.permute.xlu1 %865 }
 0x5db   :  { %1603 = vmatpush3.bf16.xpose.msra.mxu0 %v821_v7  ;;  %1604 = vmatprep.mubr.msk.bf16.mxu0 %vm1868_vm1, %v1867_v32 }
 0x5dc   :  { %1614 = vmatprep.subr.bf16.mxu0 %v1867_v32 }
 0x5dd   :  { %v1795_v26 = vpop.eup %1794 }
 0x5de   :  { %v625_v28 = vmul.f32 %v1795_v26, %v2170_v34  ;;  %v1098_v43 = vpop.permute.xlu0 %1097  ;;  %v1100_v17 = vpop.permute.xlu1 %1099 }
 0x5df   :  { %v1109_v13 = vsel %vm47_vm0, %v1098_v43, 0.0 }
 0x5e0   :  { %v627_v35 = vpack.c.bf16 %v625_v28, %v624_v15 }
 0x5e2   :  { %1599 = vmatmul.mubr.msk.bf16.vlgmr.msra.gmra.mrb[12].mxu1 %vm232_vm2, %v627_v35  ;;  %1605 = vmatmul.mubr.msk.bf16.vlgmr.msra.gmra.mrb[16].mxu0 %vm47_vm0, %v813_v30  ;;  %v1102_v62 = vpop.permute.xlu0 %1101  ;;  %v1104_v22 = vpop.permute.xlu1 %1103 }
 0x5e3   :  { %1609 = vmatpush3.bf16.xpose.msra.mxu1 %v874_v31  ;;  %1610 = vmatprep.mubr.msk.bf16.mxu1 %vm1868_vm1, %v1867_v32  ;;  %v1115_v19 = vsel %vm47_vm0, %v1102_v62, 0.0  ;;  %v1118_v25 = vsel %vm47_vm0, %v1104_v22, 0.0 }
 0x5e4   :  { %1616 = vmatprep.mubr.msk.bf16.mxu0 %vm1868_vm1, %v1867_v32  ;;  %1620 = vmatprep.subr.bf16.mxu1 %v1867_v32 }
 0x5e6   :  { %v1062_v6 = vpop.permute.xlu0 %1061  ;;  %v1064_v26 = vpop.permute.xlu1 %1063 }
 0x5e7   :  { %v1073_v8 = vsel %vm47_vm0, %v1062_v6, 0.0  ;;  %v1076_v14 = vsel %vm47_vm0, %v1064_v26, 0.0 }
 0x5ea   :  { %1611 = vmatmul.mubr.msk.bf16.vlgmr.msra.gmra.mrb[16].mxu1 %vm47_vm0, %v866_v23  ;;  %v1066_v7 = vpop.permute.xlu0 %1065  ;;  %v1068_v15 = vpop.permute.xlu1 %1067 }
 0x5eb   :  { %1622 = vmatprep.mubr.msk.bf16.mxu1 %vm1868_vm1, %v1867_v32  ;;  %v1079_v9 = vsel %vm47_vm0, %v1066_v7, 0.0  ;;  %v1082_v28 = vsel %vm47_vm0, %v1068_v15, 0.0 }
 0x6ad   :  { %v2225_v34 = vpop.f32.mrb[12].mxu0 }
 0x6ae   :  { %v1594_v36 = vpop.f32.mrb[13].mxu0 }
 0x6af   :  { %v2227_v39 = vpop.f32.mrb[14].mxu0 }
 0x6b0   :  { %v1676_v40 = vpack.i.bf16 %v2227_v39, %v2225_v34  ;;  %v1595_v41 = vpop.f32.mrb[15].mxu0 }
 0x6b5   :  { %v2234_v27 = vpop.f32.mrb[12].mxu1  ;;  %v857_v33 = vpop.f32.mrb[16].mxu0 }
 0x6b6   :  { %v858_v46 = vadd.f32 %v1501_v42, %v857_v33  ;;  %v1600_v38 = vpop.f32.mrb[13].mxu1  ;;  %v1606_v47 = vpop.f32.mrb[17].mxu0 }
 0x6b7   :  { %v2239_v49 = vpop.f32.mrb[14].mxu1  ;;  %v860_v51 = vpop.f32.mrb[18].mxu0 }
 0x6b8   :  { %v1681_v52 = vpack.i.bf16 %v2239_v49, %v2234_v27  ;;  %v861_v53 = vadd.f32 %v1502_v44, %v860_v51  ;;  %v1601_v55 = vpop.f32.mrb[15].mxu1  ;;  %v1607_v56 = vpop.f32.mrb[19].mxu0  ;;  %v917_v57 = vadd.f32 %v858_v46, %v2020_v20 }
 0x6ba   :  { %v921_v58 = vsel %vm232_vm2, %v917_v57, -inf  ;;  %v918_v59 = vadd.f32 %v861_v53, %v2025_v24 }
 0x6bb   :  { %922 = vmax.xlane.f32.xlu0 %v921_v58 }
 0x6bc   :  { %v924_v60 = vsel %vm232_vm2, %v918_v59, -inf }
 0x6bd   :  { %925 = vmax.xlane.f32.xlu1 %v924_v60  ;;  %v910_v61 = vpop.f32.mrb[16].mxu1 }
 0x6be   :  { %v911_v10 = vadd.f32 %v1501_v42, %v910_v61  ;;  %v1612_v12 = vpop.f32.mrb[17].mxu1 }
 0x6bf   :  { %v913_v63 = vpop.f32.mrb[18].mxu1 }
 0x6c0   :  { %v914_v11 = vadd.f32 %v1502_v44, %v913_v63  ;;  %v1613_v16 = vpop.f32.mrb[19].mxu1  ;;  %v919_v20 = vadd.f32 %v911_v10, %v2031_v29  ;;  %v1112_v29 = vsel %vm47_vm0, %v1100_v17, 0.0 }
 0x6c1   :  { %1110 = vadd.xlane.f32.xlu1 %v1109_v13 }
 0x6c2   :  { %v927_v24 = vsel %vm232_vm2, %v919_v20, -inf  ;;  %v920_v18 = vadd.f32 %v914_v11, %v2038_v37  ;;  %v1135_v37 = vstv %s1134_s9 }
 0x6c3   :  { %928 = vmax.xlane.f32.xlu0 %v927_v24  ;;  %1796 = vrcp.f32 %v1135_v37 }
 0x6c4   :  { %v930_v21 = vsel %vm232_vm2, %v920_v18, -inf }
 0x6c5   :  { %1116 = vadd.xlane.f32.xlu1 %v1115_v19 }
 0x6c7   :  { %931 = vmax.xlane.f32.xlu0 %v930_v21 }
 0x6c9   :  { %1074 = vadd.xlane.f32.xlu1 %v1073_v8 }
 0x6cb   :  { %1113 = vadd.xlane.f32.xlu0 %v1112_v29 }
 0x6cd   :  { %1080 = vadd.xlane.f32.xlu1 %v1079_v9  ;;  %v1797_v30 = vpop.eup %1796 }
 0x6ce   :  { %1656 = vpush %v1797_v30 }
 0x6cf   :  { %1119 = vadd.xlane.f32.xlu0 %v1118_v25 }
 0x6d3   :  { %1077 = vadd.xlane.f32.xlu0 %v1076_v14 }
 0x6d7   :  { %1083 = vadd.xlane.f32.xlu0 %v1082_v28 }
 0x6de   :  { %967 = vrot.lane.b32.xlu1 %v1913_v0, %s1877_s24 }
 0x6ff   :  { %s1657_s10 = spop %1656 }
 0x748   :  { %v923_v31 = vpop.xlane.xlu0 %922 }
 0x749   :  { %v933_v35 = vsub.f32 %v917_v57, %v923_v31 }
 0x74a   :  { %v926_v23 = vpop.xlane.xlu1 %925 }
 0x74b   :  { %v937_v36 = vmul.f32 1.442695, %v933_v35  ;;  %v934_v41 = vsub.f32 %v918_v59, %v926_v23 }
 0x74d   :  { %1798 = vpow2.f32 %v937_v36  ;;  %v939_v42 = vmul.f32 1.442695, %v934_v41  ;;  %v1138_v41 = vstv %s1657_s10 }
 0x74e   :  { %v1111_v43 = vpop.xlane.xlu1 %1110 }
 0x74f   :  { %1800 = vpow2.f32 %v939_v42  ;;  %v1121_v59 = vmax.f32 %v1111_v43, 1e-12 }
 0x750   :  { %v929_v33 = vpop.xlane.xlu0 %928 }
 0x751   :  { %v935_v44 = vsub.f32 %v919_v20, %v929_v33 }
 0x752   :  { %v1117_v46 = vpop.xlane.xlu1 %1116 }
 0x753   :  { %v941_v38 = vmul.f32 1.442695, %v935_v44  ;;  %v1123_v12 = vmax.f32 %v1117_v46, 1e-12 }
 0x754   :  { %v932_v47 = vpop.xlane.xlu0 %931 }
 0x755   :  { %1802 = vpow2.f32 %v941_v38  ;;  %v936_v51 = vsub.f32 %v920_v18, %v932_v47 }
 0x756   :  { %v1075_v53 = vpop.xlane.xlu1 %1074 }
 0x757   :  { %v2262_v55 = vpop.eup %1798  ;;  %v943_v56 = vmul.f32 1.442695, %v936_v51  ;;  %v1085_v18 = vmax.f32 %v1075_v53, 1e-12 }
 0x758   :  { %v945_v57 = vsel %vm232_vm2, %v2262_v55, 0.0  ;;  %v1114_v58 = vpop.xlane.xlu0 %1113 }
 0x759   :  { %v2266_v60 = vpop.eup %1800  ;;  %1804 = vpow2.f32 %v943_v56  ;;  %946 = vadd.xlane.f32.xlu1 %v945_v57  ;;  %v1122_v61 = vmax.f32 %v1114_v58, 1e-12 }
 0x75a   :  { %v948_v62 = vsel %vm232_vm2, %v2266_v60, 0.0  ;;  %v1081_v10 = vpop.xlane.xlu1 %1080  ;;  %1806 = vrsqrt.f32 %v1121_v59 }
 0x75b   :  { %949 = vadd.xlane.f32.xlu0 %v948_v62  ;;  %v1087_v63 = vmax.f32 %v1081_v10, 1e-12  ;;  %1808 = vrsqrt.f32 %v1122_v61 }
 0x75c   :  { %v1120_v13 = vpop.xlane.xlu0 %1119  ;;  %1810 = vrsqrt.f32 %v1123_v12 }
 0x75d   :  { %v1124_v11 = vmax.f32 %v1120_v13, 1e-12  ;;  %1812 = vrsqrt.f32 %v1087_v63 }
 0x75e   :  { %v968_v16 = vpop.permute.xlu1 %967 }
 0x75f   :  { %v2270_v20 = vpop.eup %1802  ;;  %1615 = vmatpush3.bf16.msra.mxu0 %v968_v16  ;;  %1814 = vrsqrt.f32 %v1124_v11 }
 0x760   :  { %v951_v17 = vsel %vm232_vm2, %v2270_v20, 0.0  ;;  %v1078_v24 = vpop.xlane.xlu0 %1077  ;;  %1626 = vmatprep.subr.bf16.mxu0 %v1867_v32  ;;  %1816 = vrsqrt.f32 %v1085_v18 }
 0x761   :  { %952 = vadd.xlane.f32.xlu1 %v951_v17  ;;  %v1086_v19 = vmax.f32 %v1078_v24, 1e-12 }
 0x763   :  { %v2275_v6 = vpop.eup %1804  ;;  %1818 = vrsqrt.f32 %v1086_v19 }
 0x764   :  { %v954_v21 = vsel %vm232_vm2, %v2275_v6, 0.0  ;;  %v1084_v8 = vpop.xlane.xlu0 %1083  ;;  %v1807_v7 = vpop.eup %1806 }
 0x765   :  { %955 = vadd.xlane.f32.xlu0 %v954_v21  ;;  %v1088_v22 = vmax.f32 %v1084_v8, 1e-12  ;;  %v1809_v29 = vpop.eup %1808  ;;  %v1129_v25 = vmul.f32 %v1807_v7, %v1921_v2  ;;  %v1508_v7 = vld [vmem:[%s2395_s1 + $0x30] sm:$0xff] }
 0x766   :  { %v1811_v9 = vpop.eup %1810  ;;  %v1130_v26 = vmul.f32 %v1809_v29, %v1927_v4 }
 0x767   :  { %1820 = vrsqrt.f32 %v1088_v22  ;;  %v1813_v37 = vpop.eup %1812  ;;  %v1131_v30 = vmul.f32 %v1811_v9, %v1924_v3  ;;  %v1509_v9 = vld [vmem:[%s2395_s1 + $0x38] sm:$0xff] }
 0x768   :  { %v1145_v15 = vpack.c.bf16 %v1130_v26, %v1129_v25  ;;  %v1095_v28 = vmul.f32 %v1813_v37, %v1924_v3 }
 0x769   :  { %v1815_v14 = vpop.eup %1814 }
 0x76a   :  { %v1132_v31 = vmul.f32 %v1815_v14, %v1930_v5  ;;  %v1817_v35 = vpop.eup %1816  ;;  %v1141_v43 = vmul.f32 %v1138_v41, %v1095_v28  ;;  %v1846_v14 = vld [vmem:[%s2396_s2] sm:$0xff] }
 0x76b   :  { %v1093_v44 = vmul.f32 %v1817_v35, %v1921_v2 }
 0x76c   :  { %v1146_v33 = vpack.c.bf16 %v1132_v31, %v1131_v30 }
 0x76d   :  { %v1819_v23 = vpop.eup %1818  ;;  %v1139_v3 = vmul.f32 %v1138_v41, %v1093_v44 }
 0x76e   :  { %v1094_v46 = vmul.f32 %v1819_v23, %v1927_v4  ;;  %v1847_v23 = vld [vmem:[%s2396_s2 + $0x8] sm:$0xff] }
 0x770   :  { %v1140_v51 = vmul.f32 %v1138_v41, %v1094_v46 }
 0x771   :  { %v1821_v36 = vpop.eup %1820 }
 0x772   :  { %1154 = vrot.lane.b32.xlu1 %v1145_v15, %s1875_s28  ;;  %v1096_v42 = vmul.f32 %v1821_v36, %v1930_v5  ;;  %v1143_v53 = vpack.c.bf16 %v1140_v51, %v1139_v3  ;;  %v1848_v3 = vld [vmem:[%s2396_s2 + $0x10] sm:$0xff] }
 0x774   :  { %v1142_v38 = vmul.f32 %v1138_v41, %v1096_v42 }
 0x776   :  { %v1144_v47 = vpack.c.bf16 %v1142_v38, %v1141_v43  ;;  %1207 = vrot.lane.b32.xlu1 %v1146_v33, %s1875_s28 }
 0x77a   :  { %1204 = vrot.lane.b32.xlu1 %v1144_v47, %s1876_s29 }
 0x77b   :  { %1014 = vrot.lane.b32.xlu0 %v1918_v1, %s1877_s24 }
 0x77f   :  { %1151 = vrot.lane.b32.xlu0 %v1143_v53, %s1876_s29 }
 0x7e6   :  { %v947_v5 = vpop.xlane.xlu1 %946 }
 0x7e7   :  { %1822 = vrcp.f32 %v947_v5 }
 0x7e8   :  { %v950_v56 = vpop.xlane.xlu0 %949 }
 0x7e9   :  { %1824 = vrcp.f32 %v950_v56  ;;  %v1849_v56 = vld [vmem:[%s2396_s2 + $0x18] sm:$0xff]  ;;  %s1878_s2 = smov 40  }
 0x7ee   :  { %v953_v2 = vpop.xlane.xlu1 %952 }
 0x7ef   :  { %1826 = vrcp.f32 %v953_v2 }
 0x7f1   :  { %v1823_v4 = vpop.eup %1822 }
 0x7f2   :  { %v956_v57 = vpop.xlane.xlu0 %955  ;;  %v1155_v59 = vpop.permute.xlu1 %1154  ;;  %v961_v61 = vmul.f32 %v1823_v4, %v2262_v55 }
 0x7f3   :  { %v1825_v58 = vpop.eup %1824  ;;  %1828 = vrcp.f32 %v956_v57  ;;  %v1160_v10 = vsel %vm47_vm0, %v1155_v59, 0 }
 0x7f4   :  { %v962_v62 = vmul.f32 %v1825_v58, %v2266_v60 }
 0x7f6   :  { %v1015_v12 = vpop.permute.xlu0 %1014  ;;  %v965_v13 = vpack.c.bf16 %v962_v62, %v961_v61  ;;  %v1208_v16 = vpop.permute.xlu1 %1207 }
 0x7f7   :  { %1621 = vmatpush3.bf16.msra.mxu1 %v1015_v12  ;;  %v1213_v24 = vsel %vm47_vm0, %v1208_v16, 0 }
 0x7f8   :  { %1617 = vmatmul.mubr.msk.bf16.vlgmr.msra.gmra.mrb[20].mxu0 %vm232_vm2, %v965_v13  ;;  %1632 = vmatprep.subr.bf16.mxu1 %v1867_v32 }
 0x7f9   :  { %1627 = vmatpush3.bf16.xpose.msra.mxu0 %v1160_v10  ;;  %1628 = vmatprep.mubr.msk.bf16.mxu0 %vm1868_vm1, %v1867_v32  ;;  %v1827_v63 = vpop.eup %1826 }
 0x7fa   :  { %1638 = vmatprep.subr.bf16.mxu0 %v1867_v32  ;;  %v1152_v55 = vpop.permute.xlu0 %1151  ;;  %v963_v60 = vmul.f32 %v1827_v63, %v2270_v20  ;;  %v1205_v19 = vpop.permute.xlu1 %1204 }
 0x7fd   :  { %v1829_v11 = vpop.eup %1828 }
 0x7fe   :  { %v964_v17 = vmul.f32 %v1829_v11, %v2275_v6 }
 0x800   :  { %1629 = vmatmul.mubr.msk.bf16.vlgmr.msra.gmra.mrb[24].mxu0 %vm47_vm0, %v1152_v55  ;;  %v966_v18 = vpack.c.bf16 %v964_v17, %v963_v60 }
 0x801   :  { %1640 = vmatprep.mubr.msk.bf16.mxu0 %vm1868_vm1, %v1867_v32 }
 0x802   :  { %1623 = vmatmul.mubr.msk.bf16.vlgmr.msra.gmra.mrb[20].mxu1 %vm232_vm2, %v966_v18 }
 0x803   :  { %1633 = vmatpush3.bf16.xpose.msra.mxu1 %v1213_v24  ;;  %1634 = vmatprep.mubr.msk.bf16.mxu1 %vm1868_vm1, %v1867_v32 }
 0x804   :  { %1644 = vmatprep.subr.bf16.mxu1 %v1867_v32 }
 0x80a   :  { %1635 = vmatmul.mubr.msk.bf16.vlgmr.msra.gmra.mrb[24].mxu1 %vm47_vm0, %v1205_v19 }
 0x80b   :  { %1646 = vmatprep.mubr.msk.bf16.mxu1 %vm1868_vm1, %v1867_v32 }
 0x8cb   :  { %v2314_v20 = vpop.f32.mrb[20].mxu0 }
 0x8cc   :  { %v1618_v6 = vpop.f32.mrb[21].mxu0 }
 0x8cd   :  { %v2316_v21 = vpop.f32.mrb[22].mxu0 }
 0x8ce   :  { %v1686_v8 = vpack.i.bf16 %v2316_v21, %v2314_v20  ;;  %v1619_v22 = vpop.f32.mrb[23].mxu0 }
 0x8d3   :  { %v1196_v29 = vpop.f32.mrb[24].mxu0 }
 0x8d4   :  { %v1197_v37 = vadd.f32 %v1508_v7, %v1196_v29  ;;  %v1630_v32 = vpop.f32.mrb[25].mxu0 }
 0x8d5   :  { %v2326_v25 = vpop.f32.mrb[20].mxu1  ;;  %v1199_v26 = vpop.f32.mrb[26].mxu0 }
 0x8d6   :  { %v1256_v15 = vadd.f32 %v1846_v14, %v1197_v37  ;;  %v1200_v28 = vadd.f32 %v1509_v9, %v1199_v26  ;;  %v1624_v30 = vpop.f32.mrb[21].mxu1  ;;  %v1631_v31 = vpop.f32.mrb[27].mxu0 }
 0x8d7   :  { %v1057_v35 = vpop.f32.mrb[22].mxu1 }
 0x8d8   :  { %v1257_v36 = vadd.f32 %v1847_v23, %v1200_v28  ;;  %v1691_v41 = vpack.i.bf16 %v1057_v35, %v2326_v25  ;;  %v1625_v42 = vpop.f32.mrb[23].mxu1  ;;  %v1260_v43 = vsel %vm232_vm2, %v1256_v15, -inf }
 0x8d9   :  { %1261 = vmax.xlane.f32.xlu0 %v1260_v43 }
 0x8da   :  { %v1263_v33 = vsel %vm232_vm2, %v1257_v36, -inf }
 0x8db   :  { %1264 = vmax.xlane.f32.xlu1 %v1263_v33 }
 0x8dd   :  { %v1249_v44 = vpop.f32.mrb[24].mxu1 }
 0x8de   :  { %v1250_v46 = vadd.f32 %v1508_v7, %v1249_v44  ;;  %v1636_v38 = vpop.f32.mrb[25].mxu1 }
 0x8df   :  { %v1252_v47 = vpop.f32.mrb[26].mxu1 }
 0x8e0   :  { %v1258_v51 = vadd.f32 %v1848_v3, %v1250_v46  ;;  %v1253_v53 = vadd.f32 %v1509_v9, %v1252_v47  ;;  %v1637_v5 = vpop.f32.mrb[27].mxu1 }
 0x8e2   :  { %v1259_v2 = vadd.f32 %v1849_v56, %v1253_v53  ;;  %v1266_v4 = vsel %vm232_vm2, %v1258_v51, -inf }
 0x8e3   :  { %1267 = vmax.xlane.f32.xlu0 %v1266_v4 }
 0x8e4   :  { %v1269_v57 = vsel %vm232_vm2, %v1259_v2, -inf }
 0x8e7   :  { %1270 = vmax.xlane.f32.xlu0 %v1269_v57 }
 0x966   :  { %v1262_v58 = vpop.xlane.xlu0 %1261 }
 0x967   :  { %v1272_v59 = vsub.f32 %v1256_v15, %v1262_v58 }
 0x968   :  { %v1265_v61 = vpop.xlane.xlu1 %1264 }
 0x969   :  { %v1276_v62 = vmul.f32 1.442695, %v1272_v59  ;;  %v1273_v10 = vsub.f32 %v1257_v36, %v1265_v61 }
 0x96b   :  { %1830 = vpow2.f32 %v1276_v62  ;;  %v1278_v12 = vmul.f32 1.442695, %v1273_v10 }
 0x96d   :  { %1832 = vpow2.f32 %v1278_v12 }
 0x970   :  { %v1268_v13 = vpop.xlane.xlu0 %1267 }
 0x971   :  { %v1274_v63 = vsub.f32 %v1258_v51, %v1268_v13 }
 0x973   :  { %v1280_v11 = vmul.f32 1.442695, %v1274_v63 }
 0x974   :  { %v1271_v55 = vpop.xlane.xlu0 %1270 }
 0x975   :  { %v1831_v16 = vpop.eup %1830  ;;  %1834 = vpow2.f32 %v1280_v11  ;;  %v1275_v60 = vsub.f32 %v1259_v2, %v1271_v55 }
 0x976   :  { %v1284_v17 = vsel %vm232_vm2, %v1831_v16, 0.0 }
 0x977   :  { %v1833_v24 = vpop.eup %1832  ;;  %v1282_v18 = vmul.f32 1.442695, %v1275_v60  ;;  %1285 = vadd.xlane.f32.xlu1 %v1284_v17 }
 0x978   :  { %v1287_v19 = vsel %vm232_vm2, %v1833_v24, 0.0 }
 0x979   :  { %1836 = vpow2.f32 %v1282_v18  ;;  %1288 = vadd.xlane.f32.xlu0 %v1287_v19 }
 0x97f   :  { %v1835_v6 = vpop.eup %1834 }
 0x980   :  { %v1290_v22 = vsel %vm232_vm2, %v1835_v6, 0.0 }
 0x981   :  { %1291 = vadd.xlane.f32.xlu1 %v1290_v22 }
 0x983   :  { %v1837_v7 = vpop.eup %1836 }
 0x984   :  { %v1293_v29 = vsel %vm232_vm2, %v1837_v7, 0.0 }
 0x985   :  { %1294 = vadd.xlane.f32.xlu0 %v1293_v29 }
 0x992   :  { %1306 = vrot.lane.b32.xlu1 %v1913_v0, %s1878_s2 }
 0x996   :  { %1677 = vrot.lane.b32.xlu1 %v1676_v40, %s1879_s22 }
 0x99a   :  { %1682 = vrot.lane.b32.xlu1 %v1681_v52, %s1879_s22 }
 0x99b   :  { %1353 = vrot.lane.b32.xlu0 %v1918_v1, %s1878_s2 }
 0x99e   :  { %1692 = vrot.lane.b32.xlu1 %v1691_v41, %s1880_s3 }
 0x99f   :  { %1687 = vrot.lane.b32.xlu0 %v1686_v8, %s1880_s3 }
 0xa04   :  { %v1286_v9 = vpop.xlane.xlu1 %1285 }
 0xa05   :  { %1838 = vrcp.f32 %v1286_v9 }
 0xa06   :  { %v1289_v0 = vpop.xlane.xlu0 %1288 }
 0xa07   :  { %1840 = vrcp.f32 %v1289_v0 }
 0xa0e   :  { %v1292_v37 = vpop.xlane.xlu1 %1291 }
 0xa0f   :  { %v1839_v32 = vpop.eup %1838  ;;  %1842 = vrcp.f32 %v1292_v37 }
 0xa10   :  { %v1300_v39 = vmul.f32 %v1839_v32, %v1831_v16 }
 0xa11   :  { %v1841_v34 = vpop.eup %1840 }
 0xa12   :  { %v1301_v40 = vmul.f32 %v1841_v34, %v1833_v24  ;;  %v1295_v27 = vpop.xlane.xlu0 %1294  ;;  %v1307_v49 = vpop.permute.xlu1 %1306 }
 0xa13   :  { %1844 = vrcp.f32 %v1295_v27  ;;  %1639 = vmatpush3.bf16.msra.mxu0 %v1307_v49 }
 0xa14   :  { %v1304_v1 = vpack.c.bf16 %v1301_v40, %v1300_v39 }
 0xa16   :  { %v1354_v52 = vpop.permute.xlu0 %1353  ;;  %1641 = vmatmul.mubr.msk.bf16.vlgmr.msra.gmra.mrb[28].mxu0 %vm232_vm2, %v1304_v1  ;;  %v1678_v43 = vpop.permute.xlu1 %1677 }
 0xa17   :  { %1645 = vmatpush3.bf16.msra.mxu1 %v1354_v52  ;;  %v1680_v44 = vunpack.i.h.bf16 %v1678_v43  ;;  %v1679_v46 = vunpack.i.l.bf16 %v1678_v43 }
 0xa19   :  { %v1843_v20 = vpop.eup %1842  ;;  %v1449_v51 = vsel %vm47_vm0, %v2126_v48, %v1680_v44  ;;  %v1448_v53 = vsel %vm47_vm0, %v2124_v45, %v1679_v46 }
 0xa1a   :  { %v1302_v8 = vmul.f32 %v1843_v20, %v1835_v6  ;;  %v1688_v33 = vpop.permute.xlu0 %1687  ;;  %v1683_v5 = vpop.permute.xlu1 %1682 }
 0xa1b   :  { %v1690_v38 = vunpack.i.h.bf16 %v1688_v33  ;;  %v1689_v47 = vunpack.i.l.bf16 %v1688_v33  ;;  %v1685_v48 = vunpack.i.h.bf16 %v1683_v5  ;;  %v1684_v10 = vunpack.i.l.bf16 %v1683_v5 }
 0xa1d   :  { %v1845_v21 = vpop.eup %1844  ;;  %v1452_v4 = vsel %vm232_vm2, %v1448_v53, %v1689_v47  ;;  %v1453_v57 = vsel %vm232_vm2, %v1449_v51, %v1690_v38  ;;  %v1451_v11 = vsel %vm47_vm0, %v2133_v54, %v1685_v48  ;;  %v1450_v55 = vsel %vm47_vm0, %v2128_v50, %v1684_v10 }
 0xa1e   :  { %v1303_v25 = vmul.f32 %v1845_v21, %v1837_v7  ;;  %v1693_v45 = vpop.permute.xlu1 %1692 }
 0xa1f   :  { %v1695_v12 = vunpack.i.h.bf16 %v1693_v45  ;;  %v1694_v13 = vunpack.i.l.bf16 %v1693_v45 }
 0xa20   :  { %v1305_v26 = vpack.c.bf16 %v1303_v25, %v1302_v8 }
 0xa21   :  { %v1454_v17 = vsel %vm232_vm2, %v1450_v55, %v1694_v13  ;;  %v1455_v24 = vsel %vm232_vm2, %v1451_v11, %v1695_v12 }
 0xa22   :  { %1647 = vmatmul.mubr.msk.bf16.vlgmr.msra.gmra.mrb[28].mxu1 %vm232_vm2, %v1305_v26 }
 0xae9   :  { %v1346_v14 = vpop.f32.mrb[28].mxu0 }
 0xaea   :  { %v1642_v15 = vpop.f32.mrb[29].mxu0 }
 0xaeb   :  { %v1349_v28 = vpop.f32.mrb[30].mxu0 }
 0xaec   :  { %v1696_v30 = vpack.i.bf16 %v1349_v28, %v1346_v14  ;;  %v1643_v31 = vpop.f32.mrb[31].mxu0 }
 0xaee   :  { %1697 = vrot.lane.b32.xlu0 %v1696_v30, %s1881_s0 }
 0xaf5   :  { %v1393_v35 = vpop.f32.mrb[28].mxu1 }
 0xaf6   :  { %v1648_v23 = vpop.f32.mrb[29].mxu1 }
 0xaf7   :  { %v1396_v36 = vpop.f32.mrb[30].mxu1 }
 0xaf8   :  { %v1701_v41 = vpack.i.bf16 %v1396_v36, %v1393_v35  ;;  %v1649_v42 = vpop.f32.mrb[31].mxu1 }
 0xafa   :  { %1702 = vrot.lane.b32.xlu1 %v1701_v41, %s1881_s0 }
 0xb60   :  { %v1698_v3 = vpop.permute.xlu0 %1697 }
 0xb61   :  { %v1700_v56 = vunpack.i.h.bf16 %v1698_v3  ;;  %v1699_v2 = vunpack.i.l.bf16 %v1698_v3 }
 0xb63   :  { %v1457_v58 = vsel %vm1456_vm3, %v1452_v4, %v1699_v2  ;;  %v1458_v59 = vsel %vm1456_vm3, %v1453_v57, %v1700_v56 }
 0xb64   :  { %v1518_v61 = vpack.c.bf16 %v1457_v58, %v1457_v58  ;;  %v1519_v62 = vpack.c.bf16 %v1458_v59, %v1458_v59 }
 0xb66   :  { %1478 = vst.msk [vmem:[%s2398_s4] sm:$0xf] %vm1477_vm4, %v1518_v61  ;;  %1479 = vst.msk [vmem:[%s2398_s4 + $0x4] sm:$0xf] %vm1477_vm4, %v1519_v62 }
 0xb6c   :  { %v1703_v63 = vpop.permute.xlu1 %1702 }
 0xb6d   :  { %v1705_v16 = vunpack.i.h.bf16 %v1703_v63  ;;  %v1704_v60 = vunpack.i.l.bf16 %v1703_v63 }
 0xb6f   :  { %v1459_v18 = vsel %vm1456_vm3, %v1454_v17, %v1704_v60  ;;  %v1460_v19 = vsel %vm1456_vm3, %v1455_v24, %v1705_v16 }
 0xb70   :  { %v1520_v6 = vpack.c.bf16 %v1459_v18, %v1459_v18  ;;  %v1521_v22 = vpack.c.bf16 %v1460_v19, %v1460_v19 }
 0xb72   :  { %1480 = vst.msk [vmem:[%s2398_s4 + $0x8] sm:$0xf] %vm1477_vm4, %v1520_v6  ;;  %1481 = vst.msk [vmem:[%s2398_s4 + $0xc] sm:$0xf] %vm1477_vm4, %v1521_v22 }
 0xb73   :  { %1486 = vsyncpa [#allocation3], 1 }

</bundles_post_ra>
